<compile_context>
chip_gen: v6e
topology: v6e:2x2x1
jax: 0.10.0
libtpu: 0.0.40
codegen_flags: <defaults>
</compile_context>

<pallas_src>
import jax
import jax.numpy as jnp
from jax import lax
from jax.experimental import pallas as pl
from jax.experimental.pallas import tpu as pltpu

BN_EPS = 1e-6   # matches BatchNorm2d(..., eps=1e-06) in the module


def attentive_pooling_kernel(x_ref, wT_ref, wc_ref, shift_ref, o_ref):
    # x_ref block: (1, TILE_N, K, C) channels-last tile for one batch element
    tn, k, c = x_ref.shape[1], x_ref.shape[2], x_ref.shape[3]
    x = x_ref[0].astype(jnp.float32)                     # (tn, K, C)
    wT = wT_ref[...].astype(jnp.float32)                 # (C, C) = W_lin^T

    # ---- score_fn: Linear (logits = x @ W^T) as one tall 2-D MXU matmul ----
    if k % 8 == 0:
        # free reshape: collapses major dims only, lane/sublane layout unchanged
        logits = jnp.dot(x.reshape(tn * k, c), wT,
                         preferred_element_type=jnp.float32).reshape(tn, k, c)
    else:
        logits = lax.dot_general(x, wT, (((2,), (0,)), ((), ())),
                                 preferred_element_type=jnp.float32)

    # ---- softmax over K (axis=1) ----
    m = jnp.max(logits, axis=1, keepdims=True)
    e = jnp.exp(logits - m)
    denom = jnp.sum(e, axis=1, keepdims=True)            # >= 1 after max-subtraction
    scores = e * pl.reciprocal(denom, approx=True)       # EUP slot, ~free

    # ---- attentive pooling: sum_K(scores * x) ----
    feats = jnp.sum(scores * x, axis=1)                  # (tn, C)

    # ---- SharedMLP (1x1 conv with BN + bias folded in), emitted transposed ----
    wc = wc_ref[...].astype(jnp.float32)                 # (d_out, C), BN-folded
    out_t = lax.dot_general(wc, feats, (((1,), (1,)), ((), ())),
                            preferred_element_type=jnp.float32)   # (d_out, tn)
    out_t = out_t + shift_ref[...]                       # (d_out, 1) broadcast over lanes
    out_t = jnp.maximum(out_t, 0.0)

    o_ref[0] = out_t.astype(o_ref.dtype)                 # lane-dense (d_out, tn) store


def attentive_pooling(x_nchw, w_lin, w_conv, b_conv, gamma, beta,
                      run_mean, run_var, *, tile_n=128):
    """x_nchw: (B, C, N, K) float32.  Returns (B, d_out, N, 1) float32."""
    B, C, N, K = x_nchw.shape
    d_out = w_conv.shape[0]

    # ---- fold BatchNorm (eval mode) + conv bias into the conv weight ----
    scale = gamma * lax.rsqrt(run_var + BN_EPS)                      # (d_out,)
    wc_fold = (w_conv * scale[:, None]).astype(jnp.float32)          # (d_out, C)
    shift = (beta + (b_conv - run_mean) * scale).reshape(d_out, 1)   # (d_out, 1)
    w_lin_T = jnp.transpose(w_lin)                                   # (C, C)

    # TODO(synk): ideally the producer emits channels-last (B, N, K, C) directly so
    # this HBM round-trip transpose disappears (or is fused into the input DMA).
    x_cl = jnp.transpose(x_nchw, (0, 2, 3, 1))                       # (B, N, K, C)

    tile_n = min(tile_n, N)
    n_pad = (-N) % tile_n
    if n_pad:
        x_cl = jnp.pad(x_cl, ((0, 0), (0, n_pad), (0, 0), (0, 0)))
    n_padded = N + n_pad

    out_t = pl.pallas_call(
        attentive_pooling_kernel,
        out_shape=jax.ShapeDtypeStruct((B, d_out, n_padded), jnp.float32),
        grid=(B, n_padded // tile_n),
        in_specs=[
            pl.BlockSpec((1, tile_n, K, C), lambda b, n: (b, n, 0, 0)),  # x tile
            pl.BlockSpec((C, C), lambda b, n: (0, 0)),                   # W_lin^T
            pl.BlockSpec((d_out, C), lambda b, n: (0, 0)),               # BN-folded conv W
            pl.BlockSpec((d_out, 1), lambda b, n: (0, 0)),               # BN-folded shift
        ],
        out_specs=pl.BlockSpec((1, d_out, tile_n), lambda b, n: (b, 0, n)),
        compiler_params=pltpu.CompilerParams(
            dimension_semantics=("parallel", "parallel"),
            vmem_limit_bytes=32 * 1024 * 1024),
    )(x_cl, w_lin_T, wc_fold, shift)

    if n_pad:
        out_t = out_t[:, :, :N]
    return out_t[..., None]                                          # (B, d_out, N, 1)


def reference(x_nchw, w_lin, w_conv, b_conv, gamma, beta, run_mean, run_var):
    # pure-JAX reference mirroring the PyTorch module (BN in eval mode)
    x_cl = jnp.transpose(x_nchw, (0, 2, 3, 1))             # (B, N, K, C)
    logits = jnp.einsum('bnkc,oc->bnko', x_cl, w_lin)
    scores = jax.nn.softmax(logits, axis=2)                 # softmax over K
    feats = jnp.sum(scores * x_cl, axis=2)                  # (B, N, C)
    out = jnp.einsum('bnc,oc->bno', feats, w_conv) + b_conv
    out = (out - run_mean) / jnp.sqrt(run_var + BN_EPS) * gamma + beta
    out = jnp.maximum(out, 0.0)
    return jnp.transpose(out, (0, 2, 1))[..., None]


if __name__ == "__main__":
    B, C, N, K = 2, 16, 256, 16      # (B, d_in, N, K); N=256 exercises the N tiling
    d_out = 32

    key = jax.random.PRNGKey(0)
    kx, kw, kc, kb, kg, kbe, km, kv = jax.random.split(key, 8)

    x = jax.random.normal(kx, (B, C, N, K), dtype=jnp.float32)

    # deterministic synthetic parameters (shapes per module __init__)
    w_lin = jax.random.normal(kw, (C, C), dtype=jnp.float32) * 0.2      # Linear(C, C, bias=False)
    w_conv = jax.random.normal(kc, (d_out, C), dtype=jnp.float32) * 0.2 # Conv2d(C, d_out, 1) weight (squeezed)
    b_conv = jax.random.normal(kb, (d_out,), dtype=jnp.float32) * 0.1
    gamma = 1.0 + 0.1 * jax.random.normal(kg, (d_out,), dtype=jnp.float32)
    beta = 0.1 * jax.random.normal(kbe, (d_out,), dtype=jnp.float32)
    run_mean = 0.1 * jax.random.normal(km, (d_out,), dtype=jnp.float32)
    run_var = 1.0 + 0.1 * jax.nn.softplus(jax.random.normal(kv, (d_out,), dtype=jnp.float32))

    fn = jax.jit(attentive_pooling)
    out = fn(x, w_lin, w_conv, b_conv, gamma, beta, run_mean, run_var)
    out = jax.block_until_ready(out)

    ref = reference(x, w_lin, w_conv, b_conv, gamma, beta, run_mean, run_var)
    assert out.shape == (B, d_out, N, 1), out.shape
    # tolerance loosened slightly vs exact math: EUP approx reciprocal in the softmax
    err = float(jnp.max(jnp.abs(out - ref)))
    assert jnp.allclose(out, ref, atol=3e-3, rtol=3e-3), err
    print("KERNEL_OK")
</pallas_src>

<mosaic_0001>
module attributes {stable_mosaic.version = 11 : i64} {
  func.func @attentive_pooling_kernel(%arg0: i32, %arg1: i32, %arg2: memref<1x128x16x16xf32, #tpu.memory_space<vmem>>, %arg3: memref<16x16xf32, #tpu.memory_space<vmem>>, %arg4: memref<32x16xf32, #tpu.memory_space<vmem>>, %arg5: memref<32x1xf32, #tpu.memory_space<vmem>>, %arg6: memref<1x32x128xf32, #tpu.memory_space<vmem>>) attributes {dimension_semantics = [#tpu.dimension_semantics<parallel>, #tpu.dimension_semantics<parallel>], iteration_bounds = array<i64: 2, 2>, scalar_prefetch = 0 : i64, scratch_operands = 0 : i64, tpu.core_type = #tpu.core_type<tc>, window_params = [{transform_indices = @transform_0, window_bounds = array<i64: 1, 128, 16, 16>}, {pipeline_mode = #tpu.pipeline_mode<synchronous>, transform_indices = @transform_1, window_bounds = array<i64: 16, 16>}, {pipeline_mode = #tpu.pipeline_mode<synchronous>, transform_indices = @transform_2, window_bounds = array<i64: 32, 16>}, {pipeline_mode = #tpu.pipeline_mode<synchronous>, transform_indices = @transform_3, window_bounds = array<i64: 32, 1>}, {transform_indices = @transform_4, window_bounds = array<i64: 1, 32, 128>}]} {
    %c0 = arith.constant 0 : index
    %c0_0 = arith.constant 0 : index
    %c0_1 = arith.constant 0 : index
    %c0_2 = arith.constant 0 : index
    %0 = vector.load %arg2[%c0, %c0_0, %c0_1, %c0_2] : memref<1x128x16x16xf32, #tpu.memory_space<vmem>>, vector<1x128x16x16xf32>
    %1 = vector.shape_cast %0 : vector<1x128x16x16xf32> to vector<128x16x16xf32>
    %c0_3 = arith.constant 0 : index
    %c0_4 = arith.constant 0 : index
    %2 = vector.load %arg3[%c0_3, %c0_4] : memref<16x16xf32, #tpu.memory_space<vmem>>, vector<16x16xf32>
    %3 = vector.shape_cast %1 : vector<128x16x16xf32> to vector<2048x16xf32>
    %cst = arith.constant dense<0.000000e+00> : vector<2048x16xf32>
    %4 = tpu.matmul %3, %2, %cst {dimension_numbers = #tpu.dot_dimension_numbers<[1], [0], [0], [1], [0, 0, 1, 1], [], []>} : vector<2048x16xf32>, vector<16x16xf32>, vector<2048x16xf32> -> vector<2048x16xf32>
    %5 = vector.shape_cast %4 : vector<2048x16xf32> to vector<128x16x16xf32>
    %cst_5 = arith.constant dense<0xFF800000> : vector<128x16xf32>
    %6 = vector.multi_reduction <maximumf>, %5, %cst_5 [1] : vector<128x16x16xf32> to vector<128x16xf32>
    %7 = vector.shape_cast %6 : vector<128x16xf32> to vector<128x1x16xf32>
    %8 = vector.broadcast %7 : vector<128x1x16xf32> to vector<128x16x16xf32>
    %9 = arith.subf %5, %8 : vector<128x16x16xf32>
    %10 = math.exp %9 : vector<128x16x16xf32>
    %cst_6 = arith.constant dense<0.000000e+00> : vector<128x16xf32>
    %11 = vector.multi_reduction <add>, %10, %cst_6 [1] : vector<128x16x16xf32> to vector<128x16xf32>
    %12 = vector.shape_cast %11 : vector<128x16xf32> to vector<128x1x16xf32>
    %13 = tpu.reciprocal %12 {approx = true} : vector<128x1x16xf32> -> vector<128x1x16xf32>
    %14 = vector.broadcast %13 : vector<128x1x16xf32> to vector<128x16x16xf32>
    %15 = arith.mulf %10, %14 : vector<128x16x16xf32>
    %16 = arith.mulf %15, %1 : vector<128x16x16xf32>
    %cst_7 = arith.constant dense<0.000000e+00> : vector<128x16xf32>
    %17 = vector.multi_reduction <add>, %16, %cst_7 [1] : vector<128x16x16xf32> to vector<128x16xf32>
    %c0_8 = arith.constant 0 : index
    %c0_9 = arith.constant 0 : index
    %18 = vector.load %arg4[%c0_8, %c0_9] : memref<32x16xf32, #tpu.memory_space<vmem>>, vector<32x16xf32>
    %cst_10 = arith.constant dense<0.000000e+00> : vector<32x128xf32>
    %19 = tpu.matmul %18, %17, %cst_10 {dimension_numbers = #tpu.dot_dimension_numbers<[1], [1], [0], [0], [0, 0, 1, 0], [], []>} : vector<32x16xf32>, vector<128x16xf32>, vector<32x128xf32> -> vector<32x128xf32>
    %c0_11 = arith.constant 0 : index
    %c0_12 = arith.constant 0 : index
    %20 = vector.load %arg5[%c0_11, %c0_12] : memref<32x1xf32, #tpu.memory_space<vmem>>, vector<32x1xf32>
    %21 = vector.broadcast %20 : vector<32x1xf32> to vector<32x128xf32>
    %22 = arith.addf %19, %21 : vector<32x128xf32>
    %cst_13 = arith.constant 0.000000e+00 : f32
    %23 = vector.broadcast %cst_13 : f32 to vector<32x128xf32>
    %24 = arith.maximumf %22, %23 : vector<32x128xf32>
    %c0_14 = arith.constant 0 : index
    %c0_15 = arith.constant 0 : index
    %c0_16 = arith.constant 0 : index
    %25 = vector.load %arg6[%c0_14, %c0_15, %c0_16] : memref<1x32x128xf32, #tpu.memory_space<vmem>>, vector<1x32x128xf32>
    %26 = vector.shape_cast %25 : vector<1x32x128xf32> to vector<32x128xf32>
    %27 = vector.shape_cast %24 : vector<32x128xf32> to vector<1x32x128xf32>
    tpu.vector_store %arg6[%c0_14, %c0_15, %c0_16], %27 {strides = array<i32>} : memref<1x32x128xf32, #tpu.memory_space<vmem>>, vector<1x32x128xf32>,
    return
  }
  func.func @transform_0(%arg0: i32, %arg1: i32) -> (i32, i32, i32, i32) {
    %c0_i32 = arith.constant 0 : i32
    %c0_i32_0 = arith.constant 0 : i32
    %c0_i32_1 = arith.constant 0 : i32
    return %arg0, %arg1, %c0_i32, %c0_i32_0 : i32, i32, i32, i32
  }
  func.func @transform_1(%arg0: i32, %arg1: i32) -> (i32, i32) {
    %c0_i32 = arith.constant 0 : i32
    %c0_i32_0 = arith.constant 0 : i32
    %c0_i32_1 = arith.constant 0 : i32
    return %c0_i32, %c0_i32_0 : i32, i32
  }
  func.func @transform_2(%arg0: i32, %arg1: i32) -> (i32, i32) {
    %c0_i32 = arith.constant 0 : i32
    %c0_i32_0 = arith.constant 0 : i32
    %c0_i32_1 = arith.constant 0 : i32
    return %c0_i32, %c0_i32_0 : i32, i32
  }
  func.func @transform_3(%arg0: i32, %arg1: i32) -> (i32, i32) {
    %c0_i32 = arith.constant 0 : i32
    %c0_i32_0 = arith.constant 0 : i32
    %c0_i32_1 = arith.constant 0 : i32
    return %c0_i32, %c0_i32_0 : i32, i32
  }
  func.func @transform_4(%arg0: i32, %arg1: i32) -> (i32, i32, i32) {
    %c0_i32 = arith.constant 0 : i32
    %c0_i32_0 = arith.constant 0 : i32
    return %arg0, %c0_i32, %arg1 : i32, i32, i32
  }
}

</mosaic_0001>

<bundles_post_ra>
// kernel: attentive_pooling.1
= control target key start
LH: loop header
LB: loop body
LE: loop exit
PB: predicated region body
PF: predicated region fallthrough
CT: control target
= control target key end

     0   :  { %s10166_s15 = smov 0   ;;  %s10168_s16 = smov 0   ;;  %s14831_s0 = inlined_call_operand.vmem [shape: f32[2,256,16,16], index: 0, kind: input, shape index: {}]   ;;  %s14832_s1 = inlined_call_operand.vmem [shape: f32[16,16], index: 1, kind: input, shape index: {}]   ;;  %s14833_s2 = inlined_call_operand.vmem [shape: f32[32,16], index: 2, kind: input, shape index: {}]   ;;  %s14834_s3 = inlined_call_operand.vmem [shape: f32[32,1], index: 3, kind: input, shape index: {}]   ;;  %s14835_s4 = inlined_call_operand.vmem [shape: f32[2,32,256], index: 4, kind: output, shape index: {}]  }
   0x1   :  { %s10170_s17 = smov 0   ;;  %s10172_s18 = smov 0  }
   0x2   :  { %s10174_s19 = smov 0   ;;  %s10176_s20 = smov 0  }
   0x3   :  { %s10178_s21 = smov 0  }
   0x4 LB: > { %s23_s22 = sadd.s32 1, %s10130_s19  ;;  %s26_s23 = sadd.s32 1, %s10134_s20  ;;  %s10138_s21 = sphi %s10178_s21, %s14_s21   ;;  %s10134_s20 = sphi %s10176_s20, %s15295_s20   ;;  %s10130_s19 = sphi %s10174_s19, %s15294_s19   ;;  %s10126_s18 = sphi %s10172_s18, %s15293_s18   ;;  %s10122_s17 = sphi %s10170_s17, %s15292_s17   ;;  %s10118_s16 = sphi %s10168_s16, %s15291_s16   ;;  %s10114_s15 = sphi %s10166_s15, %s15290_s15  }
   0x5   : > { %p24_p0 = scmp.ge.s32.totalorder %s23_s22, 2  ;;  %s8002_s24 = sadd.s32 4294967295, %s10138_s21  }
   0x6   : > { %p136_p1 = scmp.ne.s32.totalorder %s10118_s16, %s10114_s15  ;;  %p137_p2 = scmp.eq.s32.totalorder %s8002_s24, 3 }
   0x7   : > { %s15297_s22 = smov (%p24_p0, %s23_s22), 0  ;;  %s15299_s23 = smov (!%p24_p0, %s26_s23), %s10134_s20 }
   0x8   : > { %s122_s25 = ssub.s32 %s10130_s19, %s15297_s22  ;;  %p28_p3 = scmp.ge.s32.totalorder %s15299_s23, 2 }
   0x9   : > { %p8006_p4 = scmp.ge.s32.totalorder %s10138_s21, 1  ;;  %p10212_p5 = por %p137_p2, %p136_p1 }
   0xa   : > { %p184_p6 = scmp.lt.s32.totalorder %s10138_s21, 5  ;;  %s15301_s23 = smov (%p28_p3, %s15299_s23), 0 }
   0xb   : > { %s121_s27 = ssub.s32 %s10134_s20, %s15301_s23  ;;  %s126_s29 = sadd.s32 1, %s10118_s16 }
   0xc   : > { %p185_p7 = pnand %p8006_p4, %p184_p6  ;;  %s123_s28 = sor.u32 %s122_s25, %s121_s27 }
   0xd   : > { %p124_p8 = scmp.eq.s32.totalorder %s123_s28, 0 }
   0xe   : > { %188 = sbr.rel (%p185_p7) target bundleno = 1698 (0x6a2), region = 36 }
   0xf   : > { %s10223_s30 = scalar_select %p124_p8, %s10118_s16, %s126_s29  }
  0x13   : > { %v482_v0 = vld [vmem:[%s14832_s1 + $0x8] sm:$0xff]  ;;  %v481_v1 = vld [vmem:[%s14832_s1] sm:$0xff]  ;;  %s8008_s9 = sshll.u32 %s10122_s17, 7  ;;  %p215_p9 = scmp.lt.s32.totalorder %s10126_s18, 1  ;;  %vm483_vm0 = vcmask 130048   ;;  %vm7617_vm1 = vcmask 1041409  }
  0x14   : > { %8571 = vmatprep.subr.mxu0 %v482_v0  ;;  %8997 = vmatprep.subr.mxu1 %v482_v0  ;;  %p217_p10 = scmp.lt.s32.totalorder %s8008_s9, 255  ;;  %vm7619_vm2 = vcmask 1042434   ;;  %vm7621_vm3 = vcmask 1043459   ;;  %vm7623_vm4 = vcmask 1044484   ;;  %vm7625_vm5 = vcmask 1045509   ;;  %s211_s29 = sand.u32 1, %s10114_s15  }
  0x15   : > { %8572 = vmatpush3.msra.mxu0 %v482_v0  ;;  %8999 = vmatpush3.msra.mxu1 %v482_v0  ;;  %s216_s10 = scalar_select %p215_p9, %s10126_s18, 1  ;;  %vm7627_vm6 = vcmask 1046534   ;;  %vm7629_vm7 = vcmask 1047559  }
  0x16   : > { %8573 = vmatprep.subr.mxu0 %v481_v1  ;;  %8998 = vmatprep.subr.mxu1 %v481_v1  ;;  %s15303_s9 = smov (!%p217_p10, %s8008_s9), 255  ;;  %s8007_s5 = sshll.u32 %s211_s29, 5 }
  0x17   : > { %8574 = vmatpush3.msra.mxu0 %v481_v1  ;;  %9000 = vmatpush3.msra.mxu1 %v481_v1  ;;  %s8010_s11 = sshll.u32 %s216_s10, 9  ;;  %s8009_s12 = sshll.u32 %s15303_s9, 1 }
  0x18   : > { %s221_s13 = sadd.s32 %s8010_s11, %s8009_s12  ;;  %s213_s6 = scalar_lea.vmem [#allocation2], %s8007_s5 }
  0x19   : > { %s8011_s14 = sshll.u32 %s221_s13, 3  ;;  %s8289_s15 = sshll.u32 (%p10212_p5), %s10126_s18, 3 }
  0x1a   : > { %s10237_s27 = scalar_lea.vmem %s14831_s0, %s8011_s14  ;;  %s7881_s7 = sadd.s32 (%p10212_p5), %s10122_s17, %s8289_s15 }
  0x1b   : > { %v225_v2 = vld [vmem:[%s10237_s27] sm:$0xff]  ;;  %v355_v3 = vld [vmem:[%s10237_s27 + $0x410] sm:$0xff]  ;;  %v226_v4 = vld [vmem:[%s10237_s27 + $0x8] sm:$0xff]  ;;  %s8290_s8 = sshll.u32 (%p10212_p5), %s7881_s7, 3 }
  0x1c   : > { %8575 = vmatprep.mubr.msk.f32.mxu0 %vm483_vm0, %v225_v2  ;;  %8770 = vmatprep.mubr.msk.f32.mxu1 %vm483_vm0, %v355_v3  ;;  %v356_v5 = vld [vmem:[%s10237_s27 + $0x418] sm:$0xff]  ;;  %v227_v6 = vld [vmem:[%s10237_s27 + $0x10] sm:$0xff]  ;;  %v357_v7 = vld [vmem:[%s10237_s27 + $0x420] sm:$0xff]  ;;  %s7883_s11 = scalar_lea.vmem (%p10212_p5), %s14835_s4, %s8290_s8 }
  0x1d   : > { %8576 = vmatmul.mubr.msk.f32.vlgmr.msra.gmra.mxu0 %vm483_vm0, %v226_v4  ;;  %8771 = vmatmul.mubr.msk.f32.vlgmr.msra.gmra.mxu1 %vm483_vm0, %v356_v5  ;;  %v228_v8 = vld [vmem:[%s10237_s27 + $0x18] sm:$0xff]  ;;  %v358_v9 = vld [vmem:[%s10237_s27 + $0x428] sm:$0xff]  ;;  %v229_v10 = vld [vmem:[%s10237_s27 + $0x20] sm:$0xff] }
  0x1e   : > { %8578 = vmatprep.mubr.msk.f32.mxu0 %vm483_vm0, %v227_v6  ;;  %8773 = vmatprep.mubr.msk.f32.mxu1 %vm483_vm0, %v357_v7  ;;  %v359_v11 = vld [vmem:[%s10237_s27 + $0x430] sm:$0xff]  ;;  %v230_v12 = vld [vmem:[%s10237_s27 + $0x28] sm:$0xff]  ;;  %v360_v13 = vld [vmem:[%s10237_s27 + $0x438] sm:$0xff] }
  0x1f   : > { %v231_v14 = vld [vmem:[%s10237_s27 + $0x30] sm:$0xff]  ;;  %v361_v15 = vld [vmem:[%s10237_s27 + $0x440] sm:$0xff]  ;;  %v232_v16 = vld [vmem:[%s10237_s27 + $0x38] sm:$0xff] }
  0x20   : > { %v362_v17 = vld [vmem:[%s10237_s27 + $0x448] sm:$0xff]  ;;  %v233_v18 = vld [vmem:[%s10237_s27 + $0x40] sm:$0xff]  ;;  %v363_v19 = vld [vmem:[%s10237_s27 + $0x450] sm:$0xff] }
  0x21   : > { %8579 = vmatmul.mubr.msk.f32.gmra.mxu0 %vm483_vm0, %v228_v8  ;;  %8774 = vmatmul.mubr.msk.f32.gmra.mxu1 %vm483_vm0, %v358_v9  ;;  %v234_v20 = vld [vmem:[%s10237_s27 + $0x48] sm:$0xff]  ;;  %v364_v21 = vld [vmem:[%s10237_s27 + $0x458] sm:$0xff]  ;;  %v235_v22 = vld [vmem:[%s10237_s27 + $0x50] sm:$0xff] }
  0x22   : > { %8581 = vmatprep.mubr.msk.f32.mxu0 %vm483_vm0, %v229_v10  ;;  %8776 = vmatprep.mubr.msk.f32.mxu1 %vm483_vm0, %v359_v11  ;;  %v365_v23 = vld [vmem:[%s10237_s27 + $0x460] sm:$0xff]  ;;  %v236_v24 = vld [vmem:[%s10237_s27 + $0x58] sm:$0xff]  ;;  %v366_v25 = vld [vmem:[%s10237_s27 + $0x468] sm:$0xff] }
  0x23   : > { %v237_v26 = vld [vmem:[%s10237_s27 + $0x60] sm:$0xff]  ;;  %v367_v27 = vld [vmem:[%s10237_s27 + $0x470] sm:$0xff]  ;;  %v238_v28 = vld [vmem:[%s10237_s27 + $0x68] sm:$0xff] }
  0x24   : > { %v368_v29 = vld [vmem:[%s10237_s27 + $0x478] sm:$0xff]  ;;  %v239_v30 = vld [vmem:[%s10237_s27 + $0x70] sm:$0xff]  ;;  %v369_v31 = vld [vmem:[%s10237_s27 + $0x480] sm:$0xff] }
  0x25   : > { %8582 = vmatmul.mubr.msk.f32.gmra.mxu0 %vm483_vm0, %v230_v12  ;;  %8777 = vmatmul.mubr.msk.f32.gmra.mxu1 %vm483_vm0, %v360_v13  ;;  %v240_v32 = vld [vmem:[%s10237_s27 + $0x78] sm:$0xff]  ;;  %v370_v33 = vld [vmem:[%s10237_s27 + $0x488] sm:$0xff]  ;;  %v241_v34 = vld [vmem:[%s10237_s27 + $0x80] sm:$0xff] }
  0x26   : > { %8584 = vmatprep.mubr.msk.f32.mxu0 %vm483_vm0, %v231_v14  ;;  %8779 = vmatprep.mubr.msk.f32.mxu1 %vm483_vm0, %v361_v15  ;;  %v371_v35 = vld [vmem:[%s10237_s27 + $0x490] sm:$0xff]  ;;  %v242_v36 = vld [vmem:[%s10237_s27 + $0x88] sm:$0xff]  ;;  %v372_v37 = vld [vmem:[%s10237_s27 + $0x498] sm:$0xff] }
  0x27   : > { %v243_v38 = vld [vmem:[%s10237_s27 + $0x90] sm:$0xff]  ;;  %v373_v39 = vld [vmem:[%s10237_s27 + $0x4a0] sm:$0xff]  ;;  %v244_v40 = vld [vmem:[%s10237_s27 + $0x98] sm:$0xff] }
  0x28   : > { %v374_v41 = vld [vmem:[%s10237_s27 + $0x4a8] sm:$0xff]  ;;  %v245_v42 = vld [vmem:[%s10237_s27 + $0xa0] sm:$0xff]  ;;  %v375_v43 = vld [vmem:[%s10237_s27 + $0x4b0] sm:$0xff] }
  0x29   : > { %8585 = vmatmul.mubr.msk.f32.gmra.mxu0 %vm483_vm0, %v232_v16  ;;  %8780 = vmatmul.mubr.msk.f32.gmra.mxu1 %vm483_vm0, %v362_v17  ;;  %v246_v44 = vld [vmem:[%s10237_s27 + $0xa8] sm:$0xff]  ;;  %v376_v45 = vld [vmem:[%s10237_s27 + $0x4b8] sm:$0xff]  ;;  %v247_v46 = vld [vmem:[%s10237_s27 + $0xb0] sm:$0xff] }
  0x2a   : > { %8587 = vmatprep.mubr.msk.f32.mxu0 %vm483_vm0, %v233_v18  ;;  %8782 = vmatprep.mubr.msk.f32.mxu1 %vm483_vm0, %v363_v19  ;;  %v377_v47 = vld [vmem:[%s10237_s27 + $0x4c0] sm:$0xff]  ;;  %v248_v48 = vld [vmem:[%s10237_s27 + $0xb8] sm:$0xff]  ;;  %v378_v49 = vld [vmem:[%s10237_s27 + $0x4c8] sm:$0xff] }
  0x2b   : > { %v249_v50 = vld [vmem:[%s10237_s27 + $0xc0] sm:$0xff]  ;;  %v379_v51 = vld [vmem:[%s10237_s27 + $0x4d0] sm:$0xff]  ;;  %v250_v52 = vld [vmem:[%s10237_s27 + $0xc8] sm:$0xff] }
  0x2c   : > { %v380_v53 = vld [vmem:[%s10237_s27 + $0x4d8] sm:$0xff]  ;;  %v251_v54 = vld [vmem:[%s10237_s27 + $0xd0] sm:$0xff]  ;;  %v381_v55 = vld [vmem:[%s10237_s27 + $0x4e0] sm:$0xff] }
  0x2d   : > { %8588 = vmatmul.mubr.msk.f32.gmra.mxu0 %vm483_vm0, %v234_v20  ;;  %8783 = vmatmul.mubr.msk.f32.gmra.mxu1 %vm483_vm0, %v364_v21  ;;  %v252_v56 = vld [vmem:[%s10237_s27 + $0xd8] sm:$0xff]  ;;  %v382_v57 = vld [vmem:[%s10237_s27 + $0x4e8] sm:$0xff]  ;;  %v253_v58 = vld [vmem:[%s10237_s27 + $0xe0] sm:$0xff] }
  0x2e   : > { %8590 = vmatprep.mubr.msk.f32.mxu0 %vm483_vm0, %v235_v22  ;;  %8785 = vmatprep.mubr.msk.f32.mxu1 %vm483_vm0, %v365_v23  ;;  %v383_v59 = vld [vmem:[%s10237_s27 + $0x4f0] sm:$0xff]  ;;  %v254_v60 = vld [vmem:[%s10237_s27 + $0xe8] sm:$0xff]  ;;  %v384_v61 = vld [vmem:[%s10237_s27 + $0x4f8] sm:$0xff] }
  0x2f   : > { %v255_v62 = vld [vmem:[%s10237_s27 + $0xf0] sm:$0xff]  ;;  %v385_v63 = vld [vmem:[%s10237_s27 + $0x500] sm:$0xff]  ;;  %v256_v0 = vld [vmem:[%s10237_s27 + $0xf8] sm:$0xff] }
  0x30   : > { %v386_v1 = vld [vmem:[%s10237_s27 + $0x508] sm:$0xff]  ;;  %v257_v2 = vld [vmem:[%s10237_s27 + $0x100] sm:$0xff]  ;;  %v387_v3 = vld [vmem:[%s10237_s27 + $0x510] sm:$0xff] }
  0x31   : > { %8591 = vmatmul.mubr.msk.f32.gmra.mxu0 %vm483_vm0, %v236_v24  ;;  %8786 = vmatmul.mubr.msk.f32.gmra.mxu1 %vm483_vm0, %v366_v25  ;;  %v258_v4 = vld [vmem:[%s10237_s27 + $0x108] sm:$0xff]  ;;  %v388_v5 = vld [vmem:[%s10237_s27 + $0x518] sm:$0xff]  ;;  %v259_v6 = vld [vmem:[%s10237_s27 + $0x110] sm:$0xff] }
  0x32   : > { %8593 = vmatprep.mubr.msk.f32.mxu0 %vm483_vm0, %v237_v26  ;;  %8788 = vmatprep.mubr.msk.f32.mxu1 %vm483_vm0, %v367_v27  ;;  %v389_v7 = vld [vmem:[%s10237_s27 + $0x520] sm:$0xff]  ;;  %v260_v8 = vld [vmem:[%s10237_s27 + $0x118] sm:$0xff]  ;;  %v390_v9 = vld [vmem:[%s10237_s27 + $0x528] sm:$0xff] }
  0x33   : > { %v261_v10 = vld [vmem:[%s10237_s27 + $0x120] sm:$0xff]  ;;  %v391_v11 = vld [vmem:[%s10237_s27 + $0x530] sm:$0xff]  ;;  %v262_v12 = vld [vmem:[%s10237_s27 + $0x128] sm:$0xff] }
  0x34   : > { %v392_v13 = vld [vmem:[%s10237_s27 + $0x538] sm:$0xff]  ;;  %v263_v14 = vld [vmem:[%s10237_s27 + $0x130] sm:$0xff]  ;;  %v393_v15 = vld [vmem:[%s10237_s27 + $0x540] sm:$0xff] }
  0x35   : > { %8594 = vmatmul.mubr.msk.f32.gmra.mxu0 %vm483_vm0, %v238_v28  ;;  %8789 = vmatmul.mubr.msk.f32.gmra.mxu1 %vm483_vm0, %v368_v29  ;;  %v264_v16 = vld [vmem:[%s10237_s27 + $0x138] sm:$0xff]  ;;  %v394_v17 = vld [vmem:[%s10237_s27 + $0x548] sm:$0xff]  ;;  %v265_v18 = vld [vmem:[%s10237_s27 + $0x140] sm:$0xff] }
  0x36   : > { %8596 = vmatprep.mubr.msk.f32.mxu0 %vm483_vm0, %v239_v30  ;;  %8791 = vmatprep.mubr.msk.f32.mxu1 %vm483_vm0, %v369_v31  ;;  %v395_v19 = vld [vmem:[%s10237_s27 + $0x550] sm:$0xff]  ;;  %v266_v20 = vld [vmem:[%s10237_s27 + $0x148] sm:$0xff]  ;;  %v396_v21 = vld [vmem:[%s10237_s27 + $0x558] sm:$0xff] }
  0x37   : > { %v267_v22 = vld [vmem:[%s10237_s27 + $0x150] sm:$0xff]  ;;  %v397_v23 = vld [vmem:[%s10237_s27 + $0x560] sm:$0xff]  ;;  %v268_v24 = vld [vmem:[%s10237_s27 + $0x158] sm:$0xff] }
  0x38   : > { %v398_v25 = vld [vmem:[%s10237_s27 + $0x568] sm:$0xff]  ;;  %v269_v26 = vld [vmem:[%s10237_s27 + $0x160] sm:$0xff]  ;;  %v399_v27 = vld [vmem:[%s10237_s27 + $0x570] sm:$0xff] }
  0x39   : > { %8597 = vmatmul.mubr.msk.f32.gmra.mxu0 %vm483_vm0, %v240_v32  ;;  %8792 = vmatmul.mubr.msk.f32.gmra.mxu1 %vm483_vm0, %v370_v33  ;;  %v270_v28 = vld [vmem:[%s10237_s27 + $0x168] sm:$0xff]  ;;  %v400_v29 = vld [vmem:[%s10237_s27 + $0x578] sm:$0xff]  ;;  %v271_v30 = vld [vmem:[%s10237_s27 + $0x170] sm:$0xff] }
  0x3a   : > { %8599 = vmatprep.mubr.msk.f32.mxu0 %vm483_vm0, %v241_v34  ;;  %8794 = vmatprep.mubr.msk.f32.mxu1 %vm483_vm0, %v371_v35  ;;  %v401_v31 = vld [vmem:[%s10237_s27 + $0x580] sm:$0xff]  ;;  %v272_v32 = vld [vmem:[%s10237_s27 + $0x178] sm:$0xff]  ;;  %v402_v33 = vld [vmem:[%s10237_s27 + $0x588] sm:$0xff] }
  0x3b   : > { %v273_v34 = vld [vmem:[%s10237_s27 + $0x180] sm:$0xff]  ;;  %v403_v35 = vld [vmem:[%s10237_s27 + $0x590] sm:$0xff] }
  0x3d   : > { %8600 = vmatmul.mubr.msk.f32.gmra.mxu0 %vm483_vm0, %v242_v36  ;;  %8795 = vmatmul.mubr.msk.f32.gmra.mxu1 %vm483_vm0, %v372_v37  ;;  %v274_v36 = vld [vmem:[%s10237_s27 + $0x188] sm:$0xff]  ;;  %v404_v37 = vld [vmem:[%s10237_s27 + $0x598] sm:$0xff] }
  0x3e   : > { %8602 = vmatprep.mubr.msk.f32.mxu0 %vm483_vm0, %v243_v38  ;;  %8797 = vmatprep.mubr.msk.f32.mxu1 %vm483_vm0, %v373_v39  ;;  %v275_v38 = vld [vmem:[%s10237_s27 + $0x190] sm:$0xff]  ;;  %v405_v39 = vld [vmem:[%s10237_s27 + $0x5a0] sm:$0xff] }
  0x41   : > { %8603 = vmatmul.mubr.msk.f32.gmra.mxu0 %vm483_vm0, %v244_v40  ;;  %8798 = vmatmul.mubr.msk.f32.gmra.mxu1 %vm483_vm0, %v374_v41  ;;  %v276_v40 = vld [vmem:[%s10237_s27 + $0x198] sm:$0xff]  ;;  %v406_v41 = vld [vmem:[%s10237_s27 + $0x5a8] sm:$0xff] }
  0x42   : > { %8605 = vmatprep.mubr.msk.f32.mxu0 %vm483_vm0, %v245_v42  ;;  %8800 = vmatprep.mubr.msk.f32.mxu1 %vm483_vm0, %v375_v43  ;;  %v277_v42 = vld [vmem:[%s10237_s27 + $0x1a0] sm:$0xff]  ;;  %v407_v43 = vld [vmem:[%s10237_s27 + $0x5b0] sm:$0xff] }
  0x45   : > { %8606 = vmatmul.mubr.msk.f32.gmra.mxu0 %vm483_vm0, %v246_v44  ;;  %8801 = vmatmul.mubr.msk.f32.gmra.mxu1 %vm483_vm0, %v376_v45  ;;  %v278_v44 = vld [vmem:[%s10237_s27 + $0x1a8] sm:$0xff]  ;;  %v408_v45 = vld [vmem:[%s10237_s27 + $0x5b8] sm:$0xff] }
  0x46   : > { %8608 = vmatprep.mubr.msk.f32.mxu0 %vm483_vm0, %v247_v46  ;;  %8803 = vmatprep.mubr.msk.f32.mxu1 %vm483_vm0, %v377_v47  ;;  %v279_v46 = vld [vmem:[%s10237_s27 + $0x1b0] sm:$0xff]  ;;  %v409_v47 = vld [vmem:[%s10237_s27 + $0x5c0] sm:$0xff] }
  0x49   : > { %8609 = vmatmul.mubr.msk.f32.gmra.mxu0 %vm483_vm0, %v248_v48  ;;  %8804 = vmatmul.mubr.msk.f32.gmra.mxu1 %vm483_vm0, %v378_v49  ;;  %v280_v48 = vld [vmem:[%s10237_s27 + $0x1b8] sm:$0xff]  ;;  %v410_v49 = vld [vmem:[%s10237_s27 + $0x5c8] sm:$0xff] }
  0x4a   : > { %8611 = vmatprep.mubr.msk.f32.mxu0 %vm483_vm0, %v249_v50  ;;  %8806 = vmatprep.mubr.msk.f32.mxu1 %vm483_vm0, %v379_v51  ;;  %v281_v50 = vld [vmem:[%s10237_s27 + $0x1c0] sm:$0xff]  ;;  %v411_v51 = vld [vmem:[%s10237_s27 + $0x5d0] sm:$0xff] }
  0x4d   : > { %8612 = vmatmul.mubr.msk.f32.gmra.mxu0 %vm483_vm0, %v250_v52  ;;  %8807 = vmatmul.mubr.msk.f32.gmra.mxu1 %vm483_vm0, %v380_v53  ;;  %v282_v52 = vld [vmem:[%s10237_s27 + $0x1c8] sm:$0xff]  ;;  %v412_v53 = vld [vmem:[%s10237_s27 + $0x5d8] sm:$0xff] }
  0x4e   : > { %8614 = vmatprep.mubr.msk.f32.mxu0 %vm483_vm0, %v251_v54  ;;  %8809 = vmatprep.mubr.msk.f32.mxu1 %vm483_vm0, %v381_v55  ;;  %v283_v54 = vld [vmem:[%s10237_s27 + $0x1d0] sm:$0xff]  ;;  %v413_v55 = vld [vmem:[%s10237_s27 + $0x5e0] sm:$0xff] }
  0x51   : > { %8615 = vmatmul.mubr.msk.f32.gmra.mxu0 %vm483_vm0, %v252_v56  ;;  %8810 = vmatmul.mubr.msk.f32.gmra.mxu1 %vm483_vm0, %v382_v57  ;;  %v284_v56 = vld [vmem:[%s10237_s27 + $0x1d8] sm:$0xff]  ;;  %v414_v57 = vld [vmem:[%s10237_s27 + $0x5e8] sm:$0xff] }
  0x52   : > { %8617 = vmatprep.mubr.msk.f32.mxu0 %vm483_vm0, %v253_v58  ;;  %8812 = vmatprep.mubr.msk.f32.mxu1 %vm483_vm0, %v383_v59  ;;  %v285_v58 = vld [vmem:[%s10237_s27 + $0x1e0] sm:$0xff]  ;;  %v415_v59 = vld [vmem:[%s10237_s27 + $0x5f0] sm:$0xff] }
  0x55   : > { %8618 = vmatmul.mubr.msk.f32.gmra.mxu0 %vm483_vm0, %v254_v60  ;;  %8813 = vmatmul.mubr.msk.f32.gmra.mxu1 %vm483_vm0, %v384_v61  ;;  %v286_v60 = vld [vmem:[%s10237_s27 + $0x1e8] sm:$0xff]  ;;  %v416_v61 = vld [vmem:[%s10237_s27 + $0x5f8] sm:$0xff] }
  0x56   : > { %8620 = vmatprep.mubr.msk.f32.mxu0 %vm483_vm0, %v255_v62  ;;  %8815 = vmatprep.mubr.msk.f32.mxu1 %vm483_vm0, %v385_v63  ;;  %v287_v62 = vld [vmem:[%s10237_s27 + $0x1f0] sm:$0xff]  ;;  %v417_v63 = vld [vmem:[%s10237_s27 + $0x600] sm:$0xff] }
  0x59   : > { %8621 = vmatmul.mubr.msk.f32.gmra.mxu0 %vm483_vm0, %v256_v0  ;;  %8816 = vmatmul.mubr.msk.f32.gmra.mxu1 %vm483_vm0, %v386_v1  ;;  %v288_v0 = vld [vmem:[%s10237_s27 + $0x1f8] sm:$0xff]  ;;  %v418_v1 = vld [vmem:[%s10237_s27 + $0x608] sm:$0xff] }
  0x5a   : > { %8623 = vmatprep.mubr.msk.f32.mxu0 %vm483_vm0, %v257_v2  ;;  %8818 = vmatprep.mubr.msk.f32.mxu1 %vm483_vm0, %v387_v3  ;;  %v289_v2 = vld [vmem:[%s10237_s27 + $0x200] sm:$0xff]  ;;  %v419_v3 = vld [vmem:[%s10237_s27 + $0x610] sm:$0xff] }
  0x5d   : > { %8624 = vmatmul.mubr.msk.f32.gmra.mxu0 %vm483_vm0, %v258_v4  ;;  %8819 = vmatmul.mubr.msk.f32.gmra.mxu1 %vm483_vm0, %v388_v5  ;;  %v290_v4 = vld [vmem:[%s10237_s27 + $0x208] sm:$0xff]  ;;  %v420_v5 = vld [vmem:[%s10237_s27 + $0x618] sm:$0xff] }
  0x5e   : > { %8626 = vmatprep.mubr.msk.f32.mxu0 %vm483_vm0, %v259_v6  ;;  %8821 = vmatprep.mubr.msk.f32.mxu1 %vm483_vm0, %v389_v7  ;;  %v291_v6 = vld [vmem:[%s10237_s27 + $0x210] sm:$0xff]  ;;  %v421_v7 = vld [vmem:[%s10237_s27 + $0x620] sm:$0xff] }
  0x61   : > { %8627 = vmatmul.mubr.msk.f32.gmra.mxu0 %vm483_vm0, %v260_v8  ;;  %8822 = vmatmul.mubr.msk.f32.gmra.mxu1 %vm483_vm0, %v390_v9  ;;  %v292_v8 = vld [vmem:[%s10237_s27 + $0x218] sm:$0xff]  ;;  %v422_v9 = vld [vmem:[%s10237_s27 + $0x628] sm:$0xff] }
  0x62   : > { %8629 = vmatprep.mubr.msk.f32.mxu0 %vm483_vm0, %v261_v10  ;;  %8824 = vmatprep.mubr.msk.f32.mxu1 %vm483_vm0, %v391_v11  ;;  %v293_v10 = vld [vmem:[%s10237_s27 + $0x220] sm:$0xff]  ;;  %v423_v11 = vld [vmem:[%s10237_s27 + $0x630] sm:$0xff] }
  0x65   : > { %8630 = vmatmul.mubr.msk.f32.gmra.mxu0 %vm483_vm0, %v262_v12  ;;  %8825 = vmatmul.mubr.msk.f32.gmra.mxu1 %vm483_vm0, %v392_v13  ;;  %v294_v12 = vld [vmem:[%s10237_s27 + $0x228] sm:$0xff]  ;;  %v424_v13 = vld [vmem:[%s10237_s27 + $0x638] sm:$0xff] }
  0x66   : > { %8632 = vmatprep.mubr.msk.f32.mxu0 %vm483_vm0, %v263_v14  ;;  %8827 = vmatprep.mubr.msk.f32.mxu1 %vm483_vm0, %v393_v15  ;;  %v295_v14 = vld [vmem:[%s10237_s27 + $0x230] sm:$0xff]  ;;  %v425_v15 = vld [vmem:[%s10237_s27 + $0x640] sm:$0xff] }
  0x69   : > { %8633 = vmatmul.mubr.msk.f32.gmra.mxu0 %vm483_vm0, %v264_v16  ;;  %8828 = vmatmul.mubr.msk.f32.gmra.mxu1 %vm483_vm0, %v394_v17  ;;  %v296_v16 = vld [vmem:[%s10237_s27 + $0x238] sm:$0xff]  ;;  %v426_v17 = vld [vmem:[%s10237_s27 + $0x648] sm:$0xff] }
  0x6a   : > { %8635 = vmatprep.mubr.msk.f32.mxu0 %vm483_vm0, %v265_v18  ;;  %8830 = vmatprep.mubr.msk.f32.mxu1 %vm483_vm0, %v395_v19  ;;  %v297_v18 = vld [vmem:[%s10237_s27 + $0x240] sm:$0xff]  ;;  %v427_v19 = vld [vmem:[%s10237_s27 + $0x650] sm:$0xff] }
  0x6d   : > { %8636 = vmatmul.mubr.msk.f32.gmra.mxu0 %vm483_vm0, %v266_v20  ;;  %8831 = vmatmul.mubr.msk.f32.gmra.mxu1 %vm483_vm0, %v396_v21  ;;  %v298_v20 = vld [vmem:[%s10237_s27 + $0x248] sm:$0xff]  ;;  %v428_v21 = vld [vmem:[%s10237_s27 + $0x658] sm:$0xff] }
  0x6e   : > { %8638 = vmatprep.mubr.msk.f32.mxu0 %vm483_vm0, %v267_v22  ;;  %8833 = vmatprep.mubr.msk.f32.mxu1 %vm483_vm0, %v397_v23  ;;  %v299_v22 = vld [vmem:[%s10237_s27 + $0x250] sm:$0xff]  ;;  %v429_v23 = vld [vmem:[%s10237_s27 + $0x660] sm:$0xff] }
  0x71   : > { %8639 = vmatmul.mubr.msk.f32.gmra.mxu0 %vm483_vm0, %v268_v24  ;;  %8834 = vmatmul.mubr.msk.f32.gmra.mxu1 %vm483_vm0, %v398_v25  ;;  %v300_v24 = vld [vmem:[%s10237_s27 + $0x258] sm:$0xff]  ;;  %v430_v25 = vld [vmem:[%s10237_s27 + $0x668] sm:$0xff] }
  0x72   : > { %8641 = vmatprep.mubr.msk.f32.mxu0 %vm483_vm0, %v269_v26  ;;  %8836 = vmatprep.mubr.msk.f32.mxu1 %vm483_vm0, %v399_v27  ;;  %v301_v26 = vld [vmem:[%s10237_s27 + $0x260] sm:$0xff]  ;;  %v431_v27 = vld [vmem:[%s10237_s27 + $0x670] sm:$0xff] }
  0x75   : > { %8642 = vmatmul.mubr.msk.f32.gmra.mxu0 %vm483_vm0, %v270_v28  ;;  %8837 = vmatmul.mubr.msk.f32.gmra.mxu1 %vm483_vm0, %v400_v29  ;;  %v302_v28 = vld [vmem:[%s10237_s27 + $0x268] sm:$0xff]  ;;  %v432_v29 = vld [vmem:[%s10237_s27 + $0x678] sm:$0xff] }
  0x76   : > { %8644 = vmatprep.mubr.msk.f32.mxu0 %vm483_vm0, %v271_v30  ;;  %8839 = vmatprep.mubr.msk.f32.mxu1 %vm483_vm0, %v401_v31  ;;  %v303_v30 = vld [vmem:[%s10237_s27 + $0x270] sm:$0xff]  ;;  %v433_v31 = vld [vmem:[%s10237_s27 + $0x680] sm:$0xff] }
  0x79   : > { %8645 = vmatmul.mubr.msk.f32.gmra.mxu0 %vm483_vm0, %v272_v32  ;;  %8840 = vmatmul.mubr.msk.f32.gmra.mxu1 %vm483_vm0, %v402_v33  ;;  %v304_v32 = vld [vmem:[%s10237_s27 + $0x278] sm:$0xff]  ;;  %v434_v33 = vld [vmem:[%s10237_s27 + $0x688] sm:$0xff] }
  0x7a   : > { %8647 = vmatprep.mubr.msk.f32.mxu0 %vm483_vm0, %v273_v34  ;;  %8842 = vmatprep.mubr.msk.f32.mxu1 %vm483_vm0, %v403_v35  ;;  %v305_v34 = vld [vmem:[%s10237_s27 + $0x280] sm:$0xff]  ;;  %v435_v35 = vld [vmem:[%s10237_s27 + $0x690] sm:$0xff] }
  0x7d   : > { %8648 = vmatmul.mubr.msk.f32.gmra.mxu0 %vm483_vm0, %v274_v36  ;;  %8843 = vmatmul.mubr.msk.f32.gmra.mxu1 %vm483_vm0, %v404_v37  ;;  %v306_v36 = vld [vmem:[%s10237_s27 + $0x288] sm:$0xff]  ;;  %v436_v37 = vld [vmem:[%s10237_s27 + $0x698] sm:$0xff] }
  0x7e   : > { %8650 = vmatprep.mubr.msk.f32.mxu0 %vm483_vm0, %v275_v38  ;;  %8845 = vmatprep.mubr.msk.f32.mxu1 %vm483_vm0, %v405_v39  ;;  %v307_v38 = vld [vmem:[%s10237_s27 + $0x290] sm:$0xff]  ;;  %v437_v39 = vld [vmem:[%s10237_s27 + $0x6a0] sm:$0xff] }
  0x81   : > { %8651 = vmatmul.mubr.msk.f32.gmra.mxu0 %vm483_vm0, %v276_v40  ;;  %8846 = vmatmul.mubr.msk.f32.gmra.mxu1 %vm483_vm0, %v406_v41  ;;  %v308_v40 = vld [vmem:[%s10237_s27 + $0x298] sm:$0xff]  ;;  %v438_v41 = vld [vmem:[%s10237_s27 + $0x6a8] sm:$0xff] }
  0x82   : > { %8653 = vmatprep.mubr.msk.f32.mxu0 %vm483_vm0, %v277_v42  ;;  %8848 = vmatprep.mubr.msk.f32.mxu1 %vm483_vm0, %v407_v43  ;;  %v309_v42 = vld [vmem:[%s10237_s27 + $0x2a0] sm:$0xff]  ;;  %v439_v43 = vld [vmem:[%s10237_s27 + $0x6b0] sm:$0xff] }
  0x85   : > { %8654 = vmatmul.mubr.msk.f32.gmra.mxu0 %vm483_vm0, %v278_v44  ;;  %8849 = vmatmul.mubr.msk.f32.gmra.mxu1 %vm483_vm0, %v408_v45  ;;  %v310_v44 = vld [vmem:[%s10237_s27 + $0x2a8] sm:$0xff]  ;;  %v440_v45 = vld [vmem:[%s10237_s27 + $0x6b8] sm:$0xff] }
  0x86   : > { %8656 = vmatprep.mubr.msk.f32.mxu0 %vm483_vm0, %v279_v46  ;;  %8851 = vmatprep.mubr.msk.f32.mxu1 %vm483_vm0, %v409_v47  ;;  %v311_v46 = vld [vmem:[%s10237_s27 + $0x2b0] sm:$0xff]  ;;  %v441_v47 = vld [vmem:[%s10237_s27 + $0x6c0] sm:$0xff] }
  0x89   : > { %8657 = vmatmul.mubr.msk.f32.gmra.mxu0 %vm483_vm0, %v280_v48  ;;  %8852 = vmatmul.mubr.msk.f32.gmra.mxu1 %vm483_vm0, %v410_v49  ;;  %v312_v48 = vld [vmem:[%s10237_s27 + $0x2b8] sm:$0xff]  ;;  %v442_v49 = vld [vmem:[%s10237_s27 + $0x6c8] sm:$0xff] }
  0x8a   : > { %8659 = vmatprep.mubr.msk.f32.mxu0 %vm483_vm0, %v281_v50  ;;  %8854 = vmatprep.mubr.msk.f32.mxu1 %vm483_vm0, %v411_v51  ;;  %v313_v50 = vld [vmem:[%s10237_s27 + $0x2c0] sm:$0xff]  ;;  %v443_v51 = vld [vmem:[%s10237_s27 + $0x6d0] sm:$0xff] }
  0x8d   : > { %8660 = vmatmul.mubr.msk.f32.gmra.mxu0 %vm483_vm0, %v282_v52  ;;  %8855 = vmatmul.mubr.msk.f32.gmra.mxu1 %vm483_vm0, %v412_v53  ;;  %v314_v52 = vld [vmem:[%s10237_s27 + $0x2c8] sm:$0xff]  ;;  %v444_v53 = vld [vmem:[%s10237_s27 + $0x6d8] sm:$0xff] }
  0x8e   : > { %8662 = vmatprep.mubr.msk.f32.mxu0 %vm483_vm0, %v283_v54  ;;  %8857 = vmatprep.mubr.msk.f32.mxu1 %vm483_vm0, %v413_v55  ;;  %v315_v54 = vld [vmem:[%s10237_s27 + $0x2d0] sm:$0xff]  ;;  %v445_v55 = vld [vmem:[%s10237_s27 + $0x6e0] sm:$0xff] }
  0x91   : > { %8663 = vmatmul.mubr.msk.f32.gmra.mxu0 %vm483_vm0, %v284_v56  ;;  %8858 = vmatmul.mubr.msk.f32.gmra.mxu1 %vm483_vm0, %v414_v57  ;;  %v316_v56 = vld [vmem:[%s10237_s27 + $0x2d8] sm:$0xff]  ;;  %v446_v57 = vld [vmem:[%s10237_s27 + $0x6e8] sm:$0xff] }
  0x92   : > { %8665 = vmatprep.mubr.msk.f32.mxu0 %vm483_vm0, %v285_v58  ;;  %8860 = vmatprep.mubr.msk.f32.mxu1 %vm483_vm0, %v415_v59  ;;  %v317_v58 = vld [vmem:[%s10237_s27 + $0x2e0] sm:$0xff]  ;;  %v447_v59 = vld [vmem:[%s10237_s27 + $0x6f0] sm:$0xff] }
  0x95   : > { %8666 = vmatmul.mubr.msk.f32.gmra.mxu0 %vm483_vm0, %v286_v60  ;;  %8861 = vmatmul.mubr.msk.f32.gmra.mxu1 %vm483_vm0, %v416_v61  ;;  %v318_v60 = vld [vmem:[%s10237_s27 + $0x2e8] sm:$0xff]  ;;  %v448_v61 = vld [vmem:[%s10237_s27 + $0x6f8] sm:$0xff] }
  0x96   : > { %8668 = vmatprep.mubr.msk.f32.mxu0 %vm483_vm0, %v287_v62  ;;  %8863 = vmatprep.mubr.msk.f32.mxu1 %vm483_vm0, %v417_v63  ;;  %v319_v62 = vld [vmem:[%s10237_s27 + $0x2f0] sm:$0xff]  ;;  %v449_v63 = vld [vmem:[%s10237_s27 + $0x700] sm:$0xff] }
  0x99   : > { %8669 = vmatmul.mubr.msk.f32.gmra.mxu0 %vm483_vm0, %v288_v0  ;;  %8864 = vmatmul.mubr.msk.f32.gmra.mxu1 %vm483_vm0, %v418_v1  ;;  %v320_v0 = vld [vmem:[%s10237_s27 + $0x2f8] sm:$0xff]  ;;  %v450_v1 = vld [vmem:[%s10237_s27 + $0x708] sm:$0xff] }
  0x9a   : > { %8671 = vmatprep.mubr.msk.f32.mxu0 %vm483_vm0, %v289_v2  ;;  %8866 = vmatprep.mubr.msk.f32.mxu1 %vm483_vm0, %v419_v3  ;;  %v321_v2 = vld [vmem:[%s10237_s27 + $0x300] sm:$0xff]  ;;  %v451_v3 = vld [vmem:[%s10237_s27 + $0x710] sm:$0xff] }
  0x9d   : > { %8672 = vmatmul.mubr.msk.f32.gmra.mxu0 %vm483_vm0, %v290_v4  ;;  %8867 = vmatmul.mubr.msk.f32.gmra.mxu1 %vm483_vm0, %v420_v5  ;;  %v322_v4 = vld [vmem:[%s10237_s27 + $0x308] sm:$0xff]  ;;  %v452_v5 = vld [vmem:[%s10237_s27 + $0x718] sm:$0xff] }
  0x9e   : > { %8674 = vmatprep.mubr.msk.f32.mxu0 %vm483_vm0, %v291_v6  ;;  %8869 = vmatprep.mubr.msk.f32.mxu1 %vm483_vm0, %v421_v7  ;;  %v323_v6 = vld [vmem:[%s10237_s27 + $0x310] sm:$0xff]  ;;  %v453_v7 = vld [vmem:[%s10237_s27 + $0x720] sm:$0xff] }
  0xa1   : > { %8675 = vmatmul.mubr.msk.f32.gmra.mxu0 %vm483_vm0, %v292_v8  ;;  %8870 = vmatmul.mubr.msk.f32.gmra.mxu1 %vm483_vm0, %v422_v9 }
  0xa2   : > { %8677 = vmatprep.mubr.msk.f32.mxu0 %vm483_vm0, %v293_v10  ;;  %8872 = vmatprep.mubr.msk.f32.mxu1 %vm483_vm0, %v423_v11  ;;  %v324_v11 = vld [vmem:[%s10237_s27 + $0x318] sm:$0xff] }
  0xa5   : > { %8678 = vmatmul.mubr.msk.f32.gmra.mxu0 %vm483_vm0, %v294_v12  ;;  %8873 = vmatmul.mubr.msk.f32.gmra.mxu1 %vm483_vm0, %v424_v13  ;;  %v454_v12 = vld [vmem:[%s10237_s27 + $0x728] sm:$0xff] }
  0xa6   : > { %8680 = vmatprep.mubr.msk.f32.mxu0 %vm483_vm0, %v295_v14  ;;  %8875 = vmatprep.mubr.msk.f32.mxu1 %vm483_vm0, %v425_v15  ;;  %v325_v15 = vld [vmem:[%s10237_s27 + $0x320] sm:$0xff] }
  0xa9   : > { %8681 = vmatmul.mubr.msk.f32.gmra.mxu0 %vm483_vm0, %v296_v16  ;;  %8876 = vmatmul.mubr.msk.f32.gmra.mxu1 %vm483_vm0, %v426_v17  ;;  %v455_v16 = vld [vmem:[%s10237_s27 + $0x730] sm:$0xff] }
  0xaa   : > { %8683 = vmatprep.mubr.msk.f32.mxu0 %vm483_vm0, %v297_v18  ;;  %8878 = vmatprep.mubr.msk.f32.mxu1 %vm483_vm0, %v427_v19 }
  0xad   : > { %8684 = vmatmul.mubr.msk.f32.gmra.mxu0 %vm483_vm0, %v298_v20  ;;  %8879 = vmatmul.mubr.msk.f32.gmra.mxu1 %vm483_vm0, %v428_v21 }
  0xae   : > { %8686 = vmatprep.mubr.msk.f32.mxu0 %vm483_vm0, %v299_v22  ;;  %8881 = vmatprep.mubr.msk.f32.mxu1 %vm483_vm0, %v429_v23 }
  0xb1   : > { %8687 = vmatmul.mubr.msk.f32.gmra.mxu0 %vm483_vm0, %v300_v24  ;;  %8882 = vmatmul.mubr.msk.f32.gmra.mxu1 %vm483_vm0, %v430_v25  ;;  %v326_v25 = vld [vmem:[%s10237_s27 + $0x328] sm:$0xff] }
  0xb2   : > { %8689 = vmatprep.mubr.msk.f32.mxu0 %vm483_vm0, %v301_v26  ;;  %8884 = vmatprep.mubr.msk.f32.mxu1 %vm483_vm0, %v431_v27 }
  0xb5   : > { %8690 = vmatmul.mubr.msk.f32.gmra.mxu0 %vm483_vm0, %v302_v28  ;;  %8885 = vmatmul.mubr.msk.f32.gmra.mxu1 %vm483_vm0, %v432_v29 }
  0xb6   : > { %8692 = vmatprep.mubr.msk.f32.mxu0 %vm483_vm0, %v303_v30  ;;  %8887 = vmatprep.mubr.msk.f32.mxu1 %vm483_vm0, %v433_v31  ;;  %v456_v30 = vld [vmem:[%s10237_s27 + $0x738] sm:$0xff]  ;;  %v327_v31 = vld [vmem:[%s10237_s27 + $0x330] sm:$0xff] }
  0xb9   : > { %8693 = vmatmul.mubr.msk.f32.gmra.mxu0 %vm483_vm0, %v304_v32  ;;  %8888 = vmatmul.mubr.msk.f32.gmra.mxu1 %vm483_vm0, %v434_v33 }
  0xba   : > { %8695 = vmatprep.mubr.msk.f32.mxu0 %vm483_vm0, %v305_v34  ;;  %8890 = vmatprep.mubr.msk.f32.mxu1 %vm483_vm0, %v435_v35  ;;  %v457_v35 = vld [vmem:[%s10237_s27 + $0x740] sm:$0xff] }
  0xbd   : > { %8696 = vmatmul.mubr.msk.f32.gmra.mxu0 %vm483_vm0, %v306_v36  ;;  %8891 = vmatmul.mubr.msk.f32.gmra.mxu1 %vm483_vm0, %v436_v37 }
  0xbe   : > { %8698 = vmatprep.mubr.msk.f32.mxu0 %vm483_vm0, %v307_v38  ;;  %8893 = vmatprep.mubr.msk.f32.mxu1 %vm483_vm0, %v437_v39 }
  0xc1   : > { %8699 = vmatmul.mubr.msk.f32.gmra.mxu0 %vm483_vm0, %v308_v40  ;;  %8894 = vmatmul.mubr.msk.f32.gmra.mxu1 %vm483_vm0, %v438_v41 }
  0xc2   : > { %8701 = vmatprep.mubr.msk.f32.mxu0 %vm483_vm0, %v309_v42  ;;  %8896 = vmatprep.mubr.msk.f32.mxu1 %vm483_vm0, %v439_v43  ;;  %v328_v43 = vld [vmem:[%s10237_s27 + $0x338] sm:$0xff] }
  0xc5   : > { %8702 = vmatmul.mubr.msk.f32.gmra.mxu0 %vm483_vm0, %v310_v44  ;;  %8897 = vmatmul.mubr.msk.f32.gmra.mxu1 %vm483_vm0, %v440_v45 }
  0xc6   : > { %8704 = vmatprep.mubr.msk.f32.mxu0 %vm483_vm0, %v311_v46  ;;  %8899 = vmatprep.mubr.msk.f32.mxu1 %vm483_vm0, %v441_v47 }
  0xc9   : > { %8705 = vmatmul.mubr.msk.f32.gmra.mxu0 %vm483_vm0, %v312_v48  ;;  %8900 = vmatmul.mubr.msk.f32.gmra.mxu1 %vm483_vm0, %v442_v49 }
  0xca   : > { %8707 = vmatprep.mubr.msk.f32.mxu0 %vm483_vm0, %v313_v50  ;;  %8902 = vmatprep.mubr.msk.f32.mxu1 %vm483_vm0, %v443_v51  ;;  %v458_v50 = vld [vmem:[%s10237_s27 + $0x748] sm:$0xff]  ;;  %v329_v51 = vld [vmem:[%s10237_s27 + $0x340] sm:$0xff] }
  0xcd   : > { %8708 = vmatmul.mubr.msk.f32.gmra.mxu0 %vm483_vm0, %v314_v52  ;;  %8903 = vmatmul.mubr.msk.f32.gmra.mxu1 %vm483_vm0, %v444_v53 }
  0xce   : > { %8710 = vmatprep.mubr.msk.f32.mxu0 %vm483_vm0, %v315_v54  ;;  %8905 = vmatprep.mubr.msk.f32.mxu1 %vm483_vm0, %v445_v55  ;;  %v459_v55 = vld [vmem:[%s10237_s27 + $0x750] sm:$0xff] }
  0xd1   : > { %8711 = vmatmul.mubr.msk.f32.gmra.mxu0 %vm483_vm0, %v316_v56  ;;  %8906 = vmatmul.mubr.msk.f32.gmra.mxu1 %vm483_vm0, %v446_v57 }
  0xd2   : > { %8713 = vmatprep.mubr.msk.f32.mxu0 %vm483_vm0, %v317_v58  ;;  %8908 = vmatprep.mubr.msk.f32.mxu1 %vm483_vm0, %v447_v59 }
  0xd5   : > { %8714 = vmatmul.mubr.msk.f32.gmra.mxu0 %vm483_vm0, %v318_v60  ;;  %8909 = vmatmul.mubr.msk.f32.gmra.mxu1 %vm483_vm0, %v448_v61 }
  0xd6   : > { %8716 = vmatprep.mubr.msk.f32.mxu0 %vm483_vm0, %v319_v62  ;;  %8911 = vmatprep.mubr.msk.f32.mxu1 %vm483_vm0, %v449_v63 }
  0xd9   : > { %8717 = vmatmul.mubr.msk.f32.gmra.mxu0 %vm483_vm0, %v320_v0  ;;  %8912 = vmatmul.mubr.msk.f32.gmra.mxu1 %vm483_vm0, %v450_v1 }
  0xda   : > { %8719 = vmatprep.mubr.msk.f32.mxu0 %vm483_vm0, %v321_v2  ;;  %8914 = vmatprep.mubr.msk.f32.mxu1 %vm483_vm0, %v451_v3  ;;  %v330_v2 = vld [vmem:[%s10237_s27 + $0x348] sm:$0xff] }
  0xdd   : > { %v10631_v8 = vpop.f32.mrf.mxu0  ;;  %8720 = vmatmul.mubr.msk.f32.gmra.mxu0 %vm483_vm0, %v322_v4  ;;  %v10634_v9 = vpop.f32.mrf.mxu1  ;;  %8915 = vmatmul.mubr.msk.f32.gmra.mxu1 %vm483_vm0, %v452_v5 }
  0xde   : > { %v2598_v10 = vsel %vm483_vm0, %v10631_v8, -inf  ;;  %8722 = vmatprep.mubr.msk.f32.mxu0 %vm483_vm0, %v323_v6  ;;  %8917 = vmatprep.mubr.msk.f32.mxu1 %vm483_vm0, %v453_v7  ;;  %v3183_v17 = vsel %vm483_vm0, %v10634_v9, -inf }
  0xdf   : > { %v10643_v13 = vpop.f32.mrf.mxu0  ;;  %v10645_v14 = vpop.f32.mrf.mxu1 }
  0xe0   : > { %v2597_v18 = vsel %vm483_vm0, %v10643_v13, -inf  ;;  %v3182_v19 = vsel %vm483_vm0, %v10645_v14, -inf }
  0xe1   : > { %v2599_v20 = vmax.f32 %v2597_v18, %v2598_v10  ;;  %v3184_v21 = vmax.f32 %v3182_v19, %v3183_v17  ;;  %v10655_v22 = vpop.f32.mrf.mxu0  ;;  %8723 = vmatmul.mubr.msk.f32.gmra.mxu0 %vm483_vm0, %v324_v11  ;;  %v10658_v23 = vpop.f32.mrf.mxu1  ;;  %8918 = vmatmul.mubr.msk.f32.gmra.mxu1 %vm483_vm0, %v454_v12  ;;  %v460_v11 = vld [vmem:[%s10237_s27 + $0x758] sm:$0xff]  ;;  %v331_v18 = vld [vmem:[%s10237_s27 + $0x350] sm:$0xff] }
  0xe2   : > { %v2607_v24 = vsel %vm483_vm0, %v10655_v22, -inf  ;;  %8725 = vmatprep.mubr.msk.f32.mxu0 %vm483_vm0, %v325_v15  ;;  %8920 = vmatprep.mubr.msk.f32.mxu1 %vm483_vm0, %v455_v16  ;;  %v3192_v32 = vsel %vm483_vm0, %v10658_v23, -inf }
  0xe3   : > { %v2600_v26 = vrot.slane %v2599_v20, 4  ;;  %v3185_v27 = vrot.slane %v3184_v21, 4  ;;  %v10666_v28 = vpop.f32.mrf.mxu0  ;;  %v10668_v29 = vpop.f32.mrf.mxu1 }
  0xe4   : > { %v2606_v33 = vsel %vm483_vm0, %v10666_v28, -inf  ;;  %v3191_v34 = vsel %vm483_vm0, %v10668_v29, -inf }
  0xe5   : > { %v2601_v36 = vmax.f32 %v2599_v20, %v2600_v26  ;;  %v3186_v37 = vmax.f32 %v3184_v21, %v3185_v27  ;;  %v2608_v38 = vmax.f32 %v2606_v33, %v2607_v24  ;;  %v3193_v39 = vmax.f32 %v3191_v34, %v3192_v32  ;;  %v10679_v40 = vpop.f32.mrf.mxu0  ;;  %8726 = vmatmul.mubr.msk.f32.gmra.mxu0 %vm483_vm0, %v326_v25  ;;  %v10682_v41 = vpop.f32.mrf.mxu1  ;;  %v461_v25 = vld [vmem:[%s10237_s27 + $0x760] sm:$0xff]  ;;  %v332_v32 = vld [vmem:[%s10237_s27 + $0x358] sm:$0xff] }
  0xe6   : > { %v2616_v42 = vsel %vm483_vm0, %v10679_v40, -inf  ;;  %8921 = vmatmul.mubr.msk.f32.gmra.mxu1 %vm483_vm0, %v456_v30  ;;  %8728 = vmatprep.mubr.msk.f32.mxu0 %vm483_vm0, %v327_v31  ;;  %v3201_v52 = vsel %vm483_vm0, %v10682_v41, -inf }
  0xe7   : > { %v2602_v44 = vrot.slane %v2601_v36, 2  ;;  %v3187_v45 = vrot.slane %v3186_v37, 2  ;;  %v2609_v46 = vrot.slane %v2608_v38, 4  ;;  %v3194_v47 = vrot.slane %v3193_v39, 4  ;;  %v10689_v48 = vpop.f32.mrf.mxu0  ;;  %v10691_v49 = vpop.f32.mrf.mxu1  ;;  %8923 = vmatprep.mubr.msk.f32.mxu1 %vm483_vm0, %v457_v35 }
  0xe8   : > { %v2615_v53 = vsel %vm483_vm0, %v10689_v48, -inf  ;;  %v3200_v54 = vsel %vm483_vm0, %v10691_v49, -inf }
  0xe9   : > { %v2603_v56 = vmax.f32 %v2601_v36, %v2602_v44  ;;  %v3188_v57 = vmax.f32 %v3186_v37, %v3187_v45  ;;  %v2610_v58 = vmax.f32 %v2608_v38, %v2609_v46  ;;  %v3195_v59 = vmax.f32 %v3193_v39, %v3194_v47  ;;  %v10703_v60 = vpop.f32.mrf.mxu0  ;;  %8729 = vmatmul.mubr.msk.f32.gmra.mxu0 %vm483_vm0, %v328_v43  ;;  %v10706_v61 = vpop.f32.mrf.mxu1  ;;  %v462_v37 = vld [vmem:[%s10237_s27 + $0x768] sm:$0xff]  ;;  %v333_v38 = vld [vmem:[%s10237_s27 + $0x360] sm:$0xff] }
  0xea   : > { %v2617_v62 = vmax.f32 %v2615_v53, %v2616_v42  ;;  %v3202_v63 = vmax.f32 %v3200_v54, %v3201_v52  ;;  %v2625_v0 = vsel %vm483_vm0, %v10703_v60, -inf  ;;  %v3210_v1 = vsel %vm483_vm0, %v10706_v61, -inf  ;;  %8924 = vmatmul.mubr.msk.f32.gmra.mxu1 %vm483_vm0, %v458_v50  ;;  %8731 = vmatprep.mubr.msk.f32.mxu0 %vm483_vm0, %v329_v51  ;;  %v334_v53 = vld [vmem:[%s10237_s27 + $0x368] sm:$0xff] }
  0xeb   : > { %v2604_v3 = vrot.slane %v2603_v56, 1  ;;  %v3189_v4 = vrot.slane %v3188_v57, 1  ;;  %v2611_v5 = vrot.slane %v2610_v58, 2  ;;  %v3196_v6 = vrot.slane %v3195_v59, 2  ;;  %v10715_v7 = vpop.f32.mrf.mxu0  ;;  %v10717_v10 = vpop.f32.mrf.mxu1  ;;  %8926 = vmatprep.mubr.msk.f32.mxu1 %vm483_vm0, %v459_v55 }
  0xec   : > { %v2618_v12 = vrot.slane %v2617_v62, 4  ;;  %v3203_v15 = vrot.slane %v3202_v63, 4  ;;  %v2624_v16 = vsel %vm483_vm0, %v10715_v7, -inf  ;;  %v3209_v17 = vsel %vm483_vm0, %v10717_v10, -inf }
  0xed   : > { %v2605_v19 = vmax.f32 %v2603_v56, %v2604_v3  ;;  %v3190_v20 = vmax.f32 %v3188_v57, %v3189_v4  ;;  %v2612_v21 = vmax.f32 %v2610_v58, %v2611_v5  ;;  %v3197_v24 = vmax.f32 %v3195_v59, %v3196_v6  ;;  %8732 = vmatmul.mubr.msk.f32.gmra.mxu0 %vm483_vm0, %v330_v2  ;;  %v10739_v45 = vpop.f32.mrf.mxu0  ;;  %v10744_v52 = vpop.f32.mrf.mxu1  ;;  %v464_v57 = vld [vmem:[%s10237_s27 + $0x778] sm:$0xff]  ;;  %v335_v58 = vld [vmem:[%s10237_s27 + $0x370] sm:$0xff] }
  0xee   : > { %v2619_v26 = vmax.f32 %v2617_v62, %v2618_v12  ;;  %v3204_v27 = vmax.f32 %v3202_v63, %v3203_v15  ;;  %v2626_v30 = vmax.f32 %v2624_v16, %v2625_v0  ;;  %v10728_v31 = vmax.f32 %v3209_v17, %v3210_v1  ;;  %8927 = vmatmul.mubr.msk.f32.gmra.mxu1 %vm483_vm0, %v460_v11  ;;  %v465_v1 = vld [vmem:[%s10237_s27 + $0x780] sm:$0xff]  ;;  %v336_v5 = vld [vmem:[%s10237_s27 + $0x378] sm:$0xff]  ;;  %v466_v16 = vld [vmem:[%s10237_s27 + $0x788] sm:$0xff] }
  0xef   : > { %v3749_v33 = vsub.f32 %v10643_v13, %v2605_v19  ;;  %v3750_v34 = vsub.f32 %v10631_v8, %v2605_v19  ;;  %v3879_v35 = vsub.f32 %v10645_v14, %v3190_v20  ;;  %v3880_v36 = vsub.f32 %v10634_v9, %v3190_v20  ;;  %8734 = vmatprep.mubr.msk.f32.mxu0 %vm483_vm0, %v331_v18  ;;  %v463_v13 = vld [vmem:[%s10237_s27 + $0x770] sm:$0xff]  ;;  %v10756_v0 = vpop.f32.mrf.mxu0  ;;  %v337_v17 = vld [vmem:[%s10237_s27 + $0x380] sm:$0xff] }
  0xf0   : > { %v2613_v39 = vrot.slane %v2612_v21, 1  ;;  %v3198_v42 = vrot.slane %v3197_v24, 1  ;;  %v2620_v43 = vrot.slane %v2619_v26, 2  ;;  %v3205_v44 = vrot.slane %v3204_v27, 2  ;;  %8929 = vmatprep.mubr.msk.f32.mxu1 %vm483_vm0, %v461_v25 }
  0xf1   : > { %v4005_v46 = vmul.f32 1.442695, %v3749_v33  ;;  %v4007_v8 = vmul.f32 1.442695, %v3750_v34  ;;  %v4265_v14 = vmul.f32 1.442695, %v3879_v35  ;;  %8735 = vmatmul.mubr.msk.f32.gmra.mxu0 %vm483_vm0, %v332_v32 }
  0xf2   : > { %v4267_v9 = vmul.f32 1.442695, %v3880_v36  ;;  %v2614_v47 = vmax.f32 %v2612_v21, %v2613_v39  ;;  %v3199_v50 = vmax.f32 %v3197_v24, %v3198_v42  ;;  %v2621_v51 = vmax.f32 %v2619_v26, %v2620_v43  ;;  %8930 = vmatmul.mubr.msk.f32.gmra.mxu1 %vm483_vm0, %v462_v37  ;;  %8737 = vmatprep.mubr.msk.f32.mxu0 %vm483_vm0, %v333_v38  ;;  %v10774_v21 = vpop.f32.mrf.mxu0  ;;  %v467_v24 = vld [vmem:[%s10237_s27 + $0x790] sm:$0xff]  ;;  %v338_v34 = vld [vmem:[%s10237_s27 + $0x388] sm:$0xff]  ;;  %v469_v43 = vld [vmem:[%s10237_s27 + $0x7a0] sm:$0xff] }
  0xf3   : > { %9060 = vpow2.f32 %v4005_v46  ;;  %v3206_v54 = vmax.f32 %v3204_v27, %v3205_v44  ;;  %v2627_v55 = vrot.slane %v2626_v30, 4  ;;  %v3212_v56 = vrot.slane %v10728_v31, 4  ;;  %8932 = vmatprep.mubr.msk.f32.mxu1 %vm483_vm0, %v463_v13  ;;  %v339_v35 = vld [vmem:[%s10237_s27 + $0x390] sm:$0xff] }
  0xf4   : > { %9062 = vpow2.f32 %v4007_v8  ;;  %v3751_v59 = vsub.f32 %v10666_v28, %v2614_v47  ;;  %v3752_v62 = vsub.f32 %v10655_v22, %v2614_v47  ;;  %v3881_v63 = vsub.f32 %v10668_v29, %v3199_v50  ;;  %v10762_v22 = vpop.f32.mrf.mxu1  ;;  %v10792_v42 = vpop.f32.mrf.mxu0 }
  0xf5   : > { %9064 = vpow2.f32 %v4265_v14  ;;  %v3882_v2 = vsub.f32 %v10658_v23, %v3199_v50  ;;  %v2622_v3 = vrot.slane %v2621_v51, 1  ;;  %v3207_v4 = vrot.slane %v3206_v54, 1  ;;  %8738 = vmatmul.mubr.msk.f32.gmra.mxu0 %vm483_vm0, %v334_v53  ;;  %v340_v50 = vld [vmem:[%s10237_s27 + $0x398] sm:$0xff] }
  0xf6   : > { %9066 = vpow2.f32 %v4267_v9  ;;  %v4009_v6 = vmul.f32 1.442695, %v3751_v59  ;;  %v4011_v28 = vmul.f32 1.442695, %v3752_v62  ;;  %v4269_v11 = vmul.f32 1.442695, %v3881_v63  ;;  %8933 = vmatmul.mubr.msk.f32.gmra.mxu1 %vm483_vm0, %v464_v57  ;;  %8740 = vmatprep.mubr.msk.f32.mxu0 %vm483_vm0, %v335_v58  ;;  %v10782_v33 = vpop.f32.mrf.mxu1 }
  0xf7   : > { %v4271_v29 = vmul.f32 1.442695, %v3882_v2  ;;  %v2623_v23 = vmax.f32 %v2621_v51, %v2622_v3  ;;  %v3208_v12 = vmax.f32 %v3206_v54, %v3207_v4  ;;  %v2628_v15 = vmax.f32 %v2626_v30, %v2627_v55  ;;  %8935 = vmatprep.mubr.msk.f32.mxu1 %vm483_vm0, %v465_v1  ;;  %v470_v54 = vld [vmem:[%s10237_s27 + $0x7a8] sm:$0xff]  ;;  %v341_v55 = vld [vmem:[%s10237_s27 + $0x3a0] sm:$0xff]  ;;  %v471_v62 = vld [vmem:[%s10237_s27 + $0x7b0] sm:$0xff] }
  0xf8   : > { %9068 = vpow2.f32 %v4009_v6  ;;  %v3213_v18 = vmax.f32 %v10728_v31, %v3212_v56  ;;  %v2634_v19 = vsel %vm483_vm0, %v10739_v45, -inf  ;;  %v3219_v20 = vsel %vm483_vm0, %v10744_v52, -inf  ;;  %v10800_v47 = vpop.f32.mrf.mxu1 }
  0xf9   : > { %9070 = vpow2.f32 %v4011_v28  ;;  %v3753_v25 = vsub.f32 %v10689_v48, %v2623_v23  ;;  %v3754_v26 = vsub.f32 %v10679_v40, %v2623_v23  ;;  %v3883_v27 = vsub.f32 %v10691_v49, %v3208_v12  ;;  %8741 = vmatmul.mubr.msk.f32.gmra.mxu0 %vm483_vm0, %v336_v5  ;;  %v468_v48 = vld [vmem:[%s10237_s27 + $0x798] sm:$0xff]  ;;  %v342_v23 = vld [vmem:[%s10237_s27 + $0x3a8] sm:$0xff] }
  0xfa   : > { %9072 = vpow2.f32 %v4269_v11  ;;  %v3884_v30 = vsub.f32 %v10682_v41, %v3208_v12  ;;  %v2629_v31 = vrot.slane %v2628_v15, 2  ;;  %v3214_v32 = vrot.slane %v3213_v18, 2  ;;  %8936 = vmatmul.mubr.msk.f32.gmra.mxu1 %vm483_vm0, %v466_v16  ;;  %8743 = vmatprep.mubr.msk.f32.mxu0 %vm483_vm0, %v337_v17 }
  0xfb   : > { %9074 = vpow2.f32 %v4271_v29  ;;  %v4013_v40 = vmul.f32 1.442695, %v3753_v25  ;;  %v4015_v49 = vmul.f32 1.442695, %v3754_v26  ;;  %v4273_v36 = vmul.f32 1.442695, %v3883_v27  ;;  %8938 = vmatprep.mubr.msk.f32.mxu1 %vm483_vm0, %v467_v24 }
  0xfc   : > { %v4275_v37 = vmul.f32 1.442695, %v3884_v30  ;;  %v2630_v41 = vmax.f32 %v2628_v15, %v2629_v31  ;;  %v3215_v38 = vmax.f32 %v3213_v18, %v3214_v32  ;;  %v2633_v39 = vsel %vm483_vm0, %v10756_v0, -inf  ;;  %v473_v25 = vld [vmem:[%s10237_s27 + $0x7c0] sm:$0xff] }
  0xfd   : > { %9076 = vpow2.f32 %v4013_v40  ;;  %v2635_v44 = vmax.f32 %v2633_v39, %v2634_v19  ;;  %v3218_v13 = vsel %vm483_vm0, %v10762_v22, -inf  ;;  %v2643_v46 = vsel %vm483_vm0, %v10774_v21, -inf  ;;  %8744 = vmatmul.mubr.msk.f32.gmra.mxu0 %vm483_vm0, %v338_v34  ;;  %v344_v40 = vld [vmem:[%s10237_s27 + $0x3b8] sm:$0xff]  ;;  %v345_v39 = vld [vmem:[%s10237_s27 + $0x3c0] sm:$0xff] }
  0xfe   : > { %9078 = vpow2.f32 %v4015_v49  ;;  %v2631_v8 = vrot.slane %v2630_v41, 1  ;;  %v3216_v14 = vrot.slane %v3215_v38, 1  ;;  %v3220_v9 = vmax.f32 %v3218_v13, %v3219_v20  ;;  %8939 = vmatmul.mubr.msk.f32.gmra.mxu1 %vm483_vm0, %v468_v48  ;;  %8746 = vmatprep.mubr.msk.f32.mxu0 %vm483_vm0, %v339_v35 }
  0xff   : > { %9080 = vpow2.f32 %v4273_v36  ;;  %v2636_v51 = vrot.slane %v2635_v44, 4  ;;  %v2642_v53 = vsel %vm483_vm0, %v10792_v42, -inf  ;;  %8941 = vmatprep.mubr.msk.f32.mxu1 %vm483_vm0, %v469_v43  ;;  %v10821_v4 = vsel %vm483_vm0, %v10800_v47, -inf }
 0x100   : > { %v10810_v56 = vpop.eup %9060  ;;  %9082 = vpow2.f32 %v4275_v37  ;;  %v2632_v57 = vmax.f32 %v2630_v41, %v2631_v8  ;;  %v3217_v58 = vmax.f32 %v3215_v38, %v3216_v14  ;;  %v3221_v59 = vrot.slane %v3220_v9, 4  ;;  %v474_v38 = vld [vmem:[%s10237_s27 + $0x7c8] sm:$0xff]  ;;  %v475_v8 = vld [vmem:[%s10237_s27 + $0x7d0] sm:$0xff] }
 0x101   : > { %v10813_v63 = vpop.eup %9062  ;;  %v4517_v1 = vsel %vm483_vm0, %v10810_v56, 0.0  ;;  %v2637_v2 = vmax.f32 %v2635_v44, %v2636_v51  ;;  %v10817_v3 = vmax.f32 %v2642_v53, %v2643_v46  ;;  %8747 = vmatmul.mubr.msk.f32.gmra.mxu0 %vm483_vm0, %v340_v50 }
 0x102   : > { %v10824_v5 = vpop.eup %9064  ;;  %v4518_v6 = vsel %vm483_vm0, %v10813_v63, 0.0  ;;  %v3755_v28 = vsub.f32 %v10715_v7, %v2632_v57  ;;  %v3756_v11 = vsub.f32 %v10703_v60, %v2632_v57  ;;  %v3885_v29 = vsub.f32 %v10717_v10, %v3217_v58  ;;  %8942 = vmatmul.mubr.msk.f32.gmra.mxu1 %vm483_vm0, %v470_v54  ;;  %8749 = vmatprep.mubr.msk.f32.mxu0 %vm483_vm0, %v341_v55  ;;  %v472_v60 = vld [vmem:[%s10237_s27 + $0x7b8] sm:$0xff]  ;;  %v343_v7 = vld [vmem:[%s10237_s27 + $0x3b0] sm:$0xff] }
 0x103   : > { %v10834_v12 = vpop.eup %9066  ;;  %v4519_v15 = vadd.f32 %v4518_v6, %v4517_v1  ;;  %v5102_v16 = vsel %vm483_vm0, %v10824_v5, 0.0  ;;  %v3886_v17 = vsub.f32 %v10706_v61, %v3217_v58  ;;  %v2638_v18 = vrot.slane %v2637_v2, 2  ;;  %8944 = vmatprep.mubr.msk.f32.mxu1 %vm483_vm0, %v471_v62  ;;  %v346_v58 = vld [vmem:[%s10237_s27 + $0x3c8] sm:$0xff] }
 0x104   : > { %v5103_v10 = vsel %vm483_vm0, %v10834_v12, 0.0  ;;  %v4017_v19 = vmul.f32 1.442695, %v3755_v28  ;;  %v4019_v20 = vmul.f32 1.442695, %v3756_v11  ;;  %v3222_v24 = vmax.f32 %v3220_v9, %v3221_v59  ;;  %v476_v28 = vld [vmem:[%s10237_s27 + $0x7d8] sm:$0xff] }
 0x105   : > { %v10845_v26 = vpop.eup %9068  ;;  %v4520_v27 = vrot.slane %v4519_v15, 4  ;;  %v5104_v30 = vadd.f32 %v5103_v10, %v5102_v16  ;;  %v4277_v31 = vmul.f32 1.442695, %v3885_v29  ;;  %v4279_v32 = vmul.f32 1.442695, %v3886_v17  ;;  %8750 = vmatmul.mubr.msk.f32.gmra.mxu0 %vm483_vm0, %v342_v23  ;;  %v347_v11 = vld [vmem:[%s10237_s27 + $0x3d0] sm:$0xff] }
 0x106   : > { %v10848_v61 = vpop.eup %9070  ;;  %v4526_v34 = vsel %vm483_vm0, %v10845_v26, 0.0  ;;  %9084 = vpow2.f32 %v4017_v19  ;;  %v2639_v48 = vmax.f32 %v2637_v2, %v2638_v18  ;;  %v3223_v35 = vrot.slane %v3222_v24, 2  ;;  %8945 = vmatmul.mubr.msk.f32.gmra.mxu1 %vm483_vm0, %v472_v60  ;;  %8752 = vmatprep.mubr.msk.f32.mxu0 %vm483_vm0, %v343_v7  ;;  %v477_v18 = vld [vmem:[%s10237_s27 + $0x7e0] sm:$0xff] }
 0x107   : > { %v10855_v49 = vpop.eup %9072  ;;  %v4521_v36 = vadd.f32 %v4520_v27, %v4519_v15  ;;  %v5105_v37 = vrot.slane %v5104_v30, 4  ;;  %v4527_v41 = vsel %vm483_vm0, %v10848_v61, 0.0  ;;  %9086 = vpow2.f32 %v4019_v20  ;;  %8947 = vmatprep.mubr.msk.f32.mxu1 %vm483_vm0, %v473_v25 }
 0x108   : > { %v10862_v43 = vpop.eup %9074  ;;  %v4528_v44 = vadd.f32 %v4527_v41, %v4526_v34  ;;  %v5111_v13 = vsel %vm483_vm0, %v10855_v49, 0.0  ;;  %9088 = vpow2.f32 %v4277_v31  ;;  %v2640_v46 = vrot.slane %v2639_v48, 1 }
 0x109   : > { %v4522_v14 = vrot.slane %v4521_v36, 2  ;;  %v5106_v9 = vadd.f32 %v5105_v37, %v5104_v30  ;;  %v5112_v50 = vsel %vm483_vm0, %v10862_v43, 0.0  ;;  %9090 = vpow2.f32 %v4279_v32  ;;  %8753 = vmatmul.mubr.msk.f32.gmra.mxu0 %vm483_vm0, %v344_v40 }
 0x10a   : > { %v10870_v51 = vpop.eup %9076  ;;  %v4529_v53 = vrot.slane %v4528_v44, 4  ;;  %v5113_v54 = vadd.f32 %v5112_v50, %v5111_v13  ;;  %v2641_v55 = vmax.f32 %v2639_v48, %v2640_v46  ;;  %v10872_v57 = vmax.f32 %v3222_v24, %v3223_v35  ;;  %8948 = vmatmul.mubr.msk.f32.gmra.mxu1 %vm483_vm0, %v474_v38  ;;  %8755 = vmatprep.mubr.msk.f32.mxu0 %vm483_vm0, %v345_v39  ;;  %v478_v35 = vld [vmem:[%s10237_s27 + $0x7e8] sm:$0xff] }
 0x10b   : > { %v10877_v59 = vpop.eup %9078  ;;  %v4523_v62 = vadd.f32 %v4522_v14, %v4521_v36  ;;  %v5107_v1 = vrot.slane %v5106_v9, 2  ;;  %v4535_v2 = vsel %vm483_vm0, %v10870_v51, 0.0  ;;  %v2645_v6 = vrot.slane %v10817_v3, 4  ;;  %8950 = vmatprep.mubr.msk.f32.mxu1 %vm483_vm0, %v475_v8 }
 0x10c   : > { %v10885_v29 = vpop.eup %9080  ;;  %v4530_v23 = vadd.f32 %v4529_v53, %v4528_v44  ;;  %v5114_v15 = vrot.slane %v5113_v54, 4  ;;  %v4536_v16 = vsel %vm483_vm0, %v10877_v59, 0.0  ;;  %v3757_v17 = vsub.f32 %v10756_v0, %v2641_v55  ;;  %v348_v0 = vld [vmem:[%s10237_s27 + $0x3d8] sm:$0xff] }
 0x10d   : > { %v10891_v60 = vpop.eup %9082  ;;  %v4524_v7 = vrot.slane %v4523_v62, 1  ;;  %v5108_v10 = vadd.f32 %v5107_v1, %v5106_v9  ;;  %v4537_v19 = vadd.f32 %v4536_v16, %v4535_v2  ;;  %v5120_v20 = vsel %vm483_vm0, %v10885_v29, 0.0  ;;  %8756 = vmatmul.mubr.msk.f32.gmra.mxu0 %vm483_vm0, %v346_v58  ;;  %v10923_v16 = vpop.f32.mrf.mxu0 }
 0x10e   : > { %v4531_v24 = vrot.slane %v4530_v23, 2  ;;  %v5115_v25 = vadd.f32 %v5114_v15, %v5113_v54  ;;  %v5121_v27 = vsel %vm483_vm0, %v10891_v60, 0.0  ;;  %v3758_v30 = vsub.f32 %v10739_v45, %v2641_v55  ;;  %8951 = vmatmul.mubr.msk.f32.gmra.mxu1 %vm483_vm0, %v476_v28  ;;  %8758 = vmatprep.mubr.msk.f32.mxu0 %vm483_vm0, %v347_v11 }
 0x10f   : > { %v4525_v31 = vadd.f32 %v4524_v7, %v4523_v62  ;;  %v5109_v32 = vrot.slane %v5108_v10, 1  ;;  %v4538_v34 = vrot.slane %v4537_v19, 4  ;;  %v5122_v48 = vadd.f32 %v5121_v27, %v5120_v20  ;;  %8953 = vmatprep.mubr.msk.f32.mxu1 %vm483_vm0, %v477_v18  ;;  %v479_v27 = vld [vmem:[%s10237_s27 + $0x7f0] sm:$0xff] }
 0x110   : > { %v4532_v40 = vadd.f32 %v4531_v24, %v4530_v23  ;;  %v5116_v36 = vrot.slane %v5115_v25, 2  ;;  %v4021_v37 = vmul.f32 1.442695, %v3757_v17  ;;  %v4023_v41 = vmul.f32 1.442695, %v3758_v30  ;;  %v10925_v17 = vpop.f32.mrf.mxu1 }
 0x111   : > { %9092 = vrcp.f32 %v4525_v31  ;;  %v5110_v38 = vadd.f32 %v5109_v32, %v5108_v10  ;;  %v4539_v39 = vadd.f32 %v4538_v34, %v4537_v19  ;;  %v5123_v45 = vrot.slane %v5122_v48, 4  ;;  %8759 = vmatmul.mubr.msk.f32.gmra.mxu0 %vm483_vm0, %v348_v0  ;;  %v350_v34 = vld [vmem:[%s10237_s27 + $0x3e8] sm:$0xff] }
 0x112   : > { %v4533_v44 = vrot.slane %v4532_v40, 1  ;;  %v5117_v13 = vadd.f32 %v5116_v36, %v5115_v25  ;;  %9094 = vpow2.f32 %v4021_v37  ;;  %v3225_v46 = vrot.slane %v10872_v57, 1  ;;  %8954 = vmatmul.mubr.msk.f32.gmra.mxu1 %vm483_vm0, %v478_v35  ;;  %v349_v25 = vld [vmem:[%s10237_s27 + $0x3e0] sm:$0xff]  ;;  %v10939_v37 = vpop.f32.mrf.mxu0 }
 0x113   : > { %v10907_v8 = vpop.eup %9084  ;;  %9096 = vrcp.f32 %v5110_v38  ;;  %v4540_v14 = vrot.slane %v4539_v39, 2  ;;  %v5124_v9 = vadd.f32 %v5123_v45, %v5122_v48  ;;  %v2646_v50 = vmax.f32 %v10817_v3, %v2645_v6  ;;  %8761 = vmatprep.mubr.msk.f32.mxu0 %vm483_vm0, %v349_v25  ;;  %8956 = vmatprep.mubr.msk.f32.mxu1 %vm483_vm0, %v479_v27  ;;  %v480_v48 = vld [vmem:[%s10237_s27 + $0x7f8] sm:$0xff] }
 0x114   : > { %v10910_v53 = vpop.eup %9086  ;;  %v4534_v54 = vadd.f32 %v4533_v44, %v4532_v40  ;;  %v5118_v55 = vrot.slane %v5117_v13, 1  ;;  %v4544_v58 = vsel %vm483_vm0, %v10907_v8, 0.0  ;;  %9098 = vpow2.f32 %v4023_v41 }
 0x115   : > { %v10914_v62 = vpop.eup %9088  ;;  %v4541_v1 = vadd.f32 %v4540_v14, %v4539_v39  ;;  %v5125_v2 = vrot.slane %v5124_v9, 2  ;;  %v4545_v28 = vsel %vm483_vm0, %v10910_v53, 0.0  ;;  %v3226_v11 = vmax.f32 %v10872_v57, %v3225_v46  ;;  %8762 = vmatmul.mubr.msk.f32.gmra.mxu0 %vm483_vm0, %v350_v34 }
 0x116   : > { %v10919_v23 = vpop.eup %9090  ;;  %9100 = vrcp.f32 %v4534_v54  ;;  %v5119_v3 = vadd.f32 %v5118_v55, %v5117_v13  ;;  %v4546_v6 = vadd.f32 %v4545_v28, %v4544_v58  ;;  %v5129_v15 = vsel %vm483_vm0, %v10914_v62, 0.0 }
 0x117   : > { %v4542_v18 = vrot.slane %v4541_v1, 1  ;;  %v5126_v7 = vadd.f32 %v5125_v2, %v5124_v9  ;;  %v5130_v57 = vsel %vm483_vm0, %v10919_v23, 0.0  ;;  %v3887_v10 = vsub.f32 %v10762_v22, %v3226_v11 }
 0x118   : > { %9102 = vrcp.f32 %v5119_v3  ;;  %v4547_v19 = vrot.slane %v4546_v6, 4  ;;  %v5131_v20 = vadd.f32 %v5130_v57, %v5129_v15  ;;  %v3888_v24 = vsub.f32 %v10744_v52, %v3226_v11  ;;  %v10941_v52 = vpop.f32.mrf.mxu1  ;;  %8957 = vmatmul.mubr.msk.f32.gmra.mxu1 %vm483_vm0, %v480_v48 }
 0x119   : > { %v4543_v30 = vadd.f32 %v4542_v18, %v4541_v1  ;;  %v5127_v0 = vrot.slane %v5126_v7, 1  ;;  %v4281_v31 = vmul.f32 1.442695, %v3887_v10  ;;  %v2647_v32 = vrot.slane %v2646_v50, 2  ;;  %v9828_v18 = vld [vmem:[%s10237_s27] sm:$0xff] }
 0x11a   : > { %v4548_v35 = vadd.f32 %v4547_v19, %v4546_v6  ;;  %v5132_v40 = vrot.slane %v5131_v20, 4  ;;  %v4283_v22 = vmul.f32 1.442695, %v3888_v24  ;;  %v3228_v36 = vsel %vm483_vm0, %v10782_v33, -inf }
 0x11b   : > { %9104 = vrcp.f32 %v4543_v30  ;;  %v5128_v41 = vadd.f32 %v5127_v0, %v5126_v7  ;;  %v2648_v38 = vmax.f32 %v2646_v50, %v2647_v32  ;;  %v3229_v39 = vmax.f32 %v10821_v4, %v3228_v36  ;;  %v9829_v7 = vld [vmem:[%s10237_s27 + $0x8] sm:$0xff] }
 0x11c   : > { %v4549_v45 = vrot.slane %v4548_v35, 2  ;;  %v5133_v44 = vadd.f32 %v5132_v40, %v5131_v20  ;;  %9106 = vpow2.f32 %v4281_v31  ;;  %v2652_v54 = vsel %vm483_vm0, %v10923_v16, -inf  ;;  %v9830_v31 = vld [vmem:[%s10237_s27 + $0x410] sm:$0xff] }
 0x11d   : > { %9108 = vrcp.f32 %v5128_v41  ;;  %v2649_v13 = vrot.slane %v2648_v38, 1  ;;  %v3230_v1 = vrot.slane %v3229_v39, 4  ;;  %v2651_v6 = vsel %vm483_vm0, %v10939_v37, -inf }
 0x11e   : > { %v9093_v46 = vpop.eup %9092  ;;  %v4550_v14 = vadd.f32 %v4549_v45, %v4548_v35  ;;  %v5134_v9 = vrot.slane %v5133_v44, 2  ;;  %9110 = vpow2.f32 %v4283_v22  ;;  %v9832_v45 = vld [vmem:[%s10237_s27 + $0x10] sm:$0xff] }
 0x11f   : > { %v10948_v55 = vpop.eup %9094  ;;  %v5797_v50 = vmul.f32 %v9093_v46, %v10810_v56  ;;  %v5798_v4 = vmul.f32 %v9093_v46, %v10813_v63  ;;  %v10952_v58 = vmax.f32 %v2648_v38, %v2649_v13  ;;  %v9833_v13 = vld [vmem:[%s10237_s27 + $0x18] sm:$0xff] }
 0x120   : > { %v9097_v2 = vpop.eup %9096  ;;  %v4551_v28 = vrot.slane %v4550_v14, 1  ;;  %v5135_v11 = vadd.f32 %v5134_v9, %v5133_v44  ;;  %v4553_v3 = vsel %vm483_vm0, %v10948_v55, 0.0 }
 0x121   : > { %v10958_v15 = vpop.eup %9098  ;;  %v6053_v56 = vmul.f32 %v9828_v18, %v5797_v50  ;;  %v6054_v63 = vmul.f32 %v9829_v7, %v5798_v4  ;;  %v5927_v57 = vmul.f32 %v9097_v2, %v10824_v5  ;;  %v5928_v10 = vmul.f32 %v9097_v2, %v10834_v12  ;;  %v9831_v5 = vld [vmem:[%s10237_s27 + $0x418] sm:$0xff] }
 0x122   : > { %v4552_v19 = vadd.f32 %v4551_v28, %v4550_v14  ;;  %v5136_v20 = vrot.slane %v5135_v11, 1  ;;  %v4554_v24 = vsel %vm483_vm0, %v10958_v15, 0.0  ;;  %v3759_v25 = vsub.f32 %v10792_v42, %v10952_v58 }
 0x123   : > { %v9101_v27 = vpop.eup %9100  ;;  %v6309_v30 = vsel %vm483_vm0, %v6053_v56, 0.0  ;;  %v6310_v0 = vsel %vm483_vm0, %v6054_v63, 0.0  ;;  %v6183_v32 = vmul.f32 %v9830_v31, %v5927_v57  ;;  %v6184_v34 = vmul.f32 %v9831_v5, %v5928_v10  ;;  %v352_v57 = vld [vmem:[%s10237_s27 + $0x3f8] sm:$0xff] }
 0x124   : > { %v10972_v12 = vadd.f32 %v6310_v0, %v6309_v30  ;;  %v5799_v48 = vmul.f32 %v9101_v27, %v10845_v26  ;;  %v5800_v35 = vmul.f32 %v9101_v27, %v10848_v61  ;;  %9112 = vrcp.f32 %v4552_v19  ;;  %v10982_v26 = vpop.f32.mrf.mxu0  ;;  %v9836_v27 = vld [vmem:[%s10237_s27 + $0x20] sm:$0xff] }
 0x125   : > { %v9103_v40 = vpop.eup %9102  ;;  %v6894_v42 = vsel %vm483_vm0, %v6183_v32, 0.0  ;;  %v6895_v22 = vsel %vm483_vm0, %v6184_v34, 0.0  ;;  %v5137_v36 = vadd.f32 %v5136_v20, %v5135_v11  ;;  %v4555_v41 = vadd.f32 %v4554_v24, %v4553_v3 }
 0x126   : > { %14932 = vst [vmem:[#allocation3_spill] sm:$0xff] %v10972_v12  ;;  %v10978_v38 = vadd.f32 %v6895_v22, %v6894_v42  ;;  %v6055_v44 = vmul.f32 %v9832_v45, %v5799_v48  ;;  %v6056_v46 = vmul.f32 %v9833_v13, %v5800_v35  ;;  %v3231_v14 = vmax.f32 %v3229_v39, %v3230_v1  ;;  %v351_v39 = vld [vmem:[%s10237_s27 + $0x3f0] sm:$0xff]  ;;  %v11001_v19 = vpop.f32.mrf.mxu0 }
 0x127   : > { %v5929_v61 = vmul.f32 %v9103_v40, %v10855_v49  ;;  %v5930_v9 = vmul.f32 %v9103_v40, %v10862_v43  ;;  %9114 = vrcp.f32 %v5137_v36  ;;  %v4556_v50 = vrot.slane %v4555_v41, 4  ;;  %v9834_v49 = vld [vmem:[%s10237_s27 + $0x420] sm:$0xff]  ;;  %v9835_v43 = vld [vmem:[%s10237_s27 + $0x428] sm:$0xff]  ;;  %8764 = vmatprep.mubr.msk.f32.mxu0 %vm483_vm0, %v351_v39 }
 0x128   : > { %14933 = vst [vmem:[#allocation4_spill] sm:$0xff] %v10978_v38  ;;  %v9105_v4 = vpop.eup %9104  ;;  %v6318_v2 = vsel %vm483_vm0, %v6055_v44, 0.0  ;;  %v6319_v28 = vsel %vm483_vm0, %v6056_v46, 0.0  ;;  %v3760_v11 = vsub.f32 %v10774_v21, %v10952_v58  ;;  %v2653_v3 = vmax.f32 %v2651_v6, %v2652_v54  ;;  %8765 = vmatmul.mubr.msk.f32.gmra.mxu0 %vm483_vm0, %v352_v57 }
 0x129   : > { %v10991_v1 = vpop.eup %9106  ;;  %v10993_v18 = vadd.f32 %v6319_v28, %v6318_v2  ;;  %v6185_v56 = vmul.f32 %v9834_v49, %v5929_v61  ;;  %v6186_v7 = vmul.f32 %v9835_v43, %v5930_v9  ;;  %v5801_v63 = vmul.f32 %v9105_v4, %v10870_v51  ;;  %v11028_v9 = vpop.f32.mrf.mxu1 }
 0x12a   : > { %v9109_v10 = vpop.eup %9108  ;;  %v5802_v21 = vmul.f32 %v9105_v4, %v10877_v59  ;;  %v4557_v54 = vadd.f32 %v4556_v50, %v4555_v41  ;;  %v4025_v58 = vmul.f32 1.442695, %v3759_v25  ;;  %v3232_v6 = vrot.slane %v3231_v14, 2  ;;  %v9837_v59 = vld [vmem:[%s10237_s27 + $0x28] sm:$0xff] }
 0x12b   : > { %14934 = vst [vmem:[#allocation5_spill] sm:$0xff] %v10993_v18  ;;  %v11004_v20 = vpop.eup %9110  ;;  %v6903_v24 = vsel %vm483_vm0, %v6185_v56, 0.0  ;;  %v6904_v51 = vsel %vm483_vm0, %v6186_v7, 0.0  ;;  %v6057_v30 = vmul.f32 %v9836_v27, %v5801_v63  ;;  %v5138_v0 = vsel %vm483_vm0, %v10991_v1, 0.0  ;;  %v9838_v56 = vld [vmem:[%s10237_s27 + $0x430] sm:$0xff] }
 0x12c   : > { %v11011_v31 = vadd.f32 %v6904_v51, %v6903_v24  ;;  %v6058_v25 = vmul.f32 %v9837_v59, %v5802_v21  ;;  %v5931_v32 = vmul.f32 %v9109_v10, %v10885_v29  ;;  %v5932_v5 = vmul.f32 %v9109_v10, %v10891_v60  ;;  %v11041_v24 = vpop.f32.mrf.mxu1 }
 0x12d   : > { %v6327_v34 = vsel %vm483_vm0, %v6057_v30, 0.0  ;;  %v4558_v48 = vrot.slane %v4557_v54, 2  ;;  %v5139_v35 = vsel %vm483_vm0, %v11004_v20, 0.0  ;;  %9116 = vpow2.f32 %v4025_v58 }
 0x12e   : > { %14935 = vst [vmem:[#allocation6_spill] sm:$0xff] %v11011_v31  ;;  %v6328_v42 = vsel %vm483_vm0, %v6058_v25, 0.0  ;;  %v5140_v22 = vadd.f32 %v5139_v35, %v5138_v0  ;;  %v3237_v36 = vsel %vm483_vm0, %v10925_v17, -inf  ;;  %v4027_v45 = vmul.f32 1.442695, %v3760_v11 }
 0x12f   : > { %v11023_v41 = vadd.f32 %v6328_v42, %v6327_v34  ;;  %v4559_v29 = vadd.f32 %v4558_v48, %v4557_v54  ;;  %v3233_v60 = vmax.f32 %v3231_v14, %v3232_v6  ;;  %v2654_v46 = vrot.slane %v2653_v3, 4  ;;  %v9839_v54 = vld [vmem:[%s10237_s27 + $0x438] sm:$0xff]  ;;  %v354_v48 = vld [vmem:[%s10237_s27 + $0x408] sm:$0xff] }
 0x130   : > { %v5141_v13 = vrot.slane %v5140_v22, 4  ;;  %v3236_v61 = vsel %vm483_vm0, %v10941_v52, -inf  ;;  %9118 = vpow2.f32 %v4027_v45  ;;  %v6187_v43 = vmul.f32 %v9838_v56, %v5931_v32  ;;  %v353_v32 = vld [vmem:[%s10237_s27 + $0x400] sm:$0xff] }
 0x131   : > { %14936 = vst [vmem:[#allocation7_spill] sm:$0xff] %v11023_v41  ;;  %v9113_v50 = vpop.eup %9112  ;;  %v4560_v4 = vrot.slane %v4559_v29, 1  ;;  %v3234_v2 = vrot.slane %v3233_v60, 1  ;;  %v3238_v28 = vmax.f32 %v3236_v61, %v3237_v36  ;;  %v2655_v49 = vmax.f32 %v2653_v3, %v2654_v46  ;;  %8767 = vmatprep.mubr.msk.f32.mxu0 %vm483_vm0, %v353_v32 }
 0x132   : > { %v11031_v39 = vmul.f32 %v9113_v50, %v10907_v8  ;;  %v11034_v14 = vmul.f32 %v9113_v50, %v10910_v53  ;;  %v5142_v11 = vadd.f32 %v5141_v13, %v5140_v22  ;;  %v11039_v58 = vmul.f32 %v9839_v54, %v5932_v5  ;;  %v11043_v53 = vpop.f32.mrf.mxu0  ;;  %v11065_v22 = vpop.f32.mrf.mxu1 }
 0x133   : > { %v4561_v7 = vadd.f32 %v4560_v4, %v4559_v29  ;;  %v3235_v63 = vmax.f32 %v3233_v60, %v3234_v2  ;;  %v3239_v57 = vrot.slane %v3238_v28, 4  ;;  %v2656_v8 = vrot.slane %v2655_v49, 2 }
 0x134   : > { %v9115_v10 = vpop.eup %9114  ;;  %14937 = vst [vmem:[#allocation8_spill] sm:$0xff] %v11039_v58  ;;  %v5143_v6 = vrot.slane %v5142_v11, 2  ;;  %v2661_v25 = vsel %vm483_vm0, %v10982_v26, -inf  ;;  %v11057_v5 = vsel %vm483_vm0, %v6187_v43, 0.0  ;;  %v11067_v36 = vpop.f32.mrf.mxu0  ;;  %8768 = vmatmul.mubr.msk.f32.gmra.mxu0 %vm483_vm0, %v354_v48  ;;  %v3245_v60 = vsel %vm483_vm0, %v11041_v24, -inf }
 0x135   : > { %v11046_v3 = vmul.f32 %v9115_v10, %v10914_v62  ;;  %v11049_v51 = vmul.f32 %v9115_v10, %v10919_v23  ;;  %9120 = vrcp.f32 %v4561_v7  ;;  %v3889_v27 = vsub.f32 %v10800_v47, %v3235_v63  ;;  %14939 = vst [vmem:[#allocation10_spill] sm:$0xff] %v11057_v5  ;;  %v11080_v7 = vpop.f32.mrf.mxu1 }
 0x136   : > { %v5144_v30 = vadd.f32 %v5143_v6, %v5142_v11  ;;  %v3890_v0 = vsub.f32 %v10782_v33, %v3235_v63  ;;  %v2657_v59 = vmax.f32 %v2655_v49, %v2656_v8  ;;  %v3240_v62 = vmax.f32 %v3238_v28, %v3239_v57 }
 0x137   : > { %14938 = vst [vmem:[#allocation9_spill] sm:$0xff] %v11049_v51  ;;  %v4285_v34 = vmul.f32 1.442695, %v3889_v27  ;;  %v3246_v23 = vsel %vm483_vm0, %v11028_v9, -inf  ;;  %v2660_v33 = vsel %vm483_vm0, %v11001_v19, -inf  ;;  %v2670_v11 = vsel %vm483_vm0, %v11043_v53, -inf }
 0x138   : > { %v5145_v47 = vrot.slane %v5144_v30, 1  ;;  %v4287_v35 = vmul.f32 1.442695, %v3890_v0  ;;  %v2658_v42 = vrot.slane %v2657_v59, 1  ;;  %v3241_v29 = vrot.slane %v3240_v62, 2 }
 0x139   : > { %9122 = vpow2.f32 %v4285_v34  ;;  %v2662_v45 = vmax.f32 %v2660_v33, %v2661_v25  ;;  %v3247_v50 = vmax.f32 %v3245_v60, %v3246_v23  ;;  %v3255_v10 = vsel %vm483_vm0, %v11065_v22, -inf }
 0x13a   : > { %v11072_v13 = vpop.eup %9116  ;;  %v5146_v46 = vadd.f32 %v5145_v47, %v5144_v30  ;;  %9124 = vpow2.f32 %v4287_v35  ;;  %v2659_v61 = vmax.f32 %v2657_v59, %v2658_v42  ;;  %v3242_v2 = vmax.f32 %v3240_v62, %v3241_v29 }
 0x13b   : > { %v4562_v4 = vsel %vm483_vm0, %v11072_v13, 0.0  ;;  %v2663_v28 = vrot.slane %v2662_v45, 4  ;;  %v3248_v43 = vrot.slane %v3247_v50, 4  ;;  %v2669_v54 = vsel %vm483_vm0, %v11067_v36, -inf }
 0x13c   : > { %9126 = vrcp.f32 %v5146_v46  ;;  %v3761_v49 = vsub.f32 %v10939_v37, %v2659_v61  ;;  %v3762_v56 = vsub.f32 %v10923_v16, %v2659_v61  ;;  %v3243_v63 = vrot.slane %v3242_v2, 1 }
 0x13d   : > { %v2664_v57 = vmax.f32 %v2662_v45, %v2663_v28  ;;  %v11086_v6 = vpop.eup %9118  ;;  %v3249_v30 = vmax.f32 %v3247_v50, %v3248_v43  ;;  %v2671_v0 = vmax.f32 %v2669_v54, %v2670_v11  ;;  %v3254_v25 = vsel %vm483_vm0, %v11080_v7, -inf }
 0x13e   : > { %v4029_v8 = vmul.f32 1.442695, %v3761_v49  ;;  %v4031_v27 = vmul.f32 1.442695, %v3762_v56  ;;  %v4563_v16 = vsel %vm483_vm0, %v11086_v6, 0.0  ;;  %v3244_v37 = vmax.f32 %v3242_v2, %v3243_v63  ;;  %v9841_v49 = vld [vmem:[%s10237_s27 + $0x38] sm:$0xff] }
 0x13f   : > { %v2665_v59 = vrot.slane %v2664_v57, 2  ;;  %v4564_v32 = vadd.f32 %v4563_v16, %v4562_v4  ;;  %v3250_v34 = vrot.slane %v3249_v30, 2  ;;  %v2672_v62 = vrot.slane %v2671_v0, 4 }
 0x140   : > { %9128 = vpow2.f32 %v4029_v8  ;;  %v3891_v23 = vsub.f32 %v10941_v52, %v3244_v37  ;;  %v3892_v48 = vsub.f32 %v10925_v17, %v3244_v37  ;;  %v3256_v45 = vmax.f32 %v3254_v25, %v3255_v10  ;;  %v9840_v17 = vld [vmem:[%s10237_s27 + $0x30] sm:$0xff]  ;;  %v11110_v10 = vpop.f32.mrf.mxu0 }
 0x141   : > { %9130 = vpow2.f32 %v4031_v27  ;;  %v2666_v47 = vmax.f32 %v2664_v57, %v2665_v59  ;;  %v4565_v42 = vrot.slane %v4564_v32, 4  ;;  %v3251_v33 = vmax.f32 %v3249_v30, %v3250_v34 }
 0x142   : > { %v9121_v35 = vpop.eup %9120  ;;  %v2673_v29 = vmax.f32 %v2671_v0, %v2672_v62  ;;  %v4289_v61 = vmul.f32 1.442695, %v3891_v23  ;;  %v4291_v50 = vmul.f32 1.442695, %v3892_v48  ;;  %v11102_v11 = vmul.f32 %v9840_v17, %v11031_v39  ;;  %v11124_v23 = vpop.f32.mrf.mxu1 }
 0x143   : > { %v11095_v60 = vmul.f32 %v9121_v35, %v10948_v55  ;;  %v11098_v46 = vmul.f32 %v9121_v35, %v10958_v15  ;;  %v4566_v4 = vadd.f32 %v4565_v42, %v4564_v32  ;;  %v2667_v52 = vrot.slane %v2666_v47, 1 }
 0x144   : > { %v3252_v2 = vrot.slane %v3251_v33, 1  ;;  %v2674_v28 = vrot.slane %v2673_v29, 2  ;;  %v11106_v56 = vmul.f32 %v9841_v49, %v11034_v14  ;;  %9132 = vpow2.f32 %v4289_v61  ;;  %v11146_v49 = vpop.f32.mrf.mxu1 }
 0x145   : > { %14940 = vst [vmem:[#allocation11_spill] sm:$0xff] %v11098_v46  ;;  %v3257_v55 = vrot.slane %v3256_v45, 4  ;;  %v4567_v15 = vrot.slane %v4566_v4, 2  ;;  %9134 = vpow2.f32 %v4291_v50  ;;  %v2668_v63 = vmax.f32 %v2666_v47, %v2667_v52 }
 0x146   : > { %14941 = vst [vmem:[#allocation12_spill] sm:$0xff] %v11106_v56  ;;  %v11108_v43 = vpop.eup %9122  ;;  %v3253_v57 = vmax.f32 %v3251_v33, %v3252_v2  ;;  %v2675_v8 = vmax.f32 %v2673_v29, %v2674_v28  ;;  %v2679_v14 = vsel %vm483_vm0, %v11110_v10, -inf  ;;  %v3264_v61 = vsel %vm483_vm0, %v11124_v23, -inf }
 0x147   : > { %v11112_v54 = vpop.eup %9124  ;;  %v5147_v39 = vsel %vm483_vm0, %v11108_v43, 0.0  ;;  %v3258_v27 = vmax.f32 %v3256_v45, %v3257_v55  ;;  %v4568_v30 = vadd.f32 %v4567_v15, %v4566_v4  ;;  %v3763_v16 = vsub.f32 %v11001_v19, %v2668_v63  ;;  %v11132_v45 = vpop.f32.mrf.mxu0 }
 0x148   : > { %14942 = vst [vmem:[#allocation13_spill] sm:$0xff] %v11112_v54  ;;  %v5148_v0 = vsel %vm483_vm0, %v11112_v54, 0.0  ;;  %v3764_v37 = vsub.f32 %v10982_v26, %v2668_v63  ;;  %v3893_v32 = vsub.f32 %v11041_v24, %v3253_v57  ;;  %v3894_v34 = vsub.f32 %v11028_v9, %v3253_v57 }
 0x149   : > { %v9127_v59 = vpop.eup %9126  ;;  %v5149_v25 = vadd.f32 %v5148_v0, %v5147_v39  ;;  %v2676_v62 = vrot.slane %v2675_v8, 1  ;;  %v4569_v35 = vrot.slane %v4568_v30, 1  ;;  %v4033_v42 = vmul.f32 1.442695, %v3763_v16 }
 0x14a   : > { %v11127_v48 = vmul.f32 %v9127_v59, %v10991_v1  ;;  %v11130_v47 = vmul.f32 %v9127_v59, %v11004_v20  ;;  %v4035_v33 = vmul.f32 1.442695, %v3764_v37  ;;  %v4293_v26 = vmul.f32 1.442695, %v3893_v32 }
 0x14b   : > { %v5150_v19 = vrot.slane %v5149_v25, 4  ;;  %v2677_v29 = vmax.f32 %v2675_v8, %v2676_v62  ;;  %v4570_v24 = vadd.f32 %v4569_v35, %v4568_v30  ;;  %9136 = vpow2.f32 %v4033_v42 }
 0x14c   : > { %14943 = vst [vmem:[#allocation14_spill] sm:$0xff] %v11130_v47  ;;  %v4295_v9 = vmul.f32 1.442695, %v3894_v34  ;;  %9138 = vpow2.f32 %v4035_v33  ;;  %v3259_v28 = vrot.slane %v3258_v27, 2  ;;  %v2678_v17 = vsel %vm483_vm0, %v11132_v45, -inf }
 0x14d   : > { %v11136_v50 = vpop.eup %9128  ;;  %v5151_v1 = vadd.f32 %v5150_v19, %v5149_v25  ;;  %v3765_v20 = vsub.f32 %v11067_v36, %v2677_v29  ;;  %v3766_v4 = vsub.f32 %v11043_v53, %v2677_v29  ;;  %9140 = vrcp.f32 %v4570_v24  ;;  %v11154_v25 = vpop.f32.mrf.mxu0 }
 0x14e   : > { %v11140_v52 = vpop.eup %9130  ;;  %v4571_v2 = vsel %vm483_vm0, %v11136_v50, 0.0  ;;  %9142 = vpow2.f32 %v4293_v26  ;;  %v3260_v57 = vmax.f32 %v3258_v27, %v3259_v28  ;;  %v2680_v8 = vmax.f32 %v2678_v17, %v2679_v14  ;;  %v9842_v26 = vld [vmem:[%s10237_s27 + $0x440] sm:$0xff] }
 0x14f   : > { %14944 = vst [vmem:[#allocation15_spill] sm:$0xff] %v11140_v52  ;;  %v5152_v55 = vrot.slane %v5151_v1, 2  ;;  %v4572_v15 = vsel %vm483_vm0, %v11140_v52, 0.0  ;;  %v4037_v36 = vmul.f32 1.442695, %v3765_v20  ;;  %9144 = vpow2.f32 %v4295_v9  ;;  %v9843_v28 = vld [vmem:[%s10237_s27 + $0x40] sm:$0xff] }
 0x150   : > { %v4573_v63 = vadd.f32 %v4572_v15, %v4571_v2  ;;  %v4039_v53 = vmul.f32 1.442695, %v3766_v4  ;;  %v3263_v30 = vsel %vm483_vm0, %v11146_v49, -inf  ;;  %v3261_v37 = vrot.slane %v3260_v57, 1  ;;  %v11172_v2 = vpop.f32.mrf.mxu0 }
 0x151   : > { %v5153_v39 = vadd.f32 %v5152_v55, %v5151_v1  ;;  %9146 = vpow2.f32 %v4037_v36  ;;  %v11152_v0 = vpop.eup %9132  ;;  %v3265_v59 = vmax.f32 %v3263_v30, %v3264_v61  ;;  %v11160_v27 = vsel %vm483_vm0, %v11102_v11, 0.0  ;;  %v11180_v36 = vpop.f32.mrf.mxu1 }
 0x152   : > { %v4574_v16 = vrot.slane %v4573_v63, 4  ;;  %9148 = vpow2.f32 %v4039_v53  ;;  %v11156_v32 = vpop.eup %9134  ;;  %14946 = vst [vmem:[#allocation17_spill] sm:$0xff] %v11160_v27  ;;  %v5156_v14 = vsel %vm483_vm0, %v11152_v0, 0.0  ;;  %v2681_v62 = vrot.slane %v2680_v8, 4  ;;  %v11222_v21 = vpop.f32.mrf.mxu0 }
 0x153   : > { %14945 = vst [vmem:[#allocation16_spill] sm:$0xff] %v11156_v32  ;;  %v5154_v34 = vrot.slane %v5153_v39, 1  ;;  %v5157_v42 = vsel %vm483_vm0, %v11156_v32, 0.0  ;;  %v3262_v19 = vmax.f32 %v3260_v57, %v3261_v37  ;;  %v3266_v33 = vrot.slane %v3265_v59, 4 }
 0x154   : > { %v4575_v35 = vadd.f32 %v4574_v16, %v4573_v63  ;;  %v11168_v29 = vmul.f32 %v9842_v26, %v11046_v3  ;;  %v5158_v9 = vadd.f32 %v5157_v42, %v5156_v14  ;;  %v2682_v11 = vmax.f32 %v2680_v8, %v2681_v62  ;;  %v11192_v42 = vpop.f32.mrf.mxu1 }
 0x155   : > { %v5155_v24 = vadd.f32 %v5154_v34, %v5153_v39  ;;  %v3895_v1 = vsub.f32 %v11080_v7, %v3262_v19  ;;  %v3896_v20 = vsub.f32 %v11065_v22, %v3262_v19  ;;  %v3267_v4 = vmax.f32 %v3265_v59, %v3266_v33 }
 0x156   : > { %14947 = vst [vmem:[#allocation18_spill] sm:$0xff] %v11168_v29  ;;  %v4576_v61 = vrot.slane %v4575_v35, 2  ;;  %v11176_v17 = vmul.f32 %v9843_v28, %v11095_v60  ;;  %v5159_v55 = vrot.slane %v5158_v9, 4  ;;  %v2683_v15 = vrot.slane %v2682_v11, 2 }
 0x157   : > { %v2688_v3 = vsel %vm483_vm0, %v11154_v25, -inf  ;;  %v4297_v53 = vmul.f32 1.442695, %v3895_v1  ;;  %v4299_v57 = vmul.f32 1.442695, %v3896_v20  ;;  %v3268_v7 = vrot.slane %v3267_v4, 2 }
 0x158   : > { %14948 = vst [vmem:[#allocation19_spill] sm:$0xff] %v11176_v17  ;;  %v4577_v63 = vadd.f32 %v4576_v61, %v4575_v35  ;;  %v11182_v39 = vpop.eup %9136  ;;  %9150 = vrcp.f32 %v5155_v24  ;;  %v5160_v22 = vadd.f32 %v5159_v55, %v5158_v9  ;;  %v2684_v8 = vmax.f32 %v2682_v11, %v2683_v15 }
 0x159   : > { %v2687_v60 = vsel %vm483_vm0, %v11172_v2, -inf  ;;  %v11186_v30 = vpop.eup %9138  ;;  %v4580_v37 = vsel %vm483_vm0, %v11182_v39, 0.0  ;;  %9152 = vpow2.f32 %v4297_v53  ;;  %v3269_v59 = vmax.f32 %v3267_v4, %v3268_v7 }
 0x15a   : > { %14949 = vst [vmem:[#allocation20_spill] sm:$0xff] %v11186_v30  ;;  %v4578_v16 = vrot.slane %v4577_v63, 1  ;;  %v9141_v34 = vpop.eup %9140  ;;  %v5161_v14 = vrot.slane %v5160_v22, 2  ;;  %v4581_v62 = vsel %vm483_vm0, %v11186_v30, 0.0  ;;  %9154 = vpow2.f32 %v4299_v57 }
 0x15b   : > { %v2685_v35 = vrot.slane %v2684_v8, 1  ;;  %v11194_v19 = vpop.eup %9142  ;;  %v11197_v33 = vmul.f32 %v9141_v34, %v11072_v13  ;;  %v11200_v26 = vmul.f32 %v9141_v34, %v11086_v6  ;;  %v4582_v9 = vadd.f32 %v4581_v62, %v4580_v37 }
 0x15c   : > { %v4579_v24 = vadd.f32 %v4578_v16, %v4577_v63  ;;  %v11202_v11 = vpop.eup %9144  ;;  %v5162_v61 = vadd.f32 %v5161_v14, %v5160_v22  ;;  %v5165_v1 = vsel %vm483_vm0, %v11194_v19, 0.0  ;;  %v3270_v4 = vrot.slane %v3269_v59, 1 }
 0x15d   : > { %14950 = vst [vmem:[#allocation21_spill] sm:$0xff] %v11200_v26  ;;  %v2686_v20 = vmax.f32 %v2684_v8, %v2685_v35  ;;  %v4583_v55 = vrot.slane %v4582_v9, 4  ;;  %v5166_v13 = vsel %vm483_vm0, %v11202_v11, 0.0  ;;  %v2689_v15 = vmax.f32 %v2687_v60, %v2688_v3 }
 0x15e   : > { %v11206_v28 = vpop.eup %9146  ;;  %v3272_v6 = vsel %vm483_vm0, %v11192_v42, -inf  ;;  %v5163_v53 = vrot.slane %v5162_v61, 1  ;;  %v5167_v57 = vadd.f32 %v5166_v13, %v5165_v1  ;;  %v3271_v34 = vmax.f32 %v3269_v59, %v3270_v4 }
 0x15f   : > { %v11212_v63 = vpop.eup %9148  ;;  %v4589_v7 = vsel %vm483_vm0, %v11206_v28, 0.0  ;;  %v3767_v22 = vsub.f32 %v11132_v45, %v2686_v20  ;;  %v4584_v8 = vadd.f32 %v4583_v55, %v4582_v9  ;;  %v3768_v37 = vsub.f32 %v11110_v10, %v2686_v20 }
 0x160   : > { %v4590_v16 = vsel %vm483_vm0, %v11212_v63, 0.0  ;;  %9156 = vrcp.f32 %v4579_v24  ;;  %v5168_v3 = vrot.slane %v5167_v57, 4  ;;  %v3897_v1 = vsub.f32 %v11146_v49, %v3271_v34  ;;  %v11224_v24 = vpop.f32.mrf.mxu1 }
 0x161   : > { %v4591_v60 = vadd.f32 %v4590_v16, %v4589_v7  ;;  %v4041_v14 = vmul.f32 1.442695, %v3767_v22  ;;  %v4585_v62 = vrot.slane %v4584_v8, 2  ;;  %v4043_v35 = vmul.f32 1.442695, %v3768_v37 }
 0x162   : > { %v3898_v13 = vsub.f32 %v11124_v23, %v3271_v34  ;;  %v5164_v45 = vadd.f32 %v5163_v53, %v5162_v61  ;;  %v5169_v9 = vadd.f32 %v5168_v3, %v5167_v57  ;;  %v2690_v40 = vrot.slane %v2689_v15, 4  ;;  %v11230_v57 = vpop.f32.mrf.mxu0 }
 0x163   : > { %v4592_v55 = vrot.slane %v4591_v60, 4  ;;  %v4586_v44 = vadd.f32 %v4585_v62, %v4584_v8  ;;  %9158 = vpow2.f32 %v4041_v14  ;;  %v4301_v10 = vmul.f32 1.442695, %v3897_v1  ;;  %v9844_v8 = vld [vmem:[%s10237_s27 + $0x450] sm:$0xff] }
 0x164   : > { %v4303_v59 = vmul.f32 1.442695, %v3898_v13  ;;  %v5170_v20 = vrot.slane %v5169_v9, 2  ;;  %9160 = vpow2.f32 %v4043_v35  ;;  %v3273_v49 = vsel %vm483_vm0, %v11180_v36, -inf }
 0x165   : > { %v4593_v4 = vadd.f32 %v4592_v55, %v4591_v60  ;;  %v11228_v23 = vpop.eup %9150  ;;  %v4587_v7 = vrot.slane %v4586_v44, 1  ;;  %9162 = vpow2.f32 %v4301_v10  ;;  %v2691_v61 = vmax.f32 %v2689_v15, %v2690_v40  ;;  %v11242_v15 = vpop.f32.mrf.mxu1 }
 0x166   : > { %14951 = vst [vmem:[#allocation22_spill] sm:$0xff] %v11228_v23  ;;  %v3274_v53 = vmax.f32 %v3272_v6, %v3273_v49  ;;  %v11232_v22 = vpop.eup %9152  ;;  %v11236_v16 = vmul.f32 %v9844_v8, %v11127_v48  ;;  %v5171_v37 = vadd.f32 %v5170_v20, %v5169_v9  ;;  %9164 = vpow2.f32 %v4303_v59 }
 0x167   : > { %v4594_v34 = vrot.slane %v4593_v4, 2  ;;  %v11238_v3 = vpop.eup %9154  ;;  %9166 = vrcp.f32 %v5164_v45  ;;  %v5174_v60 = vsel %vm483_vm0, %v11232_v22, 0.0  ;;  %v2692_v14 = vrot.slane %v2691_v61, 2  ;;  %v11248_v45 = vpop.f32.mrf.mxu0 }
 0x168   : > { %14952 = vst [vmem:[#allocation23_spill] sm:$0xff] %v11236_v16  ;;  %v3275_v40 = vrot.slane %v3274_v53, 4  ;;  %v5172_v6 = vrot.slane %v5171_v37, 1  ;;  %v5175_v35 = vsel %vm483_vm0, %v11238_v3, 0.0  ;;  %v2697_v48 = vsel %vm483_vm0, %v11222_v21, -inf }
 0x169   : > { %v4595_v62 = vadd.f32 %v4594_v34, %v4593_v4  ;;  %v4588_v1 = vadd.f32 %v4587_v7, %v4586_v44  ;;  %v5176_v13 = vadd.f32 %v5175_v35, %v5174_v60  ;;  %v2693_v9 = vmax.f32 %v2691_v61, %v2692_v14  ;;  %v9845_v35 = vld [vmem:[%s10237_s27 + $0x50] sm:$0xff] }
 0x16a   : > { %v3276_v55 = vmax.f32 %v3274_v53, %v3275_v40  ;;  %v5173_v10 = vadd.f32 %v5172_v6, %v5171_v37  ;;  %v2696_v20 = vsel %vm483_vm0, %v11230_v57, -inf  ;;  %v3281_v4 = vsel %vm483_vm0, %v11242_v15, -inf  ;;  %v11258_v6 = vpop.f32.mrf.mxu0 }
 0x16b   : > { %v4596_v59 = vrot.slane %v4595_v62, 1  ;;  %v5177_v49 = vrot.slane %v5176_v13, 4  ;;  %v2694_v8 = vrot.slane %v2693_v9, 1  ;;  %v3282_v44 = vsel %vm483_vm0, %v11224_v24, -inf }
 0x16c   : > { %v3277_v34 = vrot.slane %v3276_v55, 2  ;;  %9168 = vrcp.f32 %v5173_v10  ;;  %v2698_v61 = vmax.f32 %v2696_v20, %v2697_v48  ;;  %v3283_v53 = vmax.f32 %v3281_v4, %v3282_v44 }
 0x16d   : > { %v4597_v7 = vadd.f32 %v4596_v59, %v4595_v62  ;;  %v11256_v60 = vpop.eup %9156  ;;  %9170 = vrcp.f32 %v4588_v1  ;;  %v5178_v37 = vadd.f32 %v5177_v49, %v5176_v13  ;;  %v2695_v14 = vmax.f32 %v2693_v9, %v2694_v8 }
 0x16e   : > { %14953 = vst [vmem:[#allocation24_spill] sm:$0xff] %v11256_v60  ;;  %v3278_v40 = vmax.f32 %v3276_v55, %v3277_v34  ;;  %v11262_v17 = vmul.f32 %v9845_v35, %v11197_v33  ;;  %v2699_v27 = vrot.slane %v2698_v61, 4  ;;  %v3284_v56 = vrot.slane %v3283_v53, 4  ;;  %v11290_v35 = vpop.f32.mrf.mxu1 }
 0x16f   : > { %9172 = vrcp.f32 %v4597_v7  ;;  %v5179_v41 = vrot.slane %v5178_v37, 2  ;;  %v3769_v62 = vsub.f32 %v11172_v2, %v2695_v14  ;;  %v3770_v48 = vsub.f32 %v11154_v25, %v2695_v14 }
 0x170   : > { %14954 = vst [vmem:[#allocation25_spill] sm:$0xff] %v11262_v17  ;;  %v3279_v10 = vrot.slane %v3278_v40, 1  ;;  %v11266_v59 = vpop.eup %9158  ;;  %v2700_v1 = vmax.f32 %v2698_v61, %v2699_v27  ;;  %v3285_v13 = vmax.f32 %v3283_v53, %v3284_v56  ;;  %v2706_v9 = vsel %vm483_vm0, %v11248_v45, -inf }
 0x171   : > { %v2705_v33 = vsel %vm483_vm0, %v11258_v6, -inf  ;;  %v11272_v55 = vpop.eup %9160  ;;  %v5180_v20 = vadd.f32 %v5179_v41, %v5178_v37  ;;  %v4598_v4 = vsel %vm483_vm0, %v11266_v59, 0.0  ;;  %v4045_v2 = vmul.f32 1.442695, %v3769_v62 }
 0x172   : > { %v4047_v49 = vmul.f32 1.442695, %v3770_v48  ;;  %v11276_v25 = vpop.eup %9162  ;;  %v4599_v27 = vsel %vm483_vm0, %v11272_v55, 0.0  ;;  %v3280_v56 = vmax.f32 %v3278_v40, %v3279_v10  ;;  %v2701_v8 = vrot.slane %v2700_v1, 2 }
 0x173   : > { %v3286_v34 = vrot.slane %v3285_v13, 2  ;;  %v11280_v44 = vpop.eup %9164  ;;  %v5181_v7 = vrot.slane %v5180_v20, 1  ;;  %v4600_v61 = vadd.f32 %v4599_v27, %v4598_v4  ;;  %v5183_v41 = vsel %vm483_vm0, %v11276_v25, 0.0 }
 0x174   : > { %9174 = vpow2.f32 %v4045_v2  ;;  %v11284_v53 = vpop.eup %9166  ;;  %v5184_v37 = vsel %vm483_vm0, %v11280_v44, 0.0  ;;  %v3899_v14 = vsub.f32 %v11192_v42, %v3280_v56  ;;  %v3900_v40 = vsub.f32 %v11180_v36, %v3280_v56  ;;  %v11300_v56 = vpop.f32.mrf.mxu1 }
 0x175   : > { %14955 = vst [vmem:[#allocation26_spill] sm:$0xff] %v11284_v53  ;;  %9176 = vpow2.f32 %v4047_v49  ;;  %v5182_v62 = vadd.f32 %v5181_v7, %v5180_v20  ;;  %v4601_v48 = vrot.slane %v4600_v61, 4  ;;  %v5185_v10 = vadd.f32 %v5184_v37, %v5183_v41 }
 0x176   : > { %v2702_v4 = vmax.f32 %v2700_v1, %v2701_v8  ;;  %v4305_v27 = vmul.f32 1.442695, %v3899_v14  ;;  %v4307_v17 = vmul.f32 1.442695, %v3900_v40  ;;  %v3287_v18 = vmax.f32 %v3285_v13, %v3286_v34 }
 0x177   : > { %v2707_v2 = vmax.f32 %v2705_v33, %v2706_v9  ;;  %v11294_v12 = vmul.f32 %v11228_v23, %v11108_v43  ;;  %9178 = vrcp.f32 %v5182_v62  ;;  %v4602_v49 = vadd.f32 %v4601_v48, %v4600_v61  ;;  %v9847_v62 = vld [vmem:[%s10237_s27 + $0x488] sm:$0xff] }
 0x178   : > { %v5186_v26 = vrot.slane %v5185_v10, 4  ;;  %v11298_v36 = vmul.f32 %v11256_v60, %v11136_v50  ;;  %9180 = vpow2.f32 %v4305_v27  ;;  %v2703_v42 = vrot.slane %v2702_v4, 1  ;;  %v9857_v60 = vld [vmem:[%s10237_s27 + $0xa8] sm:$0xff] }
 0x179   : > { %14956 = vst [vmem:[#allocation27_spill] sm:$0xff] %v11294_v12  ;;  %v3288_v20 = vrot.slane %v3287_v18, 1  ;;  %v9169_v1 = vpop.eup %9168  ;;  %v4603_v13 = vrot.slane %v4602_v49, 2  ;;  %9182 = vpow2.f32 %v4307_v17  ;;  %v3291_v43 = vsel %vm483_vm0, %v11290_v35, -inf  ;;  %v9846_v17 = vld [vmem:[%s10237_s27 + $0x480] sm:$0xff] }
 0x17a   : > { %14957 = vst [vmem:[#allocation28_spill] sm:$0xff] %v11298_v36  ;;  %v5187_v9 = vadd.f32 %v5186_v26, %v5185_v10  ;;  %v11304_v33 = vpop.eup %9170  ;;  %v5941_v8 = vmul.f32 %v9169_v1, %v11194_v19  ;;  %v5942_v50 = vmul.f32 %v9169_v1, %v11202_v11  ;;  %v2704_v34 = vmax.f32 %v2702_v4, %v2703_v42 }
 0x17b   : > { %14958 = vst [vmem:[#allocation29_spill] sm:$0xff] %v11304_v33  ;;  %v2708_v7 = vrot.slane %v2707_v2, 4  ;;  %v4604_v41 = vadd.f32 %v4603_v13, %v4602_v49  ;;  %v3289_v14 = vmax.f32 %v3287_v18, %v3288_v20  ;;  %v3290_v26 = vsel %vm483_vm0, %v11300_v56, -inf }
 0x17c   : > { %v9173_v61 = vpop.eup %9172  ;;  %v5188_v37 = vrot.slane %v5187_v9, 2  ;;  %v6197_v40 = vmul.f32 %v9846_v17, %v5941_v8  ;;  %v6198_v48 = vmul.f32 %v9847_v62, %v5942_v50  ;;  %v3771_v4 = vsub.f32 %v11230_v57, %v2704_v34 }
 0x17d   : > { %v5813_v10 = vmul.f32 %v9173_v61, %v11206_v28  ;;  %v5814_v19 = vmul.f32 %v9173_v61, %v11212_v63  ;;  %v4605_v27 = vrot.slane %v4604_v41, 1  ;;  %v3772_v49 = vsub.f32 %v11222_v21, %v2704_v34  ;;  %v9848_v63 = vld [vmem:[%s10237_s27 + $0x80] sm:$0xff] }
 0x17e   : > { %v5189_v11 = vadd.f32 %v5188_v37, %v5187_v9  ;;  %v11318_v18 = vmul.f32 %v11284_v53, %v11152_v0  ;;  %v11322_v42 = vmul.f32 %v11304_v33, %v11182_v39  ;;  %v6957_v20 = vsel %vm483_vm0, %v6197_v40, 0.0  ;;  %v9849_v37 = vld [vmem:[%s10237_s27 + $0x88] sm:$0xff] }
 0x17f   : > { %v6958_v28 = vsel %vm483_vm0, %v6198_v48, 0.0  ;;  %v6069_v1 = vmul.f32 %v9848_v63, %v5813_v10  ;;  %v4606_v13 = vadd.f32 %v4605_v27, %v4604_v41  ;;  %v4049_v57 = vmul.f32 1.442695, %v3771_v4  ;;  %v11341_v27 = vpop.f32.mrf.mxu0 }
 0x180   : > { %14959 = vst [vmem:[#allocation30_spill] sm:$0xff] %v11318_v18  ;;  %14960 = vst [vmem:[#allocation31_spill] sm:$0xff] %v11322_v42  ;;  %v5190_v9 = vrot.slane %v5189_v11, 1  ;;  %v4051_v21 = vmul.f32 1.442695, %v3772_v49  ;;  %v3901_v0 = vsub.f32 %v11242_v15, %v3289_v14  ;;  %v2709_v50 = vmax.f32 %v2707_v2, %v2708_v7 }
 0x181   : > { %v11327_v8 = vpop.eup %9174  ;;  %v3292_v34 = vmax.f32 %v3290_v26, %v3291_v43  ;;  %v11332_v39 = vadd.f32 %v6958_v28, %v6957_v20  ;;  %v6070_v17 = vmul.f32 %v9849_v37, %v5814_v19  ;;  %9184 = vrcp.f32 %v4606_v13  ;;  %v9850_v13 = vld [vmem:[%s10237_s27 + $0x490] sm:$0xff] }
 0x182   : > { %v11330_v61 = vpop.eup %9176  ;;  %v5191_v40 = vadd.f32 %v5190_v9, %v5189_v11  ;;  %v4607_v41 = vsel %vm483_vm0, %v11327_v8, 0.0  ;;  %9186 = vpow2.f32 %v4049_v57  ;;  %v3902_v48 = vsub.f32 %v11224_v24, %v3289_v14  ;;  %v11343_v11 = vpop.f32.mrf.mxu1  ;;  %v9851_v57 = vld [vmem:[%s10237_s27 + $0x498] sm:$0xff] }
 0x183   : > { %14961 = vst [vmem:[#allocation32_spill] sm:$0xff] %v11332_v39  ;;  %v4608_v62 = vsel %vm483_vm0, %v11330_v61, 0.0  ;;  %v6381_v15 = vsel %vm483_vm0, %v6069_v1, 0.0  ;;  %v4309_v43 = vmul.f32 1.442695, %v3901_v0  ;;  %v2710_v10 = vrot.slane %v2709_v50, 2 }
 0x184   : > { %9188 = vrcp.f32 %v5191_v40  ;;  %v4609_v2 = vadd.f32 %v4608_v62, %v4607_v41  ;;  %v9179_v7 = vpop.eup %9178  ;;  %v4311_v26 = vmul.f32 1.442695, %v3902_v48  ;;  %v3293_v19 = vrot.slane %v3292_v34, 4  ;;  %v11358_v62 = vpop.f32.mrf.mxu0 }
 0x185   : > { %9190 = vpow2.f32 %v4051_v21  ;;  %v11345_v4 = vpop.eup %9180  ;;  %v5943_v24 = vmul.f32 %v9179_v7, %v11232_v22  ;;  %v5944_v14 = vmul.f32 %v9179_v7, %v11238_v3  ;;  %v2711_v63 = vmax.f32 %v2709_v50, %v2710_v10  ;;  %v11360_v48 = vpop.f32.mrf.mxu1 }
 0x186   : > { %v4610_v49 = vrot.slane %v4609_v2, 4  ;;  %9192 = vpow2.f32 %v4309_v43  ;;  %v11349_v20 = vpop.eup %9182  ;;  %v5192_v28 = vsel %vm483_vm0, %v11345_v4, 0.0  ;;  %v3294_v1 = vmax.f32 %v3292_v34, %v3293_v19 }
 0x187   : > { %9194 = vpow2.f32 %v4311_v26  ;;  %v6199_v9 = vmul.f32 %v9850_v13, %v5943_v24  ;;  %v6200_v21 = vmul.f32 %v9851_v57, %v5944_v14  ;;  %v5193_v22 = vsel %vm483_vm0, %v11349_v20, 0.0 }
 0x188   : > { %v4611_v0 = vadd.f32 %v4610_v49, %v4609_v2  ;;  %v6382_v3 = vsel %vm483_vm0, %v6070_v17, 0.0  ;;  %v5194_v37 = vadd.f32 %v5193_v22, %v5192_v28  ;;  %v2712_v40 = vrot.slane %v2711_v63, 1 }
 0x189   : > { %v3295_v41 = vrot.slane %v3294_v1, 2  ;;  %v6966_v34 = vsel %vm483_vm0, %v6199_v9, 0.0  ;;  %v2715_v2 = vsel %vm483_vm0, %v11341_v27, -inf  ;;  %v6967_v7 = vsel %vm483_vm0, %v6200_v21, 0.0 }
 0x18a   : > { %v4612_v43 = vrot.slane %v4611_v0, 2  ;;  %v5195_v26 = vrot.slane %v5194_v37, 4  ;;  %v2713_v10 = vmax.f32 %v2711_v63, %v2712_v40  ;;  %v11367_v19 = vadd.f32 %v6382_v3, %v6381_v15 }
 0x18b   : > { %v3296_v17 = vmax.f32 %v3294_v1, %v3295_v41  ;;  %v2714_v14 = vsel %vm483_vm0, %v11358_v62, -inf  ;;  %v3299_v49 = vsel %vm483_vm0, %v11360_v48, -inf  ;;  %v3300_v57 = vsel %vm483_vm0, %v11343_v11, -inf }
 0x18c   : > { %14962 = vst [vmem:[#allocation33_spill] sm:$0xff] %v11367_v19  ;;  %v4613_v24 = vadd.f32 %v4612_v43, %v4611_v0  ;;  %v5196_v28 = vadd.f32 %v5195_v26, %v5194_v37  ;;  %v3773_v13 = vsub.f32 %v11258_v6, %v2713_v10  ;;  %v3774_v9 = vsub.f32 %v11248_v45, %v2713_v10 }
 0x18d   : > { %v11377_v21 = vadd.f32 %v6967_v7, %v6966_v34  ;;  %v3297_v15 = vrot.slane %v3296_v17, 1  ;;  %v2716_v1 = vmax.f32 %v2714_v14, %v2715_v2  ;;  %v3301_v41 = vmax.f32 %v3299_v49, %v3300_v57 }
 0x18e   : > { %v4614_v63 = vrot.slane %v4613_v24, 1  ;;  %v9185_v0 = vpop.eup %9184  ;;  %v5197_v22 = vrot.slane %v5196_v28, 2  ;;  %v4053_v3 = vmul.f32 1.442695, %v3773_v13  ;;  %v4055_v40 = vmul.f32 1.442695, %v3774_v9 }
 0x18f   : > { %14963 = vst [vmem:[#allocation34_spill] sm:$0xff] %v11377_v21  ;;  %v11379_v37 = vpop.eup %9186  ;;  %v5815_v6 = vmul.f32 %v9185_v0, %v11266_v59  ;;  %v5816_v45 = vmul.f32 %v9185_v0, %v11272_v55  ;;  %v3298_v26 = vmax.f32 %v3296_v17, %v3297_v15  ;;  %v2717_v10 = vrot.slane %v2716_v1, 4  ;;  %v9852_v13 = vld [vmem:[%s10237_s27 + $0x90] sm:$0xff]  ;;  %v9853_v9 = vld [vmem:[%s10237_s27 + $0x98] sm:$0xff] }
 0x190   : > { %v4615_v43 = vadd.f32 %v4614_v63, %v4613_v24  ;;  %v5198_v7 = vadd.f32 %v5197_v22, %v5196_v28  ;;  %v4616_v2 = vsel %vm483_vm0, %v11379_v37, 0.0  ;;  %9196 = vpow2.f32 %v4053_v3  ;;  %v9854_v3 = vld [vmem:[%s10237_s27 + $0x4a0] sm:$0xff] }
 0x191   : > { %v9189_v34 = vpop.eup %9188  ;;  %v6071_v49 = vmul.f32 %v9852_v13, %v5815_v6  ;;  %v6072_v57 = vmul.f32 %v9853_v9, %v5816_v45  ;;  %v3903_v63 = vsub.f32 %v11300_v56, %v3298_v26  ;;  %v3302_v42 = vrot.slane %v3301_v41, 4 }
 0x192   : > { %v11385_v14 = vpop.eup %9190  ;;  %v5945_v59 = vmul.f32 %v9189_v34, %v11276_v25  ;;  %v5946_v55 = vmul.f32 %v9189_v34, %v11280_v44  ;;  %9198 = vrcp.f32 %v4615_v43  ;;  %v5199_v24 = vrot.slane %v5198_v7, 1  ;;  %v9855_v25 = vld [vmem:[%s10237_s27 + $0x4a8] sm:$0xff]  ;;  %v11402_v44 = vpop.f32.mrf.mxu0 }
 0x193   : > { %v11391_v17 = vpop.eup %9192  ;;  %v4617_v28 = vsel %vm483_vm0, %v11385_v14, 0.0  ;;  %v6390_v0 = vsel %vm483_vm0, %v6071_v49, 0.0  ;;  %v6391_v22 = vsel %vm483_vm0, %v6072_v57, 0.0  ;;  %v11404_v34 = vpop.f32.mrf.mxu1  ;;  %9200 = vpow2.f32 %v4055_v40 }
 0x194   : > { %v11396_v15 = vpop.eup %9194  ;;  %v6201_v6 = vmul.f32 %v9854_v3, %v5945_v59  ;;  %v6202_v45 = vmul.f32 %v9855_v25, %v5946_v55  ;;  %v6392_v43 = vadd.f32 %v6391_v22, %v6390_v0  ;;  %v5200_v13 = vadd.f32 %v5199_v24, %v5198_v7  ;;  %v11416_v22 = vpop.f32.mrf.mxu0 }
 0x195   : > { %v4618_v9 = vadd.f32 %v4617_v28, %v4616_v2  ;;  %v5201_v56 = vsel %vm483_vm0, %v11391_v17, 0.0  ;;  %v5202_v49 = vsel %vm483_vm0, %v11396_v15, 0.0  ;;  %v2724_v57 = vsel %vm483_vm0, %v11402_v44, -inf  ;;  %v11418_v3 = vpop.f32.mrf.mxu1 }
 0x196   : > { %v6975_v55 = vsel %vm483_vm0, %v6201_v6, 0.0  ;;  %9202 = vrcp.f32 %v5200_v13  ;;  %v5203_v7 = vadd.f32 %v5202_v49, %v5201_v56  ;;  %v3904_v2 = vsub.f32 %v11290_v35, %v3298_v26  ;;  %v11433_v33 = vpop.f32.mrf.mxu0 }
 0x197   : > { %v4619_v0 = vrot.slane %v4618_v9, 4  ;;  %v4313_v24 = vmul.f32 1.442695, %v3903_v63  ;;  %v2718_v28 = vmax.f32 %v2716_v1, %v2717_v10  ;;  %v6393_v25 = vrot.slane %v6392_v43, 4 }
 0x198   : > { %v6976_v40 = vsel %vm483_vm0, %v6202_v45, 0.0  ;;  %v5204_v36 = vrot.slane %v5203_v7, 4  ;;  %v4315_v59 = vmul.f32 1.442695, %v3904_v2  ;;  %v3303_v46 = vmax.f32 %v3301_v41, %v3302_v42 }
 0x199   : > { %v4620_v50 = vadd.f32 %v4619_v0, %v4618_v9  ;;  %9204 = vpow2.f32 %v4313_v24  ;;  %v2719_v6 = vrot.slane %v2718_v28, 2  ;;  %v2723_v35 = vsel %vm483_vm0, %v11416_v22, -inf }
 0x19a   : > { %v3308_v1 = vsel %vm483_vm0, %v11418_v3, -inf  ;;  %v5205_v26 = vadd.f32 %v5204_v36, %v5203_v7  ;;  %9206 = vpow2.f32 %v4315_v59  ;;  %v2725_v63 = vmax.f32 %v2723_v35, %v2724_v57 }
 0x19b   : > { %v4621_v13 = vrot.slane %v4620_v50, 2  ;;  %v2720_v10 = vmax.f32 %v2718_v28, %v2719_v6  ;;  %v11425_v56 = vadd.f32 %v6976_v40, %v6975_v55  ;;  %v3304_v9 = vrot.slane %v3303_v46, 2 }
 0x19c   : > { %v3309_v49 = vsel %vm483_vm0, %v11404_v34, -inf  ;;  %v5206_v42 = vrot.slane %v5205_v26, 2  ;;  %v2726_v2 = vrot.slane %v2725_v63, 4  ;;  %v11435_v36 = vadd.f32 %v6393_v25, %v6392_v43 }
 0x19d   : > { %14964 = vst [vmem:[#allocation35_spill] sm:$0xff] %v11425_v56  ;;  %v4622_v45 = vadd.f32 %v4621_v13, %v4620_v50  ;;  %v11429_v0 = vpop.eup %9196  ;;  %v2721_v41 = vrot.slane %v2720_v10, 1  ;;  %v11431_v24 = vmax.f32 %v3308_v1, %v3309_v49  ;;  %v3305_v57 = vmax.f32 %v3303_v46, %v3304_v9 }
 0x19e   : > { %14965 = vst [vmem:[#allocation36_spill] sm:$0xff] %v11435_v36  ;;  %v2733_v50 = vsel %vm483_vm0, %v11433_v33, -inf  ;;  %v5207_v7 = vadd.f32 %v5206_v42, %v5205_v26  ;;  %v4625_v28 = vsel %vm483_vm0, %v11429_v0, 0.0  ;;  %v2727_v6 = vmax.f32 %v2725_v63, %v2726_v2  ;;  %v9856_v26 = vld [vmem:[%s10237_s27 + $0xa0] sm:$0xff]  ;;  %v11452_v2 = vpop.f32.mrf.mxu0 }
 0x19f   : > { %v4623_v59 = vrot.slane %v4622_v45, 1  ;;  %v9199_v55 = vpop.eup %9198  ;;  %v2722_v40 = vmax.f32 %v2720_v10, %v2721_v41  ;;  %v3306_v25 = vrot.slane %v3305_v57, 1  ;;  %v3311_v49 = vrot.slane %v11431_v24, 4 }
 0x1a0   : > { %v5817_v13 = vmul.f32 %v9199_v55, %v11327_v8  ;;  %v5818_v35 = vmul.f32 %v9199_v55, %v11330_v61  ;;  %v5208_v1 = vrot.slane %v5207_v7, 1  ;;  %v11446_v30 = vpop.eup %9200 }
 0x1a1   : > { %v4624_v43 = vadd.f32 %v4623_v59, %v4622_v45  ;;  %v3775_v46 = vsub.f32 %v11358_v62, %v2722_v40  ;;  %v3776_v9 = vsub.f32 %v11341_v27, %v2722_v40  ;;  %v3307_v63 = vmax.f32 %v3305_v57, %v3306_v25 }
 0x1a2   : > { %v6073_v42 = vmul.f32 %v9856_v26, %v5817_v13  ;;  %v6074_v10 = vmul.f32 %v9857_v60, %v5818_v35  ;;  %v5209_v61 = vadd.f32 %v5208_v1, %v5207_v7  ;;  %v4626_v45 = vsel %vm483_vm0, %v11446_v30, 0.0  ;;  %v11459_v13 = vpop.f32.mrf.mxu1 }
 0x1a3   : > { %9208 = vrcp.f32 %v4624_v43  ;;  %v9203_v8 = vpop.eup %9202  ;;  %v4057_v41 = vmul.f32 1.442695, %v3775_v46  ;;  %v4059_v62 = vmul.f32 1.442695, %v3776_v9  ;;  %v2728_v60 = vrot.slane %v2727_v6, 2  ;;  %v9858_v43 = vld [vmem:[%s10237_s27 + $0x4b0] sm:$0xff] }
 0x1a4   : > { %v6399_v27 = vsel %vm483_vm0, %v6073_v42, 0.0  ;;  %v5947_v59 = vmul.f32 %v9203_v8, %v11345_v4  ;;  %v5948_v55 = vmul.f32 %v9203_v8, %v11349_v20  ;;  %v6400_v57 = vsel %vm483_vm0, %v6074_v10, 0.0  ;;  %v9859_v20 = vld [vmem:[%s10237_s27 + $0x4b8] sm:$0xff] }
 0x1a5   : > { %9210 = vrcp.f32 %v5209_v61  ;;  %v4627_v40 = vadd.f32 %v4626_v45, %v4625_v28  ;;  %v3905_v7 = vsub.f32 %v11360_v48, %v3307_v63  ;;  %v3906_v1 = vsub.f32 %v11343_v11, %v3307_v63 }
 0x1a6   : > { %v11461_v35 = vpop.eup %9204  ;;  %v6203_v25 = vmul.f32 %v9858_v43, %v5947_v59  ;;  %9212 = vpow2.f32 %v4057_v41  ;;  %v2732_v4 = vsel %vm483_vm0, %v11452_v2, -inf  ;;  %v6204_v46 = vmul.f32 %v9859_v20, %v5948_v55  ;;  %v11478_v41 = vpop.f32.mrf.mxu1 }
 0x1a7   : > { %v4628_v9 = vrot.slane %v4627_v40, 4  ;;  %v5210_v28 = vsel %vm483_vm0, %v11461_v35, 0.0  ;;  %9214 = vpow2.f32 %v4059_v62  ;;  %v11470_v48 = vpop.eup %9206  ;;  %v11473_v42 = vadd.f32 %v6400_v57, %v6399_v27 }
 0x1a8   : > { %v4317_v10 = vmul.f32 1.442695, %v3905_v7  ;;  %v4319_v8 = vmul.f32 1.442695, %v3906_v1  ;;  %v6984_v11 = vsel %vm483_vm0, %v6203_v25, 0.0  ;;  %v5211_v61 = vsel %vm483_vm0, %v11470_v48, 0.0 }
 0x1a9   : > { %14966 = vst [vmem:[#allocation37_spill] sm:$0xff] %v11473_v42  ;;  %v4629_v63 = vadd.f32 %v4628_v9, %v4627_v40  ;;  %v2729_v45 = vmax.f32 %v2727_v6, %v2728_v60  ;;  %v5212_v59 = vadd.f32 %v5211_v61, %v5210_v28  ;;  %v3312_v62 = vmax.f32 %v11431_v24, %v3311_v49  ;;  %v11487_v24 = vpop.f32.mrf.mxu0  ;;  %v11491_v28 = vpop.f32.mrf.mxu1 }
 0x1aa   : > { %9216 = vpow2.f32 %v4317_v10  ;;  %v2734_v55 = vmax.f32 %v2732_v4, %v2733_v50  ;;  %v6985_v43 = vsel %vm483_vm0, %v6204_v46, 0.0  ;;  %v3317_v40 = vsel %vm483_vm0, %v11478_v41, -inf }
 0x1ab   : > { %v4630_v27 = vrot.slane %v4629_v63, 2  ;;  %9218 = vpow2.f32 %v4319_v8  ;;  %v2730_v57 = vrot.slane %v2729_v45, 1  ;;  %v5213_v7 = vrot.slane %v5212_v59, 4 }
 0x1ac   : > { %v3313_v1 = vrot.slane %v3312_v62, 2  ;;  %v2735_v25 = vrot.slane %v2734_v55, 4  ;;  %v3318_v9 = vsel %vm483_vm0, %v11459_v13, -inf  ;;  %v11489_v50 = vadd.f32 %v6985_v43, %v6984_v11 }
 0x1ad   : > { %v4631_v60 = vadd.f32 %v4630_v27, %v4629_v63  ;;  %v2731_v20 = vmax.f32 %v2729_v45, %v2730_v57  ;;  %v5214_v49 = vadd.f32 %v5213_v7, %v5212_v59  ;;  %v3319_v45 = vmax.f32 %v3317_v40, %v3318_v9 }
 0x1ae   : > { %14967 = vst [vmem:[#allocation38_spill] sm:$0xff] %v11489_v50  ;;  %v3314_v4 = vmax.f32 %v3312_v62, %v3313_v1  ;;  %v2736_v46 = vmax.f32 %v2734_v55, %v2735_v25  ;;  %v2742_v55 = vsel %vm483_vm0, %v11487_v24, -inf  ;;  %v3327_v7 = vsel %vm483_vm0, %v11491_v28, -inf  ;;  %v11501_v1 = vpop.f32.mrf.mxu0 }
 0x1af   : > { %v4632_v8 = vrot.slane %v4631_v60, 1  ;;  %v3777_v61 = vsub.f32 %v11416_v22, %v2731_v20  ;;  %v3778_v63 = vsub.f32 %v11402_v44, %v2731_v20  ;;  %v5215_v11 = vrot.slane %v5214_v49, 2  ;;  %v9860_v44 = vld [vmem:[%s10237_s27 + $0xb0] sm:$0xff] }
 0x1b0   : > { %v9209_v10 = vpop.eup %9208  ;;  %v3315_v43 = vrot.slane %v3314_v4, 1  ;;  %v2737_v62 = vrot.slane %v2736_v46, 2  ;;  %v3320_v42 = vrot.slane %v3319_v45, 4 }
 0x1b1   : > { %v5819_v27 = vmul.f32 %v9209_v10, %v11379_v37  ;;  %v5820_v57 = vmul.f32 %v9209_v10, %v11385_v14  ;;  %v4633_v59 = vadd.f32 %v4632_v8, %v4631_v60  ;;  %v5216_v40 = vadd.f32 %v5215_v11, %v5214_v49  ;;  %v9861_v14 = vld [vmem:[%s10237_s27 + $0xb8] sm:$0xff] }
 0x1b2   : > { %v9211_v22 = vpop.eup %9210  ;;  %v4061_v37 = vmul.f32 1.442695, %v3777_v61  ;;  %v3316_v20 = vmax.f32 %v3314_v4, %v3315_v43  ;;  %v4063_v60 = vmul.f32 1.442695, %v3778_v63  ;;  %v2738_v8 = vmax.f32 %v2736_v46, %v2737_v62 }
 0x1b3   : > { %v6075_v25 = vmul.f32 %v9860_v44, %v5819_v27  ;;  %v11504_v9 = vpop.eup %9212  ;;  %v6076_v10 = vmul.f32 %v9861_v14, %v5820_v57  ;;  %9220 = vrcp.f32 %v4633_v59  ;;  %v5217_v26 = vrot.slane %v5216_v40, 1 }
 0x1b4   : > { %v11507_v6 = vpop.eup %9214  ;;  %v4634_v52 = vsel %vm483_vm0, %v11504_v9, 0.0  ;;  %v2741_v27 = vsel %vm483_vm0, %v11501_v1, -inf  ;;  %v5949_v4 = vmul.f32 %v9211_v22, %v11391_v17  ;;  %v5950_v61 = vmul.f32 %v9211_v22, %v11396_v15 }
 0x1b5   : > { %v6408_v49 = vsel %vm483_vm0, %v6075_v25, 0.0  ;;  %v4635_v63 = vsel %vm483_vm0, %v11507_v6, 0.0  ;;  %v5218_v46 = vadd.f32 %v5217_v26, %v5216_v40  ;;  %9222 = vpow2.f32 %v4061_v37  ;;  %v11529_v37 = vpop.f32.mrf.mxu1 }
 0x1b6   : > { %v4636_v57 = vadd.f32 %v4635_v63, %v4634_v52  ;;  %v3907_v11 = vsub.f32 %v11418_v3, %v3316_v20  ;;  %v6409_v59 = vsel %vm483_vm0, %v6076_v10, 0.0  ;;  %9224 = vpow2.f32 %v4063_v60 }
 0x1b7   : > { %v11519_v43 = vpop.eup %9216  ;;  %v3908_v62 = vsub.f32 %v11404_v34, %v3316_v20  ;;  %v2739_v44 = vrot.slane %v2738_v8, 1  ;;  %9226 = vrcp.f32 %v5218_v46  ;;  %v3321_v40 = vmax.f32 %v3319_v45, %v3320_v42  ;;  %v11535_v42 = vpop.f32.mrf.mxu0 }
 0x1b8   : > { %v11523_v25 = vpop.eup %9218  ;;  %v4637_v17 = vrot.slane %v4636_v57, 4  ;;  %v5219_v15 = vsel %vm483_vm0, %v11519_v43, 0.0  ;;  %v4321_v26 = vmul.f32 1.442695, %v3907_v11  ;;  %v2743_v34 = vmax.f32 %v2741_v27, %v2742_v55 }
 0x1b9   : > { %v5220_v52 = vsel %vm483_vm0, %v11523_v25, 0.0  ;;  %v4323_v3 = vmul.f32 1.442695, %v3908_v62  ;;  %v2740_v22 = vmax.f32 %v2738_v8, %v2739_v44  ;;  %v3322_v63 = vrot.slane %v3321_v40, 2 }
 0x1ba   : > { %v4638_v14 = vadd.f32 %v4637_v17, %v4636_v57  ;;  %v5221_v10 = vadd.f32 %v5220_v52, %v5219_v15  ;;  %9228 = vpow2.f32 %v4321_v26  ;;  %v2744_v36 = vrot.slane %v2743_v34, 4 }
 0x1bb   : > { %9230 = vpow2.f32 %v4323_v3  ;;  %v3779_v20 = vsub.f32 %v11452_v2, %v2740_v22  ;;  %v3780_v60 = vsub.f32 %v11433_v33, %v2740_v22  ;;  %v3326_v8 = vsel %vm483_vm0, %v11529_v37, -inf  ;;  %v9862_v33 = vld [vmem:[%s10237_s27 + $0x4c0] sm:$0xff] }
 0x1bc   : > { %v4639_v46 = vrot.slane %v4638_v14, 2  ;;  %v5222_v11 = vrot.slane %v5221_v10, 4  ;;  %v3323_v62 = vmax.f32 %v3321_v40, %v3322_v63  ;;  %v3328_v44 = vmax.f32 %v3326_v8, %v3327_v7  ;;  %v9863_v40 = vld [vmem:[%s10237_s27 + $0x4c8] sm:$0xff] }
 0x1bd   : > { %v4065_v45 = vmul.f32 1.442695, %v3779_v20  ;;  %v4067_v57 = vmul.f32 1.442695, %v3780_v60  ;;  %v11537_v55 = vadd.f32 %v6409_v59, %v6408_v49  ;;  %v2745_v17 = vmax.f32 %v2743_v34, %v2744_v36  ;;  %v11540_v20 = vpop.f32.mrf.mxu0 }
 0x1be   : > { %v4640_v2 = vadd.f32 %v4639_v46, %v4638_v14  ;;  %v5223_v27 = vadd.f32 %v5222_v11, %v5221_v10  ;;  %v6205_v15 = vmul.f32 %v9862_v33, %v5949_v4  ;;  %v3324_v26 = vrot.slane %v3323_v62, 1  ;;  %v11553_v11 = vpop.f32.mrf.mxu1 }
 0x1bf   : > { %14968 = vst [vmem:[#allocation39_spill] sm:$0xff] %v11537_v55  ;;  %9232 = vpow2.f32 %v4065_v45  ;;  %v3329_v52 = vrot.slane %v3328_v44, 4  ;;  %v2746_v16 = vrot.slane %v2745_v17, 2  ;;  %v11543_v7 = vmul.f32 %v9863_v40, %v5950_v61  ;;  %v9865_v40 = vld [vmem:[%s10237_s27 + $0xc8] sm:$0xff] }
 0x1c0   : > { %v9221_v3 = vpop.eup %9220  ;;  %v4641_v22 = vrot.slane %v4640_v2, 1  ;;  %v5224_v19 = vrot.slane %v5223_v27, 2  ;;  %9234 = vpow2.f32 %v4067_v57  ;;  %v3325_v59 = vmax.f32 %v3323_v62, %v3324_v26 }
 0x1c1   : > { %14969 = vst [vmem:[#allocation40_spill] sm:$0xff] %v11543_v7  ;;  %v5821_v49 = vmul.f32 %v9221_v3, %v11429_v0  ;;  %v2751_v36 = vsel %vm483_vm0, %v11535_v42, -inf  ;;  %v5822_v4 = vmul.f32 %v9221_v3, %v11446_v30  ;;  %v2747_v34 = vmax.f32 %v2745_v17, %v2746_v16 }
 0x1c2   : > { %v4642_v14 = vadd.f32 %v4641_v22, %v4640_v2  ;;  %v5225_v10 = vadd.f32 %v5224_v19, %v5223_v27  ;;  %v11549_v60 = vpop.eup %9222  ;;  %v3909_v63 = vsub.f32 %v11478_v41, %v3325_v59  ;;  %v3910_v46 = vsub.f32 %v11459_v13, %v3325_v59 }
 0x1c3   : > { %v3330_v61 = vmax.f32 %v3328_v44, %v3329_v52  ;;  %v2750_v0 = vsel %vm483_vm0, %v11540_v20, -inf  ;;  %v11557_v8 = vpop.eup %9224  ;;  %v4643_v16 = vsel %vm483_vm0, %v11549_v60, 0.0  ;;  %v2748_v19 = vrot.slane %v2747_v34, 1  ;;  %v9864_v44 = vld [vmem:[%s10237_s27 + $0xc0] sm:$0xff] }
 0x1c4   : > { %9236 = vrcp.f32 %v4642_v14  ;;  %v5226_v30 = vrot.slane %v5225_v10, 1  ;;  %v9227_v45 = vpop.eup %9226  ;;  %v11562_v41 = vsel %vm483_vm0, %v6205_v15, 0.0  ;;  %v4644_v13 = vsel %vm483_vm0, %v11557_v8, 0.0 }
 0x1c5   : > { %14970 = vst [vmem:[#allocation41_spill] sm:$0xff] %v11562_v41  ;;  %v4325_v57 = vmul.f32 1.442695, %v3909_v63  ;;  %v4327_v62 = vmul.f32 1.442695, %v3910_v46  ;;  %v6077_v2 = vmul.f32 %v9864_v44, %v5821_v49  ;;  %v4645_v17 = vadd.f32 %v4644_v13, %v4643_v16 }
 0x1c6   : > { %v5227_v27 = vadd.f32 %v5226_v30, %v5225_v10  ;;  %v3336_v33 = vsel %vm483_vm0, %v11553_v11, -inf  ;;  %v2749_v52 = vmax.f32 %v2747_v34, %v2748_v19  ;;  %v3331_v3 = vrot.slane %v3330_v61, 2  ;;  %v11578_v10 = vpop.f32.mrf.mxu1 }
 0x1c7   : > { %v11569_v26 = vpop.eup %9228  ;;  %9238 = vpow2.f32 %v4325_v57  ;;  %v2752_v22 = vmax.f32 %v2750_v0, %v2751_v36  ;;  %v11574_v59 = vmul.f32 %v9865_v40, %v5822_v4  ;;  %v4646_v14 = vrot.slane %v4645_v17, 4 }
 0x1c8   : > { %v11571_v15 = vpop.eup %9230  ;;  %9240 = vrcp.f32 %v5227_v27  ;;  %v5228_v49 = vsel %vm483_vm0, %v11569_v26, 0.0  ;;  %v3781_v34 = vsub.f32 %v11501_v1, %v2749_v52  ;;  %v3782_v36 = vsub.f32 %v11487_v24, %v2749_v52  ;;  %v11598_v52 = vpop.f32.mrf.mxu1 }
 0x1c9   : > { %14971 = vst [vmem:[#allocation42_spill] sm:$0xff] %v11571_v15  ;;  %14972 = vst [vmem:[#allocation43_spill] sm:$0xff] %v11574_v59  ;;  %v5229_v63 = vsel %vm483_vm0, %v11571_v15, 0.0  ;;  %9242 = vpow2.f32 %v4327_v62  ;;  %v4647_v46 = vadd.f32 %v4646_v14, %v4645_v17  ;;  %v3332_v30 = vmax.f32 %v3330_v61, %v3331_v3  ;;  %v11596_v17 = vpop.f32.mrf.mxu0 }
 0x1ca   : > { %v5230_v0 = vadd.f32 %v5229_v63, %v5228_v49  ;;  %v2753_v4 = vrot.slane %v2752_v22, 4  ;;  %v5951_v16 = vmul.f32 %v9227_v45, %v11461_v35  ;;  %v4069_v19 = vmul.f32 1.442695, %v3781_v34 }
 0x1cb   : > { %v4071_v13 = vmul.f32 1.442695, %v3782_v36  ;;  %v3335_v57 = vsel %vm483_vm0, %v11578_v10, -inf  ;;  %v4648_v27 = vrot.slane %v4647_v46, 2  ;;  %v3333_v62 = vrot.slane %v3332_v30, 1  ;;  %v9866_v36 = vld [vmem:[%s10237_s27 + $0x4d0] sm:$0xff] }
 0x1cc   : > { %v11587_v44 = vpop.eup %9232  ;;  %v5231_v40 = vrot.slane %v5230_v0, 4  ;;  %v2754_v59 = vmax.f32 %v2752_v22, %v2753_v4  ;;  %v11592_v24 = vsel %vm483_vm0, %v6077_v2, 0.0  ;;  %9244 = vpow2.f32 %v4069_v19 }
 0x1cd   : > { %v11589_v1 = vpop.eup %9234  ;;  %14974 = vst [vmem:[#allocation45_spill] sm:$0xff] %v11592_v24  ;;  %v4652_v35 = vsel %vm483_vm0, %v11587_v44, 0.0  ;;  %v3337_v61 = vmax.f32 %v3335_v57, %v3336_v33  ;;  %v4649_v3 = vadd.f32 %v4648_v27, %v4647_v46  ;;  %9246 = vpow2.f32 %v4071_v13  ;;  %v11610_v13 = vpop.f32.mrf.mxu0 }
 0x1ce   : > { %14973 = vst [vmem:[#allocation44_spill] sm:$0xff] %v11589_v1  ;;  %v5232_v14 = vadd.f32 %v5231_v40, %v5230_v0  ;;  %v4653_v22 = vsel %vm483_vm0, %v11589_v1, 0.0  ;;  %v11603_v49 = vmul.f32 %v9227_v45, %v11470_v48  ;;  %v3334_v63 = vmax.f32 %v3332_v30, %v3333_v62  ;;  %v11612_v48 = vpop.f32.mrf.mxu1 }
 0x1cf   : > { %v4654_v2 = vadd.f32 %v4653_v22, %v4652_v35  ;;  %v2755_v34 = vrot.slane %v2754_v59, 2  ;;  %v11606_v4 = vmul.f32 %v9866_v36, %v5951_v16  ;;  %v4650_v33 = vrot.slane %v4649_v3, 1 }
 0x1d0   : > { %14975 = vst [vmem:[#allocation46_spill] sm:$0xff] %v11603_v49  ;;  %v5233_v19 = vrot.slane %v5232_v14, 2  ;;  %v3338_v57 = vrot.slane %v3337_v61, 4  ;;  %v3911_v46 = vsub.f32 %v11529_v37, %v3334_v63  ;;  %v3912_v0 = vsub.f32 %v11491_v28, %v3334_v63 }
 0x1d1   : > { %14976 = vst [vmem:[#allocation47_spill] sm:$0xff] %v11606_v4  ;;  %v9237_v24 = vpop.eup %9236  ;;  %v4655_v55 = vrot.slane %v4654_v2, 4  ;;  %v2756_v27 = vmax.f32 %v2754_v59, %v2755_v34  ;;  %v2760_v16 = vsel %vm483_vm0, %v11596_v17, -inf  ;;  %v3345_v40 = vsel %vm483_vm0, %v11598_v52, -inf }
 0x1d2   : > { %v5823_v45 = vmul.f32 %v9237_v24, %v11504_v9  ;;  %v5234_v30 = vadd.f32 %v5233_v19, %v5232_v14  ;;  %v4329_v35 = vmul.f32 1.442695, %v3911_v46  ;;  %v4331_v37 = vmul.f32 1.442695, %v3912_v0 }
 0x1d3   : > { %v4656_v62 = vadd.f32 %v4655_v55, %v4654_v2  ;;  %v2757_v22 = vrot.slane %v2756_v27, 1  ;;  %v4651_v59 = vadd.f32 %v4650_v33, %v4649_v3  ;;  %v3339_v63 = vmax.f32 %v3337_v61, %v3338_v57  ;;  %v9867_v3 = vld [vmem:[%s10237_s27 + $0xd0] sm:$0xff] }
 0x1d4   : > { %v11619_v28 = vpop.eup %9238  ;;  %v2759_v34 = vsel %vm483_vm0, %v11610_v13, -inf  ;;  %v3344_v9 = vsel %vm483_vm0, %v11612_v48, -inf  ;;  %9248 = vpow2.f32 %v4329_v35  ;;  %v11630_v46 = vmul.f32 %v9237_v24, %v11507_v6  ;;  %v11639_v35 = vpop.f32.mrf.mxu0 }
 0x1d5   : > { %v9241_v14 = vpop.eup %9240  ;;  %v4657_v36 = vrot.slane %v4656_v62, 2  ;;  %v5237_v19 = vsel %vm483_vm0, %v11619_v28, 0.0  ;;  %v2758_v55 = vmax.f32 %v2756_v27, %v2757_v22  ;;  %v11633_v61 = vmul.f32 %v9867_v3, %v5823_v45 }
 0x1d6   : > { %v11627_v2 = vpop.eup %9242  ;;  %14977 = vst [vmem:[#allocation48_spill] sm:$0xff] %v11630_v46  ;;  %v5235_v33 = vrot.slane %v5234_v30, 1  ;;  %9250 = vpow2.f32 %v4331_v37  ;;  %v5953_v27 = vmul.f32 %v9241_v14, %v11519_v43  ;;  %v3340_v24 = vrot.slane %v3339_v63, 2 }
 0x1d7   : > { %14978 = vst [vmem:[#allocation49_spill] sm:$0xff] %v11633_v61  ;;  %v4658_v57 = vadd.f32 %v4657_v36, %v4656_v62  ;;  %v5238_v0 = vsel %vm483_vm0, %v11627_v2, 0.0  ;;  %v3783_v1 = vsub.f32 %v11540_v20, %v2758_v55  ;;  %v3784_v29 = vsub.f32 %v11535_v42, %v2758_v55 }
 0x1d8   : > { %9252 = vrcp.f32 %v4651_v59  ;;  %v5239_v6 = vadd.f32 %v5238_v0, %v5237_v19  ;;  %v2761_v61 = vmax.f32 %v2759_v34, %v2760_v16  ;;  %v5236_v62 = vadd.f32 %v5235_v33, %v5234_v30  ;;  %v11650_v19 = vpop.f32.mrf.mxu0 }
 0x1d9   : > { %v4659_v22 = vrot.slane %v4658_v57, 1  ;;  %v4073_v45 = vmul.f32 1.442695, %v3783_v1  ;;  %v4075_v3 = vmul.f32 1.442695, %v3784_v29  ;;  %v11642_v37 = vpop.eup %9244  ;;  %v3341_v46 = vmax.f32 %v3339_v63, %v3340_v24 }
 0x1da   : > { %v5240_v36 = vrot.slane %v5239_v6, 4  ;;  %v3346_v5 = vmax.f32 %v3344_v9, %v3345_v40  ;;  %v11644_v20 = vpop.eup %9246  ;;  %v4661_v42 = vsel %vm483_vm0, %v11642_v37, 0.0  ;;  %v2762_v43 = vrot.slane %v2761_v61, 4  ;;  %v11654_v9 = vpop.f32.mrf.mxu1 }
 0x1db   : > { %9254 = vpow2.f32 %v4073_v45  ;;  %v2769_v59 = vsel %vm483_vm0, %v11639_v35, -inf  ;;  %v4662_v1 = vsel %vm483_vm0, %v11644_v20, 0.0  ;;  %v3342_v30 = vrot.slane %v3341_v46, 1 }
 0x1dc   : > { %v5241_v29 = vadd.f32 %v5240_v36, %v5239_v6  ;;  %9256 = vpow2.f32 %v4075_v3  ;;  %v4660_v16 = vadd.f32 %v4659_v22, %v4658_v57  ;;  %v4663_v40 = vadd.f32 %v4662_v1, %v4661_v42  ;;  %v9868_v42 = vld [vmem:[%s10237_s27 + $0x4e0] sm:$0xff] }
 0x1dd   : > { %v2763_v63 = vmax.f32 %v2761_v61, %v2762_v43  ;;  %v3347_v34 = vrot.slane %v3346_v5, 4  ;;  %v11657_v55 = vmul.f32 %v9241_v14, %v11523_v25  ;;  %v3343_v0 = vmax.f32 %v3341_v46, %v3342_v30  ;;  %v11666_v46 = vpop.f32.mrf.mxu1 }
 0x1de   : > { %v5242_v33 = vrot.slane %v5241_v29, 2  ;;  %v2768_v6 = vsel %vm483_vm0, %v11650_v19, -inf  ;;  %v4664_v24 = vrot.slane %v4663_v40, 4  ;;  %9258 = vrcp.f32 %v5236_v62 }
 0x1df   : > { %14979 = vst [vmem:[#allocation50_spill] sm:$0xff] %v11657_v55  ;;  %v2764_v45 = vrot.slane %v2763_v63, 2  ;;  %v3348_v36 = vmax.f32 %v3346_v5, %v3347_v34  ;;  %v2770_v3 = vmax.f32 %v2768_v6, %v2769_v59  ;;  %v3913_v22 = vsub.f32 %v11578_v10, %v3343_v0 }
 0x1e0   : > { %v5243_v57 = vadd.f32 %v5242_v33, %v5241_v29  ;;  %v3914_v61 = vsub.f32 %v11553_v11, %v3343_v0  ;;  %v11664_v43 = vmul.f32 %v9868_v42, %v5953_v27  ;;  %9260 = vrcp.f32 %v4660_v16 }
 0x1e1   : > { %v4665_v25 = vadd.f32 %v4664_v24, %v4663_v40  ;;  %v2765_v14 = vmax.f32 %v2763_v63, %v2764_v45  ;;  %v11668_v1 = vpop.eup %9248  ;;  %v4333_v58 = vmul.f32 1.442695, %v3913_v22  ;;  %v3349_v5 = vrot.slane %v3348_v36, 2 }
 0x1e2   : > { %14980 = vst [vmem:[#allocation51_spill] sm:$0xff] %v11664_v43  ;;  %v5244_v30 = vrot.slane %v5243_v57, 1  ;;  %v2771_v59 = vrot.slane %v2770_v3, 4  ;;  %v5246_v11 = vsel %vm483_vm0, %v11668_v1, 0.0  ;;  %v4335_v10 = vmul.f32 1.442695, %v3914_v61 }
 0x1e3   : > { %v11670_v62 = vpop.eup %9250  ;;  %v4666_v29 = vrot.slane %v4665_v25, 2  ;;  %v2766_v27 = vrot.slane %v2765_v14, 1  ;;  %9262 = vpow2.f32 %v4333_v58  ;;  %v3353_v40 = vsel %vm483_vm0, %v11666_v46, -inf }
 0x1e4   : > { %v5245_v34 = vadd.f32 %v5244_v30, %v5243_v57  ;;  %v5247_v16 = vsel %vm483_vm0, %v11670_v62, 0.0  ;;  %9264 = vpow2.f32 %v4335_v10  ;;  %v3350_v24 = vmax.f32 %v3348_v36, %v3349_v5 }
 0x1e5   : > { %v9253_v63 = vpop.eup %9252  ;;  %v4667_v33 = vadd.f32 %v4666_v29, %v4665_v25  ;;  %v5248_v0 = vadd.f32 %v5247_v16, %v5246_v11  ;;  %v2767_v6 = vmax.f32 %v2765_v14, %v2766_v27  ;;  %v3354_v45 = vsel %vm483_vm0, %v11654_v9, -inf  ;;  %v11687_v11 = vpop.f32.mrf.mxu0 }
 0x1e6   : > { %9266 = vrcp.f32 %v5245_v34  ;;  %v2772_v22 = vmax.f32 %v2770_v3, %v2771_v59  ;;  %v11685_v31 = vmul.f32 %v9253_v63, %v11549_v60  ;;  %v3351_v25 = vrot.slane %v3350_v24, 1 }
 0x1e7   : > { %v4668_v61 = vrot.slane %v4667_v33, 1  ;;  %v5249_v57 = vrot.slane %v5248_v0, 4  ;;  %v3785_v42 = vsub.f32 %v11610_v13, %v2767_v6  ;;  %v3786_v58 = vsub.f32 %v11596_v17, %v2767_v6 }
 0x1e8   : > { %v11682_v30 = vpop.eup %9254  ;;  %v2773_v29 = vrot.slane %v2772_v22, 2  ;;  %v3355_v14 = vmax.f32 %v3353_v40, %v3354_v45  ;;  %v3352_v27 = vmax.f32 %v3350_v24, %v3351_v25  ;;  %v2778_v40 = vsel %vm483_vm0, %v11687_v11, -inf  ;;  %v11699_v45 = vpop.f32.mrf.mxu0 }
 0x1e9   : > { %v11689_v36 = vpop.eup %9256  ;;  %v4669_v5 = vadd.f32 %v4668_v61, %v4667_v33  ;;  %v5250_v3 = vadd.f32 %v5249_v57, %v5248_v0  ;;  %v4670_v59 = vsel %vm483_vm0, %v11682_v30, 0.0  ;;  %v4077_v13 = vmul.f32 1.442695, %v3785_v42 }
 0x1ea   : > { %v4671_v17 = vsel %vm483_vm0, %v11689_v36, 0.0  ;;  %v4079_v10 = vmul.f32 1.442695, %v3786_v58  ;;  %v2774_v60 = vmax.f32 %v2772_v22, %v2773_v29  ;;  %v3915_v33 = vsub.f32 %v11612_v48, %v3352_v27 }
 0x1eb   : > { %9268 = vrcp.f32 %v4669_v5  ;;  %v5251_v34 = vrot.slane %v5250_v3, 2  ;;  %v4672_v16 = vadd.f32 %v4671_v17, %v4670_v59  ;;  %v3916_v0 = vsub.f32 %v11598_v52, %v3352_v27  ;;  %v11701_v61 = vpop.eup %9258 }
 0x1ec   : > { %9270 = vpow2.f32 %v4077_v13  ;;  %v2775_v6 = vrot.slane %v2774_v60, 1  ;;  %14981 = vst [vmem:[#allocation52_spill] sm:$0xff] %v11701_v61  ;;  %v3356_v24 = vrot.slane %v3355_v14, 4  ;;  %v11706_v58 = vmul.f32 %v9253_v63, %v11557_v8 }
 0x1ed   : > { %v5252_v57 = vadd.f32 %v5251_v34, %v5250_v3  ;;  %v4673_v42 = vrot.slane %v4672_v16, 4  ;;  %9272 = vpow2.f32 %v4079_v10  ;;  %v11703_v22 = vpop.eup %9260  ;;  %v4337_v25 = vmul.f32 1.442695, %v3915_v33  ;;  %v11714_v33 = vpop.f32.mrf.mxu1 }
 0x1ee   : > { %14982 = vst [vmem:[#allocation53_spill] sm:$0xff] %v11703_v22  ;;  %14983 = vst [vmem:[#allocation54_spill] sm:$0xff] %v11706_v58  ;;  %v4339_v29 = vmul.f32 1.442695, %v3916_v0  ;;  %v2776_v5 = vmax.f32 %v2774_v60, %v2775_v6  ;;  %v3357_v52 = vmax.f32 %v3355_v14, %v3356_v24  ;;  %v2777_v13 = vsel %vm483_vm0, %v11699_v45, -inf }
 0x1ef   : > { %v5253_v48 = vrot.slane %v5252_v57, 1  ;;  %v4674_v59 = vadd.f32 %v4673_v42, %v4672_v16  ;;  %9274 = vpow2.f32 %v4337_v25  ;;  %v2779_v10 = vmax.f32 %v2777_v13, %v2778_v40  ;;  %v11724_v13 = vpop.f32.mrf.mxu1 }
 0x1f0   : > { %v3787_v3 = vsub.f32 %v11650_v19, %v2776_v5  ;;  %v3788_v17 = vsub.f32 %v11639_v35, %v2776_v5  ;;  %v11712_v27 = vpop.eup %9262  ;;  %9276 = vpow2.f32 %v4339_v29  ;;  %v3358_v63 = vrot.slane %v3357_v52, 2 }
 0x1f1   : > { %v5254_v34 = vadd.f32 %v5253_v48, %v5252_v57  ;;  %v4675_v8 = vrot.slane %v4674_v59, 2  ;;  %v11716_v60 = vpop.eup %9264  ;;  %v5255_v14 = vsel %vm483_vm0, %v11712_v27, 0.0  ;;  %v2780_v19 = vrot.slane %v2779_v10, 4  ;;  %v11789_v38 = vpop.f32.mrf.mxu1 }
 0x1f2   : > { %v4081_v16 = vmul.f32 1.442695, %v3787_v3  ;;  %v4083_v0 = vmul.f32 1.442695, %v3788_v17  ;;  %v5256_v40 = vsel %vm483_vm0, %v11716_v60, 0.0  ;;  %v3359_v57 = vmax.f32 %v3357_v52, %v3358_v63  ;;  %v9869_v3 = vld [vmem:[%s10237_s27 + $0xe0] sm:$0xff] }
 0x1f3   : > { %v9267_v6 = vpop.eup %9266  ;;  %9278 = vrcp.f32 %v5254_v34  ;;  %v4676_v35 = vadd.f32 %v4675_v8, %v4674_v59  ;;  %v5257_v25 = vadd.f32 %v5256_v40, %v5255_v14  ;;  %v2781_v48 = vmax.f32 %v2779_v10, %v2780_v19  ;;  %v9871_v8 = vld [vmem:[%s10237_s27 + $0x508] sm:$0xff] }
 0x1f4   : > { %v5957_v42 = vmul.f32 %v9267_v6, %v11619_v28  ;;  %v5958_v24 = vmul.f32 %v9267_v6, %v11627_v2  ;;  %9280 = vpow2.f32 %v4081_v16  ;;  %v3360_v5 = vrot.slane %v3359_v57, 1  ;;  %v9870_v28 = vld [vmem:[%s10237_s27 + $0x500] sm:$0xff] }
 0x1f5   : > { %v4677_v29 = vrot.slane %v4676_v35, 1  ;;  %9282 = vpow2.f32 %v4083_v0  ;;  %v11728_v59 = vmul.f32 %v9869_v3, %v11685_v31  ;;  %v11732_v52 = vmul.f32 %v11701_v61, %v11569_v26  ;;  %v9872_v3 = vld [vmem:[%s10237_s27 + $0x100] sm:$0xff] }
 0x1f6   : > { %v6213_v17 = vmul.f32 %v9870_v28, %v5957_v42  ;;  %v5258_v34 = vrot.slane %v5257_v25, 4  ;;  %v11737_v2 = vmul.f32 %v11703_v22, %v11587_v44  ;;  %v6214_v63 = vmul.f32 %v9871_v8, %v5958_v24 }
 0x1f7   : > { %14984 = vst [vmem:[#allocation55_spill] sm:$0xff] %v11728_v59  ;;  %14985 = vst [vmem:[#allocation56_spill] sm:$0xff] %v11732_v52  ;;  %v4678_v10 = vadd.f32 %v4677_v29, %v4676_v35  ;;  %v3361_v14 = vmax.f32 %v3359_v57, %v3360_v5  ;;  %v3363_v31 = vsel %vm483_vm0, %v11714_v33, -inf  ;;  %v2782_v26 = vrot.slane %v2781_v48, 2  ;;  %v9905_v52 = vld [vmem:[%s10237_s27 + $0x1a8] sm:$0xff] }
 0x1f8   : > { %14986 = vst [vmem:[#allocation57_spill] sm:$0xff] %v11737_v2  ;;  %v9269_v16 = vpop.eup %9268  ;;  %v5259_v0 = vadd.f32 %v5258_v34, %v5257_v25  ;;  %v3362_v19 = vsel %vm483_vm0, %v11724_v13, -inf  ;;  %v7029_v44 = vsel %vm483_vm0, %v6213_v17, 0.0  ;;  %v7030_v5 = vsel %vm483_vm0, %v6214_v63, 0.0  ;;  %v9873_v17 = vld [vmem:[%s10237_s27 + $0x108] sm:$0xff] }
 0x1f9   : > { %v11744_v6 = vpop.eup %9270  ;;  %v5829_v40 = vmul.f32 %v9269_v16, %v11642_v37  ;;  %v5830_v35 = vmul.f32 %v9269_v16, %v11644_v20  ;;  %9284 = vrcp.f32 %v4678_v10  ;;  %v3917_v25 = vsub.f32 %v11666_v46, %v3361_v14 }
 0x1fa   : > { %v11749_v57 = vpop.eup %9272  ;;  %v5260_v42 = vrot.slane %v5259_v0, 2  ;;  %v4679_v24 = vsel %vm483_vm0, %v11744_v6, 0.0  ;;  %v3918_v29 = vsub.f32 %v11654_v9, %v3361_v14  ;;  %v3364_v16 = vmax.f32 %v3362_v19, %v3363_v31 }
 0x1fb   : > { %v6085_v28 = vmul.f32 %v9872_v3, %v5829_v40  ;;  %v6086_v34 = vmul.f32 %v9873_v17, %v5830_v35  ;;  %v4680_v37 = vsel %vm483_vm0, %v11749_v57, 0.0  ;;  %v4341_v10 = vmul.f32 1.442695, %v3917_v25 }
 0x1fc   : > { %v5261_v20 = vadd.f32 %v5260_v42, %v5259_v0  ;;  %v4681_v8 = vadd.f32 %v4680_v37, %v4679_v24  ;;  %v11760_v59 = vpop.eup %9274  ;;  %v4343_v9 = vmul.f32 1.442695, %v3918_v29  ;;  %v2783_v14 = vmax.f32 %v2781_v48, %v2782_v26 }
 0x1fd   : > { %v6453_v2 = vsel %vm483_vm0, %v6085_v28, 0.0  ;;  %v6454_v46 = vsel %vm483_vm0, %v6086_v34, 0.0  ;;  %v11764_v63 = vpop.eup %9276  ;;  %v7031_v40 = vadd.f32 %v7030_v5, %v7029_v44  ;;  %v5264_v17 = vsel %vm483_vm0, %v11760_v59, 0.0  ;;  %v11774_v28 = vpop.f32.mrf.mxu0 }
 0x1fe   : > { %v5262_v3 = vrot.slane %v5261_v20, 1  ;;  %v4682_v35 = vrot.slane %v4681_v8, 4  ;;  %v6455_v0 = vadd.f32 %v6454_v46, %v6453_v2  ;;  %v5265_v31 = vsel %vm483_vm0, %v11764_v63, 0.0 }
 0x1ff   : > { %9286 = vpow2.f32 %v4341_v10  ;;  %v2784_v19 = vrot.slane %v2783_v14, 1  ;;  %v5266_v48 = vadd.f32 %v5265_v31, %v5264_v17  ;;  %v3365_v26 = vrot.slane %v3364_v16, 4  ;;  %v11798_v51 = vpop.f32.mrf.mxu0 }
 0x200   : > { %v9279_v42 = vpop.eup %9278  ;;  %v5263_v24 = vadd.f32 %v5262_v3, %v5261_v20  ;;  %v4683_v25 = vadd.f32 %v4682_v35, %v4681_v8  ;;  %9288 = vpow2.f32 %v4343_v9  ;;  %v2787_v20 = vsel %vm483_vm0, %v11774_v28, -inf  ;;  %v9874_v8 = vld [vmem:[%s10237_s27 + $0x510] sm:$0xff]  ;;  %v9875_v3 = vld [vmem:[%s10237_s27 + $0x518] sm:$0xff] }
 0x201   : > { %v11770_v29 = vpop.eup %9280  ;;  %v5959_v44 = vmul.f32 %v9279_v42, %v11668_v1  ;;  %v5960_v5 = vmul.f32 %v9279_v42, %v11670_v62  ;;  %v2785_v2 = vmax.f32 %v2783_v14, %v2784_v19  ;;  %v5267_v10 = vrot.slane %v5266_v48, 4 }
 0x202   : > { %v11776_v34 = vpop.eup %9282  ;;  %9290 = vrcp.f32 %v5263_v24  ;;  %v4684_v37 = vrot.slane %v4683_v25, 2  ;;  %v4688_v1 = vsel %vm483_vm0, %v11770_v29, 0.0  ;;  %v7032_v19 = vrot.slane %v7031_v40, 4 }
 0x203   : > { %v6215_v46 = vmul.f32 %v9874_v8, %v5959_v44  ;;  %v6216_v35 = vmul.f32 %v9875_v3, %v5960_v5  ;;  %v4689_v62 = vsel %vm483_vm0, %v11776_v34, 0.0  ;;  %v5268_v14 = vadd.f32 %v5267_v10, %v5266_v48 }
 0x204   : > { %v4685_v9 = vadd.f32 %v4684_v37, %v4683_v25  ;;  %v4690_v17 = vadd.f32 %v4689_v62, %v4688_v1  ;;  %v3789_v31 = vsub.f32 %v11699_v45, %v2785_v2  ;;  %v6456_v42 = vrot.slane %v6455_v0, 4  ;;  %v9877_v62 = vld [vmem:[%s10237_s27 + $0x118] sm:$0xff] }
 0x205   : > { %v3790_v24 = vsub.f32 %v11687_v11, %v2785_v2  ;;  %v3366_v58 = vmax.f32 %v3364_v16, %v3365_v26  ;;  %v7038_v5 = vsel %vm483_vm0, %v6215_v46, 0.0  ;;  %v5269_v3 = vrot.slane %v5268_v14, 2  ;;  %v9876_v26 = vld [vmem:[%s10237_s27 + $0x110] sm:$0xff] }
 0x206   : > { %v9285_v44 = vpop.eup %9284  ;;  %v4686_v8 = vrot.slane %v4685_v9, 1  ;;  %v4691_v22 = vrot.slane %v4690_v17, 4  ;;  %v4085_v45 = vmul.f32 1.442695, %v3789_v31  ;;  %v7039_v10 = vsel %vm483_vm0, %v6216_v35, 0.0 }
 0x207   : > { %v5831_v25 = vmul.f32 %v9285_v44, %v11682_v30  ;;  %v5832_v48 = vmul.f32 %v9285_v44, %v11689_v36  ;;  %v4087_v37 = vmul.f32 1.442695, %v3790_v24  ;;  %v5270_v2 = vadd.f32 %v5269_v3, %v5268_v14  ;;  %v11800_v36 = vpop.f32.mrf.mxu1 }
 0x208   : > { %v4687_v11 = vadd.f32 %v4686_v8, %v4685_v9  ;;  %v4692_v16 = vadd.f32 %v4691_v22, %v4690_v17  ;;  %9292 = vpow2.f32 %v4085_v45  ;;  %v3367_v18 = vrot.slane %v3366_v58, 2 }
 0x209   : > { %v6087_v1 = vmul.f32 %v9876_v26, %v5831_v25  ;;  %v6088_v46 = vmul.f32 %v9877_v62, %v5832_v48  ;;  %v11796_v12 = vadd.f32 %v7032_v19, %v7031_v40  ;;  %v5271_v47 = vrot.slane %v5270_v2, 1 }
 0x20a   : > { %9294 = vrcp.f32 %v4687_v11  ;;  %v4693_v30 = vrot.slane %v4692_v16, 2  ;;  %v11802_v31 = vadd.f32 %v6456_v42, %v6455_v0  ;;  %v7040_v35 = vadd.f32 %v7039_v10, %v7038_v5 }
 0x20b   : > { %14987 = vst [vmem:[#allocation58_spill] sm:$0xff] %v11796_v12  ;;  %9296 = vpow2.f32 %v4087_v37  ;;  %v3368_v22 = vmax.f32 %v3366_v58, %v3367_v18  ;;  %v6462_v14 = vsel %vm483_vm0, %v6087_v1, 0.0  ;;  %v6463_v17 = vsel %vm483_vm0, %v6088_v46, 0.0  ;;  %v11826_v46 = vpop.f32.mrf.mxu1 }
 0x20c   : > { %14988 = vst [vmem:[#allocation59_spill] sm:$0xff] %v11802_v31  ;;  %v11804_v9 = vpop.eup %9286  ;;  %v5272_v40 = vadd.f32 %v5271_v47, %v5270_v2  ;;  %v4694_v19 = vadd.f32 %v4693_v30, %v4692_v16  ;;  %v3372_v44 = vsel %vm483_vm0, %v11789_v38, -inf  ;;  %v2786_v8 = vsel %vm483_vm0, %v11798_v51, -inf  ;;  %v11822_v16 = vpop.f32.mrf.mxu0  ;;  %v9878_v30 = vld [vmem:[%s10237_s27 + $0x520] sm:$0xff] }
 0x20d   : > { %v3369_v24 = vrot.slane %v3368_v22, 1  ;;  %v3371_v0 = vsel %vm483_vm0, %v11800_v36, -inf  ;;  %v11814_v42 = vpop.eup %9288  ;;  %v5273_v58 = vsel %vm483_vm0, %v11804_v9, 0.0  ;;  %v2788_v5 = vmax.f32 %v2786_v8, %v2787_v20 }
 0x20e   : > { %9298 = vrcp.f32 %v5272_v40  ;;  %v4695_v18 = vrot.slane %v4694_v19, 1  ;;  %v7041_v3 = vrot.slane %v7040_v35, 4  ;;  %v5274_v25 = vsel %vm483_vm0, %v11814_v42, 0.0 }
 0x20f   : > { %v9291_v47 = vpop.eup %9290  ;;  %v3370_v48 = vmax.f32 %v3368_v22, %v3369_v24  ;;  %v3373_v45 = vmax.f32 %v3371_v0, %v3372_v44  ;;  %v6464_v37 = vadd.f32 %v6463_v17, %v6462_v14  ;;  %v5275_v26 = vadd.f32 %v5274_v25, %v5273_v58  ;;  %v9879_v22 = vld [vmem:[%s10237_s27 + $0x528] sm:$0xff]  ;;  %v11834_v0 = vpop.f32.mrf.mxu0 }
 0x210   : > { %v5961_v10 = vmul.f32 %v9291_v47, %v11712_v27  ;;  %v5962_v11 = vmul.f32 %v9291_v47, %v11716_v60  ;;  %v4696_v2 = vadd.f32 %v4695_v18, %v4694_v19  ;;  %v2789_v62 = vrot.slane %v2788_v5, 4  ;;  %v11836_v25 = vpop.f32.mrf.mxu1 }
 0x211   : > { %v3919_v20 = vsub.f32 %v11724_v13, %v3370_v48  ;;  %v3920_v1 = vsub.f32 %v11714_v33, %v3370_v48  ;;  %v3374_v14 = vrot.slane %v3373_v45, 4  ;;  %v5276_v27 = vrot.slane %v5275_v26, 4 }
 0x212   : > { %v6217_v40 = vmul.f32 %v9878_v30, %v5961_v10  ;;  %v6218_v24 = vmul.f32 %v9879_v22, %v5962_v11  ;;  %9300 = vrcp.f32 %v4696_v2  ;;  %v2790_v19 = vmax.f32 %v2788_v5, %v2789_v62 }
 0x213   : > { %v4345_v17 = vmul.f32 1.442695, %v3919_v20  ;;  %v4347_v60 = vmul.f32 1.442695, %v3920_v1  ;;  %v11830_v44 = vadd.f32 %v7041_v3, %v7040_v35  ;;  %v3375_v33 = vmax.f32 %v3373_v45, %v3374_v14 }
 0x214   : > { %v7047_v8 = vsel %vm483_vm0, %v6217_v40, 0.0  ;;  %v7048_v13 = vsel %vm483_vm0, %v6218_v24, 0.0  ;;  %v6465_v18 = vrot.slane %v6464_v37, 4  ;;  %v5277_v58 = vadd.f32 %v5276_v27, %v5275_v26 }
 0x215   : > { %14989 = vst [vmem:[#allocation60_spill] sm:$0xff] %v11830_v44  ;;  %9302 = vpow2.f32 %v4345_v17  ;;  %v2791_v47 = vrot.slane %v2790_v19, 2  ;;  %v11838_v48 = vpop.eup %9292  ;;  %v11840_v10 = vadd.f32 %v7048_v13, %v7047_v8  ;;  %v3376_v35 = vrot.slane %v3375_v33, 2  ;;  %v9880_v17 = vld [vmem:[%s10237_s27 + $0x120] sm:$0xff] }
 0x216   : > { %9304 = vpow2.f32 %v4347_v60  ;;  %v2796_v5 = vsel %vm483_vm0, %v11822_v16, -inf  ;;  %v5278_v45 = vrot.slane %v5277_v58, 2  ;;  %v4697_v11 = vsel %vm483_vm0, %v11838_v48, 0.0 }
 0x217   : > { %14990 = vst [vmem:[#allocation61_spill] sm:$0xff] %v11840_v10  ;;  %v9295_v3 = vpop.eup %9294  ;;  %v2792_v2 = vmax.f32 %v2790_v19, %v2791_v47  ;;  %v2795_v26 = vsel %vm483_vm0, %v11834_v0, -inf  ;;  %v3377_v30 = vmax.f32 %v3375_v33, %v3376_v35  ;;  %v3380_v40 = vsel %vm483_vm0, %v11836_v25, -inf  ;;  %v9881_v19 = vld [vmem:[%s10237_s27 + $0x128] sm:$0xff] }
 0x218   : > { %v11848_v20 = vpop.eup %9296  ;;  %v5833_v1 = vmul.f32 %v9295_v3, %v11744_v6  ;;  %v5834_v62 = vmul.f32 %v9295_v3, %v11749_v57  ;;  %v5279_v22 = vadd.f32 %v5278_v45, %v5277_v58  ;;  %v3381_v27 = vsel %vm483_vm0, %v11826_v46, -inf }
 0x219   : > { %v4698_v24 = vsel %vm483_vm0, %v11848_v20, 0.0  ;;  %v2793_v14 = vrot.slane %v2792_v2, 1  ;;  %v3378_v6 = vrot.slane %v3377_v30, 1  ;;  %v2797_v35 = vmax.f32 %v2795_v26, %v2796_v5 }
 0x21a   : > { %v6089_v60 = vmul.f32 %v9880_v17, %v5833_v1  ;;  %v6090_v8 = vmul.f32 %v9881_v19, %v5834_v62  ;;  %v4699_v13 = vadd.f32 %v4698_v24, %v4697_v11  ;;  %v5280_v33 = vrot.slane %v5279_v22, 1  ;;  %v11865_v1 = vpop.f32.mrf.mxu0  ;;  %v9883_v19 = vld [vmem:[%s10237_s27 + $0x538] sm:$0xff] }
 0x21b   : > { %v9299_v57 = vpop.eup %9298  ;;  %v2794_v47 = vmax.f32 %v2792_v2, %v2793_v14  ;;  %v3382_v3 = vmax.f32 %v3380_v40, %v3381_v27  ;;  %v11860_v58 = vadd.f32 %v6465_v18, %v6464_v37  ;;  %v9882_v2 = vld [vmem:[%s10237_s27 + $0x530] sm:$0xff]  ;;  %v3379_v26 = vmax.f32 %v3377_v30, %v3378_v6 }
 0x21c   : > { %v5963_v31 = vmul.f32 %v9299_v57, %v11760_v59  ;;  %v5964_v53 = vmul.f32 %v9299_v57, %v11764_v63  ;;  %v6471_v11 = vsel %vm483_vm0, %v6089_v60, 0.0  ;;  %v5281_v62 = vadd.f32 %v5280_v33, %v5279_v22 }
 0x21d   : > { %14991 = vst [vmem:[#allocation62_spill] sm:$0xff] %v11860_v58  ;;  %v4700_v24 = vrot.slane %v4699_v13, 4  ;;  %v3791_v17 = vsub.f32 %v11798_v51, %v2794_v47  ;;  %v6472_v5 = vsel %vm483_vm0, %v6090_v8, 0.0  ;;  %v3792_v18 = vsub.f32 %v11774_v28, %v2794_v47  ;;  %v11875_v51 = vpop.f32.mrf.mxu1  ;;  %v11877_v8 = vpop.f32.mrf.mxu0 }
 0x21e   : > { %v6219_v37 = vmul.f32 %v9882_v2, %v5963_v31  ;;  %v2798_v63 = vrot.slane %v2797_v35, 4  ;;  %v3383_v27 = vrot.slane %v3382_v3, 4  ;;  %v6220_v57 = vmul.f32 %v9883_v19, %v5964_v53  ;;  %v9884_v53 = vld [vmem:[%s10237_s27 + $0x130] sm:$0xff] }
 0x21f   : > { %v9301_v40 = vpop.eup %9300  ;;  %v4701_v59 = vadd.f32 %v4700_v24, %v4699_v13  ;;  %v4089_v14 = vmul.f32 1.442695, %v3791_v17  ;;  %9306 = vrcp.f32 %v5281_v62  ;;  %v11879_v31 = vadd.f32 %v6472_v5, %v6471_v11  ;;  %v9885_v5 = vld [vmem:[%s10237_s27 + $0x138] sm:$0xff] }
 0x220   : > { %v5835_v22 = vmul.f32 %v9301_v40, %v11770_v29  ;;  %v5836_v60 = vmul.f32 %v9301_v40, %v11776_v34  ;;  %v4091_v30 = vmul.f32 1.442695, %v3792_v18  ;;  %v7056_v6 = vsel %vm483_vm0, %v6219_v37, 0.0  ;;  %v11895_v40 = vpop.f32.mrf.mxu1 }
 0x221   : > { %14992 = vst [vmem:[#allocation63_spill] sm:$0xff] %v11879_v31  ;;  %v4702_v28 = vrot.slane %v4701_v59, 2  ;;  %9308 = vpow2.f32 %v4089_v14  ;;  %v3921_v29 = vsub.f32 %v11800_v36, %v3379_v26  ;;  %v3922_v34 = vsub.f32 %v11789_v38, %v3379_v26  ;;  %v11897_v36 = vpop.f32.mrf.mxu0 }
 0x222   : > { %v11881_v13 = vpop.eup %9302  ;;  %v6091_v33 = vmul.f32 %v9884_v53, %v5835_v22  ;;  %9310 = vpow2.f32 %v4091_v30  ;;  %v2799_v24 = vmax.f32 %v2797_v35, %v2798_v63  ;;  %v7057_v17 = vsel %vm483_vm0, %v6220_v57, 0.0 }
 0x223   : > { %v11887_v47 = vpop.eup %9304  ;;  %v4703_v62 = vadd.f32 %v4702_v28, %v4701_v59  ;;  %v5282_v11 = vsel %vm483_vm0, %v11881_v13, 0.0  ;;  %v6092_v2 = vmul.f32 %v9885_v5, %v5836_v60  ;;  %v4349_v18 = vmul.f32 1.442695, %v3921_v29  ;;  %v11908_v29 = vpop.f32.mrf.mxu1 }
 0x224   : > { %v5283_v37 = vsel %vm483_vm0, %v11887_v47, 0.0  ;;  %v6480_v38 = vsel %vm483_vm0, %v6091_v33, 0.0  ;;  %v4351_v14 = vmul.f32 1.442695, %v3922_v34  ;;  %v2800_v19 = vrot.slane %v2799_v24, 2 }
 0x225   : > { %v4704_v26 = vrot.slane %v4703_v62, 1  ;;  %v5284_v59 = vadd.f32 %v5283_v37, %v5282_v11  ;;  %9312 = vpow2.f32 %v4349_v18  ;;  %v3384_v35 = vmax.f32 %v3382_v3, %v3383_v27  ;;  %v11910_v3 = vpop.f32.mrf.mxu0 }
 0x226   : > { %v2805_v63 = vsel %vm483_vm0, %v11865_v1, -inf  ;;  %9314 = vpow2.f32 %v4351_v14  ;;  %v3390_v60 = vsel %vm483_vm0, %v11875_v51, -inf  ;;  %v2801_v28 = vmax.f32 %v2799_v24, %v2800_v19 }
 0x227   : > { %v4705_v57 = vadd.f32 %v4704_v26, %v4703_v62  ;;  %v5285_v22 = vrot.slane %v5284_v59, 4  ;;  %v3385_v30 = vrot.slane %v3384_v35, 2  ;;  %v2804_v53 = vsel %vm483_vm0, %v11877_v8, -inf }
 0x228   : > { %v3389_v33 = vsel %vm483_vm0, %v11895_v40, -inf  ;;  %v2806_v34 = vmax.f32 %v2804_v53, %v2805_v63  ;;  %v6481_v11 = vsel %vm483_vm0, %v6092_v2, 0.0  ;;  %v2802_v5 = vrot.slane %v2801_v28, 1 }
 0x229   : > { %9316 = vrcp.f32 %v4705_v57  ;;  %v5286_v27 = vadd.f32 %v5285_v22, %v5284_v59  ;;  %v3391_v62 = vmax.f32 %v3389_v33, %v3390_v60  ;;  %v3386_v37 = vmax.f32 %v3384_v35, %v3385_v30  ;;  %v11920_v57 = vpop.f32.mrf.mxu1 }
 0x22a   : > { %v2814_v24 = vsel %vm483_vm0, %v11897_v36, -inf  ;;  %v2807_v26 = vrot.slane %v2806_v34, 4  ;;  %v2813_v19 = vsel %vm483_vm0, %v11910_v3, -inf  ;;  %v11918_v58 = vadd.f32 %v7057_v17, %v7056_v6 }
 0x22b   : > { %v5287_v18 = vrot.slane %v5286_v27, 2  ;;  %v3392_v14 = vrot.slane %v3391_v62, 4  ;;  %v2803_v59 = vmax.f32 %v2801_v28, %v2802_v5  ;;  %v3387_v63 = vrot.slane %v3386_v37, 1 }
 0x22c   : > { %14993 = vst [vmem:[#allocation64_spill] sm:$0xff] %v11918_v58  ;;  %v9307_v2 = vpop.eup %9306  ;;  %v11922_v22 = vadd.f32 %v6481_v11, %v6480_v38  ;;  %v2808_v60 = vmax.f32 %v2806_v34, %v2807_v26  ;;  %v3399_v30 = vsel %vm483_vm0, %v11908_v29, -inf  ;;  %v2815_v17 = vmax.f32 %v2813_v19, %v2814_v24  ;;  %v9910_v58 = vld [vmem:[%s10237_s27 + $0x5c0] sm:$0xff] }
 0x22d   : > { %v5288_v35 = vadd.f32 %v5287_v18, %v5286_v27  ;;  %v3793_v33 = vsub.f32 %v11834_v0, %v2803_v59  ;;  %v3794_v45 = vsub.f32 %v11822_v16, %v2803_v59  ;;  %v3388_v6 = vmax.f32 %v3386_v37, %v3387_v63 }
 0x22e   : > { %14994 = vst [vmem:[#allocation65_spill] sm:$0xff] %v11922_v22  ;;  %v11926_v53 = vpop.eup %9308  ;;  %v3393_v31 = vmax.f32 %v3391_v62, %v3392_v14  ;;  %v3398_v38 = vsel %vm483_vm0, %v11920_v57, -inf  ;;  %v5965_v16 = vmul.f32 %v9307_v2, %v11804_v9  ;;  %v5966_v37 = vmul.f32 %v9307_v2, %v11814_v42 }
 0x22f   : > { %v5289_v28 = vrot.slane %v5288_v35, 1  ;;  %v4706_v5 = vsel %vm483_vm0, %v11926_v53, 0.0  ;;  %v11934_v27 = vpop.eup %9310  ;;  %v4093_v34 = vmul.f32 1.442695, %v3793_v33  ;;  %v4095_v11 = vmul.f32 1.442695, %v3794_v45 }
 0x230   : > { %v3923_v18 = vsub.f32 %v11836_v25, %v3388_v6  ;;  %v3924_v0 = vsub.f32 %v11826_v46, %v3388_v6  ;;  %v4707_v24 = vsel %vm483_vm0, %v11934_v27, 0.0  ;;  %v2809_v26 = vrot.slane %v2808_v60, 2 }
 0x231   : > { %v4708_v62 = vadd.f32 %v4707_v24, %v4706_v5  ;;  %9318 = vpow2.f32 %v4093_v34  ;;  %v5290_v63 = vadd.f32 %v5289_v28, %v5288_v35  ;;  %v3394_v33 = vrot.slane %v3393_v31, 2 }
 0x232   : > { %v4353_v14 = vmul.f32 1.442695, %v3923_v18  ;;  %v4355_v19 = vmul.f32 1.442695, %v3924_v0  ;;  %v11942_v59 = vpop.eup %9312  ;;  %v2810_v45 = vmax.f32 %v2808_v60, %v2809_v26  ;;  %v2816_v25 = vrot.slane %v2815_v17, 4  ;;  %v9886_v0 = vld [vmem:[%s10237_s27 + $0x540] sm:$0xff] }
 0x233   : > { %v11944_v46 = vpop.eup %9314  ;;  %v4709_v9 = vrot.slane %v4708_v62, 4  ;;  %v5291_v42 = vsel %vm483_vm0, %v11942_v59, 0.0  ;;  %9320 = vpow2.f32 %v4095_v11  ;;  %v3400_v2 = vmax.f32 %v3398_v38, %v3399_v30  ;;  %v9887_v26 = vld [vmem:[%s10237_s27 + $0x548] sm:$0xff] }
 0x234   : > { %v5292_v6 = vsel %vm483_vm0, %v11944_v46, 0.0  ;;  %9322 = vpow2.f32 %v4353_v14  ;;  %v2811_v5 = vrot.slane %v2810_v45, 1  ;;  %v3395_v34 = vmax.f32 %v3393_v31, %v3394_v33 }
 0x235   : > { %v4710_v60 = vadd.f32 %v4709_v9, %v4708_v62  ;;  %v5293_v28 = vadd.f32 %v5292_v6, %v5291_v42  ;;  %9324 = vpow2.f32 %v4355_v19  ;;  %v2817_v18 = vmax.f32 %v2815_v17, %v2816_v25  ;;  %v11957_v19 = vpop.f32.mrf.mxu0 }
 0x236   : > { %v9317_v35 = vpop.eup %9316  ;;  %v6221_v24 = vmul.f32 %v9886_v0, %v5965_v16  ;;  %v11952_v22 = vmul.f32 %v9887_v26, %v5966_v37  ;;  %v2812_v32 = vmax.f32 %v2810_v45, %v2811_v5  ;;  %v3396_v23 = vrot.slane %v3395_v34, 1  ;;  %v11973_v0 = vpop.f32.mrf.mxu1 }
 0x237   : > { %v4711_v11 = vrot.slane %v4710_v60, 2  ;;  %v5294_v30 = vrot.slane %v5293_v28, 4  ;;  %v2818_v38 = vrot.slane %v2817_v18, 2  ;;  %v3401_v54 = vrot.slane %v3400_v2, 4  ;;  %v11965_v5 = vpop.f32.mrf.mxu0 }
 0x238   : > { %14995 = vst [vmem:[#allocation66_spill] sm:$0xff] %v11952_v22  ;;  %v5837_v14 = vmul.f32 %v9317_v35, %v11838_v48  ;;  %9326 = vrcp.f32 %v5290_v63  ;;  %v3795_v31 = vsub.f32 %v11877_v8, %v2812_v32  ;;  %v3796_v62 = vsub.f32 %v11865_v1, %v2812_v32 }
 0x239   : > { %v4712_v17 = vadd.f32 %v4711_v11, %v4710_v60  ;;  %v5295_v16 = vadd.f32 %v5294_v30, %v5293_v28  ;;  %v3397_v33 = vmax.f32 %v3395_v34, %v3396_v23  ;;  %v2819_v37 = vmax.f32 %v2817_v18, %v2818_v38  ;;  %v9889_v28 = vld [vmem:[%s10237_s27 + $0x148] sm:$0xff] }
 0x23a   : > { %v5838_v45 = vmul.f32 %v9317_v35, %v11848_v20  ;;  %v4097_v25 = vmul.f32 1.442695, %v3795_v31  ;;  %v4099_v9 = vmul.f32 1.442695, %v3796_v62  ;;  %v3402_v42 = vmax.f32 %v3400_v2, %v3401_v54  ;;  %v9888_v2 = vld [vmem:[%s10237_s27 + $0x140] sm:$0xff]  ;;  %v11984_v62 = vpop.f32.mrf.mxu0 }
 0x23b   : > { %v4713_v6 = vrot.slane %v4712_v17, 1  ;;  %v5296_v48 = vrot.slane %v5295_v16, 2  ;;  %v3925_v63 = vsub.f32 %v11895_v40, %v3397_v33  ;;  %v3926_v8 = vsub.f32 %v11875_v51, %v3397_v33 }
 0x23c   : > { %v11963_v32 = vsel %vm483_vm0, %v6221_v24, 0.0  ;;  %9328 = vpow2.f32 %v4097_v25  ;;  %v2820_v1 = vrot.slane %v2819_v37, 1  ;;  %v3403_v23 = vrot.slane %v3402_v42, 2 }
 0x23d   : > { %14996 = vst [vmem:[#allocation67_spill] sm:$0xff] %v11963_v32  ;;  %v4714_v20 = vadd.f32 %v4713_v6, %v4712_v17  ;;  %v5297_v34 = vadd.f32 %v5296_v48, %v5295_v16  ;;  %9330 = vpow2.f32 %v4099_v9  ;;  %v4357_v35 = vmul.f32 1.442695, %v3925_v63  ;;  %v11998_v6 = vpop.f32.mrf.mxu1 }
 0x23e   : > { %v11967_v54 = vpop.eup %9318  ;;  %v6093_v60 = vmul.f32 %v9888_v2, %v5837_v14  ;;  %v11971_v40 = vmul.f32 %v9889_v28, %v5838_v45  ;;  %v4359_v51 = vmul.f32 1.442695, %v3926_v8  ;;  %v2821_v18 = vmax.f32 %v2819_v37, %v2820_v1 }
 0x23f   : > { %9332 = vrcp.f32 %v4714_v20  ;;  %v5298_v24 = vrot.slane %v5297_v34, 1  ;;  %v4715_v26 = vsel %vm483_vm0, %v11967_v54, 0.0  ;;  %v3404_v11 = vmax.f32 %v3402_v42, %v3403_v23  ;;  %v12002_v20 = vpop.f32.mrf.mxu0 }
 0x240   : > { %14997 = vst [vmem:[#allocation68_spill] sm:$0xff] %v11971_v40  ;;  %v11977_v30 = vpop.eup %9320  ;;  %9334 = vpow2.f32 %v4357_v35  ;;  %v3797_v38 = vsub.f32 %v11910_v3, %v2821_v18  ;;  %v2823_v14 = vsel %vm483_vm0, %v11957_v19, -inf  ;;  %v2822_v31 = vsel %vm483_vm0, %v11965_v5, -inf }
 0x241   : > { %v11986_v17 = vpop.eup %9322  ;;  %v5299_v16 = vadd.f32 %v5298_v24, %v5297_v34  ;;  %v4716_v33 = vsel %vm483_vm0, %v11977_v30, 0.0  ;;  %9336 = vpow2.f32 %v4359_v51  ;;  %v3798_v37 = vsub.f32 %v11897_v36, %v2821_v18  ;;  %v12062_v7 = vpop.f32.mrf.mxu0 }
 0x242   : > { %v11991_v45 = vpop.eup %9324  ;;  %v11994_v3 = vsel %vm483_vm0, %v6093_v60, 0.0  ;;  %v4717_v25 = vadd.f32 %v4716_v33, %v4715_v26  ;;  %v5300_v9 = vsel %vm483_vm0, %v11986_v17, 0.0  ;;  %v4101_v42 = vmul.f32 1.442695, %v3797_v38 }
 0x243   : > { %14998 = vst [vmem:[#allocation69_spill] sm:$0xff] %v11991_v45  ;;  %14999 = vst [vmem:[#allocation70_spill] sm:$0xff] %v11994_v3  ;;  %9338 = vrcp.f32 %v5299_v16  ;;  %v5301_v48 = vsel %vm483_vm0, %v11991_v45, 0.0  ;;  %v4103_v63 = vmul.f32 1.442695, %v3798_v37  ;;  %v3405_v8 = vrot.slane %v3404_v11, 1 }
 0x244   : > { %v4718_v1 = vrot.slane %v4717_v25, 4  ;;  %v5302_v36 = vadd.f32 %v5301_v48, %v5300_v9  ;;  %9340 = vpow2.f32 %v4101_v42  ;;  %v2824_v23 = vmax.f32 %v2822_v31, %v2823_v14 }
 0x245   : > { %v9327_v34 = vpop.eup %9326  ;;  %9342 = vpow2.f32 %v4103_v63  ;;  %v3406_v35 = vmax.f32 %v3404_v11, %v3405_v8  ;;  %v3408_v2 = vsel %vm483_vm0, %v11973_v0, -inf  ;;  %v3407_v60 = vsel %vm483_vm0, %v11998_v6, -inf }
 0x246   : > { %v4719_v28 = vadd.f32 %v4718_v1, %v4717_v25  ;;  %v5303_v51 = vrot.slane %v5302_v36, 4  ;;  %v2825_v18 = vrot.slane %v2824_v23, 4  ;;  %v3409_v24 = vmax.f32 %v3407_v60, %v3408_v2 }
 0x247   : > { %v3927_v26 = vsub.f32 %v11920_v57, %v3406_v35  ;;  %v3928_v38 = vsub.f32 %v11908_v29, %v3406_v35  ;;  %v2832_v14 = vsel %vm483_vm0, %v11984_v62, -inf  ;;  %v2831_v11 = vsel %vm483_vm0, %v12002_v20, -inf  ;;  %v12020_v29 = vpop.f32.mrf.mxu1 }
 0x248   : > { %v4720_v31 = vrot.slane %v4719_v28, 2  ;;  %v5304_v16 = vadd.f32 %v5303_v51, %v5302_v36  ;;  %v2826_v33 = vmax.f32 %v2824_v23, %v2825_v18  ;;  %v3410_v37 = vrot.slane %v3409_v24, 4 }
 0x249   : > { %v12014_v9 = vpop.eup %9328  ;;  %v5967_v25 = vmul.f32 %v9327_v34, %v11881_v13  ;;  %v12018_v42 = vmul.f32 %v9327_v34, %v11887_v47  ;;  %v4361_v57 = vmul.f32 1.442695, %v3927_v26  ;;  %v4363_v48 = vmul.f32 1.442695, %v3928_v38  ;;  %v9890_v26 = vld [vmem:[%s10237_s27 + $0x550] sm:$0xff]  ;;  %v12034_v40 = vpop.f32.mrf.mxu1 }
 0x24a   : > { %v12022_v63 = vpop.eup %9330  ;;  %v4721_v8 = vadd.f32 %v4720_v31, %v4719_v28  ;;  %v5305_v1 = vrot.slane %v5304_v16, 2  ;;  %v4724_v36 = vsel %vm483_vm0, %v12014_v9, 0.0  ;;  %v2827_v23 = vrot.slane %v2826_v33, 2 }
 0x24b   : > { %15000 = vst [vmem:[#allocation71_spill] sm:$0xff] %v12018_v42  ;;  %15001 = vst [vmem:[#allocation72_spill] sm:$0xff] %v12022_v63  ;;  %v4725_v35 = vsel %vm483_vm0, %v12022_v63, 0.0  ;;  %9344 = vpow2.f32 %v4361_v57  ;;  %v3411_v13 = vmax.f32 %v3409_v24, %v3410_v37  ;;  %v2833_v47 = vmax.f32 %v2831_v11, %v2832_v14 }
 0x24c   : > { %v9333_v34 = vpop.eup %9332  ;;  %v4722_v2 = vrot.slane %v4721_v8, 1  ;;  %v5306_v60 = vadd.f32 %v5305_v1, %v5304_v16  ;;  %v4726_v51 = vadd.f32 %v4725_v35, %v4724_v36  ;;  %9346 = vpow2.f32 %v4363_v48 }
 0x24d   : > { %v12028_v18 = vpop.eup %9334  ;;  %v12031_v28 = vmul.f32 %v9890_v26, %v5967_v25  ;;  %v5839_v38 = vmul.f32 %v9333_v34, %v11926_v53  ;;  %v2828_v31 = vmax.f32 %v2826_v33, %v2827_v23  ;;  %v3412_v3 = vrot.slane %v3411_v13, 2 }
 0x24e   : > { %v12036_v63 = vpop.eup %9336  ;;  %v4723_v24 = vadd.f32 %v4722_v2, %v4721_v8  ;;  %v4727_v14 = vrot.slane %v4726_v51, 4  ;;  %v5309_v11 = vsel %vm483_vm0, %v12028_v18, 0.0  ;;  %v3417_v16 = vsel %vm483_vm0, %v12020_v29, -inf  ;;  %v9891_v2 = vld [vmem:[%s10237_s27 + $0x150] sm:$0xff] }
 0x24f   : > { %15002 = vst [vmem:[#allocation73_spill] sm:$0xff] %v12031_v28  ;;  %v5307_v37 = vrot.slane %v5306_v60, 1  ;;  %v5310_v25 = vsel %vm483_vm0, %v12036_v63, 0.0  ;;  %v2829_v53 = vrot.slane %v2828_v31, 1  ;;  %v3413_v33 = vmax.f32 %v3411_v13, %v3412_v3 }
 0x250   : > { %v9339_v57 = vpop.eup %9338  ;;  %v4728_v48 = vadd.f32 %v4727_v14, %v4726_v51  ;;  %v5311_v1 = vadd.f32 %v5310_v25, %v5309_v11  ;;  %v2834_v36 = vrot.slane %v2833_v47, 4  ;;  %v3416_v8 = vsel %vm483_vm0, %v12034_v40, -inf }
 0x251   : > { %v12046_v23 = vpop.eup %9340  ;;  %v12049_v35 = vmul.f32 %v9333_v34, %v11934_v27  ;;  %v12052_v26 = vmul.f32 %v9891_v2, %v5839_v38  ;;  %v2830_v43 = vmax.f32 %v2828_v31, %v2829_v53  ;;  %v3414_v41 = vrot.slane %v3413_v33, 1 }
 0x252   : > { %v12054_v4 = vpop.eup %9342  ;;  %9348 = vrcp.f32 %v4723_v24  ;;  %v4729_v3 = vrot.slane %v4728_v48, 2  ;;  %v5312_v13 = vrot.slane %v5311_v1, 4  ;;  %v4733_v51 = vsel %vm483_vm0, %v12046_v23, 0.0 }
 0x253   : > { %15003 = vst [vmem:[#allocation74_spill] sm:$0xff] %v12049_v35  ;;  %15004 = vst [vmem:[#allocation75_spill] sm:$0xff] %v12052_v26  ;;  %v5308_v14 = vadd.f32 %v5307_v37, %v5306_v60  ;;  %v4734_v11 = vsel %vm483_vm0, %v12054_v4, 0.0  ;;  %v3799_v27 = vsub.f32 %v11965_v5, %v2830_v43  ;;  %v3800_v34 = vsub.f32 %v11957_v19, %v2830_v43 }
 0x254   : > { %v4730_v38 = vadd.f32 %v4729_v3, %v4728_v48  ;;  %v5313_v25 = vadd.f32 %v5312_v13, %v5311_v1  ;;  %v4735_v31 = vadd.f32 %v4734_v11, %v4733_v51  ;;  %v3415_v53 = vmax.f32 %v3413_v33, %v3414_v41 }
 0x255   : > { %v4105_v2 = vmul.f32 1.442695, %v3799_v27  ;;  %v4107_v26 = vmul.f32 1.442695, %v3800_v34  ;;  %v2835_v24 = vmax.f32 %v2833_v47, %v2834_v36  ;;  %v3418_v35 = vmax.f32 %v3416_v8, %v3417_v16  ;;  %v12080_v34 = vpop.f32.mrf.mxu1 }
 0x256   : > { %v5969_v50 = vmul.f32 %v9339_v57, %v11942_v59  ;;  %v5314_v60 = vrot.slane %v5313_v25, 2  ;;  %v4736_v37 = vrot.slane %v4735_v31, 4  ;;  %v3929_v56 = vsub.f32 %v11998_v6, %v3415_v53  ;;  %v12073_v6 = vpop.f32.mrf.mxu0 }
 0x257   : > { %9350 = vpow2.f32 %v4105_v2  ;;  %v3930_v5 = vsub.f32 %v11973_v0, %v3415_v53  ;;  %v2836_v43 = vrot.slane %v2835_v24, 2  ;;  %v3419_v19 = vrot.slane %v3418_v35, 4 }
 0x258   : > { %v12067_v48 = vpop.eup %9344  ;;  %v4731_v41 = vrot.slane %v4730_v38, 1  ;;  %v5315_v33 = vadd.f32 %v5314_v60, %v5313_v25  ;;  %v4737_v1 = vadd.f32 %v4736_v37, %v4735_v31  ;;  %9352 = vpow2.f32 %v4107_v26  ;;  %v12082_v2 = vpop.f32.mrf.mxu0 }
 0x259   : > { %v12069_v47 = vpop.eup %9346  ;;  %v5318_v59 = vsel %vm483_vm0, %v12067_v48, 0.0  ;;  %v4365_v16 = vmul.f32 1.442695, %v3929_v56  ;;  %v4367_v36 = vmul.f32 1.442695, %v3930_v5  ;;  %v2837_v8 = vmax.f32 %v2835_v24, %v2836_v43  ;;  %v9892_v24 = vld [vmem:[%s10237_s27 + $0x560] sm:$0xff] }
 0x25a   : > { %v12076_v0 = vmul.f32 %v9339_v57, %v11944_v46  ;;  %v5316_v3 = vrot.slane %v5315_v33, 1  ;;  %v4738_v13 = vrot.slane %v4737_v1, 2  ;;  %v5319_v51 = vsel %vm483_vm0, %v12069_v47, 0.0 }
 0x25b   : > { %v5320_v26 = vadd.f32 %v5319_v51, %v5318_v59  ;;  %9354 = vpow2.f32 %v4365_v16  ;;  %v2838_v11 = vrot.slane %v2837_v8, 1  ;;  %v3420_v27 = vmax.f32 %v3418_v35, %v3419_v19 }
 0x25c   : > { %15005 = vst [vmem:[#allocation76_spill] sm:$0xff] %v12076_v0  ;;  %v4732_v56 = vadd.f32 %v4731_v41, %v4730_v38  ;;  %v5317_v25 = vadd.f32 %v5316_v3, %v5315_v33  ;;  %v4739_v31 = vadd.f32 %v4738_v13, %v4737_v1  ;;  %9356 = vpow2.f32 %v4367_v36  ;;  %v12091_v41 = vpop.f32.mrf.mxu1  ;;  %v12097_v3 = vpop.f32.mrf.mxu0 }
 0x25d   : > { %9358 = vrcp.f32 %v5308_v14  ;;  %v5321_v53 = vrot.slane %v5320_v26, 4  ;;  %v2839_v46 = vmax.f32 %v2837_v8, %v2838_v11  ;;  %v3421_v57 = vrot.slane %v3420_v27, 2 }
 0x25e   : > { %v12085_v60 = vmul.f32 %v9892_v24, %v5969_v50  ;;  %9360 = vrcp.f32 %v5317_v25  ;;  %v4740_v37 = vrot.slane %v4739_v31, 1  ;;  %v2841_v35 = vsel %vm483_vm0, %v12062_v7, -inf }
 0x25f   : > { %v9349_v5 = vpop.eup %9348  ;;  %v5322_v43 = vadd.f32 %v5321_v53, %v5320_v26  ;;  %v3801_v38 = vsub.f32 %v12002_v20, %v2839_v46  ;;  %v3802_v19 = vsub.f32 %v11984_v62, %v2839_v46  ;;  %v3422_v14 = vmax.f32 %v3420_v27, %v3421_v57 }
 0x260   : > { %15006 = vst [vmem:[#allocation77_spill] sm:$0xff] %v12085_v60  ;;  %9362 = vrcp.f32 %v4732_v56  ;;  %v4741_v33 = vadd.f32 %v4740_v37, %v4739_v31  ;;  %v3426_v50 = vsel %vm483_vm0, %v12080_v34, -inf  ;;  %v2840_v1 = vsel %vm483_vm0, %v12073_v6, -inf }
 0x261   : > { %v5323_v59 = vrot.slane %v5322_v43, 2  ;;  %v4109_v16 = vmul.f32 1.442695, %v3801_v38  ;;  %v4111_v36 = vmul.f32 1.442695, %v3802_v19  ;;  %v3423_v8 = vrot.slane %v3422_v14, 1 }
 0x262   : > { %9364 = vrcp.f32 %v4741_v33  ;;  %v2842_v20 = vmax.f32 %v2840_v1, %v2841_v35  ;;  %v3425_v62 = vsel %vm483_vm0, %v12091_v41, -inf  ;;  %v2850_v13 = vsel %vm483_vm0, %v12082_v2, -inf  ;;  %v12114_v35 = vpop.f32.mrf.mxu1 }
 0x263   : > { %v5324_v51 = vadd.f32 %v5323_v59, %v5322_v43  ;;  %9366 = vpow2.f32 %v4109_v16  ;;  %v3424_v26 = vmax.f32 %v3422_v14, %v3423_v8  ;;  %v3427_v11 = vmax.f32 %v3425_v62, %v3426_v50  ;;  %v9893_v62 = vld [vmem:[%s10237_s27 + $0x160] sm:$0xff] }
 0x264   : > { %v12103_v27 = vpop.eup %9350  ;;  %v5841_v56 = vmul.f32 %v9349_v5, %v11967_v54  ;;  %9368 = vpow2.f32 %v4111_v36  ;;  %v2843_v25 = vrot.slane %v2842_v20, 4  ;;  %v2849_v31 = vsel %vm483_vm0, %v12097_v3, -inf }
 0x265   : > { %v12108_v53 = vpop.eup %9352  ;;  %v5325_v46 = vrot.slane %v5324_v51, 1  ;;  %v4742_v57 = vsel %vm483_vm0, %v12103_v27, 0.0  ;;  %v3931_v24 = vsub.f32 %v12034_v40, %v3424_v26  ;;  %v3932_v37 = vsub.f32 %v12020_v29, %v3424_v26 }
 0x266   : > { %v4743_v54 = vsel %vm483_vm0, %v12108_v53, 0.0  ;;  %v2844_v43 = vmax.f32 %v2842_v20, %v2843_v25  ;;  %v3428_v38 = vrot.slane %v3427_v11, 4  ;;  %v2851_v19 = vmax.f32 %v2849_v31, %v2850_v13 }
 0x267   : > { %v5326_v14 = vadd.f32 %v5325_v46, %v5324_v51  ;;  %v4744_v33 = vadd.f32 %v4743_v54, %v4742_v57  ;;  %v4369_v50 = vmul.f32 1.442695, %v3931_v24  ;;  %v4371_v1 = vmul.f32 1.442695, %v3932_v37  ;;  %v12130_v51 = vpop.f32.mrf.mxu1 }
 0x268   : > { %v12118_v59 = vpop.eup %9354  ;;  %v12121_v16 = vmul.f32 %v9349_v5, %v11977_v30  ;;  %v2845_v40 = vrot.slane %v2844_v43, 2  ;;  %v3429_v29 = vmax.f32 %v3427_v11, %v3428_v38  ;;  %v2852_v36 = vrot.slane %v2851_v19, 4 }
 0x269   : > { %v12123_v8 = vpop.eup %9356  ;;  %v12126_v26 = vmul.f32 %v9893_v62, %v5841_v56  ;;  %9370 = vrcp.f32 %v5326_v14  ;;  %v4745_v20 = vrot.slane %v4744_v33, 4  ;;  %v5327_v13 = vsel %vm483_vm0, %v12118_v59, 0.0 }
 0x26a   : > { %15007 = vst [vmem:[#allocation78_spill] sm:$0xff] %v12121_v16  ;;  %v12132_v25 = vpop.eup %9358  ;;  %v5328_v30 = vsel %vm483_vm0, %v12123_v8, 0.0  ;;  %9372 = vpow2.f32 %v4369_v50  ;;  %v2846_v5 = vmax.f32 %v2844_v43, %v2845_v40  ;;  %v3430_v11 = vrot.slane %v3429_v29, 2 }
 0x26b   : > { %15008 = vst [vmem:[#allocation79_spill] sm:$0xff] %v12126_v26  ;;  %15009 = vst [vmem:[#allocation80_spill] sm:$0xff] %v12132_v25  ;;  %v9361_v31 = vpop.eup %9360  ;;  %v4746_v56 = vadd.f32 %v4745_v20, %v4744_v33  ;;  %v5329_v46 = vadd.f32 %v5328_v30, %v5327_v13  ;;  %9374 = vpow2.f32 %v4371_v1  ;;  %v2853_v57 = vmax.f32 %v2851_v19, %v2852_v36  ;;  %v9894_v19 = vld [vmem:[%s10237_s27 + $0x580] sm:$0xff] }
 0x26c   : > { %v5973_v24 = vmul.f32 %v9361_v31, %v12028_v18  ;;  %v5974_v37 = vmul.f32 %v9361_v31, %v12036_v63  ;;  %v2847_v54 = vrot.slane %v2846_v5, 1  ;;  %v3434_v38 = vsel %vm483_vm0, %v12130_v51, -inf  ;;  %v9895_v18 = vld [vmem:[%s10237_s27 + $0x588] sm:$0xff] }
 0x26d   : > { %v12140_v14 = vpop.eup %9362  ;;  %v12144_v43 = vmul.f32 %v12132_v25, %v11986_v17  ;;  %v4747_v50 = vrot.slane %v4746_v56, 2  ;;  %v5330_v40 = vrot.slane %v5329_v46, 4  ;;  %v3435_v33 = vsel %vm483_vm0, %v12114_v35, -inf }
 0x26e   : > { %15010 = vst [vmem:[#allocation81_spill] sm:$0xff] %v12140_v14  ;;  %v6229_v1 = vmul.f32 %v9894_v19, %v5973_v24  ;;  %v6230_v36 = vmul.f32 %v9895_v18, %v5974_v37  ;;  %v2848_v63 = vmax.f32 %v2846_v5, %v2847_v54  ;;  %v3431_v62 = vmax.f32 %v3429_v29, %v3430_v11 }
 0x26f   : > { %15011 = vst [vmem:[#allocation82_spill] sm:$0xff] %v12144_v43  ;;  %v9365_v20 = vpop.eup %9364  ;;  %v4748_v13 = vadd.f32 %v4747_v50, %v4746_v56  ;;  %v5331_v30 = vadd.f32 %v5330_v40, %v5329_v46  ;;  %v2854_v31 = vrot.slane %v2853_v57, 2  ;;  %v12150_v26 = vmax.f32 %v3434_v38, %v3435_v33  ;;  %v9931_v43 = vld [vmem:[%s10237_s27 + $0x638] sm:$0xff] }
 0x270   : > { %v12152_v17 = vpop.eup %9366  ;;  %v7101_v16 = vsel %vm483_vm0, %v6229_v1, 0.0  ;;  %v7102_v21 = vsel %vm483_vm0, %v6230_v36, 0.0  ;;  %v5845_v39 = vmul.f32 %v9365_v20, %v12046_v23  ;;  %v5846_v24 = vmul.f32 %v9365_v20, %v12054_v4  ;;  %v9896_v4 = vld [vmem:[%s10237_s27 + $0x180] sm:$0xff] }
 0x271   : > { %v12158_v37 = vpop.eup %9368  ;;  %v7103_v29 = vadd.f32 %v7102_v21, %v7101_v16  ;;  %v4749_v5 = vrot.slane %v4748_v13, 1  ;;  %v5332_v11 = vrot.slane %v5331_v30, 2  ;;  %v4751_v56 = vsel %vm483_vm0, %v12152_v17, 0.0 }
 0x272   : > { %v12164_v46 = vmul.f32 %v12140_v14, %v12014_v9  ;;  %v4752_v54 = vsel %vm483_vm0, %v12158_v37, 0.0  ;;  %v3803_v23 = vsub.f32 %v12073_v6, %v2848_v63  ;;  %v3432_v38 = vrot.slane %v3431_v62, 1  ;;  %v9897_v9 = vld [vmem:[%s10237_s27 + $0x188] sm:$0xff] }
 0x273   : > { %v6101_v50 = vmul.f32 %v9896_v4, %v5845_v39  ;;  %v4750_v40 = vadd.f32 %v4749_v5, %v4748_v13  ;;  %v5333_v21 = vadd.f32 %v5332_v11, %v5331_v30  ;;  %v4753_v16 = vadd.f32 %v4752_v54, %v4751_v56  ;;  %v9898_v54 = vld [vmem:[%s10237_s27 + $0x590] sm:$0xff] }
 0x274   : > { %15012 = vst [vmem:[#allocation83_spill] sm:$0xff] %v12164_v46  ;;  %v3804_v33 = vsub.f32 %v12062_v7, %v2848_v63  ;;  %v4113_v19 = vmul.f32 1.442695, %v3803_v23  ;;  %v2855_v1 = vmax.f32 %v2853_v57, %v2854_v31  ;;  %v3437_v18 = vrot.slane %v12150_v26, 4 }
 0x275   : > { %v7104_v36 = vrot.slane %v7103_v29, 4  ;;  %v6102_v20 = vmul.f32 %v9897_v9, %v5846_v24  ;;  %9376 = vrcp.f32 %v4750_v40  ;;  %v5334_v46 = vrot.slane %v5333_v21, 1 }
 0x276   : > { %v9371_v14 = vpop.eup %9370  ;;  %v4754_v6 = vrot.slane %v4753_v16, 4  ;;  %9378 = vpow2.f32 %v4113_v19  ;;  %v4115_v39 = vmul.f32 1.442695, %v3804_v33  ;;  %v3433_v13 = vmax.f32 %v3431_v62, %v3432_v38  ;;  %v9899_v38 = vld [vmem:[%s10237_s27 + $0x598] sm:$0xff] }
 0x277   : > { %v12173_v30 = vpop.eup %9372  ;;  %v6525_v7 = vsel %vm483_vm0, %v6101_v50, 0.0  ;;  %v5975_v57 = vmul.f32 %v9371_v14, %v12067_v48  ;;  %v5976_v63 = vmul.f32 %v9371_v14, %v12069_v47  ;;  %v5335_v31 = vadd.f32 %v5334_v46, %v5333_v21  ;;  %v12186_v48 = vpop.f32.mrf.mxu0 }
 0x278   : > { %v12178_v5 = vpop.eup %9374  ;;  %v4755_v24 = vadd.f32 %v4754_v6, %v4753_v16  ;;  %v5336_v11 = vsel %vm483_vm0, %v12173_v30, 0.0  ;;  %9380 = vpow2.f32 %v4115_v39  ;;  %v3933_v56 = vsub.f32 %v12091_v41, %v3433_v13  ;;  %v12188_v47 = vpop.f32.mrf.mxu1 }
 0x279   : > { %v6526_v62 = vsel %vm483_vm0, %v6102_v20, 0.0  ;;  %v6231_v23 = vmul.f32 %v9898_v54, %v5975_v57  ;;  %v6232_v4 = vmul.f32 %v9899_v38, %v5976_v63  ;;  %9382 = vrcp.f32 %v5335_v31  ;;  %v12198_v31 = vpop.f32.mrf.mxu0 }
 0x27a   : > { %v4756_v14 = vrot.slane %v4755_v24, 2  ;;  %v5337_v46 = vsel %vm483_vm0, %v12178_v5, 0.0  ;;  %v3934_v50 = vsub.f32 %v12080_v34, %v3433_v13  ;;  %v4373_v40 = vmul.f32 1.442695, %v3933_v56  ;;  %v12200_v34 = vpop.f32.mrf.mxu1 }
 0x27b   : > { %v7110_v41 = vsel %vm483_vm0, %v6231_v23, 0.0  ;;  %v7111_v21 = vsel %vm483_vm0, %v6232_v4, 0.0  ;;  %v5338_v16 = vadd.f32 %v5337_v46, %v5336_v11  ;;  %v2856_v33 = vrot.slane %v2855_v1, 1 }
 0x27c   : > { %v6527_v19 = vadd.f32 %v6526_v62, %v6525_v7  ;;  %v4757_v9 = vadd.f32 %v4756_v14, %v4755_v24  ;;  %9384 = vpow2.f32 %v4373_v40  ;;  %v4375_v20 = vmul.f32 1.442695, %v3934_v50 }
 0x27d   : > { %v12195_v6 = vadd.f32 %v7104_v36, %v7103_v29  ;;  %v5339_v39 = vrot.slane %v5338_v16, 4  ;;  %v2857_v57 = vmax.f32 %v2855_v1, %v2856_v33  ;;  %v3438_v63 = vmax.f32 %v12150_v26, %v3437_v18 }
 0x27e   : > { %v7112_v13 = vadd.f32 %v7111_v21, %v7110_v41  ;;  %v4758_v56 = vrot.slane %v4757_v9, 1  ;;  %9386 = vpow2.f32 %v4375_v20  ;;  %v2859_v11 = vsel %vm483_vm0, %v12186_v48, -inf }
 0x27f   : > { %15013 = vst [vmem:[#allocation84_spill] sm:$0xff] %v12195_v6  ;;  %v5340_v7 = vadd.f32 %v5339_v39, %v5338_v16  ;;  %v3805_v24 = vsub.f32 %v12097_v3, %v2857_v57  ;;  %v3806_v29 = vsub.f32 %v12082_v2, %v2857_v57  ;;  %v3439_v36 = vrot.slane %v3438_v63, 2  ;;  %v9900_v39 = vld [vmem:[%s10237_s27 + $0x190] sm:$0xff] }
 0x280   : > { %v6528_v62 = vrot.slane %v6527_v19, 4  ;;  %v4759_v1 = vadd.f32 %v4758_v56, %v4757_v9  ;;  %v2858_v26 = vsel %vm483_vm0, %v12198_v31, -inf  ;;  %v3443_v18 = vsel %vm483_vm0, %v12200_v34, -inf }
 0x281   : > { %v5341_v54 = vrot.slane %v5340_v7, 2  ;;  %v4117_v23 = vmul.f32 1.442695, %v3805_v24  ;;  %v4119_v38 = vmul.f32 1.442695, %v3806_v29  ;;  %v3440_v4 = vmax.f32 %v3438_v63, %v3439_v36  ;;  %v9901_v63 = vld [vmem:[%s10237_s27 + $0x198] sm:$0xff] }
 0x282   : > { %v9377_v14 = vpop.eup %9376  ;;  %v7113_v46 = vrot.slane %v7112_v13, 4  ;;  %9388 = vrcp.f32 %v4759_v1  ;;  %v3444_v2 = vsel %vm483_vm0, %v12188_v47, -inf  ;;  %v2860_v3 = vmax.f32 %v2858_v26, %v2859_v11 }
 0x283   : > { %v12212_v50 = vpop.eup %9378  ;;  %v5847_v40 = vmul.f32 %v9377_v14, %v12103_v27  ;;  %v5848_v41 = vmul.f32 %v9377_v14, %v12108_v53  ;;  %v5342_v21 = vadd.f32 %v5341_v54, %v5340_v7  ;;  %9390 = vpow2.f32 %v4117_v23  ;;  %v12230_v23 = vpop.f32.mrf.mxu0 }
 0x284   : > { %9392 = vpow2.f32 %v4119_v38  ;;  %v3441_v16 = vrot.slane %v3440_v4, 1  ;;  %v2861_v33 = vrot.slane %v2860_v3, 4  ;;  %v3445_v9 = vmax.f32 %v3443_v18, %v3444_v2 }
 0x285   : > { %v12216_v20 = vpop.eup %9380  ;;  %v6103_v57 = vmul.f32 %v9900_v39, %v5847_v40  ;;  %v6104_v56 = vmul.f32 %v9901_v63, %v5848_v41  ;;  %v5343_v24 = vrot.slane %v5342_v21, 1  ;;  %v4760_v11 = vsel %vm483_vm0, %v12212_v50, 0.0 }
 0x286   : > { %v9383_v29 = vpop.eup %9382  ;;  %v12222_v27 = vadd.f32 %v6528_v62, %v6527_v19  ;;  %v4761_v53 = vsel %vm483_vm0, %v12216_v20, 0.0  ;;  %v3442_v7 = vmax.f32 %v3440_v4, %v3441_v16  ;;  %v2862_v36 = vmax.f32 %v2860_v3, %v2861_v33  ;;  %v12238_v16 = vpop.f32.mrf.mxu1 }
 0x287   : > { %v6534_v1 = vsel %vm483_vm0, %v6103_v57, 0.0  ;;  %v6535_v26 = vsel %vm483_vm0, %v6104_v56, 0.0  ;;  %v5977_v18 = vmul.f32 %v9383_v29, %v12118_v59  ;;  %v5978_v54 = vmul.f32 %v9383_v29, %v12123_v8  ;;  %v9902_v59 = vld [vmem:[%s10237_s27 + $0x5a0] sm:$0xff] }
 0x288   : > { %15014 = vst [vmem:[#allocation85_spill] sm:$0xff] %v12222_v27  ;;  %v6536_v38 = vadd.f32 %v6535_v26, %v6534_v1  ;;  %v5344_v19 = vadd.f32 %v5343_v24, %v5342_v21  ;;  %v4762_v62 = vadd.f32 %v4761_v53, %v4760_v11  ;;  %v3935_v14 = vsub.f32 %v12130_v51, %v3442_v7  ;;  %v9903_v51 = vld [vmem:[%s10237_s27 + $0x5a8] sm:$0xff] }
 0x289   : > { %v12233_v2 = vpop.eup %9384  ;;  %v12235_v4 = vadd.f32 %v7113_v46, %v7112_v13  ;;  %v3936_v3 = vsub.f32 %v12114_v35, %v3442_v7  ;;  %v2863_v40 = vrot.slane %v2862_v36, 2  ;;  %v3446_v41 = vrot.slane %v3445_v9, 4  ;;  %v12248_v46 = vpop.f32.mrf.mxu0 }
 0x28a   : > { %v6233_v8 = vmul.f32 %v9902_v59, %v5977_v18  ;;  %9394 = vrcp.f32 %v5344_v19  ;;  %v4763_v33 = vrot.slane %v4762_v62, 4  ;;  %v5345_v21 = vsel %vm483_vm0, %v12233_v2, 0.0 }
 0x28b   : > { %15015 = vst [vmem:[#allocation86_spill] sm:$0xff] %v12235_v4  ;;  %v12243_v39 = vpop.eup %9386  ;;  %v6234_v57 = vmul.f32 %v9903_v51, %v5978_v54  ;;  %v4377_v63 = vmul.f32 1.442695, %v3935_v14  ;;  %v4379_v13 = vmul.f32 1.442695, %v3936_v3  ;;  %v2868_v35 = vsel %vm483_vm0, %v12230_v23, -inf }
 0x28c   : > { %v6537_v56 = vrot.slane %v6536_v38, 4  ;;  %v4764_v24 = vadd.f32 %v4763_v33, %v4762_v62  ;;  %v5346_v11 = vsel %vm483_vm0, %v12243_v39, 0.0  ;;  %v12254_v29 = vsel %vm483_vm0, %v12238_v16, -inf }
 0x28d   : > { %v5347_v53 = vadd.f32 %v5346_v11, %v5345_v21  ;;  %9396 = vpow2.f32 %v4377_v63  ;;  %v2864_v7 = vmax.f32 %v2862_v36, %v2863_v40  ;;  %v3447_v1 = vmax.f32 %v3445_v9, %v3446_v41  ;;  %v9904_v11 = vld [vmem:[%s10237_s27 + $0x1a0] sm:$0xff] }
 0x28e   : > { %v12257_v26 = vsel %vm483_vm0, %v6233_v8, 0.0  ;;  %v4765_v18 = vrot.slane %v4764_v24, 2  ;;  %9398 = vpow2.f32 %v4379_v13  ;;  %v2867_v54 = vsel %vm483_vm0, %v12248_v46, -inf  ;;  %v12272_v13 = vpop.f32.mrf.mxu1 }
 0x28f   : > { %v9389_v19 = vpop.eup %9388  ;;  %v12262_v62 = vsel %vm483_vm0, %v6234_v57, 0.0  ;;  %v5348_v14 = vrot.slane %v5347_v53, 4  ;;  %v2865_v3 = vrot.slane %v2864_v7, 1  ;;  %v3448_v59 = vrot.slane %v3447_v1, 2 }
 0x290   : > { %v12264_v33 = vpop.eup %9390  ;;  %v5849_v9 = vmul.f32 %v9389_v19, %v12152_v17  ;;  %v5850_v36 = vmul.f32 %v9389_v19, %v12158_v37  ;;  %v4766_v40 = vadd.f32 %v4765_v18, %v4764_v24  ;;  %v2869_v41 = vmax.f32 %v2867_v54, %v2868_v35 }
 0x291   : > { %v12268_v8 = vpop.eup %9392  ;;  %v5349_v21 = vadd.f32 %v5348_v14, %v5347_v53  ;;  %v4769_v51 = vsel %vm483_vm0, %v12264_v33, 0.0  ;;  %v2866_v57 = vmax.f32 %v2864_v7, %v2865_v3  ;;  %v3449_v63 = vmax.f32 %v3447_v1, %v3448_v59 }
 0x292   : > { %v6105_v27 = vmul.f32 %v9904_v11, %v5849_v9  ;;  %v6106_v55 = vmul.f32 %v9905_v52, %v5850_v36  ;;  %v4767_v49 = vrot.slane %v4766_v40, 1  ;;  %v4770_v17 = vsel %vm483_vm0, %v12268_v8, 0.0 }
 0x293   : > { %v5350_v37 = vrot.slane %v5349_v21, 2  ;;  %v4771_v35 = vadd.f32 %v4770_v17, %v4769_v51  ;;  %v3807_v24 = vsub.f32 %v12198_v31, %v2866_v57  ;;  %v3808_v53 = vsub.f32 %v12186_v48, %v2866_v57 }
 0x294   : > { %v12280_v18 = vadd.f32 %v6537_v56, %v6536_v38  ;;  %v4768_v7 = vadd.f32 %v4767_v49, %v4766_v40  ;;  %v3450_v1 = vrot.slane %v3449_v63, 1  ;;  %v3452_v54 = vsel %vm483_vm0, %v12272_v13, -inf  ;;  %v12286_v38 = vpop.f32.mrf.mxu0 }
 0x295   : > { %v6543_v19 = vsel %vm483_vm0, %v6105_v27, 0.0  ;;  %v5351_v52 = vadd.f32 %v5350_v37, %v5349_v21  ;;  %v4772_v14 = vrot.slane %v4771_v35, 4  ;;  %v4121_v3 = vmul.f32 1.442695, %v3807_v24  ;;  %v12291_v21 = vpop.f32.mrf.mxu1  ;;  %v9906_v37 = vld [vmem:[%s10237_s27 + $0x5b0] sm:$0xff]  ;;  %v9907_v24 = vld [vmem:[%s10237_s27 + $0x5b8] sm:$0xff] }
 0x296   : > { %15016 = vst [vmem:[#allocation87_spill] sm:$0xff] %v12280_v18  ;;  %9400 = vrcp.f32 %v4768_v7  ;;  %v4123_v59 = vmul.f32 1.442695, %v3808_v53  ;;  %v3451_v9 = vmax.f32 %v3449_v63, %v3450_v1  ;;  %v2870_v36 = vrot.slane %v2869_v41, 4 }
 0x297   : > { %v9395_v51 = vpop.eup %9394  ;;  %v6544_v48 = vsel %vm483_vm0, %v6106_v55, 0.0  ;;  %v5352_v31 = vrot.slane %v5351_v52, 1  ;;  %v4773_v49 = vadd.f32 %v4772_v14, %v4771_v35  ;;  %9402 = vpow2.f32 %v4121_v3  ;;  %v12303_v14 = vpop.f32.mrf.mxu0 }
 0x298   : > { %v5979_v56 = vmul.f32 %v9395_v51, %v12173_v30  ;;  %v5980_v27 = vmul.f32 %v9395_v51, %v12178_v5  ;;  %9404 = vpow2.f32 %v4123_v59  ;;  %v3937_v40 = vsub.f32 %v12200_v34, %v3451_v9 }
 0x299   : > { %v5353_v57 = vadd.f32 %v5352_v31, %v5351_v52  ;;  %v4774_v63 = vrot.slane %v4773_v49, 2  ;;  %v3938_v11 = vsub.f32 %v12188_v47, %v3451_v9  ;;  %v2871_v55 = vmax.f32 %v2869_v41, %v2870_v36 }
 0x29a   : > { %v12294_v17 = vpop.eup %9396  ;;  %v6235_v35 = vmul.f32 %v9906_v37, %v5979_v56  ;;  %v6236_v53 = vmul.f32 %v9907_v24, %v5980_v27  ;;  %v4381_v7 = vmul.f32 1.442695, %v3937_v40  ;;  %v3454_v30 = vmax.f32 %v3452_v54, %v12254_v29  ;;  %v12313_v29 = vpop.f32.mrf.mxu1  ;;  %v9908_v37 = vld [vmem:[%s10237_s27 + $0x1b0] sm:$0xff] }
 0x29b   : > { %v12299_v5 = vpop.eup %9398  ;;  %9406 = vrcp.f32 %v5353_v57  ;;  %v4775_v34 = vadd.f32 %v4774_v63, %v4773_v49  ;;  %v5354_v1 = vsel %vm483_vm0, %v12294_v17, 0.0  ;;  %v4383_v52 = vmul.f32 1.442695, %v3938_v11  ;;  %v12323_v56 = vpop.f32.mrf.mxu0 }
 0x29c   : > { %v12307_v47 = vadd.f32 %v12262_v62, %v12257_v26  ;;  %v12309_v41 = vadd.f32 %v6544_v48, %v6543_v19  ;;  %v5355_v3 = vsel %vm483_vm0, %v12299_v5, 0.0  ;;  %9408 = vpow2.f32 %v4381_v7  ;;  %v12327_v11 = vpop.f32.mrf.mxu1 }
 0x29d   : > { %v7128_v54 = vsel %vm483_vm0, %v6235_v35, 0.0  ;;  %v4776_v59 = vrot.slane %v4775_v34, 1  ;;  %v5356_v9 = vadd.f32 %v5355_v3, %v5354_v1  ;;  %9410 = vpow2.f32 %v4383_v52 }
 0x29e   : > { %15017 = vst [vmem:[#allocation88_spill] sm:$0xff] %v12307_v47  ;;  %15018 = vst [vmem:[#allocation89_spill] sm:$0xff] %v12309_v41  ;;  %v7129_v36 = vsel %vm483_vm0, %v6236_v53, 0.0  ;;  %v2872_v51 = vrot.slane %v2871_v55, 2  ;;  %v3455_v31 = vrot.slane %v3454_v30, 4  ;;  %v2877_v26 = vsel %vm483_vm0, %v12286_v38, -inf  ;;  %v12349_v53 = vpop.f32.mrf.mxu1 }
 0x29f   : > { %v4777_v62 = vadd.f32 %v4776_v59, %v4775_v34  ;;  %v5357_v19 = vrot.slane %v5356_v9, 4  ;;  %v2876_v48 = vsel %vm483_vm0, %v12303_v14, -inf  ;;  %v3461_v49 = vsel %vm483_vm0, %v12313_v29, -inf }
 0x2a0   : > { %v2873_v27 = vmax.f32 %v2871_v55, %v2872_v51  ;;  %v3456_v40 = vmax.f32 %v3454_v30, %v3455_v31  ;;  %v3462_v57 = vsel %vm483_vm0, %v12291_v21, -inf  ;;  %v2878_v63 = vmax.f32 %v2876_v48, %v2877_v26  ;;  %v12339_v51 = vpop.f32.mrf.mxu0 }
 0x2a1   : > { %9412 = vrcp.f32 %v4777_v62  ;;  %v5358_v35 = vadd.f32 %v5357_v19, %v5356_v9  ;;  %v3463_v24 = vmax.f32 %v3461_v49, %v3462_v57  ;;  %v12331_v3 = vadd.f32 %v7129_v36, %v7128_v54 }
 0x2a2   : > { %v2874_v7 = vrot.slane %v2873_v27, 1  ;;  %v3457_v34 = vrot.slane %v3456_v40, 2  ;;  %v2879_v1 = vrot.slane %v2878_v63, 4  ;;  %v2886_v30 = vsel %vm483_vm0, %v12323_v56, -inf }
 0x2a3   : > { %v9401_v52 = vpop.eup %9400  ;;  %15019 = vst [vmem:[#allocation90_spill] sm:$0xff] %v12331_v3  ;;  %v5359_v55 = vrot.slane %v5358_v35, 2  ;;  %v12337_v59 = vsel %vm483_vm0, %v12327_v11, -inf  ;;  %v3464_v57 = vrot.slane %v3463_v24, 4 }
 0x2a4   : > { %v12341_v9 = vpop.eup %9402  ;;  %v5851_v31 = vmul.f32 %v9401_v52, %v12212_v50  ;;  %v5852_v26 = vmul.f32 %v9401_v52, %v12216_v20  ;;  %v2875_v54 = vmax.f32 %v2873_v27, %v2874_v7  ;;  %v3458_v36 = vmax.f32 %v3456_v40, %v3457_v34  ;;  %v9909_v27 = vld [vmem:[%s10237_s27 + $0x1b8] sm:$0xff] }
 0x2a5   : > { %v12345_v62 = vpop.eup %9404  ;;  %v5360_v19 = vadd.f32 %v5359_v55, %v5358_v35  ;;  %v4778_v48 = vsel %vm483_vm0, %v12341_v9, 0.0  ;;  %v2880_v49 = vmax.f32 %v2878_v63, %v2879_v1  ;;  %v2885_v20 = vsel %vm483_vm0, %v12339_v51, -inf  ;;  %v12359_v63 = vpop.f32.mrf.mxu0 }
 0x2a6   : > { %v6107_v41 = vmul.f32 %v9908_v37, %v5851_v31  ;;  %v4779_v18 = vsel %vm483_vm0, %v12345_v62, 0.0  ;;  %v3809_v50 = vsub.f32 %v12248_v46, %v2875_v54  ;;  %v6108_v40 = vmul.f32 %v9909_v27, %v5852_v26 }
 0x2a7   : > { %v5361_v35 = vrot.slane %v5360_v19, 1  ;;  %v4780_v7 = vadd.f32 %v4779_v18, %v4778_v48  ;;  %v3810_v34 = vsub.f32 %v12230_v23, %v2875_v54  ;;  %v3459_v55 = vrot.slane %v3458_v36, 1 }
 0x2a8   : > { %v9407_v1 = vpop.eup %9406  ;;  %v4125_v52 = vmul.f32 1.442695, %v3809_v50  ;;  %v3470_v37 = vsel %vm483_vm0, %v12349_v53, -inf  ;;  %v12365_v46 = vsel %vm483_vm0, %v12359_v63, -inf  ;;  %v6552_v26 = vsel %vm483_vm0, %v6107_v41, 0.0 }
 0x2a9   : > { %v12367_v31 = vpop.eup %9408  ;;  %v5362_v27 = vadd.f32 %v5361_v35, %v5360_v19  ;;  %v2881_v18 = vrot.slane %v2880_v49, 2  ;;  %v3465_v48 = vmax.f32 %v3463_v24, %v3464_v57  ;;  %v4781_v54 = vrot.slane %v4780_v7, 4 }
 0x2aa   : > { %v12370_v23 = vpop.eup %9410  ;;  %v5363_v50 = vsel %vm483_vm0, %v12367_v31, 0.0  ;;  %9414 = vpow2.f32 %v4125_v52  ;;  %v4127_v61 = vmul.f32 1.442695, %v3810_v34  ;;  %v6553_v15 = vsel %vm483_vm0, %v6108_v40, 0.0 }
 0x2ab   : > { %v5981_v60 = vmul.f32 %v9407_v1, %v12233_v2  ;;  %v5982_v32 = vmul.f32 %v9407_v1, %v12243_v39  ;;  %v5364_v41 = vsel %vm483_vm0, %v12370_v23, 0.0  ;;  %v4782_v19 = vadd.f32 %v4781_v54, %v4780_v7 }
 0x2ac   : > { %v5365_v24 = vadd.f32 %v5364_v41, %v5363_v50  ;;  %9416 = vpow2.f32 %v4127_v61  ;;  %v3460_v57 = vmax.f32 %v3458_v36, %v3459_v55  ;;  %v2882_v35 = vmax.f32 %v2880_v49, %v2881_v18  ;;  %v12391_v41 = vpop.f32.mrf.mxu0 }
 0x2ad   : > { %9418 = vrcp.f32 %v5362_v27  ;;  %v3466_v28 = vrot.slane %v3465_v48, 2  ;;  %v2887_v52 = vmax.f32 %v2885_v20, %v2886_v30  ;;  %v4783_v22 = vrot.slane %v4782_v19, 2  ;;  %v9911_v27 = vld [vmem:[%s10237_s27 + $0x5c8] sm:$0xff] }
 0x2ae   : > { %v9413_v34 = vpop.eup %9412  ;;  %v5366_v40 = vrot.slane %v5365_v24, 4  ;;  %v3939_v2 = vsub.f32 %v12272_v13, %v3460_v57  ;;  %v3940_v39 = vsub.f32 %v12238_v16, %v3460_v57  ;;  %v12381_v1 = vadd.f32 %v6553_v15, %v6552_v26 }
 0x2af   : > { %v6237_v10 = vmul.f32 %v9910_v58, %v5981_v60  ;;  %v2883_v7 = vrot.slane %v2882_v35, 1  ;;  %v3467_v54 = vmax.f32 %v3465_v48, %v3466_v28  ;;  %v4784_v61 = vadd.f32 %v4783_v22, %v4782_v19 }
 0x2b0   : > { %15020 = vst [vmem:[#allocation91_spill] sm:$0xff] %v12381_v1  ;;  %v5367_v36 = vadd.f32 %v5366_v40, %v5365_v24  ;;  %v4385_v55 = vmul.f32 1.442695, %v3939_v2  ;;  %v4387_v49 = vmul.f32 1.442695, %v3940_v39  ;;  %v12385_v18 = vmul.f32 %v9911_v27, %v5982_v32  ;;  %v12395_v40 = vpop.f32.mrf.mxu1 }
 0x2b1   : > { %v5853_v30 = vmul.f32 %v9413_v34, %v12264_v33  ;;  %v2884_v20 = vmax.f32 %v2882_v35, %v2883_v7  ;;  %v3468_v13 = vrot.slane %v3467_v54, 1  ;;  %v4785_v50 = vrot.slane %v4784_v61, 1  ;;  %v9912_v33 = vld [vmem:[%s10237_s27 + $0x1c0] sm:$0xff] }
 0x2b2   : > { %15021 = vst [vmem:[#allocation92_spill] sm:$0xff] %v12385_v18  ;;  %v5368_v16 = vrot.slane %v5367_v36, 2  ;;  %9420 = vpow2.f32 %v4385_v55  ;;  %v2888_v15 = vrot.slane %v2887_v52, 4  ;;  %v5854_v58 = vmul.f32 %v9413_v34, %v12268_v8  ;;  %v12418_v27 = vpop.f32.mrf.mxu1 }
 0x2b3   : > { %9422 = vpow2.f32 %v4387_v49  ;;  %v3811_v22 = vsub.f32 %v12303_v14, %v2884_v20  ;;  %v3812_v28 = vsub.f32 %v12286_v38, %v2884_v20  ;;  %v4786_v60 = vadd.f32 %v4785_v50, %v4784_v61 }
 0x2b4   : > { %v5369_v26 = vadd.f32 %v5368_v16, %v5367_v36  ;;  %v3469_v32 = vmax.f32 %v3467_v54, %v3468_v13  ;;  %v2889_v48 = vmax.f32 %v2887_v52, %v2888_v15  ;;  %v6109_v19 = vmul.f32 %v9912_v33, %v5853_v30  ;;  %v12408_v54 = vpop.f32.mrf.mxu0 }
 0x2b5   : > { %v4129_v24 = vmul.f32 1.442695, %v3811_v22  ;;  %v4131_v57 = vmul.f32 1.442695, %v3812_v28  ;;  %v3472_v35 = vmax.f32 %v3470_v37, %v12337_v59  ;;  %9424 = vrcp.f32 %v4786_v60 }
 0x2b6   : > { %v5370_v8 = vrot.slane %v5369_v26, 1  ;;  %v3941_v14 = vsub.f32 %v12313_v29, %v3469_v32  ;;  %v3942_v38 = vsub.f32 %v12291_v21, %v3469_v32  ;;  %v2890_v52 = vrot.slane %v2889_v48, 2  ;;  %v9913_v21 = vld [vmem:[%s10237_s27 + $0x1c8] sm:$0xff]  ;;  %v12427_v32 = vpop.f32.mrf.mxu0 }
 0x2b7   : > { %v12399_v34 = vpop.eup %9414  ;;  %9426 = vpow2.f32 %v4129_v24  ;;  %v3473_v2 = vrot.slane %v3472_v35, 4  ;;  %v2894_v39 = vsel %vm483_vm0, %v12391_v41, -inf  ;;  %v12404_v7 = vsel %vm483_vm0, %v6237_v10, 0.0 }
 0x2b8   : > { %15022 = vst [vmem:[#allocation93_spill] sm:$0xff] %v12404_v7  ;;  %v4787_v59 = vsel %vm483_vm0, %v12399_v34, 0.0  ;;  %9428 = vpow2.f32 %v4131_v57  ;;  %v4389_v37 = vmul.f32 1.442695, %v3941_v14  ;;  %v12413_v61 = vmul.f32 %v9913_v21, %v5854_v58 }
 0x2b9   : > { %v12410_v29 = vpop.eup %9416  ;;  %v12416_v36 = vsel %vm483_vm0, %v6109_v19, 0.0  ;;  %v4391_v55 = vmul.f32 1.442695, %v3942_v38  ;;  %v2891_v49 = vmax.f32 %v2889_v48, %v2890_v52  ;;  %v5371_v30 = vadd.f32 %v5370_v8, %v5369_v26 }
 0x2ba   : > { %15023 = vst [vmem:[#allocation94_spill] sm:$0xff] %v12413_v61  ;;  %15024 = vst [vmem:[#allocation95_spill] sm:$0xff] %v12416_v36  ;;  %v9419_v10 = vpop.eup %9418  ;;  %v4788_v20 = vsel %vm483_vm0, %v12410_v29, 0.0  ;;  %v3474_v13 = vmax.f32 %v3472_v35, %v3473_v2  ;;  %v2896_v50 = vmax.f32 %v2894_v39, %v12365_v46  ;;  %9430 = vpow2.f32 %v4389_v37 }
 0x2bb   : > { %v4789_v16 = vadd.f32 %v4788_v20, %v4787_v59  ;;  %v2892_v15 = vrot.slane %v2891_v49, 1  ;;  %v3480_v58 = vsel %vm483_vm0, %v12395_v40, -inf  ;;  %9432 = vpow2.f32 %v4391_v55 }
 0x2bc   : > { %v3475_v22 = vrot.slane %v3474_v13, 2  ;;  %v2897_v28 = vrot.slane %v2896_v50, 4  ;;  %v3479_v60 = vsel %vm483_vm0, %v12418_v27, -inf  ;;  %v5983_v26 = vmul.f32 %v9419_v10, %v12294_v17 }
 0x2bd   : > { %v4790_v48 = vrot.slane %v4789_v16, 4  ;;  %v2893_v33 = vmax.f32 %v2891_v49, %v2892_v15  ;;  %v3481_v19 = vmax.f32 %v3479_v60, %v3480_v58  ;;  %9434 = vrcp.f32 %v5371_v30  ;;  %v12444_v30 = vpop.f32.mrf.mxu1  ;;  %v9914_v15 = vld [vmem:[%s10237_s27 + $0x5d0] sm:$0xff] }
 0x2be   : > { %v3476_v46 = vmax.f32 %v3474_v13, %v3475_v22  ;;  %v2898_v24 = vmax.f32 %v2896_v50, %v2897_v28  ;;  %v2904_v57 = vsel %vm483_vm0, %v12408_v54, -inf  ;;  %v2903_v52 = vsel %vm483_vm0, %v12427_v32, -inf }
 0x2bf   : > { %v12432_v35 = vpop.eup %9420  ;;  %v4791_v8 = vadd.f32 %v4790_v48, %v4789_v16  ;;  %v3813_v14 = vsub.f32 %v12339_v51, %v2893_v33  ;;  %v3814_v38 = vsub.f32 %v12323_v56, %v2893_v33  ;;  %v3482_v37 = vrot.slane %v3481_v19, 4 }
 0x2c0   : > { %v12438_v17 = vpop.eup %9422  ;;  %v5372_v2 = vsel %vm483_vm0, %v12432_v35, 0.0  ;;  %v3477_v39 = vrot.slane %v3476_v46, 1  ;;  %v2899_v59 = vrot.slane %v2898_v24, 2  ;;  %v12447_v56 = vmul.f32 %v9419_v10, %v12299_v5 }
 0x2c1   : > { %15025 = vst [vmem:[#allocation96_spill] sm:$0xff] %v12438_v17  ;;  %v4792_v21 = vrot.slane %v4791_v8, 2  ;;  %v5373_v55 = vsel %vm483_vm0, %v12438_v17, 0.0  ;;  %v4133_v49 = vmul.f32 1.442695, %v3813_v14  ;;  %v12450_v58 = vmul.f32 %v9914_v15, %v5983_v26 }
 0x2c2   : > { %v4135_v51 = vmul.f32 1.442695, %v3814_v38  ;;  %15026 = vst [vmem:[#allocation97_spill] sm:$0xff] %v12447_v56  ;;  %v5374_v20 = vadd.f32 %v5373_v55, %v5372_v2  ;;  %v3478_v13 = vmax.f32 %v3476_v46, %v3477_v39  ;;  %v2900_v50 = vmax.f32 %v2898_v24, %v2899_v59  ;;  %v9425_v16 = vpop.eup %9424 }
 0x2c3   : > { %15027 = vst [vmem:[#allocation98_spill] sm:$0xff] %v12450_v58  ;;  %v4793_v22 = vadd.f32 %v4792_v21, %v4791_v8  ;;  %9436 = vpow2.f32 %v4133_v49  ;;  %v2905_v28 = vmax.f32 %v2903_v52, %v2904_v57  ;;  %v3483_v33 = vmax.f32 %v3481_v19, %v3482_v37  ;;  %v12463_v57 = vpop.f32.mrf.mxu1 }
 0x2c4   : > { %v12452_v60 = vpop.eup %9426  ;;  %v5375_v48 = vrot.slane %v5374_v20, 4  ;;  %9438 = vpow2.f32 %v4135_v51  ;;  %v3489_v14 = vsel %vm483_vm0, %v12444_v30, -inf  ;;  %v5855_v10 = vmul.f32 %v9425_v16, %v12341_v9  ;;  %v9915_v51 = vld [vmem:[%s10237_s27 + $0x1d0] sm:$0xff] }
 0x2c5   : > { %v12456_v5 = vpop.eup %9428  ;;  %v4796_v46 = vsel %vm483_vm0, %v12452_v60, 0.0  ;;  %v3943_v26 = vsub.f32 %v12349_v53, %v3478_v13  ;;  %v3944_v24 = vsub.f32 %v12327_v11, %v3478_v13  ;;  %v4794_v8 = vrot.slane %v4793_v22, 1 }
 0x2c6   : > { %15028 = vst [vmem:[#allocation99_spill] sm:$0xff] %v12456_v5  ;;  %v5376_v38 = vadd.f32 %v5375_v48, %v5374_v20  ;;  %v4797_v19 = vsel %vm483_vm0, %v12456_v5, 0.0  ;;  %v2901_v52 = vrot.slane %v2900_v50, 1  ;;  %v2906_v9 = vrot.slane %v2905_v28, 4 }
 0x2c7   : > { %v4798_v2 = vadd.f32 %v4797_v19, %v4796_v46  ;;  %v4393_v39 = vmul.f32 1.442695, %v3943_v26  ;;  %v4395_v59 = vmul.f32 1.442695, %v3944_v24  ;;  %v12467_v37 = vpop.eup %9430  ;;  %v12470_v21 = vmul.f32 %v9425_v16, %v12345_v62 }
 0x2c8   : > { %v5377_v53 = vrot.slane %v5376_v38, 2  ;;  %v2902_v11 = vmax.f32 %v2900_v50, %v2901_v52  ;;  %v3488_v55 = vsel %vm483_vm0, %v12463_v57, -inf  ;;  %v12474_v49 = vpop.eup %9432  ;;  %v12477_v20 = vmul.f32 %v9915_v51, %v5855_v10 }
 0x2c9   : > { %15029 = vst [vmem:[#allocation100_spill] sm:$0xff] %v12470_v21  ;;  %v4799_v13 = vrot.slane %v4798_v2, 4  ;;  %v5381_v15 = vsel %vm483_vm0, %v12467_v37, 0.0  ;;  %v3484_v48 = vrot.slane %v3483_v33, 2  ;;  %v4795_v46 = vadd.f32 %v4794_v8, %v4793_v22 }
 0x2ca   : > { %15030 = vst [vmem:[#allocation101_spill] sm:$0xff] %v12477_v20  ;;  %v5378_v26 = vadd.f32 %v5377_v53, %v5376_v38  ;;  %v5382_v62 = vsel %vm483_vm0, %v12474_v49, 0.0  ;;  %9440 = vpow2.f32 %v4393_v39  ;;  %v9435_v50 = vpop.eup %9434  ;;  %v3815_v19 = vsub.f32 %v12391_v41, %v2902_v11  ;;  %v12485_v39 = vpop.f32.mrf.mxu0 }
 0x2cb   : > { %v4800_v16 = vadd.f32 %v4799_v13, %v4798_v2  ;;  %v5383_v24 = vadd.f32 %v5382_v62, %v5381_v15  ;;  %9442 = vpow2.f32 %v4395_v59  ;;  %v3816_v10 = vsub.f32 %v12359_v63, %v2902_v11 }
 0x2cc   : > { %v5379_v52 = vrot.slane %v5378_v26, 1  ;;  %v3485_v51 = vmax.f32 %v3483_v33, %v3484_v48  ;;  %v2907_v20 = vmax.f32 %v2905_v28, %v2906_v9  ;;  %v4137_v1 = vmul.f32 1.442695, %v3815_v19  ;;  %v12501_v15 = vpop.f32.mrf.mxu0 }
 0x2cd   : > { %v4801_v36 = vrot.slane %v4800_v16, 2  ;;  %v5384_v61 = vrot.slane %v5383_v24, 4  ;;  %v3490_v22 = vmax.f32 %v3488_v55, %v3489_v14  ;;  %9444 = vrcp.f32 %v4795_v46 }
 0x2ce   : > { %v4139_v8 = vmul.f32 1.442695, %v3816_v10  ;;  %v3486_v38 = vrot.slane %v3485_v51, 1  ;;  %v2908_v53 = vrot.slane %v2907_v20, 2  ;;  %9446 = vpow2.f32 %v4137_v1 }
 0x2cf   : > { %v4802_v2 = vadd.f32 %v4801_v36, %v4800_v16  ;;  %v5385_v13 = vadd.f32 %v5384_v61, %v5383_v24  ;;  %v3491_v59 = vrot.slane %v3490_v22, 4  ;;  %v5985_v63 = vmul.f32 %v9435_v50, %v12367_v31 }
 0x2d0   : > { %v12487_v41 = vpop.eup %9436  ;;  %v12491_v28 = vmul.f32 %v9435_v50, %v12370_v23  ;;  %v3487_v33 = vmax.f32 %v3485_v51, %v3486_v38  ;;  %v2909_v14 = vmax.f32 %v2907_v20, %v2908_v53  ;;  %v5380_v11 = vadd.f32 %v5379_v52, %v5378_v26  ;;  %v9916_v26 = vld [vmem:[%s10237_s27 + $0x5e0] sm:$0xff]  ;;  %v12506_v52 = vpop.f32.mrf.mxu1 }
 0x2d1   : > { %v12493_v9 = vpop.eup %9438  ;;  %v5386_v55 = vrot.slane %v5385_v13, 2  ;;  %v4805_v36 = vsel %vm483_vm0, %v12487_v41, 0.0  ;;  %9448 = vpow2.f32 %v4139_v8  ;;  %v4803_v48 = vrot.slane %v4802_v2, 1  ;;  %v12512_v38 = vpop.f32.mrf.mxu0 }
 0x2d2   : > { %15031 = vst [vmem:[#allocation102_spill] sm:$0xff] %v12491_v28  ;;  %v4806_v1 = vsel %vm483_vm0, %v12493_v9, 0.0  ;;  %v3945_v61 = vsub.f32 %v12418_v27, %v3487_v33  ;;  %v3946_v31 = vsub.f32 %v12395_v40, %v3487_v33  ;;  %v2910_v23 = vrot.slane %v2909_v14, 1  ;;  %v9952_v28 = vld [vmem:[%s10237_s27 + $0x2a0] sm:$0xff] }
 0x2d3   : > { %v5387_v20 = vadd.f32 %v5386_v55, %v5385_v13  ;;  %v4807_v46 = vadd.f32 %v4806_v1, %v4805_v36  ;;  %v3492_v62 = vmax.f32 %v3490_v22, %v3491_v59  ;;  %v12504_v50 = vmul.f32 %v9916_v26, %v5985_v63 }
 0x2d4   : > { %v4397_v16 = vmul.f32 1.442695, %v3945_v61  ;;  %v4399_v24 = vmul.f32 1.442695, %v3946_v31  ;;  %v2911_v19 = vmax.f32 %v2909_v14, %v2910_v23  ;;  %9450 = vrcp.f32 %v5380_v11 }
 0x2d5   : > { %15032 = vst [vmem:[#allocation103_spill] sm:$0xff] %v12504_v50  ;;  %v5388_v10 = vrot.slane %v5387_v20, 1  ;;  %v4808_v27 = vrot.slane %v4807_v46, 4  ;;  %v2913_v40 = vsel %vm483_vm0, %v12485_v39, -inf  ;;  %v3493_v22 = vrot.slane %v3492_v62, 2 }
 0x2d6   : > { %9452 = vpow2.f32 %v4397_v16  ;;  %v3817_v51 = vsub.f32 %v12427_v32, %v2911_v19  ;;  %v3818_v8 = vsub.f32 %v12408_v54, %v2911_v19  ;;  %v4804_v13 = vadd.f32 %v4803_v48, %v4802_v2  ;;  %v12522_v54 = vpop.f32.mrf.mxu1  ;;  %v12528_v48 = vpop.f32.mrf.mxu0 }
 0x2d7   : > { %v12514_v53 = vpop.eup %9440  ;;  %v5389_v59 = vadd.f32 %v5388_v10, %v5387_v20  ;;  %v4809_v63 = vadd.f32 %v4808_v27, %v4807_v46  ;;  %v2912_v33 = vsel %vm483_vm0, %v12501_v15, -inf  ;;  %9454 = vpow2.f32 %v4399_v24 }
 0x2d8   : > { %v12518_v14 = vpop.eup %9442  ;;  %v5390_v11 = vsel %vm483_vm0, %v12514_v53, 0.0  ;;  %v4141_v32 = vmul.f32 1.442695, %v3817_v51  ;;  %v4143_v55 = vmul.f32 1.442695, %v3818_v8  ;;  %v3498_v1 = vsel %vm483_vm0, %v12506_v52, -inf }
 0x2d9   : > { %9456 = vrcp.f32 %v5389_v59  ;;  %v4810_v36 = vrot.slane %v4809_v63, 2  ;;  %v5391_v2 = vsel %vm483_vm0, %v12518_v14, 0.0  ;;  %v3494_v31 = vmax.f32 %v3492_v62, %v3493_v22 }
 0x2da   : > { %v5392_v61 = vadd.f32 %v5391_v2, %v5390_v11  ;;  %9458 = vpow2.f32 %v4141_v32  ;;  %v2914_v23 = vmax.f32 %v2912_v33, %v2913_v40  ;;  %v9445_v20 = vpop.eup %9444  ;;  %v3497_v26 = vsel %vm483_vm0, %v12522_v54, -inf }
 0x2db   : > { %v4811_v46 = vadd.f32 %v4810_v36, %v4809_v63  ;;  %9460 = vpow2.f32 %v4143_v55  ;;  %v2922_v16 = vsel %vm483_vm0, %v12512_v38, -inf  ;;  %v12534_v24 = vpop.eup %9446  ;;  %v3495_v10 = vrot.slane %v3494_v31, 1 }
 0x2dc   : > { %v5393_v19 = vrot.slane %v5392_v61, 4  ;;  %v2915_v27 = vrot.slane %v2914_v23, 4  ;;  %v3499_v51 = vmax.f32 %v3497_v26, %v3498_v1  ;;  %9462 = vrcp.f32 %v4804_v13 }
 0x2dd   : > { %v4812_v62 = vrot.slane %v4811_v46, 1  ;;  %v4814_v40 = vsel %vm483_vm0, %v12534_v24, 0.0  ;;  %v2921_v8 = vsel %vm483_vm0, %v12528_v48, -inf  ;;  %v5857_v59 = vmul.f32 %v9445_v20, %v12399_v34 }
 0x2de   : > { %v12540_v22 = vpop.eup %9448  ;;  %v5394_v63 = vadd.f32 %v5393_v19, %v5392_v61  ;;  %v3496_v33 = vmax.f32 %v3494_v31, %v3495_v10  ;;  %v2916_v11 = vmax.f32 %v2914_v23, %v2915_v27  ;;  %v3500_v36 = vrot.slane %v3499_v51, 4 }
 0x2df   : > { %v4813_v32 = vadd.f32 %v4812_v62, %v4811_v46  ;;  %v4815_v55 = vsel %vm483_vm0, %v12540_v22, 0.0  ;;  %v2923_v13 = vmax.f32 %v2921_v8, %v2922_v16  ;;  %v12552_v16 = vmul.f32 %v9445_v20, %v12410_v29  ;;  %v9917_v8 = vld [vmem:[%s10237_s27 + $0x1e0] sm:$0xff] }
 0x2e0   : > { %v5395_v2 = vrot.slane %v5394_v63, 2  ;;  %v4816_v1 = vadd.f32 %v4815_v55, %v4814_v40  ;;  %v3947_v26 = vsub.f32 %v12463_v57, %v3496_v33  ;;  %v3948_v21 = vsub.f32 %v12444_v30, %v3496_v33 }
 0x2e1   : > { %9464 = vrcp.f32 %v4813_v32  ;;  %v2917_v5 = vrot.slane %v2916_v11, 2  ;;  %v3501_v44 = vmax.f32 %v3499_v51, %v3500_v36  ;;  %v2924_v12 = vrot.slane %v2923_v13, 4  ;;  %v12547_v34 = vpop.eup %9450  ;;  %15034 = vst [vmem:[#allocation105_spill] sm:$0xff] %v12552_v16 }
 0x2e2   : > { %15033 = vst [vmem:[#allocation104_spill] sm:$0xff] %v12547_v34  ;;  %v5396_v61 = vadd.f32 %v5395_v2, %v5394_v63  ;;  %v4817_v31 = vrot.slane %v4816_v1, 4  ;;  %v4401_v23 = vmul.f32 1.442695, %v3947_v26  ;;  %v4403_v46 = vmul.f32 1.442695, %v3948_v21  ;;  %v12567_v2 = vpop.f32.mrf.mxu1 }
 0x2e3   : > { %v12549_v19 = vpop.eup %9452  ;;  %v2918_v10 = vmax.f32 %v2916_v11, %v2917_v5  ;;  %v3502_v57 = vrot.slane %v3501_v44, 2  ;;  %v2925_v27 = vmax.f32 %v2923_v13, %v2924_v12  ;;  %v12559_v63 = vmul.f32 %v9917_v8, %v5857_v59 }
 0x2e4   : > { %v5397_v30 = vrot.slane %v5396_v61, 1  ;;  %v4818_v62 = vadd.f32 %v4817_v31, %v4816_v1  ;;  %v5399_v51 = vsel %vm483_vm0, %v12549_v19, 0.0  ;;  %9466 = vpow2.f32 %v4401_v23  ;;  %v12556_v40 = vpop.eup %9454  ;;  %v9918_v31 = vld [vmem:[%s10237_s27 + $0x600] sm:$0xff] }
 0x2e5   : > { %15035 = vst [vmem:[#allocation106_spill] sm:$0xff] %v12559_v63  ;;  %9468 = vpow2.f32 %v4403_v46  ;;  %v2919_v21 = vrot.slane %v2918_v10, 1  ;;  %v3503_v33 = vmax.f32 %v3501_v44, %v3502_v57  ;;  %v5400_v12 = vsel %vm483_vm0, %v12556_v40, 0.0  ;;  %v9919_v46 = vld [vmem:[%s10237_s27 + $0x608] sm:$0xff] }
 0x2e6   : > { %v9457_v32 = vpop.eup %9456  ;;  %v5398_v29 = vadd.f32 %v5397_v30, %v5396_v61  ;;  %v4819_v5 = vrot.slane %v4818_v62, 2  ;;  %v2926_v20 = vrot.slane %v2925_v27, 2  ;;  %v5401_v59 = vadd.f32 %v5400_v12, %v5399_v51  ;;  %v12584_v12 = vpop.f32.mrf.mxu1 }
 0x2e7   : > { %v12563_v11 = vpop.eup %9458  ;;  %v5989_v55 = vmul.f32 %v9457_v32, %v12467_v37  ;;  %v5990_v36 = vmul.f32 %v9457_v32, %v12474_v49  ;;  %v2920_v13 = vmax.f32 %v2918_v10, %v2919_v21  ;;  %v3504_v61 = vrot.slane %v3503_v33, 1 }
 0x2e8   : > { %v12569_v44 = vpop.eup %9460  ;;  %9470 = vrcp.f32 %v5398_v29  ;;  %v4820_v1 = vadd.f32 %v4819_v5, %v4818_v62  ;;  %v4823_v26 = vsel %vm483_vm0, %v12563_v11, 0.0  ;;  %v5402_v30 = vrot.slane %v5401_v59, 4 }
 0x2e9   : > { %v6245_v23 = vmul.f32 %v9918_v31, %v5989_v55  ;;  %v6246_v57 = vmul.f32 %v9919_v46, %v5990_v36  ;;  %v4824_v37 = vsel %vm483_vm0, %v12569_v44, 0.0  ;;  %v12577_v49 = vpop.eup %9462  ;;  %v3819_v8 = vsub.f32 %v12501_v15, %v2920_v13 }
 0x2ea   : > { %15036 = vst [vmem:[#allocation107_spill] sm:$0xff] %v12577_v49  ;;  %v4821_v10 = vrot.slane %v4820_v1, 1  ;;  %v4825_v51 = vadd.f32 %v4824_v37, %v4823_v26  ;;  %v3820_v62 = vsub.f32 %v12485_v39, %v2920_v13  ;;  %v5403_v32 = vadd.f32 %v5402_v30, %v5401_v59 }
 0x2eb   : > { %v7173_v21 = vsel %vm483_vm0, %v6245_v23, 0.0  ;;  %v3505_v29 = vmax.f32 %v3503_v33, %v3504_v61  ;;  %v3507_v5 = vsel %vm483_vm0, %v12567_v2, -inf  ;;  %v7174_v55 = vsel %vm483_vm0, %v6246_v57, 0.0 }
 0x2ec   : > { %v4822_v36 = vadd.f32 %v4821_v10, %v4820_v1  ;;  %v4826_v31 = vrot.slane %v4825_v51, 4  ;;  %v4145_v46 = vmul.f32 1.442695, %v3819_v8  ;;  %v5404_v63 = vrot.slane %v5403_v32, 2 }
 0x2ed   : > { %v4147_v26 = vmul.f32 1.442695, %v3820_v62  ;;  %v3949_v15 = vsub.f32 %v12522_v54, %v3505_v29  ;;  %v3950_v39 = vsub.f32 %v12506_v52, %v3505_v29  ;;  %v2927_v59 = vmax.f32 %v2925_v27, %v2926_v20  ;;  %v9920_v52 = vld [vmem:[%s10237_s27 + $0x200] sm:$0xff]  ;;  %v9921_v62 = vld [vmem:[%s10237_s27 + $0x208] sm:$0xff] }
 0x2ee   : > { %v9465_v13 = vpop.eup %9464  ;;  %9472 = vrcp.f32 %v4822_v36  ;;  %v4827_v33 = vadd.f32 %v4826_v31, %v4825_v51  ;;  %v3506_v61 = vsel %vm483_vm0, %v12584_v12, -inf  ;;  %v5405_v57 = vadd.f32 %v5404_v63, %v5403_v32  ;;  %v12605_v31 = vpop.f32.mrf.mxu0 }
 0x2ef   : > { %v5861_v23 = vmul.f32 %v9465_v13, %v12487_v41  ;;  %v5862_v1 = vmul.f32 %v9465_v13, %v12493_v9  ;;  %9474 = vpow2.f32 %v4145_v46  ;;  %v7175_v30 = vadd.f32 %v7174_v55, %v7173_v21 }
 0x2f0   : > { %v4828_v37 = vrot.slane %v4827_v33, 2  ;;  %9476 = vpow2.f32 %v4147_v26  ;;  %v4405_v54 = vmul.f32 1.442695, %v3949_v15  ;;  %v5406_v27 = vrot.slane %v5405_v57, 1 }
 0x2f1   : > { %v12593_v10 = vpop.eup %9466  ;;  %v6117_v8 = vmul.f32 %v9920_v52, %v5861_v23  ;;  %v6118_v51 = vmul.f32 %v9921_v62, %v5862_v1  ;;  %v4407_v20 = vmul.f32 1.442695, %v3950_v39  ;;  %v2928_v9 = vrot.slane %v2927_v59, 1 }
 0x2f2   : > { %v12597_v29 = vpop.eup %9468  ;;  %v4829_v36 = vadd.f32 %v4828_v37, %v4827_v33  ;;  %v5408_v41 = vsel %vm483_vm0, %v12593_v10, 0.0  ;;  %9478 = vpow2.f32 %v4405_v54  ;;  %v5407_v32 = vadd.f32 %v5406_v27, %v5405_v57  ;;  %v9922_v27 = vld [vmem:[%s10237_s27 + $0x610] sm:$0xff] }
 0x2f3   : > { %v6597_v63 = vsel %vm483_vm0, %v6117_v8, 0.0  ;;  %v6598_v21 = vsel %vm483_vm0, %v6118_v51, 0.0  ;;  %v5409_v55 = vsel %vm483_vm0, %v12597_v29, 0.0  ;;  %v12609_v46 = vmul.f32 %v12547_v34, %v12432_v35  ;;  %v12615_v51 = vpop.f32.mrf.mxu0  ;;  %v9953_v34 = vld [vmem:[%s10237_s27 + $0x2a8] sm:$0xff] }
 0x2f4   : > { %v4830_v26 = vrot.slane %v4829_v36, 1  ;;  %v5410_v15 = vadd.f32 %v5409_v55, %v5408_v41  ;;  %9480 = vpow2.f32 %v4407_v20  ;;  %v7176_v13 = vrot.slane %v7175_v30, 4  ;;  %v9923_v41 = vld [vmem:[%s10237_s27 + $0x618] sm:$0xff] }
 0x2f5   : > { %15037 = vst [vmem:[#allocation108_spill] sm:$0xff] %v12609_v46  ;;  %v9471_v39 = vpop.eup %9470  ;;  %9482 = vrcp.f32 %v5407_v32  ;;  %v2929_v33 = vmax.f32 %v2927_v59, %v2928_v9  ;;  %v3508_v23 = vmax.f32 %v3506_v61, %v3507_v5  ;;  %v6599_v1 = vadd.f32 %v6598_v21, %v6597_v63 }
 0x2f6   : > { %v5991_v57 = vmul.f32 %v9471_v39, %v12514_v53  ;;  %v5992_v37 = vmul.f32 %v9471_v39, %v12518_v14  ;;  %v4831_v54 = vadd.f32 %v4830_v26, %v4829_v36  ;;  %v5411_v52 = vrot.slane %v5410_v15, 4 }
 0x2f7   : > { %v3821_v35 = vsub.f32 %v12528_v48, %v2929_v33  ;;  %v3822_v8 = vsub.f32 %v12512_v38, %v2929_v33  ;;  %v3509_v62 = vrot.slane %v3508_v23, 4  ;;  %v2931_v5 = vsel %vm483_vm0, %v12605_v31, -inf }
 0x2f8   : > { %v6247_v20 = vmul.f32 %v9922_v27, %v5991_v57  ;;  %v6248_v32 = vmul.f32 %v9923_v41, %v5992_v37  ;;  %9484 = vrcp.f32 %v4831_v54  ;;  %v5412_v53 = vadd.f32 %v5411_v52, %v5410_v15  ;;  %v9924_v54 = vld [vmem:[%s10237_s27 + $0x210] sm:$0xff] }
 0x2f9   : > { %v4149_v59 = vmul.f32 1.442695, %v3821_v35  ;;  %v4151_v14 = vmul.f32 1.442695, %v3822_v8  ;;  %v3510_v61 = vmax.f32 %v3508_v23, %v3509_v62  ;;  %v12623_v48 = vmul.f32 %v12577_v49, %v12452_v60  ;;  %v9925_v35 = vld [vmem:[%s10237_s27 + $0x218] sm:$0xff] }
 0x2fa   : > { %v12625_v38 = vadd.f32 %v7176_v13, %v7175_v30  ;;  %v7182_v36 = vsel %vm483_vm0, %v6247_v20, 0.0  ;;  %v2930_v9 = vsel %vm483_vm0, %v12615_v51, -inf  ;;  %v7183_v21 = vsel %vm483_vm0, %v6248_v32, 0.0 }
 0x2fb   : > { %15038 = vst [vmem:[#allocation109_spill] sm:$0xff] %v12623_v48  ;;  %v9473_v63 = vpop.eup %9472  ;;  %v5413_v55 = vrot.slane %v5412_v53, 2  ;;  %9486 = vpow2.f32 %v4149_v59  ;;  %v3511_v26 = vrot.slane %v3510_v61, 2  ;;  %v2932_v39 = vmax.f32 %v2930_v9, %v2931_v5  ;;  %v12645_v5 = vpop.f32.mrf.mxu1 }
 0x2fc   : > { %15039 = vst [vmem:[#allocation110_spill] sm:$0xff] %v12625_v38  ;;  %v12631_v15 = vpop.eup %9474  ;;  %v5863_v60 = vmul.f32 %v9473_v63, %v12534_v24  ;;  %v5864_v30 = vmul.f32 %v9473_v63, %v12540_v22  ;;  %9488 = vpow2.f32 %v4151_v14  ;;  %v6600_v33 = vrot.slane %v6599_v1, 4 }
 0x2fd   : > { %v12635_v13 = vpop.eup %9476  ;;  %v5414_v23 = vadd.f32 %v5413_v55, %v5412_v53  ;;  %v4832_v57 = vsel %vm483_vm0, %v12631_v15, 0.0  ;;  %v3512_v37 = vmax.f32 %v3510_v61, %v3511_v26  ;;  %v2933_v24 = vrot.slane %v2932_v39, 4 }
 0x2fe   : > { %v6119_v52 = vmul.f32 %v9924_v54, %v5863_v60  ;;  %v6120_v8 = vmul.f32 %v9925_v35, %v5864_v30  ;;  %v4833_v62 = vsel %vm483_vm0, %v12635_v13, 0.0  ;;  %v7184_v22 = vadd.f32 %v7183_v21, %v7182_v36 }
 0x2ff   : > { %v12643_v27 = vpop.eup %9478  ;;  %v5415_v20 = vrot.slane %v5414_v23, 1  ;;  %v4834_v41 = vadd.f32 %v4833_v62, %v4832_v57  ;;  %v3513_v32 = vrot.slane %v3512_v37, 1  ;;  %v2934_v61 = vmax.f32 %v2932_v39, %v2933_v24 }
 0x300   : > { %v6606_v53 = vsel %vm483_vm0, %v6119_v52, 0.0  ;;  %v6607_v59 = vsel %vm483_vm0, %v6120_v8, 0.0  ;;  %v5417_v14 = vsel %vm483_vm0, %v12643_v27, 0.0  ;;  %v12653_v21 = vadd.f32 %v6600_v33, %v6599_v1  ;;  %v12663_v33 = vpop.f32.mrf.mxu1 }
 0x301   : > { %v12651_v9 = vpop.eup %9480  ;;  %v6608_v63 = vadd.f32 %v6607_v59, %v6606_v53  ;;  %v5416_v55 = vadd.f32 %v5415_v20, %v5414_v23  ;;  %v4835_v26 = vrot.slane %v4834_v41, 4  ;;  %v3514_v60 = vmax.f32 %v3512_v37, %v3513_v32  ;;  %v9926_v20 = vld [vmem:[%s10237_s27 + $0x620] sm:$0xff]  ;;  %v9927_v53 = vld [vmem:[%s10237_s27 + $0x628] sm:$0xff] }
 0x302   : > { %v9483_v36 = vpop.eup %9482  ;;  %15040 = vst [vmem:[#allocation111_spill] sm:$0xff] %v12653_v21  ;;  %v5418_v30 = vsel %vm483_vm0, %v12651_v9, 0.0  ;;  %v3516_v57 = vsel %vm483_vm0, %v12645_v5, -inf  ;;  %v2935_v54 = vrot.slane %v2934_v61, 2  ;;  %v7185_v52 = vrot.slane %v7184_v22, 4 }
 0x303   : > { %v5993_v39 = vmul.f32 %v9483_v36, %v12549_v19  ;;  %v5994_v35 = vmul.f32 %v9483_v36, %v12556_v40  ;;  %9490 = vrcp.f32 %v5416_v55  ;;  %v4836_v23 = vadd.f32 %v4835_v26, %v4834_v41 }
 0x304   : > { %v5419_v37 = vadd.f32 %v5418_v30, %v5417_v14  ;;  %v3951_v8 = vsub.f32 %v12584_v12, %v3514_v60  ;;  %v3952_v1 = vsub.f32 %v12567_v2, %v3514_v60  ;;  %v6609_v24 = vrot.slane %v6608_v63, 4  ;;  %v12669_v12 = vpop.f32.mrf.mxu0 }
 0x305   : > { %v9485_v62 = vpop.eup %9484  ;;  %v6249_v32 = vmul.f32 %v9926_v20, %v5993_v39  ;;  %v6250_v59 = vmul.f32 %v9927_v53, %v5994_v35  ;;  %v2936_v19 = vmax.f32 %v2934_v61, %v2935_v54  ;;  %v4837_v14 = vrot.slane %v4836_v23, 2  ;;  %v9928_v39 = vld [vmem:[%s10237_s27 + $0x220] sm:$0xff]  ;;  %v9929_v61 = vld [vmem:[%s10237_s27 + $0x228] sm:$0xff] }
 0x306   : > { %v5865_v40 = vmul.f32 %v9485_v62, %v12563_v11  ;;  %v5866_v41 = vmul.f32 %v9485_v62, %v12569_v44  ;;  %v5420_v55 = vrot.slane %v5419_v37, 4  ;;  %v12671_v2 = vadd.f32 %v7185_v52, %v7184_v22  ;;  %v12681_v62 = vpop.f32.mrf.mxu1 }
 0x307   : > { %v4409_v26 = vmul.f32 1.442695, %v3951_v8  ;;  %v4411_v60 = vmul.f32 1.442695, %v3952_v1  ;;  %v3515_v36 = vsel %vm483_vm0, %v12663_v33, -inf  ;;  %v4838_v11 = vadd.f32 %v4837_v14, %v4836_v23 }
 0x308   : > { %15041 = vst [vmem:[#allocation112_spill] sm:$0xff] %v12671_v2  ;;  %v12675_v30 = vpop.eup %9486  ;;  %v6121_v35 = vmul.f32 %v9928_v39, %v5865_v40  ;;  %v6122_v54 = vmul.f32 %v9929_v61, %v5866_v41  ;;  %v2940_v44 = vsel %vm483_vm0, %v12669_v12, -inf  ;;  %v5421_v22 = vadd.f32 %v5420_v55, %v5419_v37  ;;  %v12691_v41 = vpop.f32.mrf.mxu0 }
 0x309   : > { %v12683_v20 = vpop.eup %9488  ;;  %v4841_v52 = vsel %vm483_vm0, %v12675_v30, 0.0  ;;  %9492 = vpow2.f32 %v4409_v26  ;;  %v2937_v8 = vrot.slane %v2936_v19, 1  ;;  %v12687_v1 = vadd.f32 %v6609_v24, %v6608_v63  ;;  %v12696_v63 = vpop.f32.mrf.mxu1 }
 0x30a   : > { %v7191_v53 = vsel %vm483_vm0, %v6249_v32, 0.0  ;;  %v7192_v40 = vsel %vm483_vm0, %v6250_v59, 0.0  ;;  %v4839_v23 = vrot.slane %v4838_v11, 1  ;;  %v6615_v14 = vsel %vm483_vm0, %v6121_v35, 0.0 }
 0x30b   : > { %15042 = vst [vmem:[#allocation113_spill] sm:$0xff] %v12687_v1  ;;  %v5422_v39 = vrot.slane %v5421_v22, 2  ;;  %v4842_v37 = vsel %vm483_vm0, %v12683_v20, 0.0  ;;  %9494 = vpow2.f32 %v4411_v60  ;;  %v2938_v26 = vmax.f32 %v2936_v19, %v2937_v8  ;;  %v9930_v1 = vld [vmem:[%s10237_s27 + $0x630] sm:$0xff] }
 0x30c   : > { %v4840_v55 = vadd.f32 %v4839_v23, %v4838_v11  ;;  %v4843_v61 = vadd.f32 %v4842_v37, %v4841_v52  ;;  %v3517_v48 = vmax.f32 %v3515_v36, %v3516_v57  ;;  %v6616_v24 = vsel %vm483_vm0, %v6122_v54, 0.0 }
 0x30d   : > { %v5423_v32 = vadd.f32 %v5422_v39, %v5421_v22  ;;  %v3525_v59 = vsel %vm483_vm0, %v12681_v62, -inf  ;;  %v2939_v35 = vsel %vm483_vm0, %v12691_v41, -inf  ;;  %v3823_v49 = vsub.f32 %v12615_v51, %v2938_v26  ;;  %v12707_v39 = vpop.f32.mrf.mxu0 }
 0x30e   : > { %9496 = vrcp.f32 %v4840_v55  ;;  %v4844_v16 = vrot.slane %v4843_v61, 4  ;;  %v3824_v60 = vsub.f32 %v12605_v31, %v2938_v26  ;;  %v3518_v19 = vrot.slane %v3517_v48, 4 }
 0x30f   : > { %v5424_v11 = vrot.slane %v5423_v32, 1  ;;  %v2941_v57 = vmax.f32 %v2939_v35, %v2940_v44  ;;  %v3524_v36 = vsel %vm483_vm0, %v12696_v63, -inf  ;;  %v4153_v52 = vmul.f32 1.442695, %v3823_v49 }
 0x310   : > { %v9491_v54 = vpop.eup %9490  ;;  %v4845_v22 = vadd.f32 %v4844_v16, %v4843_v61  ;;  %v4155_v8 = vmul.f32 1.442695, %v3824_v60  ;;  %v3526_v23 = vmax.f32 %v3524_v36, %v3525_v59  ;;  %v3519_v55 = vmax.f32 %v3517_v48, %v3518_v19  ;;  %v12713_v60 = vpop.f32.mrf.mxu0 }
 0x311   : > { %v5995_v37 = vmul.f32 %v9491_v54, %v12593_v10  ;;  %v5996_v51 = vmul.f32 %v9491_v54, %v12597_v29  ;;  %v5425_v31 = vadd.f32 %v5424_v11, %v5423_v32  ;;  %9498 = vpow2.f32 %v4153_v52 }
 0x312   : > { %v4846_v26 = vrot.slane %v4845_v22, 2  ;;  %v2942_v44 = vrot.slane %v2941_v57, 4  ;;  %v3527_v35 = vrot.slane %v3526_v23, 4  ;;  %v3520_v16 = vrot.slane %v3519_v55, 2 }
 0x313   : > { %v6251_v21 = vmul.f32 %v9930_v1, %v5995_v37  ;;  %v6252_v0 = vmul.f32 %v9931_v43, %v5996_v51  ;;  %9500 = vrcp.f32 %v5425_v31  ;;  %v12715_v10 = vadd.f32 %v7192_v40, %v7191_v53  ;;  %v12727_v40 = vpop.f32.mrf.mxu1 }
 0x314   : > { %v4847_v49 = vadd.f32 %v4846_v26, %v4845_v22  ;;  %9502 = vpow2.f32 %v4155_v8  ;;  %v2943_v61 = vmax.f32 %v2941_v57, %v2942_v44  ;;  %v3528_v59 = vmax.f32 %v3526_v23, %v3527_v35 }
 0x315   : > { %15043 = vst [vmem:[#allocation114_spill] sm:$0xff] %v12715_v10  ;;  %v12717_v29 = vadd.f32 %v6616_v24, %v6615_v14  ;;  %v3521_v48 = vmax.f32 %v3519_v55, %v3520_v16  ;;  %v2949_v32 = vsel %vm483_vm0, %v12707_v39, -inf  ;;  %v7200_v43 = vsel %vm483_vm0, %v6251_v21, 0.0 }
 0x316   : > { %v12721_v11 = vpop.eup %9492  ;;  %v4848_v1 = vrot.slane %v4847_v49, 1  ;;  %v2944_v19 = vrot.slane %v2943_v61, 2  ;;  %v3529_v36 = vrot.slane %v3528_v59, 2  ;;  %v7201_v57 = vsel %vm483_vm0, %v6252_v0, 0.0 }
 0x317   : > { %15044 = vst [vmem:[#allocation115_spill] sm:$0xff] %v12717_v29  ;;  %v5426_v54 = vsel %vm483_vm0, %v12721_v11, 0.0  ;;  %v3522_v53 = vrot.slane %v3521_v48, 1  ;;  %v2948_v14 = vsel %vm483_vm0, %v12713_v60, -inf  ;;  %v12737_v31 = vadd.f32 %v7201_v57, %v7200_v43 }
 0x318   : > { %v12731_v24 = vpop.eup %9494  ;;  %v4849_v22 = vadd.f32 %v4848_v1, %v4847_v49  ;;  %v2945_v52 = vmax.f32 %v2943_v61, %v2944_v19  ;;  %v3530_v8 = vmax.f32 %v3528_v59, %v3529_v36  ;;  %v2950_v21 = vmax.f32 %v2948_v14, %v2949_v32  ;;  %v12741_v59 = vpop.f32.mrf.mxu1 }
 0x319   : > { %v5427_v0 = vsel %vm483_vm0, %v12731_v24, 0.0  ;;  %v3523_v51 = vmax.f32 %v3521_v48, %v3522_v53  ;;  %15045 = vst [vmem:[#allocation116_spill] sm:$0xff] %v12737_v31  ;;  %v9932_v53 = vld [vmem:[%s10237_s27 + $0x230] sm:$0xff] }
 0x31a   : > { %v5428_v55 = vadd.f32 %v5427_v0, %v5426_v54  ;;  %v2946_v26 = vrot.slane %v2945_v52, 1  ;;  %v3531_v44 = vrot.slane %v3530_v8, 1  ;;  %9504 = vrcp.f32 %v4849_v22 }
 0x31b   : > { %v9497_v35 = vpop.eup %9496  ;;  %v3953_v16 = vsub.f32 %v12663_v33, %v3523_v51  ;;  %v3954_v49 = vsub.f32 %v12645_v5, %v3523_v51  ;;  %v2951_v61 = vrot.slane %v2950_v21, 4  ;;  %v3534_v54 = vsel %vm483_vm0, %v12727_v40, -inf }
 0x31c   : > { %v5867_v32 = vmul.f32 %v9497_v35, %v12631_v15  ;;  %v5868_v48 = vmul.f32 %v9497_v35, %v12635_v13  ;;  %v5429_v43 = vrot.slane %v5428_v55, 4  ;;  %v2947_v1 = vmax.f32 %v2945_v52, %v2946_v26  ;;  %v9933_v15 = vld [vmem:[%s10237_s27 + $0x238] sm:$0xff]  ;;  %v12759_v35 = vpop.f32.mrf.mxu0 }
 0x31d   : > { %v4413_v19 = vmul.f32 1.442695, %v3953_v16  ;;  %v4415_v36 = vmul.f32 1.442695, %v3954_v49  ;;  %v3532_v57 = vmax.f32 %v3530_v8, %v3531_v44  ;;  %v3533_v22 = vsel %vm483_vm0, %v12741_v59, -inf }
 0x31e   : > { %v6123_v33 = vmul.f32 %v9932_v53, %v5867_v32  ;;  %v5430_v14 = vadd.f32 %v5429_v43, %v5428_v55  ;;  %v3825_v5 = vsub.f32 %v12691_v41, %v2947_v1  ;;  %v12751_v0 = vpop.eup %9498  ;;  %v6124_v13 = vmul.f32 %v9933_v15, %v5868_v48  ;;  %v12772_v53 = vpop.f32.mrf.mxu0  ;;  %v9934_v15 = vld [vmem:[%s10237_s27 + $0x640] sm:$0xff] }
 0x31f   : > { %9506 = vpow2.f32 %v4413_v19  ;;  %v3826_v52 = vsub.f32 %v12669_v12, %v2947_v1  ;;  %v3955_v8 = vsub.f32 %v12696_v63, %v3532_v57  ;;  %v4850_v44 = vsel %vm483_vm0, %v12751_v0, 0.0 }
 0x320   : > { %v9501_v51 = vpop.eup %9500  ;;  %v5431_v26 = vrot.slane %v5430_v14, 2  ;;  %v3956_v55 = vsub.f32 %v12681_v62, %v3532_v57  ;;  %v2952_v41 = vmax.f32 %v2950_v21, %v2951_v61  ;;  %9508 = vpow2.f32 %v4415_v36  ;;  %v12768_v62 = vpop.f32.mrf.mxu1 }
 0x321   : > { %v12761_v16 = vpop.eup %9502  ;;  %v5997_v49 = vmul.f32 %v9501_v51, %v12643_v27  ;;  %v3535_v32 = vmax.f32 %v3533_v22, %v3534_v54  ;;  %v2958_v12 = vsel %vm483_vm0, %v12759_v35, -inf  ;;  %v4157_v43 = vmul.f32 1.442695, %v3825_v5 }
 0x322   : > { %v5432_v63 = vadd.f32 %v5431_v26, %v5430_v14  ;;  %v4851_v48 = vsel %vm483_vm0, %v12761_v16, 0.0  ;;  %v4159_v1 = vmul.f32 1.442695, %v3826_v52  ;;  %v6624_v21 = vsel %vm483_vm0, %v6123_v33, 0.0 }
 0x323   : > { %v6625_v61 = vsel %vm483_vm0, %v6124_v13, 0.0  ;;  %v4852_v19 = vadd.f32 %v4851_v48, %v4850_v44  ;;  %v4417_v27 = vmul.f32 1.442695, %v3955_v8  ;;  %9510 = vpow2.f32 %v4157_v43  ;;  %v12776_v13 = vpop.f32.mrf.mxu1 }
 0x324   : > { %v5433_v36 = vrot.slane %v5432_v63, 1  ;;  %v4419_v57 = vmul.f32 1.442695, %v3956_v55  ;;  %v2953_v54 = vrot.slane %v2952_v41, 2  ;;  %v5998_v14 = vmul.f32 %v9501_v51, %v12651_v9 }
 0x325   : > { %v4853_v22 = vrot.slane %v4852_v19, 4  ;;  %9512 = vpow2.f32 %v4159_v1  ;;  %v3536_v5 = vrot.slane %v3535_v32, 4  ;;  %v6253_v52 = vmul.f32 %v9934_v15, %v5997_v49 }
 0x326   : > { %v5434_v26 = vadd.f32 %v5433_v36, %v5432_v63  ;;  %9514 = vpow2.f32 %v4417_v27  ;;  %v2954_v33 = vmax.f32 %v2952_v41, %v2953_v54  ;;  %v2957_v55 = vsel %vm483_vm0, %v12772_v53, -inf }
 0x327   : > { %v4854_v8 = vadd.f32 %v4853_v22, %v4852_v19  ;;  %9516 = vpow2.f32 %v4419_v57  ;;  %v3537_v44 = vmax.f32 %v3535_v32, %v3536_v5  ;;  %v9505_v48 = vpop.eup %9504  ;;  %v12780_v43 = vadd.f32 %v6625_v61, %v6624_v21  ;;  %v12786_v19 = vpop.f32.mrf.mxu0  ;;  %v9935_v32 = vld [vmem:[%s10237_s27 + $0x648] sm:$0xff] }
 0x328   : > { %9518 = vrcp.f32 %v5434_v26  ;;  %v2955_v9 = vrot.slane %v2954_v33, 1  ;;  %v3543_v51 = vsel %vm483_vm0, %v12768_v62, -inf  ;;  %v2959_v41 = vmax.f32 %v2957_v55, %v2958_v12 }
 0x329   : > { %15046 = vst [vmem:[#allocation117_spill] sm:$0xff] %v12780_v43  ;;  %v4855_v49 = vrot.slane %v4854_v8, 2  ;;  %v3538_v63 = vrot.slane %v3537_v44, 2  ;;  %v3542_v1 = vsel %vm483_vm0, %v12776_v13, -inf  ;;  %v12789_v27 = vmul.f32 %v9935_v32, %v5998_v14 }
 0x32a   : > { %v12792_v36 = vsel %vm483_vm0, %v6253_v52, 0.0  ;;  %v2956_v21 = vmax.f32 %v2954_v33, %v2955_v9  ;;  %v3544_v61 = vmax.f32 %v3542_v1, %v3543_v51  ;;  %v5869_v57 = vmul.f32 %v9505_v48, %v12675_v30  ;;  %v12804_v30 = vpop.f32.mrf.mxu0 }
 0x32b   : > { %15047 = vst [vmem:[#allocation118_spill] sm:$0xff] %v12789_v27  ;;  %15048 = vst [vmem:[#allocation119_spill] sm:$0xff] %v12792_v36  ;;  %v4856_v54 = vadd.f32 %v4855_v49, %v4854_v8  ;;  %v3539_v22 = vmax.f32 %v3537_v44, %v3538_v63  ;;  %v2960_v5 = vrot.slane %v2959_v41, 4  ;;  %v12798_v12 = vmul.f32 %v9505_v48, %v12683_v20 }
 0x32c   : > { %v12795_v15 = vpop.eup %9506  ;;  %v3827_v26 = vsub.f32 %v12713_v60, %v2956_v21  ;;  %v3828_v14 = vsub.f32 %v12707_v39, %v2956_v21  ;;  %v3545_v55 = vrot.slane %v3544_v61, 4  ;;  %v2967_v20 = vsel %vm483_vm0, %v12786_v19, -inf }
 0x32d   : > { %v4857_v32 = vrot.slane %v4856_v54, 1  ;;  %v5435_v52 = vsel %vm483_vm0, %v12795_v15, 0.0  ;;  %v3540_v33 = vrot.slane %v3539_v22, 1  ;;  %v2961_v9 = vmax.f32 %v2959_v41, %v2960_v5  ;;  %v12806_v8 = vpop.eup %9508 }
 0x32e   : > { %v4161_v44 = vmul.f32 1.442695, %v3827_v26  ;;  %v4163_v51 = vmul.f32 1.442695, %v3828_v14  ;;  %v3546_v49 = vmax.f32 %v3544_v61, %v3545_v55  ;;  %v5436_v39 = vsel %vm483_vm0, %v12806_v8, 0.0 }
 0x32f   : > { %v4858_v60 = vadd.f32 %v4857_v32, %v4856_v54  ;;  %v3541_v48 = vmax.f32 %v3539_v22, %v3540_v33  ;;  %v2962_v63 = vrot.slane %v2961_v9, 2  ;;  %v5437_v1 = vadd.f32 %v5436_v39, %v5435_v52  ;;  %v12826_v39 = vpop.f32.mrf.mxu1 }
 0x330   : > { %9520 = vpow2.f32 %v4161_v44  ;;  %v3547_v21 = vrot.slane %v3546_v49, 2  ;;  %v2966_v41 = vsel %vm483_vm0, %v12804_v30, -inf  ;;  %v12814_v5 = vpop.eup %9510  ;;  %v3552_v42 = vsel %vm483_vm0, %v12826_v39, -inf }
 0x331   : > { %9522 = vrcp.f32 %v4858_v60  ;;  %v3957_v61 = vsub.f32 %v12741_v59, %v3541_v48  ;;  %v3958_v26 = vsub.f32 %v12727_v40, %v3541_v48  ;;  %v2963_v14 = vmax.f32 %v2961_v9, %v2962_v63 }
 0x332   : > { %v12818_v54 = vpop.eup %9512  ;;  %v5438_v55 = vrot.slane %v5437_v1, 4  ;;  %v4859_v22 = vsel %vm483_vm0, %v12814_v5, 0.0  ;;  %9524 = vpow2.f32 %v4163_v51  ;;  %v3548_v32 = vmax.f32 %v3546_v49, %v3547_v21 }
 0x333   : > { %v12822_v52 = vpop.eup %9514  ;;  %v4860_v33 = vsel %vm483_vm0, %v12818_v54, 0.0  ;;  %v4421_v44 = vmul.f32 1.442695, %v3957_v61  ;;  %v4423_v60 = vmul.f32 1.442695, %v3958_v26  ;;  %v2964_v59 = vrot.slane %v2963_v14, 1 }
 0x334   : > { %v12828_v40 = vpop.eup %9516  ;;  %v5439_v9 = vadd.f32 %v5438_v55, %v5437_v1  ;;  %v4861_v48 = vadd.f32 %v4860_v33, %v4859_v22  ;;  %v5444_v63 = vsel %vm483_vm0, %v12822_v52, 0.0  ;;  %v3549_v51 = vrot.slane %v3548_v32, 1  ;;  %v9936_v61 = vld [vmem:[%s10237_s27 + $0x240] sm:$0xff] }
 0x335   : > { %15049 = vst [vmem:[#allocation120_spill] sm:$0xff] %v12828_v40  ;;  %v9519_v49 = vpop.eup %9518  ;;  %v5445_v21 = vsel %vm483_vm0, %v12828_v40, 0.0  ;;  %9526 = vpow2.f32 %v4421_v44  ;;  %v2965_v37 = vmax.f32 %v2963_v14, %v2964_v59  ;;  %v2968_v23 = vmax.f32 %v2966_v41, %v2967_v20  ;;  %v12840_v14 = vpop.f32.mrf.mxu1 }
 0x336   : > { %v6125_v26 = vmul.f32 %v9936_v61, %v5869_v57  ;;  %v5440_v43 = vrot.slane %v5439_v9, 2  ;;  %v4862_v29 = vrot.slane %v4861_v48, 4  ;;  %v5446_v1 = vadd.f32 %v5445_v21, %v5444_v63 }
 0x337   : > { %9528 = vpow2.f32 %v4423_v60  ;;  %v3829_v55 = vsub.f32 %v12772_v53, %v2965_v37  ;;  %v3830_v22 = vsub.f32 %v12759_v35, %v2965_v37  ;;  %v5999_v33 = vmul.f32 %v9519_v49, %v12721_v11  ;;  %v12846_v11 = vpop.f32.mrf.mxu0 }
 0x338   : > { %v5441_v25 = vadd.f32 %v5440_v43, %v5439_v9  ;;  %v4863_v45 = vadd.f32 %v4862_v29, %v4861_v48  ;;  %v3550_v44 = vmax.f32 %v3548_v32, %v3549_v51  ;;  %v5447_v20 = vrot.slane %v5446_v1, 4 }
 0x339   : > { %v4165_v57 = vmul.f32 1.442695, %v3829_v55  ;;  %v4167_v41 = vmul.f32 1.442695, %v3830_v22  ;;  %v2969_v59 = vrot.slane %v2968_v23, 4  ;;  %v3551_v29 = vsel %vm483_vm0, %v12840_v14, -inf }
 0x33a   : > { %v5442_v61 = vrot.slane %v5441_v25, 1  ;;  %v4864_v50 = vrot.slane %v4863_v45, 2  ;;  %v3959_v63 = vsub.f32 %v12776_v13, %v3550_v44  ;;  %v3960_v60 = vsub.f32 %v12768_v62, %v3550_v44  ;;  %v12850_v62 = vpop.f32.mrf.mxu1 }
 0x33b   : > { %v5448_v53 = vadd.f32 %v5447_v20, %v5446_v1  ;;  %9530 = vpow2.f32 %v4165_v57  ;;  %v2970_v37 = vmax.f32 %v2968_v23, %v2969_v59  ;;  %v3553_v21 = vmax.f32 %v3551_v29, %v3552_v42  ;;  %v9937_v23 = vld [vmem:[%s10237_s27 + $0x248] sm:$0xff]  ;;  %v12866_v20 = vpop.f32.mrf.mxu0  ;;  %v9938_v59 = vld [vmem:[%s10237_s27 + $0x650] sm:$0xff] }
 0x33c   : > { %v5443_v35 = vadd.f32 %v5442_v61, %v5441_v25  ;;  %v4865_v43 = vadd.f32 %v4864_v50, %v4863_v45  ;;  %9532 = vpow2.f32 %v4167_v41  ;;  %v4425_v32 = vmul.f32 1.442695, %v3959_v63 }
 0x33d   : > { %v12848_v9 = vpop.eup %9520  ;;  %v5449_v48 = vrot.slane %v5448_v53, 2  ;;  %v4427_v51 = vmul.f32 1.442695, %v3960_v60  ;;  %v2971_v13 = vrot.slane %v2970_v37, 2  ;;  %v12854_v55 = vmul.f32 %v9937_v23, %v12798_v12 }
 0x33e   : > { %v9523_v1 = vpop.eup %9522  ;;  %9534 = vrcp.f32 %v5443_v35  ;;  %v4866_v22 = vrot.slane %v4865_v43, 1  ;;  %v4868_v45 = vsel %vm483_vm0, %v12848_v9, 0.0  ;;  %v12861_v50 = vsel %vm483_vm0, %v6125_v26, 0.0 }
 0x33f   : > { %15050 = vst [vmem:[#allocation121_spill] sm:$0xff] %v12854_v55  ;;  %v12858_v25 = vpop.eup %9524  ;;  %15052 = vst [vmem:[#allocation123_spill] sm:$0xff] %v12861_v50  ;;  %v12864_v42 = vmul.f32 %v9519_v49, %v12731_v24  ;;  %v5450_v44 = vadd.f32 %v5449_v48, %v5448_v53  ;;  %9536 = vpow2.f32 %v4425_v32  ;;  %v2972_v41 = vmax.f32 %v2970_v37, %v2971_v13  ;;  %v12875_v24 = vpop.f32.mrf.mxu1 }
 0x340   : > { %15051 = vst [vmem:[#allocation122_spill] sm:$0xff] %v12858_v25  ;;  %v4867_v57 = vadd.f32 %v4866_v22, %v4865_v43  ;;  %v4869_v12 = vsel %vm483_vm0, %v12858_v25, 0.0  ;;  %9538 = vpow2.f32 %v4427_v51  ;;  %v12871_v61 = vmul.f32 %v9938_v59, %v5999_v33  ;;  %v9939_v25 = vld [vmem:[%s10237_s27 + $0x250] sm:$0xff] }
 0x341   : > { %15053 = vst [vmem:[#allocation124_spill] sm:$0xff] %v12864_v42  ;;  %v4870_v63 = vadd.f32 %v4869_v12, %v4868_v45  ;;  %v3554_v60 = vrot.slane %v3553_v21, 4  ;;  %v2976_v26 = vsel %vm483_vm0, %v12846_v11, -inf  ;;  %v5871_v53 = vmul.f32 %v9523_v1, %v12751_v0 }
 0x342   : > { %15054 = vst [vmem:[#allocation125_spill] sm:$0xff] %v12871_v61  ;;  %v12877_v49 = vpop.eup %9526  ;;  %v12881_v29 = vmul.f32 %v9523_v1, %v12761_v16  ;;  %v2973_v35 = vrot.slane %v2972_v41, 1  ;;  %v2975_v37 = vsel %vm483_vm0, %v12866_v20, -inf  ;;  %v5451_v33 = vrot.slane %v5450_v44, 1 }
 0x343   : > { %v4871_v43 = vrot.slane %v4870_v63, 4  ;;  %v5453_v32 = vsel %vm483_vm0, %v12877_v49, 0.0  ;;  %v3555_v48 = vmax.f32 %v3553_v21, %v3554_v60  ;;  %9540 = vrcp.f32 %v4867_v57 }
 0x344   : > { %15055 = vst [vmem:[#allocation126_spill] sm:$0xff] %v12881_v29  ;;  %v12887_v51 = vpop.eup %9528  ;;  %v2974_v13 = vmax.f32 %v2972_v41, %v2973_v35  ;;  %v2977_v23 = vmax.f32 %v2975_v37, %v2976_v26  ;;  %v3560_v0 = vsel %vm483_vm0, %v12875_v24, -inf  ;;  %v3561_v45 = vsel %vm483_vm0, %v12850_v62, -inf }
 0x345   : > { %v4872_v16 = vadd.f32 %v4871_v43, %v4870_v63  ;;  %v5454_v1 = vsel %vm483_vm0, %v12887_v51, 0.0  ;;  %v3556_v22 = vrot.slane %v3555_v48, 2  ;;  %v5452_v41 = vadd.f32 %v5451_v33, %v5450_v44 }
 0x346   : > { %v5455_v12 = vadd.f32 %v5454_v1, %v5453_v32  ;;  %v3831_v21 = vsub.f32 %v12804_v30, %v2974_v13  ;;  %v3832_v59 = vsub.f32 %v12786_v19, %v2974_v13  ;;  %v2978_v57 = vrot.slane %v2977_v23, 4 }
 0x347   : > { %v4873_v60 = vrot.slane %v4872_v16, 2  ;;  %v3557_v26 = vmax.f32 %v3555_v48, %v3556_v22  ;;  %v3562_v35 = vmax.f32 %v3560_v0, %v3561_v45  ;;  %v12902_v58 = vmul.f32 %v9939_v25, %v5871_v53  ;;  %v12908_v22 = vpop.f32.mrf.mxu0 }
 0x348   : > { %v12897_v37 = vpop.eup %9530  ;;  %v5456_v63 = vrot.slane %v5455_v12, 4  ;;  %v4169_v43 = vmul.f32 1.442695, %v3831_v21  ;;  %v4171_v50 = vmul.f32 1.442695, %v3832_v59  ;;  %v2979_v55 = vmax.f32 %v2977_v23, %v2978_v57 }
 0x349   : > { %v12899_v29 = vpop.eup %9532  ;;  %15056 = vst [vmem:[#allocation127_spill] sm:$0xff] %v12902_v58  ;;  %v4874_v32 = vadd.f32 %v4873_v60, %v4872_v16  ;;  %v4877_v19 = vsel %vm483_vm0, %v12897_v37, 0.0  ;;  %v3558_v30 = vrot.slane %v3557_v26, 1  ;;  %v3563_v16 = vrot.slane %v3562_v35, 4  ;;  %v12919_v60 = vpop.f32.mrf.mxu1 }
 0x34a   : > { %v5457_v44 = vadd.f32 %v5456_v63, %v5455_v12  ;;  %v4878_v33 = vsel %vm483_vm0, %v12899_v29, 0.0  ;;  %9542 = vpow2.f32 %v4169_v43  ;;  %v2980_v48 = vrot.slane %v2979_v55, 2 }
 0x34b   : > { %v9535_v13 = vpop.eup %9534  ;;  %v4875_v0 = vrot.slane %v4874_v32, 1  ;;  %v4879_v1 = vadd.f32 %v4878_v33, %v4877_v19  ;;  %9544 = vpow2.f32 %v4171_v50  ;;  %v3559_v23 = vmax.f32 %v3557_v26, %v3558_v30 }
 0x34c   : > { %v12910_v25 = vpop.eup %9536  ;;  %9546 = vrcp.f32 %v5452_v41  ;;  %v5458_v53 = vrot.slane %v5457_v44, 2  ;;  %v2985_v45 = vsel %vm483_vm0, %v12908_v22, -inf  ;;  %v2981_v50 = vmax.f32 %v2979_v55, %v2980_v48 }
 0x34d   : > { %v12914_v12 = vpop.eup %9538  ;;  %v4880_v21 = vrot.slane %v4879_v1, 4  ;;  %v5462_v59 = vsel %vm483_vm0, %v12910_v25, 0.0  ;;  %v3961_v57 = vsub.f32 %v12840_v14, %v3559_v23  ;;  %v6001_v26 = vmul.f32 %v9535_v13, %v12795_v15  ;;  %v12930_v15 = vpop.f32.mrf.mxu0 }
 0x34e   : > { %v5459_v63 = vadd.f32 %v5458_v53, %v5457_v44  ;;  %v5463_v41 = vsel %vm483_vm0, %v12914_v12, 0.0  ;;  %v3962_v43 = vsub.f32 %v12826_v39, %v3559_v23  ;;  %v4876_v19 = vadd.f32 %v4875_v0, %v4874_v32  ;;  %v12932_v23 = vpop.f32.mrf.mxu1  ;;  %v9940_v32 = vld [vmem:[%s10237_s27 + $0x660] sm:$0xff] }
 0x34f   : > { %v4881_v30 = vadd.f32 %v4880_v21, %v4879_v1  ;;  %v5464_v33 = vadd.f32 %v5463_v41, %v5462_v59  ;;  %v4429_v58 = vmul.f32 1.442695, %v3961_v57  ;;  %v12926_v7 = vmul.f32 %v9535_v13, %v12806_v8 }
 0x350   : > { %v5460_v14 = vrot.slane %v5459_v63, 1  ;;  %v4431_v55 = vmul.f32 1.442695, %v3962_v43  ;;  %v3570_v48 = vsel %vm483_vm0, %v12919_v60, -inf  ;;  %v9541_v44 = vpop.eup %9540  ;;  %v2982_v39 = vrot.slane %v2981_v50, 1  ;;  %v12941_v43 = vpop.f32.mrf.mxu0 }
 0x351   : > { %15057 = vst [vmem:[#allocation128_spill] sm:$0xff] %v12926_v7  ;;  %v4882_v53 = vrot.slane %v4881_v30, 2  ;;  %v5465_v18 = vrot.slane %v5464_v33, 4  ;;  %9548 = vpow2.f32 %v4429_v58  ;;  %v12935_v0 = vmul.f32 %v9940_v32, %v6001_v26 }
 0x352   : > { %v5461_v1 = vadd.f32 %v5460_v14, %v5459_v63  ;;  %9550 = vpow2.f32 %v4431_v55  ;;  %v3564_v8 = vmax.f32 %v3562_v35, %v3563_v16  ;;  %v2983_v59 = vmax.f32 %v2981_v50, %v2982_v39 }
 0x353   : > { %15058 = vst [vmem:[#allocation129_spill] sm:$0xff] %v12935_v0  ;;  %9552 = vrcp.f32 %v4876_v19  ;;  %v4883_v13 = vadd.f32 %v4882_v53, %v4881_v30  ;;  %v5466_v21 = vadd.f32 %v5465_v18, %v5464_v33  ;;  %v2984_v41 = vsel %vm483_vm0, %v12930_v15, -inf }
 0x354   : > { %9554 = vrcp.f32 %v5461_v1  ;;  %v3565_v57 = vrot.slane %v3564_v8, 2  ;;  %v3569_v58 = vsel %vm483_vm0, %v12932_v23, -inf  ;;  %v3833_v63 = vsub.f32 %v12866_v20, %v2983_v59 }
 0x355   : > { %v4884_v3 = vrot.slane %v4883_v13, 1  ;;  %v5467_v26 = vrot.slane %v5466_v21, 2  ;;  %v3834_v35 = vsub.f32 %v12846_v11, %v2983_v59  ;;  %v5873_v16 = vmul.f32 %v9541_v44, %v12814_v5  ;;  %v12952_v11 = vpop.f32.mrf.mxu0 }
 0x356   : > { %v3566_v18 = vmax.f32 %v3564_v8, %v3565_v57  ;;  %v2986_v50 = vmax.f32 %v2984_v41, %v2985_v45  ;;  %v3571_v19 = vmax.f32 %v3569_v58, %v3570_v48  ;;  %v4173_v55 = vmul.f32 1.442695, %v3833_v63 }
 0x357   : > { %v12946_v30 = vpop.eup %9542  ;;  %v4885_v33 = vadd.f32 %v4884_v3, %v4883_v13  ;;  %v5468_v14 = vadd.f32 %v5467_v26, %v5466_v21  ;;  %v4175_v53 = vmul.f32 1.442695, %v3834_v35  ;;  %v2994_v48 = vsel %vm483_vm0, %v12941_v43, -inf }
 0x358   : > { %v12948_v39 = vpop.eup %9544  ;;  %v4886_v32 = vsel %vm483_vm0, %v12946_v30, 0.0  ;;  %v3567_v1 = vrot.slane %v3566_v18, 1  ;;  %v2987_v20 = vrot.slane %v2986_v50, 4  ;;  %v3572_v47 = vrot.slane %v3571_v19, 4 }
 0x359   : > { %v12954_v5 = vpop.eup %9546  ;;  %9556 = vrcp.f32 %v4885_v33  ;;  %v5469_v45 = vrot.slane %v5468_v14, 1  ;;  %v4887_v3 = vsel %vm483_vm0, %v12948_v39, 0.0  ;;  %v2993_v41 = vsel %vm483_vm0, %v12952_v11, -inf }
 0x35a   : > { %15059 = vst [vmem:[#allocation130_spill] sm:$0xff] %v12954_v5  ;;  %v4888_v8 = vadd.f32 %v4887_v3, %v4886_v32  ;;  %9558 = vpow2.f32 %v4173_v55  ;;  %v3568_v13 = vmax.f32 %v3566_v18, %v3567_v1  ;;  %v2988_v21 = vmax.f32 %v2986_v50, %v2987_v20  ;;  %v12969_v32 = vpop.f32.mrf.mxu1 }
 0x35b   : > { %v5470_v59 = vadd.f32 %v5469_v45, %v5468_v14  ;;  %9560 = vpow2.f32 %v4175_v53  ;;  %v3573_v57 = vmax.f32 %v3571_v19, %v3572_v47  ;;  %v12965_v33 = vmul.f32 %v9541_v44, %v12818_v54 }
 0x35c   : > { %v4889_v58 = vrot.slane %v4888_v8, 4  ;;  %v3963_v26 = vsub.f32 %v12875_v24, %v3568_v13  ;;  %v3964_v63 = vsub.f32 %v12850_v62, %v3568_v13  ;;  %v2989_v35 = vrot.slane %v2988_v21, 2  ;;  %v9941_v24 = vld [vmem:[%s10237_s27 + $0x260] sm:$0xff] }
 0x35d   : > { %15060 = vst [vmem:[#allocation131_spill] sm:$0xff] %v12965_v33  ;;  %9562 = vrcp.f32 %v5470_v59  ;;  %v3574_v55 = vrot.slane %v3573_v57, 2  ;;  %v2995_v18 = vmax.f32 %v2993_v41, %v2994_v48  ;;  %v12974_v20 = vmul.f32 %v9941_v24, %v5873_v16  ;;  %v9948_v33 = vld [vmem:[%s10237_s27 + $0x290] sm:$0xff] }
 0x35e   : > { %v12967_v50 = vpop.eup %9548  ;;  %v4890_v14 = vadd.f32 %v4889_v58, %v4888_v8  ;;  %v4433_v47 = vmul.f32 1.442695, %v3963_v26  ;;  %v4435_v19 = vmul.f32 1.442695, %v3964_v63  ;;  %v2990_v53 = vmax.f32 %v2988_v21, %v2989_v35  ;;  %v12984_v63 = vpop.f32.mrf.mxu1 }
 0x35f   : > { %v12971_v1 = vpop.eup %9550  ;;  %15061 = vst [vmem:[#allocation132_spill] sm:$0xff] %v12974_v20  ;;  %v5471_v54 = vsel %vm483_vm0, %v12967_v50, 0.0  ;;  %v3575_v62 = vmax.f32 %v3573_v57, %v3574_v55  ;;  %v2996_v44 = vrot.slane %v2995_v18, 4  ;;  %v12988_v35 = vmul.f32 %v12954_v5, %v12822_v52 }
 0x360   : > { %v12978_v45 = vpop.eup %9552  ;;  %v4891_v3 = vrot.slane %v4890_v14, 2  ;;  %v5472_v48 = vsel %vm483_vm0, %v12971_v1, 0.0  ;;  %9564 = vpow2.f32 %v4433_v47  ;;  %v2991_v8 = vrot.slane %v2990_v53, 1 }
 0x361   : > { %15062 = vst [vmem:[#allocation133_spill] sm:$0xff] %v12978_v45  ;;  %v9555_v13 = vpop.eup %9554  ;;  %v5473_v21 = vadd.f32 %v5472_v48, %v5471_v54  ;;  %9566 = vpow2.f32 %v4435_v19  ;;  %v3576_v16 = vrot.slane %v3575_v62, 1  ;;  %v2997_v59 = vmax.f32 %v2995_v18, %v2996_v44  ;;  %15063 = vst [vmem:[#allocation134_spill] sm:$0xff] %v12988_v35  ;;  %v9942_v19 = vld [vmem:[%s10237_s27 + $0x680] sm:$0xff]  ;;  %v9943_v18 = vld [vmem:[%s10237_s27 + $0x688] sm:$0xff] }
 0x362   : > { %v6005_v41 = vmul.f32 %v9555_v13, %v12877_v49  ;;  %v6006_v57 = vmul.f32 %v9555_v13, %v12887_v51  ;;  %v4892_v58 = vadd.f32 %v4891_v3, %v4890_v14  ;;  %v2992_v26 = vmax.f32 %v2990_v53, %v2991_v8  ;;  %v9969_v35 = vld [vmem:[%s10237_s27 + $0x308] sm:$0xff] }
 0x363   : > { %v5474_v55 = vrot.slane %v5473_v21, 4  ;;  %v3577_v47 = vmax.f32 %v3575_v62, %v3576_v16  ;;  %v3579_v24 = vsel %vm483_vm0, %v12969_v32, -inf  ;;  %v2998_v3 = vrot.slane %v2997_v59, 2 }
 0x364   : > { %v6261_v54 = vmul.f32 %v9942_v19, %v6005_v41  ;;  %v6262_v44 = vmul.f32 %v9943_v18, %v6006_v57  ;;  %v4893_v49 = vrot.slane %v4892_v58, 1  ;;  %v3835_v51 = vsub.f32 %v12930_v15, %v2992_v26  ;;  %v9945_v18 = vld [vmem:[%s10237_s27 + $0x288] sm:$0xff] }
 0x365   : > { %v5475_v14 = vadd.f32 %v5474_v55, %v5473_v21  ;;  %v3836_v53 = vsub.f32 %v12908_v22, %v2992_v26  ;;  %v3578_v52 = vsel %vm483_vm0, %v12984_v63, -inf  ;;  %v3965_v16 = vsub.f32 %v12932_v23, %v3577_v47 }
 0x366   : > { %v9557_v48 = vpop.eup %9556  ;;  %v7245_v62 = vsel %vm483_vm0, %v6261_v54, 0.0  ;;  %v4894_v8 = vadd.f32 %v4893_v49, %v4892_v58  ;;  %v4177_v13 = vmul.f32 1.442695, %v3835_v51  ;;  %v7246_v15 = vsel %vm483_vm0, %v6262_v44, 0.0  ;;  %v9944_v54 = vld [vmem:[%s10237_s27 + $0x280] sm:$0xff] }
 0x367   : > { %v13000_v41 = vpop.eup %9558  ;;  %v5877_v21 = vmul.f32 %v9557_v48, %v12897_v37  ;;  %v5878_v22 = vmul.f32 %v9557_v48, %v12899_v29  ;;  %v5476_v57 = vrot.slane %v5475_v14, 2  ;;  %v3966_v58 = vsub.f32 %v12919_v60, %v3577_v47 }
 0x368   : > { %v13005_v26 = vpop.eup %9560  ;;  %9568 = vrcp.f32 %v4894_v8  ;;  %v4895_v55 = vsel %vm483_vm0, %v13000_v41, 0.0  ;;  %v3580_v19 = vmax.f32 %v3578_v52, %v3579_v24  ;;  %v4179_v44 = vmul.f32 1.442695, %v3836_v53 }
 0x369   : > { %v6133_v23 = vmul.f32 %v9944_v54, %v5877_v21  ;;  %v6134_v49 = vmul.f32 %v9945_v18, %v5878_v22  ;;  %v5477_v51 = vadd.f32 %v5476_v57, %v5475_v14  ;;  %v13012_v20 = vadd.f32 %v7246_v15, %v7245_v62  ;;  %v9946_v22 = vld [vmem:[%s10237_s27 + $0x690] sm:$0xff]  ;;  %v13027_v57 = vpop.f32.mrf.mxu1 }
 0x36a   : > { %v9563_v37 = vpop.eup %9562  ;;  %v4896_v29 = vsel %vm483_vm0, %v13005_v26, 0.0  ;;  %9570 = vpow2.f32 %v4177_v13  ;;  %v2999_v48 = vmax.f32 %v2997_v59, %v2998_v3  ;;  %v4437_v24 = vmul.f32 1.442695, %v3965_v16  ;;  %v13025_v3 = vpop.f32.mrf.mxu0 }
 0x36b   : > { %v6669_v8 = vsel %vm483_vm0, %v6133_v23, 0.0  ;;  %v6670_v60 = vsel %vm483_vm0, %v6134_v49, 0.0  ;;  %v6007_v47 = vmul.f32 %v9563_v37, %v12910_v25  ;;  %v6008_v14 = vmul.f32 %v9563_v37, %v12914_v12  ;;  %v9947_v25 = vld [vmem:[%s10237_s27 + $0x698] sm:$0xff] }
 0x36c   : > { %v5478_v53 = vrot.slane %v5477_v51, 1  ;;  %v4897_v52 = vadd.f32 %v4896_v29, %v4895_v55  ;;  %v4439_v21 = vmul.f32 1.442695, %v3966_v58  ;;  %v13022_v15 = vadd.f32 %v6670_v60, %v6669_v8 }
 0x36d   : > { %v13020_v62 = vpop.eup %9564  ;;  %v6263_v13 = vmul.f32 %v9946_v22, %v6007_v47  ;;  %9572 = vpow2.f32 %v4179_v44  ;;  %v3000_v59 = vrot.slane %v2999_v48, 1  ;;  %v6264_v16 = vmul.f32 %v9947_v25, %v6008_v14  ;;  %v13043_v47 = vpop.f32.mrf.mxu0 }
 0x36e   : > { %v13029_v54 = vpop.eup %9566  ;;  %v5479_v12 = vadd.f32 %v5478_v53, %v5477_v51  ;;  %v4898_v23 = vrot.slane %v4897_v52, 4  ;;  %v3581_v55 = vrot.slane %v3580_v19, 4  ;;  %v5480_v18 = vsel %vm483_vm0, %v13020_v62, 0.0  ;;  %v13045_v14 = vpop.f32.mrf.mxu1 }
 0x36f   : > { %v7254_v58 = vsel %vm483_vm0, %v6263_v13, 0.0  ;;  %v5481_v49 = vsel %vm483_vm0, %v13029_v54, 0.0  ;;  %9574 = vpow2.f32 %v4437_v24  ;;  %v13039_v44 = vmul.f32 %v12978_v45, %v12848_v9 }
 0x370   : > { %v7255_v37 = vsel %vm483_vm0, %v6264_v16, 0.0  ;;  %9576 = vrcp.f32 %v5479_v12  ;;  %v4899_v29 = vadd.f32 %v4898_v23, %v4897_v52  ;;  %v7248_v51 = vrot.slane %v13012_v20, 4 }
 0x371   : > { %15064 = vst [vmem:[#allocation135_spill] sm:$0xff] %v13039_v44  ;;  %v5482_v8 = vadd.f32 %v5481_v49, %v5480_v18  ;;  %9578 = vpow2.f32 %v4439_v21  ;;  %v3001_v60 = vmax.f32 %v2999_v48, %v3000_v59  ;;  %v6672_v53 = vrot.slane %v13022_v15, 4 }
 0x372   : > { %v13048_v24 = vadd.f32 %v7255_v37, %v7254_v58  ;;  %v4900_v22 = vrot.slane %v4899_v29, 2  ;;  %v3582_v9 = vmax.f32 %v3580_v19, %v3581_v55  ;;  %v3003_v16 = vsel %vm483_vm0, %v13025_v3, -inf }
 0x373   : > { %v5483_v13 = vrot.slane %v5482_v8, 4  ;;  %v3837_v25 = vsub.f32 %v12952_v11, %v3001_v60  ;;  %v3838_v52 = vsub.f32 %v12941_v43, %v3001_v60  ;;  %v3002_v59 = vsel %vm483_vm0, %v13043_v47, -inf }
 0x374   : > { %v4901_v21 = vadd.f32 %v4900_v22, %v4899_v29  ;;  %v3583_v48 = vrot.slane %v3582_v9, 2  ;;  %v3587_v12 = vsel %vm483_vm0, %v13045_v14, -inf  ;;  %v3588_v43 = vsel %vm483_vm0, %v13027_v57, -inf }
 0x375   : > { %v9569_v23 = vpop.eup %9568  ;;  %v5484_v19 = vadd.f32 %v5483_v13, %v5482_v8  ;;  %v4181_v55 = vmul.f32 1.442695, %v3837_v25  ;;  %v4183_v58 = vmul.f32 1.442695, %v3838_v52  ;;  %v3004_v22 = vmax.f32 %v3002_v59, %v3003_v16  ;;  %v9949_v8 = vld [vmem:[%s10237_s27 + $0x298] sm:$0xff] }
 0x376   : > { %v5879_v11 = vmul.f32 %v9569_v23, %v12946_v30  ;;  %v5880_v18 = vmul.f32 %v9569_v23, %v12948_v39  ;;  %v4902_v49 = vrot.slane %v4901_v21, 1  ;;  %v3584_v37 = vmax.f32 %v3582_v9, %v3583_v48 }
 0x377   : > { %v13062_v29 = vpop.eup %9570  ;;  %v5485_v60 = vrot.slane %v5484_v19, 2  ;;  %9580 = vpow2.f32 %v4181_v55  ;;  %v3589_v44 = vmax.f32 %v3587_v12, %v3588_v43  ;;  %v3005_v39 = vrot.slane %v3004_v22, 4 }
 0x378   : > { %v6135_v45 = vmul.f32 %v9948_v33, %v5879_v11  ;;  %v6136_v13 = vmul.f32 %v9949_v8, %v5880_v18  ;;  %v4903_v25 = vadd.f32 %v4902_v49, %v4901_v21  ;;  %v4904_v52 = vsel %vm483_vm0, %v13062_v29, 0.0 }
 0x379   : > { %v5486_v4 = vadd.f32 %v5485_v60, %v5484_v19  ;;  %9582 = vpow2.f32 %v4183_v58  ;;  %v3585_v30 = vrot.slane %v3584_v37, 1  ;;  %v3590_v16 = vrot.slane %v3589_v44, 4 }
 0x37a   : > { %v13068_v23 = vpop.eup %9572  ;;  %v6678_v9 = vsel %vm483_vm0, %v6135_v45, 0.0  ;;  %v6679_v48 = vsel %vm483_vm0, %v6136_v13, 0.0  ;;  %9584 = vrcp.f32 %v4903_v25  ;;  %v13077_v19 = vadd.f32 %v7248_v51, %v13012_v20  ;;  %v13083_v13 = vpop.f32.mrf.mxu0 }
 0x37b   : > { %v6680_v59 = vadd.f32 %v6679_v48, %v6678_v9  ;;  %v5487_v33 = vrot.slane %v5486_v4, 1  ;;  %v4905_v21 = vsel %vm483_vm0, %v13068_v23, 0.0  ;;  %v3586_v12 = vmax.f32 %v3584_v37, %v3585_v30 }
 0x37c   : > { %v13074_v55 = vpop.eup %9574  ;;  %15065 = vst [vmem:[#allocation136_spill] sm:$0xff] %v13077_v19  ;;  %v7257_v58 = vrot.slane %v13048_v24, 4  ;;  %v4906_v43 = vadd.f32 %v4905_v21, %v4904_v52  ;;  %v3006_v11 = vmax.f32 %v3004_v22, %v3005_v39  ;;  %v3591_v8 = vmax.f32 %v3589_v44, %v3590_v16  ;;  %v13094_v44 = vpop.f32.mrf.mxu1 }
 0x37d   : > { %v9577_v45 = vpop.eup %9576  ;;  %v5488_v18 = vadd.f32 %v5487_v33, %v5486_v4  ;;  %v5489_v49 = vsel %vm483_vm0, %v13074_v55, 0.0  ;;  %v3967_v60 = vsub.f32 %v12984_v63, %v3586_v12  ;;  %v13088_v25 = vadd.f32 %v6672_v53, %v13022_v15  ;;  %v13100_v48 = vpop.f32.mrf.mxu0 }
 0x37e   : > { %v13085_v37 = vpop.eup %9578  ;;  %v6681_v20 = vrot.slane %v6680_v59, 4  ;;  %v4907_v51 = vrot.slane %v4906_v43, 4  ;;  %v3968_v52 = vsub.f32 %v12969_v32, %v3586_v12  ;;  %v6009_v22 = vmul.f32 %v9577_v45, %v12967_v50 }
 0x37f   : > { %15066 = vst [vmem:[#allocation137_spill] sm:$0xff] %v13088_v25  ;;  %9586 = vrcp.f32 %v5488_v18  ;;  %v5490_v4 = vsel %vm483_vm0, %v13085_v37, 0.0  ;;  %v4441_v63 = vmul.f32 1.442695, %v3967_v60  ;;  %v13097_v30 = vadd.f32 %v7257_v58, %v13048_v24  ;;  %v9950_v24 = vld [vmem:[%s10237_s27 + $0x6a0] sm:$0xff] }
 0x380   : > { %v6010_v15 = vmul.f32 %v9577_v45, %v12971_v1  ;;  %v4908_v53 = vadd.f32 %v4907_v51, %v4906_v43  ;;  %v5491_v39 = vadd.f32 %v5490_v4, %v5489_v49  ;;  %v4443_v32 = vmul.f32 1.442695, %v3968_v52  ;;  %v13107_v45 = vpop.f32.mrf.mxu1  ;;  %v9951_v49 = vld [vmem:[%s10237_s27 + $0x6a8] sm:$0xff] }
 0x381   : > { %15067 = vst [vmem:[#allocation138_spill] sm:$0xff] %v13097_v30  ;;  %9588 = vpow2.f32 %v4441_v63  ;;  %v3007_v9 = vrot.slane %v3006_v11, 2  ;;  %v3592_v50 = vrot.slane %v3591_v8, 2  ;;  %v13102_v16 = vadd.f32 %v6681_v20, %v6680_v59 }
 0x382   : > { %v4909_v33 = vrot.slane %v4908_v53, 2  ;;  %v5492_v21 = vrot.slane %v5491_v39, 4  ;;  %v3012_v12 = vsel %vm483_vm0, %v13083_v13, -inf  ;;  %v6265_v58 = vmul.f32 %v9950_v24, %v6009_v22 }
 0x383   : > { %15068 = vst [vmem:[#allocation139_spill] sm:$0xff] %v13102_v16  ;;  %9590 = vpow2.f32 %v4443_v32  ;;  %v3008_v1 = vmax.f32 %v3006_v11, %v3007_v9  ;;  %v3593_v43 = vmax.f32 %v3591_v8, %v3592_v50  ;;  %v6266_v60 = vmul.f32 %v9951_v49, %v6010_v15 }
 0x384   : > { %v13109_v18 = vpop.eup %9580  ;;  %v4910_v51 = vadd.f32 %v4909_v33, %v4908_v53  ;;  %v5493_v52 = vadd.f32 %v5492_v21, %v5491_v39  ;;  %v3011_v59 = vsel %vm483_vm0, %v13100_v48, -inf  ;;  %v3597_v11 = vsel %vm483_vm0, %v13094_v44, -inf }
 0x385   : > { %v4913_v20 = vsel %vm483_vm0, %v13109_v18, 0.0  ;;  %v3009_v4 = vrot.slane %v3008_v1, 1  ;;  %v3594_v63 = vrot.slane %v3593_v43, 1  ;;  %v3013_v9 = vmax.f32 %v3011_v59, %v3012_v12 }
 0x386   : > { %v13118_v8 = vpop.eup %9582  ;;  %v4911_v22 = vrot.slane %v4910_v51, 1  ;;  %v5494_v32 = vrot.slane %v5493_v52, 2  ;;  %v3596_v15 = vsel %vm483_vm0, %v13107_v45, -inf }
 0x387   : > { %v9585_v53 = vpop.eup %9584  ;;  %v4914_v39 = vsel %vm483_vm0, %v13118_v8, 0.0  ;;  %v3010_v50 = vmax.f32 %v3008_v1, %v3009_v4  ;;  %v3595_v33 = vmax.f32 %v3593_v43, %v3594_v63  ;;  %v3598_v21 = vmax.f32 %v3596_v15, %v3597_v11  ;;  %v13140_v11 = vpop.f32.mrf.mxu0 }
 0x388   : > { %v5881_v24 = vmul.f32 %v9585_v53, %v13000_v41  ;;  %v5882_v49 = vmul.f32 %v9585_v53, %v13005_v26  ;;  %v4912_v16 = vadd.f32 %v4911_v22, %v4910_v51  ;;  %v5495_v25 = vadd.f32 %v5494_v32, %v5493_v52  ;;  %v9955_v32 = vld [vmem:[%s10237_s27 + $0x6b8] sm:$0xff] }
 0x389   : > { %v4915_v6 = vadd.f32 %v4914_v39, %v4913_v20  ;;  %v3839_v12 = vsub.f32 %v13043_v47, %v3010_v50  ;;  %v3840_v59 = vsub.f32 %v13025_v3, %v3010_v50  ;;  %v3969_v46 = vsub.f32 %v13045_v14, %v3595_v33 }
 0x38a   : > { %v6137_v56 = vmul.f32 %v9952_v28, %v5881_v24  ;;  %v6138_v17 = vmul.f32 %v9953_v34, %v5882_v49  ;;  %9592 = vrcp.f32 %v4912_v16  ;;  %v5496_v1 = vrot.slane %v5495_v25, 1 }
 0x38b   : > { %v7263_v43 = vsel %vm483_vm0, %v6265_v58, 0.0  ;;  %v7264_v41 = vsel %vm483_vm0, %v6266_v60, 0.0  ;;  %v4916_v26 = vrot.slane %v4915_v6, 4  ;;  %v3970_v51 = vsub.f32 %v13027_v57, %v3595_v33 }
 0x38c   : > { %v9587_v52 = vpop.eup %9586  ;;  %v6687_v47 = vsel %vm483_vm0, %v6137_v56, 0.0  ;;  %v5497_v3 = vadd.f32 %v5496_v1, %v5495_v25  ;;  %v4185_v14 = vmul.f32 1.442695, %v3839_v12  ;;  %v4187_v20 = vmul.f32 1.442695, %v3840_v59  ;;  %v13142_v56 = vpop.f32.mrf.mxu1  ;;  %v9954_v25 = vld [vmem:[%s10237_s27 + $0x6b0] sm:$0xff] }
 0x38d   : > { %v6688_v28 = vsel %vm483_vm0, %v6138_v17, 0.0  ;;  %v6011_v34 = vmul.f32 %v9587_v52, %v13020_v62  ;;  %v6012_v16 = vmul.f32 %v9587_v52, %v13029_v54  ;;  %v4917_v58 = vadd.f32 %v4916_v26, %v4915_v6  ;;  %v13157_v1 = vpop.f32.mrf.mxu0 }
 0x38e   : > { %v13138_v4 = vpop.eup %9588  ;;  %9594 = vrcp.f32 %v5497_v3  ;;  %v4445_v60 = vmul.f32 1.442695, %v3969_v46  ;;  %v3014_v57 = vrot.slane %v3013_v9, 4  ;;  %v3599_v63 = vrot.slane %v3598_v21, 4  ;;  %v13159_v26 = vpop.f32.mrf.mxu1 }
 0x38f   : > { %v6267_v22 = vmul.f32 %v9954_v25, %v6011_v34  ;;  %v6268_v15 = vmul.f32 %v9955_v32, %v6012_v16  ;;  %v4918_v17 = vrot.slane %v4917_v58, 2  ;;  %v4447_v53 = vmul.f32 1.442695, %v3970_v51 }
 0x390   : > { %v13146_v62 = vpop.eup %9590  ;;  %v5498_v6 = vsel %vm483_vm0, %v13138_v4, 0.0  ;;  %9596 = vpow2.f32 %v4185_v14  ;;  %v3015_v54 = vmax.f32 %v3013_v9, %v3014_v57  ;;  %v3600_v46 = vmax.f32 %v3598_v21, %v3599_v63 }
 0x391   : > { %v13150_v39 = vadd.f32 %v7264_v41, %v7263_v43  ;;  %v13152_v50 = vadd.f32 %v6688_v28, %v6687_v47  ;;  %v4919_v33 = vadd.f32 %v4918_v17, %v4917_v58  ;;  %v5499_v24 = vsel %vm483_vm0, %v13146_v62, 0.0 }
 0x392   : > { %v7272_v49 = vsel %vm483_vm0, %v6267_v22, 0.0  ;;  %v5500_v12 = vadd.f32 %v5499_v24, %v5498_v6  ;;  %9598 = vpow2.f32 %v4187_v20  ;;  %v3016_v59 = vrot.slane %v3015_v54, 2  ;;  %v13178_v24 = vpop.f32.mrf.mxu1 }
 0x393   : > { %15069 = vst [vmem:[#allocation140_spill] sm:$0xff] %v13150_v39  ;;  %15070 = vst [vmem:[#allocation141_spill] sm:$0xff] %v13152_v50  ;;  %v4920_v51 = vrot.slane %v4919_v33, 1  ;;  %9600 = vpow2.f32 %v4445_v60  ;;  %v3601_v9 = vrot.slane %v3600_v46, 2  ;;  %v3021_v21 = vsel %vm483_vm0, %v13140_v11, -inf  ;;  %v13170_v60 = vpop.f32.mrf.mxu0 }
 0x394   : > { %v7273_v43 = vsel %vm483_vm0, %v6268_v15, 0.0  ;;  %v5501_v41 = vrot.slane %v5500_v12, 4  ;;  %9602 = vpow2.f32 %v4447_v53  ;;  %v3017_v52 = vmax.f32 %v3015_v54, %v3016_v59 }
 0x395   : > { %v4921_v47 = vadd.f32 %v4920_v51, %v4919_v33  ;;  %v3602_v3 = vmax.f32 %v3600_v46, %v3601_v9  ;;  %v3020_v14 = vsel %vm483_vm0, %v13157_v1, -inf  ;;  %v3605_v20 = vsel %vm483_vm0, %v13159_v26, -inf  ;;  %v9957_v51 = vld [vmem:[%s10237_s27 + $0x2b8] sm:$0xff] }
 0x396   : > { %v5502_v28 = vadd.f32 %v5501_v41, %v5500_v12  ;;  %v3018_v34 = vrot.slane %v3017_v52, 1  ;;  %v3606_v16 = vsel %vm483_vm0, %v13142_v56, -inf  ;;  %v3022_v58 = vmax.f32 %v3020_v14, %v3021_v21  ;;  %v9956_v12 = vld [vmem:[%s10237_s27 + $0x2b0] sm:$0xff] }
 0x397   : > { %v9593_v57 = vpop.eup %9592  ;;  %9604 = vrcp.f32 %v4921_v47  ;;  %v3603_v25 = vrot.slane %v3602_v3, 1  ;;  %v3607_v22 = vmax.f32 %v3605_v20, %v3606_v16  ;;  %v13176_v54 = vadd.f32 %v7273_v43, %v7272_v49 }
 0x398   : > { %v5883_v32 = vmul.f32 %v9593_v57, %v13062_v29  ;;  %v5884_v15 = vmul.f32 %v9593_v57, %v13068_v23  ;;  %v5503_v17 = vrot.slane %v5502_v28, 2  ;;  %v3019_v53 = vmax.f32 %v3017_v52, %v3018_v34  ;;  %v13183_v29 = vpop.f32.mrf.mxu0 }
 0x399   : > { %15071 = vst [vmem:[#allocation142_spill] sm:$0xff] %v13176_v54  ;;  %v3604_v46 = vmax.f32 %v3602_v3, %v3603_v25  ;;  %v3023_v33 = vrot.slane %v3022_v58, 4  ;;  %v3608_v14 = vrot.slane %v3607_v22, 4  ;;  %v3030_v20 = vsel %vm483_vm0, %v13170_v60, -inf }
 0x39a   : > { %v6139_v59 = vmul.f32 %v9956_v12, %v5883_v32  ;;  %v6140_v9 = vmul.f32 %v9957_v51, %v5884_v15  ;;  %v5504_v21 = vadd.f32 %v5503_v17, %v5502_v28  ;;  %v3841_v41 = vsub.f32 %v13100_v48, %v3019_v53 }
 0x39b   : > { %v9595_v23 = vpop.eup %9594  ;;  %v3842_v52 = vsub.f32 %v13083_v13, %v3019_v53  ;;  %v3971_v47 = vsub.f32 %v13107_v45, %v3604_v46  ;;  %v3972_v49 = vsub.f32 %v13094_v44, %v3604_v46  ;;  %v3024_v43 = vmax.f32 %v3022_v58, %v3023_v33  ;;  %v9958_v46 = vld [vmem:[%s10237_s27 + $0x6c0] sm:$0xff] }
 0x39c   : > { %v6013_v3 = vmul.f32 %v9595_v23, %v13074_v55  ;;  %v3615_v28 = vsel %vm483_vm0, %v13178_v24, -inf  ;;  %v5505_v34 = vrot.slane %v5504_v21, 1  ;;  %v4189_v16 = vmul.f32 1.442695, %v3841_v41 }
 0x39d   : > { %v13193_v48 = vpop.eup %9596  ;;  %v4191_v13 = vmul.f32 1.442695, %v3842_v52  ;;  %v3029_v45 = vsel %vm483_vm0, %v13183_v29, -inf  ;;  %v6696_v44 = vsel %vm483_vm0, %v6139_v59, 0.0  ;;  %v6697_v55 = vsel %vm483_vm0, %v6140_v9, 0.0 }
 0x39e   : > { %v4922_v58 = vsel %vm483_vm0, %v13193_v48, 0.0  ;;  %v4449_v57 = vmul.f32 1.442695, %v3971_v47  ;;  %v6014_v32 = vmul.f32 %v9595_v23, %v13085_v37  ;;  %9606 = vpow2.f32 %v4189_v16  ;;  %v13213_v23 = vpop.f32.mrf.mxu1 }
 0x39f   : > { %v13201_v25 = vpop.eup %9598  ;;  %v4451_v15 = vmul.f32 1.442695, %v3972_v49  ;;  %v3025_v17 = vrot.slane %v3024_v43, 2  ;;  %v6269_v33 = vmul.f32 %v9958_v46, %v6013_v3  ;;  %9608 = vpow2.f32 %v4191_v13 }
 0x3a0   : > { %v13204_v53 = vpop.eup %9600  ;;  %v4923_v12 = vsel %vm483_vm0, %v13201_v25, 0.0  ;;  %v3609_v59 = vmax.f32 %v3607_v22, %v3608_v14  ;;  %v5506_v9 = vadd.f32 %v5505_v34, %v5504_v21  ;;  %9610 = vpow2.f32 %v4449_v57 }
 0x3a1   : > { %v13209_v51 = vpop.eup %9602  ;;  %v4924_v41 = vadd.f32 %v4923_v12, %v4922_v58  ;;  %v5507_v52 = vsel %vm483_vm0, %v13204_v53, 0.0  ;;  %v3026_v37 = vmax.f32 %v3024_v43, %v3025_v17  ;;  %v3031_v3 = vmax.f32 %v3029_v45, %v3030_v20  ;;  %v9959_v17 = vld [vmem:[%s10237_s27 + $0x6c8] sm:$0xff] }
 0x3a2   : > { %v5508_v47 = vsel %vm483_vm0, %v13209_v51, 0.0  ;;  %v3610_v49 = vrot.slane %v3609_v59, 2  ;;  %9612 = vpow2.f32 %v4451_v15  ;;  %v13217_v21 = vadd.f32 %v6697_v55, %v6696_v44 }
 0x3a3   : > { %v4925_v16 = vrot.slane %v4924_v41, 4  ;;  %v5509_v13 = vadd.f32 %v5508_v47, %v5507_v52  ;;  %v3027_v22 = vrot.slane %v3026_v37, 1  ;;  %v3032_v58 = vrot.slane %v3031_v3, 4 }
 0x3a4   : > { %v9605_v14 = vpop.eup %9604  ;;  %15072 = vst [vmem:[#allocation143_spill] sm:$0xff] %v13217_v21  ;;  %v3611_v34 = vmax.f32 %v3609_v59, %v3610_v49  ;;  %v3614_v43 = vsel %vm483_vm0, %v13213_v23, -inf  ;;  %v13222_v46 = vmul.f32 %v9959_v17, %v6014_v32  ;;  %v13225_v12 = vsel %vm483_vm0, %v6269_v33, 0.0  ;;  %v13228_v49 = vpop.f32.mrf.mxu0  ;;  %v9962_v21 = vld [vmem:[%s10237_s27 + $0x6d0] sm:$0xff] }
 0x3a5   : > { %15074 = vst [vmem:[#allocation145_spill] sm:$0xff] %v13225_v12  ;;  %v4926_v57 = vadd.f32 %v4925_v16, %v4924_v41  ;;  %v5510_v20 = vrot.slane %v5509_v13, 4  ;;  %v3028_v45 = vmax.f32 %v3026_v37, %v3027_v22  ;;  %v3033_v15 = vmax.f32 %v3031_v3, %v3032_v58 }
 0x3a6   : > { %15073 = vst [vmem:[#allocation144_spill] sm:$0xff] %v13222_v46  ;;  %v3612_v52 = vrot.slane %v3611_v34, 1  ;;  %v3616_v47 = vmax.f32 %v3614_v43, %v3615_v28  ;;  %v5885_v44 = vmul.f32 %v9605_v14, %v13109_v18  ;;  %9614 = vrcp.f32 %v5506_v9 }
 0x3a7   : > { %v4927_v55 = vrot.slane %v4926_v57, 2  ;;  %v5511_v59 = vadd.f32 %v5510_v20, %v5509_v13  ;;  %v3843_v6 = vsub.f32 %v13157_v1, %v3028_v45  ;;  %v3844_v32 = vsub.f32 %v13140_v11, %v3028_v45  ;;  %v13235_v20 = vpop.f32.mrf.mxu0 }
 0x3a8   : > { %v3613_v17 = vmax.f32 %v3611_v34, %v3612_v52  ;;  %v3034_v33 = vrot.slane %v3033_v15, 2  ;;  %v5886_v41 = vmul.f32 %v9605_v14, %v13118_v8  ;;  %v3617_v3 = vrot.slane %v3616_v47, 4  ;;  %v9960_v34 = vld [vmem:[%s10237_s27 + $0x2c0] sm:$0xff] }
 0x3a9   : > { %v4928_v37 = vadd.f32 %v4927_v55, %v4926_v57  ;;  %v5512_v16 = vrot.slane %v5511_v59, 2  ;;  %v4193_v28 = vmul.f32 1.442695, %v3843_v6  ;;  %v4195_v22 = vmul.f32 1.442695, %v3844_v32  ;;  %v13240_v6 = vpop.f32.mrf.mxu1 }
 0x3aa   : > { %v3973_v18 = vsub.f32 %v13159_v26, %v3613_v17  ;;  %v3974_v9 = vsub.f32 %v13142_v56, %v3613_v17  ;;  %v3035_v43 = vmax.f32 %v3033_v15, %v3034_v33  ;;  %v3618_v1 = vmax.f32 %v3616_v47, %v3617_v3 }
 0x3ab   : > { %v4929_v13 = vrot.slane %v4928_v37, 1  ;;  %v5513_v58 = vadd.f32 %v5512_v16, %v5511_v59  ;;  %v13237_v11 = vpop.eup %9606  ;;  %v6141_v8 = vmul.f32 %v9960_v34, %v5885_v44  ;;  %9616 = vpow2.f32 %v4193_v28  ;;  %v9961_v59 = vld [vmem:[%s10237_s27 + $0x2c8] sm:$0xff] }
 0x3ac   : > { %v4453_v14 = vmul.f32 1.442695, %v3973_v18  ;;  %v4455_v57 = vmul.f32 1.442695, %v3974_v9  ;;  %v13242_v45 = vpop.eup %9608  ;;  %v4931_v52 = vsel %vm483_vm0, %v13237_v11, 0.0  ;;  %9618 = vpow2.f32 %v4195_v22  ;;  %v13261_v18 = vpop.f32.mrf.mxu1 }
 0x3ad   : > { %v4930_v26 = vadd.f32 %v4929_v13, %v4928_v37  ;;  %v5514_v56 = vrot.slane %v5513_v58, 1  ;;  %v4932_v15 = vsel %vm483_vm0, %v13242_v45, 0.0  ;;  %v3036_v47 = vrot.slane %v3035_v43, 1  ;;  %v13248_v44 = vpop.eup %9610  ;;  %v13255_v37 = vpop.f32.mrf.mxu0 }
 0x3ae   : > { %9620 = vpow2.f32 %v4453_v14  ;;  %v3619_v55 = vrot.slane %v3618_v1, 2  ;;  %v13251_v32 = vmul.f32 %v9961_v59, %v5886_v41  ;;  %v3039_v33 = vsel %vm483_vm0, %v13228_v49, -inf }
 0x3af   : > { %9622 = vrcp.f32 %v4930_v26  ;;  %v5515_v17 = vadd.f32 %v5514_v56, %v5513_v58  ;;  %v13257_v16 = vpop.eup %9612  ;;  %v4933_v3 = vadd.f32 %v4932_v15, %v4931_v52  ;;  %v5516_v28 = vsel %vm483_vm0, %v13248_v44, 0.0  ;;  %v13276_v52 = vpop.f32.mrf.mxu0 }
 0x3b0   : > { %15075 = vst [vmem:[#allocation146_spill] sm:$0xff] %v13251_v32  ;;  %9624 = vpow2.f32 %v4455_v57  ;;  %v3037_v22 = vmax.f32 %v3035_v43, %v3036_v47  ;;  %v13264_v41 = vsel %vm483_vm0, %v6141_v8, 0.0  ;;  %v5517_v9 = vsel %vm483_vm0, %v13257_v16, 0.0 }
 0x3b1   : > { %15076 = vst [vmem:[#allocation147_spill] sm:$0xff] %v13264_v41  ;;  %9626 = vrcp.f32 %v5515_v17  ;;  %v3620_v13 = vmax.f32 %v3618_v1, %v3619_v55  ;;  %v4934_v58 = vrot.slane %v4933_v3, 4  ;;  %v5518_v34 = vadd.f32 %v5517_v9, %v5516_v28 }
 0x3b2   : > { %v3845_v14 = vsub.f32 %v13183_v29, %v3037_v22  ;;  %v3846_v26 = vsub.f32 %v13170_v60, %v3037_v22  ;;  %v3624_v43 = vsel %vm483_vm0, %v13240_v6, -inf  ;;  %v3038_v57 = vsel %vm483_vm0, %v13235_v20, -inf }
 0x3b3   : > { %v3621_v56 = vrot.slane %v3620_v13, 1  ;;  %v3623_v8 = vsel %vm483_vm0, %v13261_v18, -inf  ;;  %v9615_v15 = vpop.eup %9614  ;;  %v4935_v1 = vadd.f32 %v4934_v58, %v4933_v3  ;;  %v5519_v47 = vrot.slane %v5518_v34, 4 }
 0x3b4   : > { %v4197_v55 = vmul.f32 1.442695, %v3845_v14  ;;  %v4199_v59 = vmul.f32 1.442695, %v3846_v26  ;;  %v3040_v17 = vmax.f32 %v3038_v57, %v3039_v33  ;;  %v3625_v60 = vmax.f32 %v3623_v8, %v3624_v43  ;;  %v13284_v14 = vpop.f32.mrf.mxu1 }
 0x3b5   : > { %v3622_v29 = vmax.f32 %v3620_v13, %v3621_v56  ;;  %v3048_v28 = vsel %vm483_vm0, %v13255_v37, -inf  ;;  %v4936_v22 = vrot.slane %v4935_v1, 2  ;;  %v5520_v9 = vadd.f32 %v5519_v47, %v5518_v34 }
 0x3b6   : > { %9628 = vpow2.f32 %v4197_v55  ;;  %v3047_v63 = vsel %vm483_vm0, %v13276_v52, -inf  ;;  %v3041_v58 = vrot.slane %v3040_v17, 4  ;;  %v6015_v33 = vmul.f32 %v9615_v15, %v13138_v4 }
 0x3b7   : > { %9630 = vpow2.f32 %v4199_v59  ;;  %v3975_v41 = vsub.f32 %v13213_v23, %v3622_v29  ;;  %v3976_v3 = vsub.f32 %v13178_v24, %v3622_v29  ;;  %v4937_v13 = vadd.f32 %v4936_v22, %v4935_v1 }
 0x3b8   : > { %v5521_v26 = vrot.slane %v5520_v9, 2  ;;  %v3626_v56 = vrot.slane %v3625_v60, 4  ;;  %v13287_v43 = vpop.eup %9616  ;;  %v3042_v8 = vmax.f32 %v3040_v17, %v3041_v58  ;;  %v3049_v47 = vmax.f32 %v3047_v63, %v3048_v28  ;;  %v13300_v63 = vpop.f32.mrf.mxu1 }
 0x3b9   : > { %v4457_v34 = vmul.f32 1.442695, %v3975_v41  ;;  %v4459_v57 = vmul.f32 1.442695, %v3976_v3  ;;  %v13289_v55 = vpop.eup %9618  ;;  %v13292_v23 = vmul.f32 %v9615_v15, %v13146_v62  ;;  %v4938_v24 = vrot.slane %v4937_v13, 1 }
 0x3ba   : > { %15077 = vst [vmem:[#allocation148_spill] sm:$0xff] %v13289_v55  ;;  %v5522_v59 = vadd.f32 %v5521_v26, %v5520_v9  ;;  %v4940_v29 = vsel %vm483_vm0, %v13287_v43, 0.0  ;;  %v4941_v1 = vsel %vm483_vm0, %v13289_v55, 0.0  ;;  %v3043_v41 = vrot.slane %v3042_v8, 2 }
 0x3bb   : > { %v13296_v4 = vpop.eup %9620  ;;  %9632 = vpow2.f32 %v4457_v34  ;;  %v3627_v17 = vmax.f32 %v3625_v60, %v3626_v56  ;;  %v4939_v22 = vadd.f32 %v4938_v24, %v4937_v13  ;;  %v4942_v15 = vadd.f32 %v4941_v1, %v4940_v29 }
 0x3bc   : > { %v9623_v28 = vpop.eup %9622  ;;  %v5523_v62 = vrot.slane %v5522_v59, 1  ;;  %v5525_v9 = vsel %vm483_vm0, %v13296_v4, 0.0  ;;  %9634 = vpow2.f32 %v4459_v57  ;;  %v3044_v26 = vmax.f32 %v3042_v8, %v3043_v41 }
 0x3bd   : > { %v13304_v3 = vpop.eup %9624  ;;  %v5887_v58 = vmul.f32 %v9623_v28, %v13193_v48  ;;  %v3050_v32 = vrot.slane %v3049_v47, 4  ;;  %v13308_v60 = vmul.f32 %v9962_v21, %v6015_v33  ;;  %v4943_v56 = vrot.slane %v4942_v15, 4  ;;  %v9963_v33 = vld [vmem:[%s10237_s27 + $0x2d0] sm:$0xff] }
 0x3be   : > { %v9627_v34 = vpop.eup %9626  ;;  %v5526_v13 = vsel %vm483_vm0, %v13304_v3, 0.0  ;;  %v3632_v24 = vsel %vm483_vm0, %v13300_v63, -inf  ;;  %v13315_v29 = vmul.f32 %v9623_v28, %v13201_v25  ;;  %v5524_v1 = vadd.f32 %v5523_v62, %v5522_v59 }
 0x3bf   : > { %15078 = vst [vmem:[#allocation149_spill] sm:$0xff] %v13308_v60  ;;  %v5527_v48 = vadd.f32 %v5526_v13, %v5525_v9  ;;  %v3633_v57 = vsel %vm483_vm0, %v13284_v14, -inf  ;;  %9636 = vrcp.f32 %v4939_v22  ;;  %v4944_v8 = vadd.f32 %v4943_v56, %v4942_v15 }
 0x3c0   : > { %15079 = vst [vmem:[#allocation150_spill] sm:$0xff] %v13315_v29  ;;  %v3045_v41 = vrot.slane %v3044_v26, 1  ;;  %v3628_v21 = vrot.slane %v3627_v17, 2  ;;  %v13320_v50 = vmul.f32 %v9963_v33, %v5887_v58  ;;  %v3051_v0 = vmax.f32 %v3049_v47, %v3050_v32  ;;  %v9964_v33 = vld [vmem:[%s10237_s27 + $0x6e0] sm:$0xff] }
 0x3c1   : > { %v5528_v55 = vrot.slane %v5527_v48, 4  ;;  %v3634_v61 = vmax.f32 %v3632_v24, %v3633_v57  ;;  %v6017_v36 = vmul.f32 %v9627_v34, %v13204_v53  ;;  %v4945_v27 = vrot.slane %v4944_v8, 2  ;;  %v13331_v53 = vpop.f32.mrf.mxu0 }
 0x3c2   : > { %15080 = vst [vmem:[#allocation151_spill] sm:$0xff] %v13320_v50  ;;  %v3046_v25 = vmax.f32 %v3044_v26, %v3045_v41  ;;  %v3629_v28 = vmax.f32 %v3627_v17, %v3628_v21  ;;  %9638 = vrcp.f32 %v5524_v1  ;;  %v3052_v9 = vrot.slane %v3051_v0, 2 }
 0x3c3   : > { %v13323_v59 = vpop.eup %9628  ;;  %v5529_v62 = vadd.f32 %v5528_v55, %v5527_v48  ;;  %v3635_v22 = vrot.slane %v3634_v61, 4  ;;  %v4946_v56 = vadd.f32 %v4945_v27, %v4944_v8  ;;  %v13343_v29 = vpop.f32.mrf.mxu0 }
 0x3c4   : > { %v13325_v15 = vpop.eup %9630  ;;  %v4949_v58 = vsel %vm483_vm0, %v13323_v59, 0.0  ;;  %v3847_v32 = vsub.f32 %v13235_v20, %v3046_v25  ;;  %v3848_v47 = vsub.f32 %v13228_v49, %v3046_v25  ;;  %v3630_v55 = vrot.slane %v3629_v28, 1 }
 0x3c5   : > { %v5530_v17 = vrot.slane %v5529_v62, 2  ;;  %v4950_v26 = vsel %vm483_vm0, %v13325_v15, 0.0  ;;  %v3053_v13 = vmax.f32 %v3051_v0, %v3052_v9  ;;  %v4947_v24 = vrot.slane %v4946_v56, 1 }
 0x3c6   : > { %v4951_v1 = vadd.f32 %v4950_v26, %v4949_v58  ;;  %v4201_v48 = vmul.f32 1.442695, %v3847_v32  ;;  %v4203_v27 = vmul.f32 1.442695, %v3848_v47  ;;  %v3631_v8 = vmax.f32 %v3629_v28, %v3630_v55 }
 0x3c7   : > { %v5531_v57 = vadd.f32 %v5530_v17, %v5529_v62  ;;  %v3054_v41 = vrot.slane %v3053_v13, 1  ;;  %v3636_v21 = vmax.f32 %v3634_v61, %v3635_v22  ;;  %v13338_v49 = vmul.f32 %v9627_v34, %v13209_v51 }
 0x3c8   : > { %v13335_v20 = vpop.eup %9632  ;;  %v13341_v25 = vmul.f32 %v9964_v33, %v6017_v36  ;;  %v4952_v50 = vrot.slane %v4951_v1, 4  ;;  %9640 = vpow2.f32 %v4201_v48  ;;  %v3977_v28 = vsub.f32 %v13261_v18, %v3631_v8  ;;  %v13351_v36 = vpop.f32.mrf.mxu1 }
 0x3c9   : > { %15081 = vst [vmem:[#allocation152_spill] sm:$0xff] %v13338_v49  ;;  %v5532_v0 = vrot.slane %v5531_v57, 1  ;;  %v5534_v9 = vsel %vm483_vm0, %v13335_v20, 0.0  ;;  %9642 = vpow2.f32 %v4203_v27  ;;  %v13348_v61 = vpop.eup %9634  ;;  %v4948_v62 = vadd.f32 %v4947_v24, %v4946_v56  ;;  %v10001_v49 = vld [vmem:[%s10237_s27 + $0x3a8] sm:$0xff] }
 0x3ca   : > { %15082 = vst [vmem:[#allocation153_spill] sm:$0xff] %v13341_v25  ;;  %v4953_v22 = vadd.f32 %v4952_v50, %v4951_v1  ;;  %v3978_v51 = vsub.f32 %v13240_v6, %v3631_v8  ;;  %v3055_v34 = vmax.f32 %v3053_v13, %v3054_v41  ;;  %v5535_v32 = vsel %vm483_vm0, %v13348_v61, 0.0  ;;  %v13359_v50 = vpop.f32.mrf.mxu0  ;;  %v13365_v8 = vpop.f32.mrf.mxu1 }
 0x3cb   : > { %v5533_v58 = vadd.f32 %v5532_v0, %v5531_v57  ;;  %v4461_v47 = vmul.f32 1.442695, %v3977_v28  ;;  %v3637_v17 = vrot.slane %v3636_v21, 2  ;;  %v5536_v55 = vadd.f32 %v5535_v32, %v5534_v9 }
 0x3cc   : > { %v4954_v26 = vrot.slane %v4953_v22, 2  ;;  %v3057_v18 = vsel %vm483_vm0, %v13331_v53, -inf  ;;  %v3056_v56 = vsel %vm483_vm0, %v13343_v29, -inf  ;;  %v9637_v6 = vpop.eup %9636  ;;  %v4463_v13 = vmul.f32 1.442695, %v3978_v51 }
 0x3cd   : > { %9644 = vrcp.f32 %v5533_v58  ;;  %v3849_v24 = vsub.f32 %v13276_v52, %v3055_v34  ;;  %v3850_v1 = vsub.f32 %v13255_v37, %v3055_v34  ;;  %v5537_v27 = vrot.slane %v5536_v55, 4  ;;  %v13369_v58 = vpop.f32.mrf.mxu0 }
 0x3ce   : > { %9646 = vrcp.f32 %v4948_v62  ;;  %v4955_v48 = vadd.f32 %v4954_v26, %v4953_v22  ;;  %v3642_v57 = vsel %vm483_vm0, %v13351_v36, -inf  ;;  %v3638_v0 = vmax.f32 %v3636_v21, %v3637_v17 }
 0x3cf   : > { %9648 = vpow2.f32 %v4461_v47  ;;  %v4205_v41 = vmul.f32 1.442695, %v3849_v24  ;;  %v4207_v33 = vmul.f32 1.442695, %v3850_v1  ;;  %v13367_v9 = vpop.eup %9638  ;;  %v5538_v51 = vadd.f32 %v5537_v27, %v5536_v55  ;;  %v13375_v47 = vpop.f32.mrf.mxu1 }
 0x3d0   : > { %v4956_v28 = vrot.slane %v4955_v48, 1  ;;  %9650 = vpow2.f32 %v4463_v13  ;;  %v3058_v52 = vmax.f32 %v3056_v56, %v3057_v18  ;;  %v3639_v37 = vrot.slane %v3638_v0, 1 }
 0x3d1   : > { %9652 = vpow2.f32 %v4205_v41  ;;  %v3641_v62 = vsel %vm483_vm0, %v13365_v8, -inf  ;;  %v3066_v22 = vsel %vm483_vm0, %v13359_v50, -inf  ;;  %v5539_v32 = vrot.slane %v5538_v51, 2 }
 0x3d2   : > { %v4957_v34 = vadd.f32 %v4956_v28, %v4955_v48  ;;  %9654 = vpow2.f32 %v4207_v33  ;;  %v3059_v21 = vrot.slane %v3058_v52, 4  ;;  %v5889_v17 = vmul.f32 %v9637_v6, %v13237_v11 }
 0x3d3   : > { %v3640_v26 = vmax.f32 %v3638_v0, %v3639_v37  ;;  %v3643_v55 = vmax.f32 %v3641_v62, %v3642_v57  ;;  %v3065_v18 = vsel %vm483_vm0, %v13369_v58, -inf  ;;  %v5540_v56 = vadd.f32 %v5539_v32, %v5538_v51 }
 0x3d4   : > { %9656 = vrcp.f32 %v4957_v34  ;;  %v3060_v13 = vmax.f32 %v3058_v52, %v3059_v21  ;;  %v3067_v24 = vmax.f32 %v3065_v18, %v3066_v22  ;;  %v13383_v48 = vmul.f32 %v9637_v6, %v13242_v45  ;;  %v13391_v52 = vpop.f32.mrf.mxu1 }
 0x3d5   : > { %v13380_v1 = vpop.eup %9640  ;;  %v3979_v27 = vsub.f32 %v13300_v63, %v3640_v26  ;;  %v3980_v41 = vsub.f32 %v13284_v14, %v3640_v26  ;;  %v3644_v11 = vrot.slane %v3643_v55, 4  ;;  %v5541_v57 = vrot.slane %v5540_v56, 1  ;;  %v9965_v63 = vld [vmem:[%s10237_s27 + $0x2e0] sm:$0xff] }
 0x3d6   : > { %15083 = vst [vmem:[#allocation154_spill] sm:$0xff] %v13383_v48  ;;  %v13387_v33 = vpop.eup %9642  ;;  %v4958_v0 = vsel %vm483_vm0, %v13380_v1, 0.0  ;;  %v3061_v28 = vrot.slane %v3060_v13, 2  ;;  %v3068_v51 = vrot.slane %v3067_v24, 4  ;;  %v13396_v22 = vmul.f32 %v9965_v63, %v5889_v17 }
 0x3d7   : > { %v4959_v37 = vsel %vm483_vm0, %v13387_v33, 0.0  ;;  %v4465_v45 = vmul.f32 1.442695, %v3979_v27  ;;  %v4467_v6 = vmul.f32 1.442695, %v3980_v41  ;;  %v3645_v62 = vmax.f32 %v3643_v55, %v3644_v11 }
 0x3d8   : > { %15084 = vst [vmem:[#allocation155_spill] sm:$0xff] %v13396_v22  ;;  %v5542_v14 = vadd.f32 %v5541_v57, %v5540_v56  ;;  %v4960_v34 = vadd.f32 %v4959_v37, %v4958_v0  ;;  %v3062_v32 = vmax.f32 %v3060_v13, %v3061_v28  ;;  %v3651_v26 = vsel %vm483_vm0, %v13375_v47, -inf }
 0x3d9   : > { %9658 = vpow2.f32 %v4465_v45  ;;  %v3646_v21 = vrot.slane %v3645_v62, 2  ;;  %v3650_v18 = vsel %vm483_vm0, %v13391_v52, -inf  ;;  %v13402_v41 = vmax.f32 %v3067_v24, %v3068_v51  ;;  %v9966_v51 = vld [vmem:[%s10237_s27 + $0x700] sm:$0xff] }
 0x3da   : > { %v9645_v48 = vpop.eup %9644  ;;  %9660 = vrcp.f32 %v5542_v14  ;;  %v4961_v27 = vrot.slane %v4960_v34, 4  ;;  %v3063_v55 = vrot.slane %v3062_v32, 1  ;;  %v13412_v0 = vmul.f32 %v13367_v9, %v13248_v44  ;;  %v9967_v14 = vld [vmem:[%s10237_s27 + $0x708] sm:$0xff] }
 0x3db   : > { %v13404_v17 = vpop.eup %9646  ;;  %v6021_v56 = vmul.f32 %v9645_v48, %v13296_v4  ;;  %v6022_v13 = vmul.f32 %v9645_v48, %v13304_v3  ;;  %9662 = vpow2.f32 %v4467_v6  ;;  %v3647_v11 = vmax.f32 %v3645_v62, %v3646_v21 }
 0x3dc   : > { %15085 = vst [vmem:[#allocation156_spill] sm:$0xff] %v13404_v17  ;;  %v13408_v57 = vpop.eup %9648  ;;  %15086 = vst [vmem:[#allocation157_spill] sm:$0xff] %v13412_v0  ;;  %v4962_v28 = vadd.f32 %v4961_v27, %v4960_v34  ;;  %v3064_v37 = vmax.f32 %v3062_v32, %v3063_v55  ;;  %v13414_v45 = vmax.f32 %v3650_v18, %v3651_v26  ;;  %v3070_v55 = vrot.slane %v13402_v41, 2  ;;  %v10000_v0 = vld [vmem:[%s10237_s27 + $0x3a0] sm:$0xff] }
 0x3dd   : > { %v13416_v24 = vpop.eup %9650  ;;  %v6277_v63 = vmul.f32 %v9966_v51, %v6021_v56  ;;  %v6278_v4 = vmul.f32 %v9967_v14, %v6022_v13  ;;  %v5543_v3 = vsel %vm483_vm0, %v13408_v57, 0.0  ;;  %v3648_v48 = vrot.slane %v3647_v11, 1 }
 0x3de   : > { %v13422_v6 = vpop.eup %9652  ;;  %v4963_v62 = vrot.slane %v4962_v28, 2  ;;  %v5544_v44 = vsel %vm483_vm0, %v13416_v24, 0.0  ;;  %v3851_v34 = vsub.f32 %v13343_v29, %v3064_v37  ;;  %v3852_v32 = vsub.f32 %v13331_v53, %v3064_v37 }
 0x3df   : > { %v13428_v21 = vpop.eup %9654  ;;  %v7317_v26 = vsel %vm483_vm0, %v6277_v63, 0.0  ;;  %v5545_v18 = vadd.f32 %v5544_v44, %v5543_v3  ;;  %v4967_v27 = vsel %vm483_vm0, %v13422_v6, 0.0  ;;  %v7318_v56 = vsel %vm483_vm0, %v6278_v4, 0.0 }
 0x3e0   : > { %v4964_v13 = vadd.f32 %v4963_v62, %v4962_v28  ;;  %v4968_v51 = vsel %vm483_vm0, %v13428_v21, 0.0  ;;  %v4209_v29 = vmul.f32 1.442695, %v3851_v34  ;;  %v4211_v22 = vmul.f32 1.442695, %v3852_v32  ;;  %v9968_v34 = vld [vmem:[%s10237_s27 + $0x300] sm:$0xff] }
 0x3e1   : > { %v9657_v14 = vpop.eup %9656  ;;  %v5546_v53 = vrot.slane %v5545_v18, 4  ;;  %v4969_v37 = vadd.f32 %v4968_v51, %v4967_v27  ;;  %v3649_v63 = vmax.f32 %v3647_v11, %v3648_v48  ;;  %v3653_v10 = vrot.slane %v13414_v45, 4 }
 0x3e2   : > { %v5893_v3 = vmul.f32 %v9657_v14, %v13323_v59  ;;  %v5894_v44 = vmul.f32 %v9657_v14, %v13325_v15  ;;  %v4965_v31 = vrot.slane %v4964_v13, 1  ;;  %9664 = vpow2.f32 %v4209_v29 }
 0x3e3   : > { %v5547_v4 = vadd.f32 %v5546_v53, %v5545_v18  ;;  %v4970_v28 = vrot.slane %v4969_v37, 4  ;;  %v3981_v62 = vsub.f32 %v13365_v8, %v3649_v63  ;;  %v7319_v2 = vadd.f32 %v7318_v56, %v7317_v26 }
 0x3e4   : > { %v6149_v38 = vmul.f32 %v9968_v34, %v5893_v3  ;;  %v6150_v7 = vmul.f32 %v9969_v35, %v5894_v44  ;;  %v4966_v27 = vadd.f32 %v4965_v31, %v4964_v13  ;;  %9666 = vpow2.f32 %v4211_v22  ;;  %v13450_v35 = vpop.f32.mrf.mxu0 }
 0x3e5   : > { %v5548_v32 = vrot.slane %v5547_v4, 2  ;;  %v4971_v11 = vadd.f32 %v4970_v28, %v4969_v37  ;;  %v3982_v59 = vsub.f32 %v13351_v36, %v3649_v63  ;;  %v4469_v51 = vmul.f32 1.442695, %v3981_v62  ;;  %v13458_v63 = vpop.f32.mrf.mxu1 }
 0x3e6   : > { %v13444_v15 = vpop.eup %9658  ;;  %v6741_v48 = vsel %vm483_vm0, %v6149_v38, 0.0  ;;  %v6742_v18 = vsel %vm483_vm0, %v6150_v7, 0.0  ;;  %9668 = vrcp.f32 %v4966_v27  ;;  %v7320_v13 = vrot.slane %v7319_v2, 4  ;;  %v13466_v27 = vpop.f32.mrf.mxu0 }
 0x3e7   : > { %v9661_v8 = vpop.eup %9660  ;;  %v6743_v26 = vadd.f32 %v6742_v18, %v6741_v48  ;;  %v5549_v56 = vadd.f32 %v5548_v32, %v5547_v4  ;;  %v4972_v29 = vrot.slane %v4971_v11, 2  ;;  %v5552_v31 = vsel %vm483_vm0, %v13444_v15, 0.0  ;;  %v9971_v32 = vld [vmem:[%s10237_s27 + $0x718] sm:$0xff] }
 0x3e8   : > { %v13452_v22 = vpop.eup %9662  ;;  %v6023_v36 = vmul.f32 %v9661_v8, %v13335_v20  ;;  %v6024_v38 = vmul.f32 %v9661_v8, %v13348_v61  ;;  %9670 = vpow2.f32 %v4469_v51  ;;  %v4471_v7 = vmul.f32 1.442695, %v3982_v59  ;;  %v9970_v20 = vld [vmem:[%s10237_s27 + $0x710] sm:$0xff] }
 0x3e9   : > { %v5550_v14 = vrot.slane %v5549_v56, 1  ;;  %v4973_v53 = vadd.f32 %v4972_v29, %v4971_v11  ;;  %v5553_v37 = vsel %vm483_vm0, %v13452_v22, 0.0  ;;  %v13462_v3 = vmul.f32 %v13404_v17, %v13287_v43  ;;  %v13474_v29 = vpop.f32.mrf.mxu1 }
 0x3ea   : > { %v6744_v44 = vrot.slane %v6743_v26, 4  ;;  %v5554_v4 = vadd.f32 %v5553_v37, %v5552_v31  ;;  %9672 = vpow2.f32 %v4471_v7  ;;  %v6279_v61 = vmul.f32 %v9970_v20, %v6023_v36 }
 0x3eb   : > { %15087 = vst [vmem:[#allocation158_spill] sm:$0xff] %v13462_v3  ;;  %v5551_v28 = vadd.f32 %v5550_v14, %v5549_v56  ;;  %v4974_v62 = vrot.slane %v4973_v53, 1  ;;  %v3071_v34 = vmax.f32 %v13402_v41, %v3070_v55  ;;  %v6280_v11 = vmul.f32 %v9971_v32, %v6024_v38 }
 0x3ec   : > { %v5555_v59 = vrot.slane %v5554_v4, 4  ;;  %v3654_v48 = vmax.f32 %v13414_v45, %v3653_v10  ;;  %v3075_v43 = vsel %vm483_vm0, %v13450_v35, -inf  ;;  %v13472_v18 = vadd.f32 %v7320_v13, %v7319_v2 }
 0x3ed   : > { %9674 = vrcp.f32 %v5551_v28  ;;  %v4975_v51 = vadd.f32 %v4974_v62, %v4973_v53  ;;  %v3072_v8 = vrot.slane %v3071_v34, 1  ;;  %v13476_v56 = vadd.f32 %v6744_v44, %v6743_v26 }
 0x3ee   : > { %v5556_v41 = vadd.f32 %v5555_v59, %v5554_v4  ;;  %v3655_v55 = vrot.slane %v3654_v48, 2  ;;  %v3074_v31 = vsel %vm483_vm0, %v13466_v27, -inf  ;;  %v7326_v36 = vsel %vm483_vm0, %v6279_v61, 0.0 }
 0x3ef   : > { %15088 = vst [vmem:[#allocation159_spill] sm:$0xff] %v13476_v56  ;;  %9676 = vrcp.f32 %v4975_v51  ;;  %v3073_v10 = vmax.f32 %v3071_v34, %v3072_v8  ;;  %v3076_v45 = vmax.f32 %v3074_v31, %v3075_v43  ;;  %v13481_v38 = vpop.eup %9664  ;;  %v7327_v2 = vsel %vm483_vm0, %v6280_v11, 0.0 }
 0x3f0   : > { %v5557_v7 = vrot.slane %v5556_v41, 2  ;;  %v3656_v13 = vmax.f32 %v3654_v48, %v3655_v55  ;;  %v3659_v26 = vsel %vm483_vm0, %v13474_v29, -inf  ;;  %v4976_v14 = vsel %vm483_vm0, %v13481_v38, 0.0 }
 0x3f1   : > { %v3853_v53 = vsub.f32 %v13369_v58, %v3073_v10  ;;  %v3854_v37 = vsub.f32 %v13359_v50, %v3073_v10  ;;  %v3660_v44 = vsel %vm483_vm0, %v13458_v63, -inf  ;;  %v13492_v4 = vpop.eup %9666  ;;  %v3077_v28 = vrot.slane %v3076_v45, 4  ;;  %v9972_v10 = vld [vmem:[%s10237_s27 + $0x310] sm:$0xff] }
 0x3f2   : > { %v5558_v20 = vadd.f32 %v5557_v7, %v5556_v41  ;;  %v3657_v61 = vrot.slane %v3656_v13, 1  ;;  %v3661_v62 = vmax.f32 %v3659_v26, %v3660_v44  ;;  %v7328_v32 = vadd.f32 %v7327_v2, %v7326_v36  ;;  %v9973_v36 = vld [vmem:[%s10237_s27 + $0x318] sm:$0xff] }
 0x3f3   : > { %v9669_v34 = vpop.eup %9668  ;;  %v4977_v11 = vsel %vm483_vm0, %v13492_v4, 0.0  ;;  %v4213_v59 = vmul.f32 1.442695, %v3853_v53  ;;  %v4215_v58 = vmul.f32 1.442695, %v3854_v37  ;;  %v3078_v55 = vmax.f32 %v3076_v45, %v3077_v28 }
 0x3f4   : > { %v5895_v50 = vmul.f32 %v9669_v34, %v13380_v1  ;;  %v5896_v48 = vmul.f32 %v9669_v34, %v13387_v33  ;;  %v5559_v43 = vrot.slane %v5558_v20, 1  ;;  %v4978_v51 = vadd.f32 %v4977_v11, %v4976_v14 }
 0x3f5   : > { %v13498_v8 = vpop.eup %9670  ;;  %9678 = vpow2.f32 %v4213_v59  ;;  %v3658_v41 = vmax.f32 %v3656_v13, %v3657_v61  ;;  %v3662_v31 = vrot.slane %v3661_v62, 4  ;;  %v7329_v59 = vrot.slane %v7328_v32, 4 }
 0x3f6   : > { %v6151_v7 = vmul.f32 %v9972_v10, %v5895_v50  ;;  %v6152_v2 = vmul.f32 %v9973_v36, %v5896_v48  ;;  %v5560_v26 = vadd.f32 %v5559_v43, %v5558_v20  ;;  %v4979_v44 = vrot.slane %v4978_v51, 4 }
 0x3f7   : > { %v13502_v53 = vpop.eup %9672  ;;  %v5561_v1 = vsel %vm483_vm0, %v13498_v8, 0.0  ;;  %9680 = vpow2.f32 %v4215_v58  ;;  %v3983_v33 = vsub.f32 %v13391_v52, %v3658_v41  ;;  %v3984_v14 = vsub.f32 %v13375_v47, %v3658_v41  ;;  %v13512_v47 = vpop.f32.mrf.mxu0 }
 0x3f8   : > { %v6750_v13 = vsel %vm483_vm0, %v6151_v7, 0.0  ;;  %v6751_v45 = vsel %vm483_vm0, %v6152_v2, 0.0  ;;  %9682 = vrcp.f32 %v5560_v26  ;;  %v4980_v37 = vadd.f32 %v4979_v44, %v4978_v51  ;;  %v9974_v26 = vld [vmem:[%s10237_s27 + $0x720] sm:$0xff] }
 0x3f9   : > { %v6752_v61 = vadd.f32 %v6751_v45, %v6750_v13  ;;  %v5562_v20 = vsel %vm483_vm0, %v13502_v53, 0.0  ;;  %v4473_v28 = vmul.f32 1.442695, %v3983_v33  ;;  %v4475_v34 = vmul.f32 1.442695, %v3984_v14  ;;  %v9975_v33 = vld [vmem:[%s10237_s27 + $0x728] sm:$0xff] }
 0x3fa   : > { %v9675_v11 = vpop.eup %9674  ;;  %v4981_v58 = vrot.slane %v4980_v37, 2  ;;  %v5563_v52 = vadd.f32 %v5562_v20, %v5561_v1  ;;  %v3079_v50 = vrot.slane %v3078_v55, 2  ;;  %v3663_v51 = vmax.f32 %v3661_v62, %v3662_v31  ;;  %v13520_v20 = vpop.f32.mrf.mxu1 }
 0x3fb   : > { %v6025_v48 = vmul.f32 %v9675_v11, %v13408_v57  ;;  %v6026_v43 = vmul.f32 %v9675_v11, %v13416_v24  ;;  %9684 = vpow2.f32 %v4473_v28  ;;  %v6753_v2 = vrot.slane %v6752_v61, 4  ;;  %v13522_v62 = vpop.f32.mrf.mxu0 }
 0x3fc   : > { %v9677_v41 = vpop.eup %9676  ;;  %v4982_v10 = vadd.f32 %v4981_v58, %v4980_v37  ;;  %v5564_v7 = vrot.slane %v5563_v52, 4  ;;  %9686 = vpow2.f32 %v4475_v34  ;;  %v3080_v36 = vmax.f32 %v3078_v55, %v3079_v50  ;;  %v9976_v34 = vld [vmem:[%s10237_s27 + $0x320] sm:$0xff] }
 0x3fd   : > { %v6281_v44 = vmul.f32 %v9974_v26, %v6025_v48  ;;  %v6282_v1 = vmul.f32 %v9975_v33, %v6026_v43  ;;  %v5897_v14 = vmul.f32 %v9677_v41, %v13422_v6  ;;  %v5898_v13 = vmul.f32 %v9677_v41, %v13428_v21  ;;  %v9977_v41 = vld [vmem:[%s10237_s27 + $0x328] sm:$0xff] }
 0x3fe   : > { %v4983_v57 = vrot.slane %v4982_v10, 1  ;;  %v5565_v45 = vadd.f32 %v5564_v7, %v5563_v52  ;;  %v3081_v24 = vrot.slane %v3080_v36, 1  ;;  %v13524_v31 = vadd.f32 %v7329_v59, %v7328_v32 }
 0x3ff   : > { %v7335_v55 = vsel %vm483_vm0, %v6281_v44, 0.0  ;;  %v3664_v37 = vrot.slane %v3663_v51, 2  ;;  %v3084_v28 = vsel %vm483_vm0, %v13512_v47, -inf  ;;  %v7336_v6 = vsel %vm483_vm0, %v6282_v1, 0.0  ;;  %v13540_v44 = vpop.f32.mrf.mxu1 }
 0x400   : > { %v6153_v21 = vmul.f32 %v9976_v34, %v5897_v14  ;;  %v4984_v11 = vadd.f32 %v4983_v57, %v4982_v10  ;;  %v5566_v58 = vrot.slane %v5565_v45, 2  ;;  %v3082_v52 = vmax.f32 %v3080_v36, %v3081_v24 }
 0x401   : > { %v3665_v50 = vmax.f32 %v3663_v51, %v3664_v37  ;;  %v3669_v48 = vsel %vm483_vm0, %v13520_v20, -inf  ;;  %v3083_v32 = vsel %vm483_vm0, %v13522_v62, -inf  ;;  %v13537_v43 = vadd.f32 %v6753_v2, %v6752_v61 }
 0x402   : > { %v13535_v59 = vpop.eup %9678  ;;  %v6154_v7 = vmul.f32 %v9977_v41, %v5898_v13  ;;  %9688 = vrcp.f32 %v4984_v11  ;;  %v5567_v26 = vadd.f32 %v5566_v58, %v5565_v45  ;;  %v13542_v10 = vadd.f32 %v7336_v6, %v7335_v55 }
 0x403   : > { %15089 = vst [vmem:[#allocation160_spill] sm:$0xff] %v13537_v43  ;;  %v4985_v51 = vsel %vm483_vm0, %v13535_v59, 0.0  ;;  %v3855_v36 = vsub.f32 %v13466_v27, %v3082_v52  ;;  %v3856_v33 = vsub.f32 %v13450_v35, %v3082_v52  ;;  %v6759_v61 = vsel %vm483_vm0, %v6153_v21, 0.0  ;;  %v13557_v21 = vpop.f32.mrf.mxu0 }
 0x404   : > { %v13548_v1 = vpop.eup %9680  ;;  %v5568_v2 = vrot.slane %v5567_v26, 1  ;;  %v3666_v14 = vrot.slane %v3665_v50, 1  ;;  %v3085_v13 = vmax.f32 %v3083_v32, %v3084_v28  ;;  %v3668_v37 = vsel %vm483_vm0, %v13540_v44, -inf  ;;  %v9978_v32 = vld [vmem:[%s10237_s27 + $0x730] sm:$0xff] }
 0x405   : > { %v9683_v57 = vpop.eup %9682  ;;  %v4986_v45 = vsel %vm483_vm0, %v13548_v1, 0.0  ;;  %v4217_v24 = vmul.f32 1.442695, %v3855_v36  ;;  %v4219_v55 = vmul.f32 1.442695, %v3856_v33  ;;  %v6760_v27 = vsel %vm483_vm0, %v6154_v7, 0.0  ;;  %v13563_v7 = vpop.f32.mrf.mxu1 }
 0x406   : > { %v6027_v35 = vmul.f32 %v9683_v57, %v13444_v15  ;;  %v5569_v6 = vadd.f32 %v5568_v2, %v5567_v26  ;;  %v4987_v34 = vadd.f32 %v4986_v45, %v4985_v51  ;;  %v6028_v28 = vmul.f32 %v9683_v57, %v13452_v22  ;;  %v13576_v57 = vpop.f32.mrf.mxu0  ;;  %v9979_v45 = vld [vmem:[%s10237_s27 + $0x738] sm:$0xff] }
 0x407   : > { %9690 = vpow2.f32 %v4217_v24  ;;  %v3667_v11 = vmax.f32 %v3665_v50, %v3666_v14  ;;  %v3086_v58 = vrot.slane %v3085_v13, 4  ;;  %v3670_v33 = vmax.f32 %v3668_v37, %v3669_v48 }
 0x408   : > { %v13560_v52 = vpop.eup %9684  ;;  %v6283_v41 = vmul.f32 %v9978_v32, %v6027_v35  ;;  %9692 = vrcp.f32 %v5569_v6  ;;  %v4988_v36 = vrot.slane %v4987_v34, 4  ;;  %v13572_v2 = vadd.f32 %v6760_v27, %v6759_v61 }
 0x409   : > { %v13565_v15 = vpop.eup %9686  ;;  %v5570_v26 = vsel %vm483_vm0, %v13560_v52, 0.0  ;;  %9694 = vpow2.f32 %v4219_v55  ;;  %v3985_v22 = vsub.f32 %v13474_v29, %v3667_v11  ;;  %v3986_v50 = vsub.f32 %v13458_v63, %v3667_v11  ;;  %v13581_v11 = vpop.f32.mrf.mxu1 }
 0x40a   : > { %15090 = vst [vmem:[#allocation161_spill] sm:$0xff] %v13572_v2  ;;  %v4989_v14 = vadd.f32 %v4988_v36, %v4987_v34  ;;  %v5571_v48 = vsel %vm483_vm0, %v13565_v15, 0.0  ;;  %v6284_v24 = vmul.f32 %v9979_v45, %v6028_v28  ;;  %v3087_v32 = vmax.f32 %v3085_v13, %v3086_v58 }
 0x40b   : > { %v5572_v37 = vadd.f32 %v5571_v48, %v5570_v26  ;;  %v4477_v35 = vmul.f32 1.442695, %v3985_v22  ;;  %v4479_v6 = vmul.f32 1.442695, %v3986_v50  ;;  %v3671_v29 = vrot.slane %v3670_v33, 4 }
 0x40c   : > { %v4990_v55 = vrot.slane %v4989_v14, 2  ;;  %v3093_v63 = vsel %vm483_vm0, %v13557_v21, -inf  ;;  %v7344_v61 = vsel %vm483_vm0, %v6283_v41, 0.0  ;;  %v3092_v34 = vsel %vm483_vm0, %v13576_v57, -inf }
 0x40d   : > { %v5573_v27 = vrot.slane %v5572_v37, 4  ;;  %9696 = vpow2.f32 %v4477_v35  ;;  %v3088_v28 = vrot.slane %v3087_v32, 2  ;;  %v3672_v26 = vmax.f32 %v3670_v33, %v3671_v29  ;;  %v9980_v29 = vld [vmem:[%s10237_s27 + $0x330] sm:$0xff] }
 0x40e   : > { %v4991_v36 = vadd.f32 %v4990_v55, %v4989_v14  ;;  %9698 = vpow2.f32 %v4479_v6  ;;  %v7345_v58 = vsel %vm483_vm0, %v6284_v24, 0.0  ;;  %v3094_v50 = vmax.f32 %v3092_v34, %v3093_v63  ;;  %v9981_v24 = vld [vmem:[%s10237_s27 + $0x338] sm:$0xff] }
 0x40f   : > { %v9689_v13 = vpop.eup %9688  ;;  %v5574_v22 = vadd.f32 %v5573_v27, %v5572_v37  ;;  %v3677_v48 = vsel %vm483_vm0, %v13581_v11, -inf  ;;  %v3089_v51 = vmax.f32 %v3087_v32, %v3088_v28  ;;  %v3673_v6 = vrot.slane %v3672_v26, 2 }
 0x410   : > { %v5899_v41 = vmul.f32 %v9689_v13, %v13481_v38  ;;  %v5900_v45 = vmul.f32 %v9689_v13, %v13492_v4  ;;  %v4992_v35 = vrot.slane %v4991_v36, 1  ;;  %v3678_v33 = vsel %vm483_vm0, %v13563_v7, -inf }
 0x411   : > { %v5575_v14 = vrot.slane %v5574_v22, 2  ;;  %v3095_v55 = vrot.slane %v3094_v50, 4  ;;  %v3090_v27 = vrot.slane %v3089_v51, 1  ;;  %v3674_v17 = vmax.f32 %v3672_v26, %v3673_v6  ;;  %v13604_v26 = vpop.f32.mrf.mxu0 }
 0x412   : > { %v6155_v3 = vmul.f32 %v9980_v29, %v5899_v41  ;;  %v6156_v37 = vmul.f32 %v9981_v24, %v5900_v45  ;;  %v4993_v63 = vadd.f32 %v4992_v35, %v4991_v36  ;;  %v3679_v38 = vmax.f32 %v3677_v48, %v3678_v33  ;;  %v13617_v24 = vpop.f32.mrf.mxu1 }
 0x413   : > { %v5576_v34 = vadd.f32 %v5575_v14, %v5574_v22  ;;  %v3096_v43 = vmax.f32 %v3094_v50, %v3095_v55  ;;  %v13598_v32 = vadd.f32 %v7345_v58, %v7344_v61  ;;  %v3091_v28 = vmax.f32 %v3089_v51, %v3090_v27 }
 0x414   : > { %v13595_v56 = vpop.eup %9690  ;;  %9700 = vrcp.f32 %v4993_v63  ;;  %v6768_v42 = vsel %vm483_vm0, %v6155_v3, 0.0  ;;  %v6769_v41 = vsel %vm483_vm0, %v6156_v37, 0.0  ;;  %v3675_v22 = vrot.slane %v3674_v17, 1 }
 0x415   : > { %v9693_v13 = vpop.eup %9692  ;;  %v4994_v36 = vsel %vm483_vm0, %v13595_v56, 0.0  ;;  %v5577_v48 = vrot.slane %v5576_v34, 1  ;;  %v3857_v45 = vsub.f32 %v13522_v62, %v3091_v28  ;;  %v3858_v61 = vsub.f32 %v13512_v47, %v3091_v28 }
 0x416   : > { %v13606_v50 = vpop.eup %9694  ;;  %v3102_v51 = vsel %vm483_vm0, %v13604_v26, -inf  ;;  %v3676_v58 = vmax.f32 %v3674_v17, %v3675_v22  ;;  %v3097_v35 = vrot.slane %v3096_v43, 2  ;;  %v3680_v14 = vrot.slane %v3679_v38, 4 }
 0x417   : > { %v4995_v3 = vsel %vm483_vm0, %v13606_v50, 0.0  ;;  %v13614_v6 = vadd.f32 %v6769_v41, %v6768_v42  ;;  %v6029_v33 = vmul.f32 %v9693_v13, %v13498_v8  ;;  %v4221_v29 = vmul.f32 1.442695, %v3857_v45  ;;  %v13624_v41 = vpop.f32.mrf.mxu0 }
 0x418   : > { %v4996_v55 = vadd.f32 %v4995_v3, %v4994_v36  ;;  %v6030_v62 = vmul.f32 %v9693_v13, %v13502_v53  ;;  %v4223_v47 = vmul.f32 1.442695, %v3858_v61  ;;  %v3987_v37 = vsub.f32 %v13540_v44, %v3676_v58 }
 0x419   : > { %15091 = vst [vmem:[#allocation162_spill] sm:$0xff] %v13614_v6  ;;  %v3988_v63 = vsub.f32 %v13520_v20, %v3676_v58  ;;  %v5578_v17 = vadd.f32 %v5577_v48, %v5576_v34  ;;  %9702 = vpow2.f32 %v4221_v29  ;;  %v3098_v42 = vmax.f32 %v3096_v43, %v3097_v35  ;;  %v13632_v48 = vpop.f32.mrf.mxu1  ;;  %v9982_v43 = vld [vmem:[%s10237_s27 + $0x740] sm:$0xff] }
 0x41a   : > { %v13622_v27 = vpop.eup %9696  ;;  %v4997_v28 = vrot.slane %v4996_v55, 4  ;;  %9704 = vpow2.f32 %v4223_v47  ;;  %v4481_v53 = vmul.f32 1.442695, %v3987_v37  ;;  %v3681_v34 = vmax.f32 %v3679_v38, %v3680_v14  ;;  %v9983_v47 = vld [vmem:[%s10237_s27 + $0x748] sm:$0xff] }
 0x41b   : > { %v13626_v8 = vpop.eup %9698  ;;  %v5579_v36 = vsel %vm483_vm0, %v13622_v27, 0.0  ;;  %v4483_v44 = vmul.f32 1.442695, %v3988_v63  ;;  %v3099_v22 = vrot.slane %v3098_v42, 1  ;;  %v6285_v45 = vmul.f32 %v9982_v43, %v6029_v33 }
 0x41c   : > { %v4998_v13 = vadd.f32 %v4997_v28, %v4996_v55  ;;  %v5580_v20 = vsel %vm483_vm0, %v13626_v8, 0.0  ;;  %9706 = vpow2.f32 %v4481_v53  ;;  %v3101_v3 = vsel %vm483_vm0, %v13624_v41, -inf  ;;  %v13644_v53 = vpop.f32.mrf.mxu0 }
 0x41d   : > { %v5581_v61 = vadd.f32 %v5580_v20, %v5579_v36  ;;  %9708 = vpow2.f32 %v4483_v44  ;;  %v3100_v35 = vmax.f32 %v3098_v42, %v3099_v22  ;;  %v3682_v29 = vrot.slane %v3681_v34, 2 }
 0x41e   : > { %v4999_v58 = vrot.slane %v4998_v13, 2  ;;  %v13638_v55 = vmul.f32 %v9983_v47, %v6030_v62  ;;  %v3103_v63 = vmax.f32 %v3101_v3, %v3102_v51  ;;  %v3686_v38 = vsel %vm483_vm0, %v13632_v48, -inf }
 0x41f   : > { %v5582_v37 = vrot.slane %v5581_v61, 4  ;;  %v3859_v33 = vsub.f32 %v13576_v57, %v3100_v35  ;;  %v3860_v28 = vsub.f32 %v13557_v21, %v3100_v35  ;;  %v3683_v36 = vmax.f32 %v3681_v34, %v3682_v29  ;;  %v13649_v21 = vpop.f32.mrf.mxu1  ;;  %v13655_v35 = vpop.f32.mrf.mxu0 }
 0x420   : > { %v5000_v14 = vadd.f32 %v4999_v58, %v4998_v13  ;;  %9710 = vrcp.f32 %v5578_v17  ;;  %v3687_v62 = vsel %vm483_vm0, %v13617_v24, -inf  ;;  %v3104_v44 = vrot.slane %v3103_v63, 4 }
 0x421   : > { %v9701_v20 = vpop.eup %9700  ;;  %v5583_v42 = vadd.f32 %v5582_v37, %v5581_v61  ;;  %v4225_v43 = vmul.f32 1.442695, %v3859_v33  ;;  %v3688_v3 = vmax.f32 %v3686_v38, %v3687_v62  ;;  %v4227_v58 = vmul.f32 1.442695, %v3860_v28 }
 0x422   : > { %v5901_v51 = vmul.f32 %v9701_v20, %v13535_v59  ;;  %v5001_v22 = vrot.slane %v5000_v14, 1  ;;  %v3684_v57 = vrot.slane %v3683_v36, 1  ;;  %v3105_v47 = vmax.f32 %v3103_v63, %v3104_v44 }
 0x423   : > { %v5584_v13 = vrot.slane %v5583_v42, 2  ;;  %v13652_v34 = vsel %vm483_vm0, %v6285_v45, 0.0  ;;  %v5902_v17 = vmul.f32 %v9701_v20, %v13548_v1  ;;  %9712 = vpow2.f32 %v4225_v43  ;;  %v9984_v1 = vld [vmem:[%s10237_s27 + $0x340] sm:$0xff] }
 0x424   : > { %v5002_v61 = vadd.f32 %v5001_v22, %v5000_v14  ;;  %9714 = vpow2.f32 %v4227_v58  ;;  %v3685_v29 = vmax.f32 %v3683_v36, %v3684_v57  ;;  %v3106_v37 = vrot.slane %v3105_v47, 2  ;;  %v9985_v58 = vld [vmem:[%s10237_s27 + $0x348] sm:$0xff] }
 0x425   : > { %v5585_v59 = vadd.f32 %v5584_v13, %v5583_v42  ;;  %v3689_v38 = vrot.slane %v3688_v3, 4  ;;  %v3111_v63 = vsel %vm483_vm0, %v13644_v53, -inf  ;;  %v3696_v45 = vsel %vm483_vm0, %v13649_v21, -inf  ;;  %v13672_v13 = vpop.f32.mrf.mxu1 }
 0x426   : > { %9716 = vrcp.f32 %v5002_v61  ;;  %v13661_v33 = vpop.eup %9702  ;;  %v6157_v14 = vmul.f32 %v9984_v1, %v5901_v51  ;;  %v3989_v20 = vsub.f32 %v13581_v11, %v3685_v29  ;;  %v3110_v36 = vsel %vm483_vm0, %v13655_v35, -inf }
 0x427   : > { %v5586_v28 = vrot.slane %v5585_v59, 1  ;;  %v13667_v42 = vpop.eup %9704  ;;  %v5003_v62 = vsel %vm483_vm0, %v13661_v33, 0.0  ;;  %v3990_v44 = vsub.f32 %v13563_v7, %v3685_v29  ;;  %v3107_v22 = vmax.f32 %v3105_v47, %v3106_v37 }
 0x428   : > { %v3690_v43 = vmax.f32 %v3688_v3, %v3689_v38  ;;  %v13675_v57 = vmul.f32 %v9985_v58, %v5902_v17  ;;  %v5004_v11 = vsel %vm483_vm0, %v13667_v42, 0.0  ;;  %v4485_v61 = vmul.f32 1.442695, %v3989_v20 }
 0x429   : > { %v5587_v51 = vadd.f32 %v5586_v28, %v5585_v59  ;;  %v13679_v1 = vpop.eup %9706  ;;  %v5005_v4 = vadd.f32 %v5004_v11, %v5003_v62  ;;  %v4487_v6 = vmul.f32 1.442695, %v3990_v44  ;;  %v3108_v2 = vrot.slane %v3107_v22, 1 }
 0x42a   : > { %15092 = vst [vmem:[#allocation163_spill] sm:$0xff] %v13675_v57  ;;  %v3691_v5 = vrot.slane %v3690_v43, 2  ;;  %v13681_v40 = vpop.eup %9708  ;;  %v5588_v7 = vsel %vm483_vm0, %v13679_v1, 0.0  ;;  %v3112_v3 = vmax.f32 %v3110_v36, %v3111_v63  ;;  %v3695_v47 = vsel %vm483_vm0, %v13672_v13, -inf }
 0x42b   : > { %9718 = vrcp.f32 %v5587_v51  ;;  %v5006_v17 = vrot.slane %v5005_v4, 4  ;;  %v5589_v59 = vsel %vm483_vm0, %v13681_v40, 0.0  ;;  %v3109_v29 = vmax.f32 %v3107_v22, %v3108_v2 }
 0x42c   : > { %9720 = vpow2.f32 %v4485_v61  ;;  %v5590_v37 = vadd.f32 %v5589_v59, %v5588_v7  ;;  %v3692_v38 = vmax.f32 %v3690_v43, %v3691_v5  ;;  %v3113_v28 = vrot.slane %v3112_v3, 4  ;;  %v13697_v7 = vpop.f32.mrf.mxu0 }
 0x42d   : > { %9722 = vpow2.f32 %v4487_v6  ;;  %v9711_v20 = vpop.eup %9710  ;;  %v5007_v62 = vadd.f32 %v5006_v17, %v5005_v4  ;;  %v3861_v44 = vsub.f32 %v13624_v41, %v3109_v29  ;;  %v3862_v58 = vsub.f32 %v13604_v26, %v3109_v29 }
 0x42e   : > { %v3697_v63 = vmax.f32 %v3695_v47, %v3696_v45  ;;  %v13692_v36 = vsel %vm483_vm0, %v6157_v14, 0.0  ;;  %v5591_v51 = vrot.slane %v5590_v37, 4  ;;  %v3693_v11 = vrot.slane %v3692_v38, 1 }
 0x42f   : > { %15093 = vst [vmem:[#allocation164_spill] sm:$0xff] %v13692_v36  ;;  %v3114_v57 = vmax.f32 %v3112_v3, %v3113_v28  ;;  %v5008_v25 = vrot.slane %v5007_v62, 2  ;;  %v4229_v61 = vmul.f32 1.442695, %v3861_v44  ;;  %v4231_v2 = vmul.f32 1.442695, %v3862_v58 }
 0x430   : > { %v3698_v22 = vrot.slane %v3697_v63, 4  ;;  %v13694_v6 = vpop.eup %9712  ;;  %v6031_v5 = vmul.f32 %v9711_v20, %v13560_v52  ;;  %v5592_v4 = vadd.f32 %v5591_v51, %v5590_v37  ;;  %v3694_v43 = vmax.f32 %v3692_v38, %v3693_v11  ;;  %v13713_v51 = vpop.f32.mrf.mxu0  ;;  %v9986_v11 = vld [vmem:[%s10237_s27 + $0x750] sm:$0xff] }
 0x431   : > { %v3115_v41 = vrot.slane %v3114_v57, 2  ;;  %v13699_v26 = vpop.eup %9714  ;;  %v5009_v45 = vadd.f32 %v5008_v25, %v5007_v62  ;;  %v5012_v14 = vsel %vm483_vm0, %v13694_v6, 0.0  ;;  %9724 = vpow2.f32 %v4229_v61 }
 0x432   : > { %15094 = vst [vmem:[#allocation165_spill] sm:$0xff] %v13699_v26  ;;  %v3699_v3 = vmax.f32 %v3697_v63, %v3698_v22  ;;  %v5593_v17 = vrot.slane %v5592_v4, 2  ;;  %v5013_v59 = vsel %vm483_vm0, %v13699_v26, 0.0  ;;  %9726 = vpow2.f32 %v4231_v2  ;;  %v13711_v63 = vpop.f32.mrf.mxu1 }
 0x433   : > { %v9717_v47 = vpop.eup %9716  ;;  %v3991_v52 = vsub.f32 %v13632_v48, %v3694_v43  ;;  %v13707_v29 = vmul.f32 %v9711_v20, %v13565_v15  ;;  %v5010_v25 = vrot.slane %v5009_v45, 1  ;;  %v5014_v38 = vadd.f32 %v5013_v59, %v5012_v14 }
 0x434   : > { %v5903_v37 = vmul.f32 %v9717_v47, %v13595_v56  ;;  %v5594_v28 = vadd.f32 %v5593_v17, %v5592_v4  ;;  %v3992_v62 = vsub.f32 %v13617_v24, %v3694_v43  ;;  %v3116_v58 = vmax.f32 %v3114_v57, %v3115_v41  ;;  %v9987_v17 = vld [vmem:[%s10237_s27 + $0x350] sm:$0xff] }
 0x435   : > { %v4489_v44 = vmul.f32 1.442695, %v3991_v52  ;;  %v13716_v61 = vmul.f32 %v9986_v11, %v6031_v5  ;;  %v5015_v48 = vrot.slane %v5014_v38, 4  ;;  %v3700_v15 = vrot.slane %v3699_v3, 2 }
 0x436   : > { %v3120_v56 = vsel %vm483_vm0, %v13697_v7, -inf  ;;  %v5011_v20 = vadd.f32 %v5010_v25, %v5009_v45  ;;  %v4491_v2 = vmul.f32 1.442695, %v3992_v62  ;;  %v3117_v22 = vrot.slane %v3116_v58, 1 }
 0x437   : > { %9728 = vpow2.f32 %v4489_v44  ;;  %v5016_v4 = vadd.f32 %v5015_v48, %v5014_v38  ;;  %v3701_v57 = vmax.f32 %v3699_v3, %v3700_v15  ;;  %v3705_v43 = vsel %vm483_vm0, %v13711_v63, -inf  ;;  %v13736_v44 = vpop.f32.mrf.mxu1 }
 0x438   : > { %v9719_v24 = vpop.eup %9718  ;;  %v3119_v41 = vsel %vm483_vm0, %v13713_v51, -inf  ;;  %v13727_v14 = vmul.f32 %v9717_v47, %v13606_v50  ;;  %v13730_v59 = vmul.f32 %v9987_v17, %v5903_v37  ;;  %v5595_v45 = vrot.slane %v5594_v28, 1  ;;  %v13743_v17 = vpop.f32.mrf.mxu0 }
 0x439   : > { %v13724_v5 = vpop.eup %9720  ;;  %9730 = vpow2.f32 %v4491_v2  ;;  %v5017_v25 = vrot.slane %v5016_v4, 2  ;;  %v3118_v38 = vmax.f32 %v3116_v58, %v3117_v22  ;;  %v3702_v62 = vrot.slane %v3701_v57, 1 }
 0x43a   : > { %15095 = vst [vmem:[#allocation166_spill] sm:$0xff] %v13727_v14  ;;  %15096 = vst [vmem:[#allocation167_spill] sm:$0xff] %v13730_v59  ;;  %v13732_v52 = vpop.eup %9722  ;;  %v5597_v3 = vsel %vm483_vm0, %v13724_v5, 0.0  ;;  %v6033_v11 = vmul.f32 %v9719_v24, %v13622_v27  ;;  %9732 = vrcp.f32 %v5011_v20  ;;  %v3121_v47 = vmax.f32 %v3119_v41, %v3120_v56 }
 0x43b   : > { %v5598_v50 = vsel %vm483_vm0, %v13732_v52, 0.0  ;;  %v5018_v37 = vadd.f32 %v5017_v25, %v5016_v4  ;;  %v3863_v15 = vsub.f32 %v13655_v35, %v3118_v38  ;;  %v3864_v2 = vsub.f32 %v13644_v53, %v3118_v38 }
 0x43c   : > { %v5599_v48 = vadd.f32 %v5598_v50, %v5597_v3  ;;  %v13746_v58 = vmul.f32 %v9719_v24, %v13626_v8  ;;  %v3703_v22 = vmax.f32 %v3701_v57, %v3702_v62  ;;  %v3122_v59 = vrot.slane %v3121_v47, 4  ;;  %v13754_v3 = vpop.f32.mrf.mxu1  ;;  %v13760_v62 = vpop.f32.mrf.mxu0 }
 0x43d   : > { %v3704_v27 = vsel %vm483_vm0, %v13736_v44, -inf  ;;  %v5019_v20 = vrot.slane %v5018_v37, 1  ;;  %v4233_v14 = vmul.f32 1.442695, %v3863_v15  ;;  %v4235_v56 = vmul.f32 1.442695, %v3864_v2 }
 0x43e   : > { %v5600_v36 = vrot.slane %v5599_v48, 4  ;;  %v13750_v4 = vpop.eup %9724  ;;  %v3993_v35 = vsub.f32 %v13672_v13, %v3703_v22  ;;  %v3994_v53 = vsub.f32 %v13649_v21, %v3703_v22  ;;  %v3123_v41 = vmax.f32 %v3121_v47, %v3122_v59 }
 0x43f   : > { %v3706_v25 = vmax.f32 %v3704_v27, %v3705_v43  ;;  %v13756_v8 = vpop.eup %9726  ;;  %v5596_v24 = vadd.f32 %v5595_v45, %v5594_v28  ;;  %v5021_v38 = vsel %vm483_vm0, %v13750_v4, 0.0  ;;  %9734 = vpow2.f32 %v4233_v14 }
 0x440   : > { %v5601_v57 = vadd.f32 %v5600_v36, %v5599_v48  ;;  %v5022_v50 = vsel %vm483_vm0, %v13756_v8, 0.0  ;;  %9736 = vpow2.f32 %v4235_v56  ;;  %v4493_v13 = vmul.f32 1.442695, %v3993_v35  ;;  %v13768_v48 = vpop.f32.mrf.mxu1  ;;  %v9988_v56 = vld [vmem:[%s10237_s27 + $0x760] sm:$0xff] }
 0x441   : > { %v4495_v21 = vmul.f32 1.442695, %v3994_v53  ;;  %v5023_v59 = vadd.f32 %v5022_v50, %v5021_v38  ;;  %v3124_v47 = vrot.slane %v3123_v41, 2  ;;  %v3129_v28 = vsel %vm483_vm0, %v13743_v17, -inf }
 0x442   : > { %v5602_v43 = vrot.slane %v5601_v57, 2  ;;  %v5020_v36 = vadd.f32 %v5019_v20, %v5018_v37  ;;  %9738 = vpow2.f32 %v4493_v13  ;;  %v3707_v45 = vrot.slane %v3706_v25, 4 }
 0x443   : > { %v3128_v14 = vsel %vm483_vm0, %v13760_v62, -inf  ;;  %v5024_v22 = vrot.slane %v5023_v59, 4  ;;  %9740 = vpow2.f32 %v4495_v21  ;;  %v3125_v27 = vmax.f32 %v3123_v41, %v3124_v47 }
 0x444   : > { %v13770_v15 = vpop.eup %9728  ;;  %v5603_v2 = vadd.f32 %v5602_v43, %v5601_v57  ;;  %v13773_v35 = vmul.f32 %v9988_v56, %v6033_v11  ;;  %v3708_v37 = vmax.f32 %v3706_v25, %v3707_v45  ;;  %v3130_v20 = vmax.f32 %v3128_v14, %v3129_v28 }
 0x445   : > { %v5606_v53 = vsel %vm483_vm0, %v13770_v15, 0.0  ;;  %9742 = vrcp.f32 %v5596_v24  ;;  %v5025_v13 = vadd.f32 %v5024_v22, %v5023_v59  ;;  %v3713_v26 = vsel %vm483_vm0, %v13768_v48, -inf }
 0x446   : > { %v13777_v38 = vpop.eup %9730  ;;  %v5604_v50 = vrot.slane %v5603_v2, 1  ;;  %v3126_v41 = vrot.slane %v3125_v27, 1  ;;  %v3709_v21 = vrot.slane %v3708_v37, 2  ;;  %v3131_v11 = vrot.slane %v3130_v20, 4 }
 0x447   : > { %v5607_v57 = vsel %vm483_vm0, %v13777_v38, 0.0  ;;  %v9733_v43 = vpop.eup %9732  ;;  %9744 = vrcp.f32 %v5020_v36  ;;  %v5026_v56 = vrot.slane %v5025_v13, 2  ;;  %v3714_v24 = vsel %vm483_vm0, %v13754_v3, -inf }
 0x448   : > { %v5605_v47 = vadd.f32 %v5604_v50, %v5603_v2  ;;  %v5608_v25 = vadd.f32 %v5607_v57, %v5606_v53  ;;  %v3127_v28 = vmax.f32 %v3125_v27, %v3126_v41  ;;  %v3710_v45 = vmax.f32 %v3708_v37, %v3709_v21 }
 0x449   : > { %v3132_v59 = vmax.f32 %v3130_v20, %v3131_v11  ;;  %v5027_v14 = vadd.f32 %v5026_v56, %v5025_v13  ;;  %v3715_v60 = vmax.f32 %v3713_v26, %v3714_v24  ;;  %v5905_v36 = vmul.f32 %v9733_v43, %v13661_v33  ;;  %v13794_v11 = vpop.f32.mrf.mxu0 }
 0x44a   : > { %9746 = vrcp.f32 %v5605_v47  ;;  %v5609_v22 = vrot.slane %v5608_v25, 4  ;;  %v3865_v12 = vsub.f32 %v13713_v51, %v3127_v28  ;;  %v3866_v46 = vsub.f32 %v13697_v7, %v3127_v28 }
 0x44b   : > { %v3711_v54 = vrot.slane %v3710_v45, 1  ;;  %v3133_v39 = vrot.slane %v3132_v59, 2  ;;  %v5028_v2 = vrot.slane %v5027_v14, 1  ;;  %v3716_v27 = vrot.slane %v3715_v60, 4 }
 0x44c   : > { %v5610_v53 = vadd.f32 %v5609_v22, %v5608_v25  ;;  %v13788_v37 = vpop.eup %9734  ;;  %v4237_v50 = vmul.f32 1.442695, %v3865_v12  ;;  %v4239_v57 = vmul.f32 1.442695, %v3866_v46 }
 0x44d   : > { %v3712_v20 = vmax.f32 %v3710_v45, %v3711_v54  ;;  %v3134_v41 = vmax.f32 %v3132_v59, %v3133_v39  ;;  %v13790_v13 = vpop.eup %9736  ;;  %v5029_v26 = vadd.f32 %v5028_v2, %v5027_v14  ;;  %v5030_v7 = vsel %vm483_vm0, %v13788_v37, 0.0 }
 0x44e   : > { %v5611_v21 = vrot.slane %v5610_v53, 2  ;;  %v3717_v51 = vmax.f32 %v3715_v60, %v3716_v27  ;;  %v5031_v33 = vsel %vm483_vm0, %v13790_v13, 0.0  ;;  %9748 = vpow2.f32 %v4237_v50 }
 0x44f   : > { %v3995_v47 = vsub.f32 %v13736_v44, %v3712_v20  ;;  %v3996_v46 = vsub.f32 %v13711_v63, %v3712_v20  ;;  %v13800_v54 = vpop.eup %9738  ;;  %v13803_v39 = vmul.f32 %v9733_v43, %v13667_v42  ;;  %9750 = vrcp.f32 %v5029_v26  ;;  %v13811_v42 = vpop.f32.mrf.mxu0  ;;  %v9989_v26 = vld [vmem:[%s10237_s27 + $0x360] sm:$0xff] }
 0x450   : > { %v5612_v12 = vadd.f32 %v5611_v21, %v5610_v53  ;;  %v5032_v56 = vadd.f32 %v5031_v33, %v5030_v7  ;;  %v13805_v25 = vpop.eup %9740  ;;  %v5615_v60 = vsel %vm483_vm0, %v13800_v54, 0.0  ;;  %9752 = vpow2.f32 %v4239_v57  ;;  %v13817_v57 = vpop.f32.mrf.mxu1 }
 0x451   : > { %15097 = vst [vmem:[#allocation168_spill] sm:$0xff] %v13803_v39  ;;  %v4497_v28 = vmul.f32 1.442695, %v3995_v47  ;;  %v4499_v45 = vmul.f32 1.442695, %v3996_v46  ;;  %v5616_v63 = vsel %vm483_vm0, %v13805_v25, 0.0  ;;  %v13822_v21 = vmul.f32 %v9989_v26, %v5905_v36 }
 0x452   : > { %v5613_v24 = vrot.slane %v5612_v12, 1  ;;  %v5033_v44 = vrot.slane %v5032_v56, 4  ;;  %v3135_v59 = vrot.slane %v3134_v41, 1  ;;  %v13813_v43 = vpop.eup %9742  ;;  %v5617_v14 = vadd.f32 %v5616_v63, %v5615_v60  ;;  %v13832_v26 = vpop.f32.mrf.mxu1 }
 0x453   : > { %9754 = vpow2.f32 %v4497_v28  ;;  %v3718_v22 = vrot.slane %v3717_v51, 2  ;;  %v3138_v2 = vsel %vm483_vm0, %v13794_v11, -inf  ;;  %15099 = vst [vmem:[#allocation170_spill] sm:$0xff] %v13822_v21  ;;  %v3137_v47 = vsel %vm483_vm0, %v13811_v42, -inf }
 0x454   : > { %v5614_v53 = vadd.f32 %v5613_v24, %v5612_v12  ;;  %v5034_v27 = vadd.f32 %v5033_v44, %v5032_v56  ;;  %9756 = vpow2.f32 %v4499_v45  ;;  %v3136_v50 = vmax.f32 %v3134_v41, %v3135_v59  ;;  %v13819_v20 = vpop.eup %9744 }
 0x455   : > { %15098 = vst [vmem:[#allocation169_spill] sm:$0xff] %v13819_v20  ;;  %v5618_v7 = vrot.slane %v5617_v14, 4  ;;  %v3719_v33 = vmax.f32 %v3717_v51, %v3718_v22  ;;  %v3723_v36 = vsel %vm483_vm0, %v13817_v57, -inf  ;;  %v3139_v45 = vmax.f32 %v3137_v47, %v3138_v2 }
 0x456   : > { %9758 = vrcp.f32 %v5614_v53  ;;  %v5035_v46 = vrot.slane %v5034_v27, 2  ;;  %v3867_v60 = vsub.f32 %v13760_v62, %v3136_v50  ;;  %v3868_v12 = vsub.f32 %v13743_v17, %v3136_v50  ;;  %v9990_v17 = vld [vmem:[%s10237_s27 + $0x780] sm:$0xff] }
 0x457   : > { %v9747_v41 = vpop.eup %9746  ;;  %v5619_v56 = vadd.f32 %v5618_v7, %v5617_v14  ;;  %v3720_v28 = vrot.slane %v3719_v33, 1  ;;  %v3140_v53 = vrot.slane %v3139_v45, 4  ;;  %v9991_v14 = vld [vmem:[%s10237_s27 + $0x788] sm:$0xff] }
 0x458   : > { %v6037_v51 = vmul.f32 %v9747_v41, %v13724_v5  ;;  %v6038_v24 = vmul.f32 %v9747_v41, %v13732_v52  ;;  %v5036_v44 = vadd.f32 %v5035_v46, %v5034_v27  ;;  %v4241_v63 = vmul.f32 1.442695, %v3867_v60 }
 0x459   : > { %v5620_v59 = vrot.slane %v5619_v56, 2  ;;  %v4243_v22 = vmul.f32 1.442695, %v3868_v12  ;;  %v3721_v62 = vmax.f32 %v3719_v33, %v3720_v28  ;;  %v3722_v46 = vsel %vm483_vm0, %v13832_v26, -inf }
 0x45a   : > { %v6293_v50 = vmul.f32 %v9990_v17, %v6037_v51  ;;  %v6294_v7 = vmul.f32 %v9991_v14, %v6038_v24  ;;  %v5037_v21 = vrot.slane %v5036_v44, 1  ;;  %9760 = vpow2.f32 %v4241_v63  ;;  %v9993_v17 = vld [vmem:[%s10237_s27 + $0x388] sm:$0xff] }
 0x45b   : > { %v5621_v39 = vadd.f32 %v5620_v59, %v5619_v56  ;;  %9762 = vpow2.f32 %v4243_v22  ;;  %v3997_v5 = vsub.f32 %v13768_v48, %v3721_v62  ;;  %v3998_v52 = vsub.f32 %v13754_v3, %v3721_v62  ;;  %v13838_v2 = vpop.eup %9748  ;;  %v9992_v22 = vld [vmem:[%s10237_s27 + $0x380] sm:$0xff] }
 0x45c   : > { %v7389_v27 = vsel %vm483_vm0, %v6293_v50, 0.0  ;;  %v7390_v33 = vsel %vm483_vm0, %v6294_v7, 0.0  ;;  %v5038_v47 = vadd.f32 %v5037_v21, %v5036_v44  ;;  %v9751_v60 = vpop.eup %9750  ;;  %v5039_v41 = vsel %vm483_vm0, %v13838_v2, 0.0 }
 0x45d   : > { %v5622_v12 = vrot.slane %v5621_v39, 1  ;;  %v4501_v48 = vmul.f32 1.442695, %v3997_v5  ;;  %v3141_v56 = vmax.f32 %v3139_v45, %v3140_v53  ;;  %v13846_v3 = vpop.eup %9752  ;;  %v5909_v28 = vmul.f32 %v9751_v60, %v13750_v4 }
 0x45e   : > { %v5910_v51 = vmul.f32 %v9751_v60, %v13756_v8  ;;  %9764 = vrcp.f32 %v5038_v47  ;;  %v4503_v21 = vmul.f32 1.442695, %v3998_v52  ;;  %v5040_v44 = vsel %vm483_vm0, %v13846_v3, 0.0 }
 0x45f   : > { %v5623_v24 = vadd.f32 %v5622_v12, %v5621_v39  ;;  %9766 = vpow2.f32 %v4501_v48  ;;  %v3724_v63 = vmax.f32 %v3722_v46, %v3723_v36  ;;  %v6165_v62 = vmul.f32 %v9992_v22, %v5909_v28 }
 0x460   : > { %v13852_v59 = vpop.eup %9754  ;;  %v6166_v45 = vmul.f32 %v9993_v17, %v5910_v51  ;;  %v5041_v53 = vadd.f32 %v5040_v44, %v5039_v41  ;;  %9768 = vpow2.f32 %v4503_v21  ;;  %v13858_v4 = vadd.f32 %v7390_v33, %v7389_v27  ;;  %v9994_v44 = vld [vmem:[%s10237_s27 + $0x790] sm:$0xff] }
 0x461   : > { %v13856_v50 = vpop.eup %9756  ;;  %9770 = vrcp.f32 %v5623_v24  ;;  %v5624_v8 = vsel %vm483_vm0, %v13852_v59, 0.0  ;;  %v3142_v39 = vrot.slane %v3141_v56, 2  ;;  %v13864_v36 = vmul.f32 %v13813_v43, %v13679_v1 }
 0x462   : > { %v6813_v14 = vsel %vm483_vm0, %v6165_v62, 0.0  ;;  %v5042_v7 = vrot.slane %v5041_v53, 4  ;;  %v5625_v5 = vsel %vm483_vm0, %v13856_v50, 0.0  ;;  %v6814_v27 = vsel %vm483_vm0, %v6166_v45, 0.0  ;;  %v13881_v45 = vpop.f32.mrf.mxu0 }
 0x463   : > { %v9759_v52 = vpop.eup %9758  ;;  %v5626_v33 = vadd.f32 %v5625_v5, %v5624_v8  ;;  %v3143_v47 = vmax.f32 %v3141_v56, %v3142_v39  ;;  %v3725_v46 = vrot.slane %v3724_v63, 4  ;;  %v13872_v60 = vmul.f32 %v13819_v20, %v13694_v6  ;;  %v9995_v56 = vld [vmem:[%s10237_s27 + $0x798] sm:$0xff] }
 0x464   : > { %v6039_v1 = vmul.f32 %v9759_v52, %v13770_v15  ;;  %v6040_v12 = vmul.f32 %v9759_v52, %v13777_v38  ;;  %v5043_v41 = vadd.f32 %v5042_v7, %v5041_v53  ;;  %v7392_v48 = vrot.slane %v13858_v4, 4 }
 0x465   : > { %15100 = vst [vmem:[#allocation171_spill] sm:$0xff] %v13872_v60  ;;  %v5627_v28 = vrot.slane %v5626_v33, 4  ;;  %v3144_v51 = vrot.slane %v3143_v47, 1  ;;  %v3726_v21 = vmax.f32 %v3724_v63, %v3725_v46  ;;  %v13877_v24 = vadd.f32 %v6814_v27, %v6813_v14 }
 0x466   : > { %v6295_v22 = vmul.f32 %v9994_v44, %v6039_v1  ;;  %v6296_v62 = vmul.f32 %v9995_v56, %v6040_v12  ;;  %v5044_v17 = vrot.slane %v5043_v41, 2  ;;  %v3147_v53 = vsel %vm483_vm0, %v13881_v45, -inf }
 0x467   : > { %v13883_v6 = vpop.eup %9760  ;;  %v5628_v15 = vadd.f32 %v5627_v28, %v5626_v33  ;;  %v3145_v8 = vmax.f32 %v3143_v47, %v3144_v51  ;;  %v3727_v38 = vrot.slane %v3726_v21, 2  ;;  %v6816_v46 = vrot.slane %v13877_v24, 4  ;;  %v13898_v51 = vpop.f32.mrf.mxu0 }
 0x468   : > { %v13887_v39 = vpop.eup %9762  ;;  %v7398_v63 = vsel %vm483_vm0, %v6295_v22, 0.0  ;;  %v7399_v14 = vsel %vm483_vm0, %v6296_v62, 0.0  ;;  %v5045_v7 = vadd.f32 %v5044_v17, %v5043_v41  ;;  %v5048_v5 = vsel %vm483_vm0, %v13883_v6, 0.0  ;;  %v13900_v17 = vpop.f32.mrf.mxu1 }
 0x469   : > { %v7400_v52 = vadd.f32 %v7399_v14, %v7398_v63  ;;  %v5629_v27 = vrot.slane %v5628_v15, 2  ;;  %v5049_v33 = vsel %vm483_vm0, %v13887_v39, 0.0  ;;  %v3869_v47 = vsub.f32 %v13811_v42, %v3145_v8 }
 0x46a   : > { %v5046_v1 = vrot.slane %v5045_v7, 1  ;;  %v5050_v12 = vadd.f32 %v5049_v33, %v5048_v5  ;;  %v3870_v28 = vsub.f32 %v13794_v11, %v3145_v8  ;;  %v3728_v62 = vmax.f32 %v3726_v21, %v3727_v38  ;;  %v9996_v38 = vld [vmem:[%s10237_s27 + $0x390] sm:$0xff] }
 0x46b   : > { %v9765_v44 = vpop.eup %9764  ;;  %v7401_v41 = vrot.slane %v7400_v52, 4  ;;  %v5630_v22 = vadd.f32 %v5629_v27, %v5628_v15  ;;  %v4245_v56 = vmul.f32 1.442695, %v3869_v47  ;;  %v3146_v21 = vsel %vm483_vm0, %v13898_v51, -inf  ;;  %v9997_v47 = vld [vmem:[%s10237_s27 + $0x398] sm:$0xff] }
 0x46c   : > { %v13902_v63 = vpop.eup %9766  ;;  %v5911_v42 = vmul.f32 %v9765_v44, %v13788_v37  ;;  %v5912_v14 = vmul.f32 %v9765_v44, %v13790_v13  ;;  %v5047_v5 = vadd.f32 %v5046_v1, %v5045_v7  ;;  %v5051_v33 = vrot.slane %v5050_v12, 4 }
 0x46d   : > { %v13906_v11 = vpop.eup %9768  ;;  %v5631_v8 = vrot.slane %v5630_v22, 1  ;;  %v5633_v60 = vsel %vm483_vm0, %v13902_v63, 0.0  ;;  %9772 = vpow2.f32 %v4245_v56  ;;  %v13918_v56 = vpop.f32.mrf.mxu1 }
 0x46e   : > { %v9771_v15 = vpop.eup %9770  ;;  %v6167_v27 = vmul.f32 %v9996_v38, %v5911_v42  ;;  %v6168_v37 = vmul.f32 %v9997_v47, %v5912_v14  ;;  %9774 = vrcp.f32 %v5047_v5  ;;  %v5052_v13 = vadd.f32 %v5051_v33, %v5050_v12 }
 0x46f   : > { %v6041_v7 = vmul.f32 %v9771_v15, %v13800_v54  ;;  %v6042_v1 = vmul.f32 %v9771_v15, %v13805_v25  ;;  %v5632_v44 = vadd.f32 %v5631_v8, %v5630_v22  ;;  %v5634_v20 = vsel %vm483_vm0, %v13906_v11, 0.0  ;;  %v9998_v54 = vld [vmem:[%s10237_s27 + $0x7a0] sm:$0xff]  ;;  %v13928_v15 = vpop.f32.mrf.mxu0 }
 0x470   : > { %v6822_v30 = vsel %vm483_vm0, %v6167_v27, 0.0  ;;  %v6823_v19 = vsel %vm483_vm0, %v6168_v37, 0.0  ;;  %v5053_v42 = vrot.slane %v5052_v13, 2  ;;  %v5635_v38 = vadd.f32 %v5634_v20, %v5633_v60 }
 0x471   : > { %v13923_v14 = vadd.f32 %v7392_v48, %v13858_v4  ;;  %v13925_v12 = vadd.f32 %v6823_v19, %v6822_v30  ;;  %v6297_v25 = vmul.f32 %v9998_v54, %v6041_v7  ;;  %9776 = vrcp.f32 %v5632_v44  ;;  %v13937_v19 = vpop.f32.mrf.mxu1  ;;  %v9999_v30 = vld [vmem:[%s10237_s27 + $0x7a8] sm:$0xff] }
 0x472   : > { %v5054_v22 = vadd.f32 %v5053_v42, %v5052_v13  ;;  %v5636_v5 = vrot.slane %v5635_v38, 4  ;;  %v4247_v33 = vmul.f32 1.442695, %v3870_v28  ;;  %v3729_v8 = vrot.slane %v3728_v62, 1 }
 0x473   : > { %v13931_v27 = vadd.f32 %v6816_v46, %v13877_v24  ;;  %v13933_v47 = vadd.f32 %v7401_v41, %v7400_v52  ;;  %v3732_v20 = vsel %vm483_vm0, %v13900_v17, -inf  ;;  %v3148_v4 = vmax.f32 %v3146_v21, %v3147_v53  ;;  %v13944_v53 = vpop.f32.mrf.mxu0 }
 0x474   : > { %v6298_v60 = vmul.f32 %v9999_v30, %v6042_v1  ;;  %v5055_v48 = vrot.slane %v5054_v22, 1  ;;  %v5637_v37 = vadd.f32 %v5636_v5, %v5635_v38  ;;  %9778 = vpow2.f32 %v4247_v33 }
 0x475   : > { %15101 = vst [vmem:[#allocation172_spill] sm:$0xff] %v13931_v27  ;;  %v6825_v28 = vrot.slane %v13925_v12, 4  ;;  %v3730_v13 = vmax.f32 %v3728_v62, %v3729_v8  ;;  %v3149_v7 = vrot.slane %v3148_v4, 4  ;;  %v3731_v24 = vsel %vm483_vm0, %v13918_v56, -inf  ;;  %v13950_v62 = vpop.f32.mrf.mxu1 }
 0x476   : > { %v7407_v52 = vsel %vm483_vm0, %v6297_v25, 0.0  ;;  %v5056_v46 = vadd.f32 %v5055_v48, %v5054_v22  ;;  %v5638_v41 = vrot.slane %v5637_v37, 2  ;;  %v3733_v44 = vmax.f32 %v3731_v24, %v3732_v20 }
 0x477   : > { %v3999_v21 = vsub.f32 %v13832_v26, %v3730_v13  ;;  %v4000_v1 = vsub.f32 %v13817_v57, %v3730_v13  ;;  %v3150_v42 = vmax.f32 %v3148_v4, %v3149_v7  ;;  %v3156_v38 = vsel %vm483_vm0, %v13928_v15, -inf }
 0x478   : > { %9780 = vrcp.f32 %v5056_v46  ;;  %v5639_v54 = vadd.f32 %v5638_v41, %v5637_v37  ;;  %v3734_v5 = vrot.slane %v3733_v44, 4  ;;  %v3741_v25 = vsel %vm483_vm0, %v13937_v19, -inf }
 0x479   : > { %v4505_v22 = vmul.f32 1.442695, %v3999_v21  ;;  %v4507_v33 = vmul.f32 1.442695, %v4000_v1  ;;  %v3151_v8 = vrot.slane %v3150_v42, 2  ;;  %v3155_v26 = vsel %vm483_vm0, %v13944_v53, -inf }
 0x47a   : > { %v13956_v20 = vpop.eup %9772  ;;  %v5640_v57 = vrot.slane %v5639_v54, 1  ;;  %v3735_v4 = vmax.f32 %v3733_v44, %v3734_v5  ;;  %v3157_v30 = vmax.f32 %v3155_v26, %v3156_v38  ;;  %v3740_v48 = vsel %vm483_vm0, %v13950_v62, -inf }
 0x47b   : > { %v9775_v37 = vpop.eup %9774  ;;  %v7408_v13 = vsel %vm483_vm0, %v6298_v60, 0.0  ;;  %9782 = vpow2.f32 %v4505_v22  ;;  %v3152_v7 = vmax.f32 %v3150_v42, %v3151_v8  ;;  %v3742_v24 = vmax.f32 %v3740_v48, %v3741_v25 }
 0x47c   : > { %v5913_v46 = vmul.f32 %v9775_v37, %v13838_v2  ;;  %v5914_v41 = vmul.f32 %v9775_v37, %v13846_v3  ;;  %v5641_v21 = vadd.f32 %v5640_v57, %v5639_v54  ;;  %9784 = vpow2.f32 %v4507_v33 }
 0x47d   : > { %v3153_v1 = vrot.slane %v3152_v7, 1  ;;  %v3736_v44 = vrot.slane %v3735_v4, 2  ;;  %v3158_v38 = vrot.slane %v3157_v30, 4  ;;  %v3743_v5 = vrot.slane %v3742_v24, 4 }
 0x47e   : > { %v9777_v26 = vpop.eup %9776  ;;  %v13963_v27 = vadd.f32 %v7408_v13, %v7407_v52  ;;  %v6169_v60 = vmul.f32 %v10000_v0, %v5913_v46  ;;  %v6170_v22 = vmul.f32 %v10001_v49, %v5914_v41  ;;  %9786 = vrcp.f32 %v5641_v21  ;;  %v10002_v0 = vld [vmem:[%s10237_s27 + $0x7b0] sm:$0xff]  ;;  %v13980_v13 = vpop.f32.mrf.mxu0  ;;  %v10003_v21 = vld [vmem:[%s10237_s27 + $0x7b8] sm:$0xff] }
 0x47f   : > { %v6043_v42 = vmul.f32 %v9777_v26, %v13852_v59  ;;  %v5057_v2 = vsel %vm483_vm0, %v13956_v20, 0.0  ;;  %v3154_v3 = vmax.f32 %v3152_v7, %v3153_v1  ;;  %v3737_v54 = vmax.f32 %v3735_v4, %v3736_v44 }
 0x480   : > { %v6831_v25 = vsel %vm483_vm0, %v6169_v60, 0.0  ;;  %v6832_v33 = vsel %vm483_vm0, %v6170_v22, 0.0  ;;  %v6044_v52 = vmul.f32 %v9777_v26, %v13856_v50  ;;  %v3159_v8 = vmax.f32 %v3157_v30, %v3158_v38  ;;  %v13992_v22 = vpop.f32.mrf.mxu0 }
 0x481   : > { %v13973_v57 = vpop.eup %9778  ;;  %v13976_v49 = vadd.f32 %v6825_v28, %v13925_v12  ;;  %v6299_v59 = vmul.f32 %v10002_v0, %v6043_v42  ;;  %v3871_v48 = vsub.f32 %v13898_v51, %v3154_v3  ;;  %v3744_v37 = vmax.f32 %v3742_v24, %v3743_v5  ;;  %v10004_v0 = vld [vmem:[%s10237_s27 + $0x3b0] sm:$0xff] }
 0x482   : > { %v5058_v4 = vsel %vm483_vm0, %v13973_v57, 0.0  ;;  %v3872_v7 = vsub.f32 %v13881_v45, %v3154_v3  ;;  %v3738_v50 = vrot.slane %v3737_v54, 1  ;;  %v3160_v30 = vrot.slane %v3159_v8, 2 }
 0x483   : > { %v7410_v46 = vrot.slane %v13963_v27, 4  ;;  %v13986_v41 = vadd.f32 %v6832_v33, %v6831_v25  ;;  %v5059_v12 = vadd.f32 %v5058_v4, %v5057_v2  ;;  %v3165_v28 = vsel %vm483_vm0, %v13980_v13, -inf }
 0x484   : > { %v6300_v51 = vmul.f32 %v10003_v21, %v6044_v52  ;;  %v4249_v24 = vmul.f32 1.442695, %v3871_v48  ;;  %v4251_v1 = vmul.f32 1.442695, %v3872_v7  ;;  %v3739_v44 = vmax.f32 %v3737_v54, %v3738_v50 }
 0x485   : > { %v9781_v38 = vpop.eup %9780  ;;  %v7416_v5 = vsel %vm483_vm0, %v6299_v59, 0.0  ;;  %v5060_v45 = vrot.slane %v5059_v12, 4  ;;  %v3161_v26 = vmax.f32 %v3159_v8, %v3160_v30  ;;  %v3745_v60 = vrot.slane %v3744_v37, 2  ;;  %v14006_v30 = vpop.f32.mrf.mxu0 }
 0x486   : > { %v5915_v42 = vmul.f32 %v9781_v38, %v13883_v6  ;;  %v5916_v2 = vmul.f32 %v9781_v38, %v13887_v39  ;;  %9788 = vpow2.f32 %v4249_v24  ;;  %v4001_v3 = vsub.f32 %v13918_v56, %v3739_v44 }
 0x487   : > { %v5061_v25 = vadd.f32 %v5060_v45, %v5059_v12  ;;  %9790 = vpow2.f32 %v4251_v1  ;;  %v4002_v54 = vsub.f32 %v13900_v17, %v3739_v44  ;;  %v3162_v33 = vrot.slane %v3161_v26, 1  ;;  %v10005_v17 = vld [vmem:[%s10237_s27 + $0x3b8] sm:$0xff] }
 0x488   : > { %v13998_v52 = vpop.eup %9782  ;;  %v7417_v8 = vsel %vm483_vm0, %v6300_v51, 0.0  ;;  %v6171_v59 = vmul.f32 %v10004_v0, %v5915_v42  ;;  %v4509_v48 = vmul.f32 1.442695, %v4001_v3  ;;  %v3746_v4 = vmax.f32 %v3744_v37, %v3745_v60 }
 0x489   : > { %v14002_v6 = vpop.eup %9784  ;;  %v5062_v39 = vrot.slane %v5061_v25, 2  ;;  %v5642_v56 = vsel %vm483_vm0, %v13998_v52, 0.0  ;;  %v4511_v7 = vmul.f32 1.442695, %v4002_v54  ;;  %v3163_v50 = vmax.f32 %v3161_v26, %v3162_v33  ;;  %v14021_v33 = vpop.f32.mrf.mxu0 }
 0x48a   : > { %v6172_v12 = vmul.f32 %v10005_v17, %v5916_v2  ;;  %v5643_v21 = vsel %vm483_vm0, %v14002_v6, 0.0  ;;  %9792 = vpow2.f32 %v4509_v48  ;;  %v3164_v51 = vsel %vm483_vm0, %v13992_v22, -inf }
 0x48b   : > { %v9787_v37 = vpop.eup %9786  ;;  %v6834_v24 = vrot.slane %v13986_v41, 4  ;;  %v5063_v1 = vadd.f32 %v5062_v39, %v5061_v25  ;;  %v5644_v44 = vadd.f32 %v5643_v21, %v5642_v56  ;;  %9794 = vpow2.f32 %v4511_v7 }
 0x48c   : > { %v14014_v38 = vadd.f32 %v7417_v8, %v7416_v5  ;;  %v14017_v45 = vsel %vm483_vm0, %v6171_v59, 0.0  ;;  %v3873_v26 = vsub.f32 %v13944_v53, %v3163_v50  ;;  %v3874_v60 = vsub.f32 %v13928_v15, %v3163_v50 }
 0x48d   : > { %v5064_v42 = vrot.slane %v5063_v1, 1  ;;  %v5645_v2 = vrot.slane %v5644_v44, 4  ;;  %v3747_v3 = vrot.slane %v3746_v4, 1  ;;  %v3166_v54 = vmax.f32 %v3164_v51, %v3165_v28 }
 0x48e   : > { %v6841_v0 = vsel %vm483_vm0, %v6172_v12, 0.0  ;;  %v6045_v25 = vmul.f32 %v9787_v37, %v13902_v63  ;;  %v4253_v48 = vmul.f32 1.442695, %v3873_v26  ;;  %v4255_v5 = vmul.f32 1.442695, %v3874_v60 }
 0x48f   : > { %v5065_v8 = vadd.f32 %v5064_v42, %v5063_v1  ;;  %v5646_v39 = vadd.f32 %v5645_v2, %v5644_v44  ;;  %v3748_v59 = vmax.f32 %v3746_v4, %v3747_v3  ;;  %v3167_v56 = vrot.slane %v3166_v54, 4 }
 0x490   : > { %v6046_v53 = vmul.f32 %v9787_v37, %v13906_v11  ;;  %9796 = vpow2.f32 %v4253_v48  ;;  %v3174_v15 = vsel %vm483_vm0, %v14006_v30, -inf  ;;  %v3173_v28 = vsel %vm483_vm0, %v14021_v33, -inf }
 0x491   : > { %9798 = vrcp.f32 %v5065_v8  ;;  %v5647_v7 = vrot.slane %v5646_v39, 2  ;;  %v4003_v50 = vsub.f32 %v13950_v62, %v3748_v59  ;;  %v4004_v63 = vsub.f32 %v13937_v19, %v3748_v59 }
 0x492   : > { %9800 = vpow2.f32 %v4255_v5  ;;  %v3168_v17 = vmax.f32 %v3166_v54, %v3167_v56  ;;  %v3175_v12 = vmax.f32 %v3173_v28, %v3174_v15  ;;  %v7394_v4 = vrot.slane %v13923_v14, 2 }
 0x493   : > { %v14033_v21 = vpop.eup %9788  ;;  %v5648_v11 = vadd.f32 %v5647_v7, %v5646_v39  ;;  %v4513_v51 = vmul.f32 1.442695, %v4003_v50  ;;  %v4515_v37 = vmul.f32 1.442695, %v4004_v63  ;;  %v7403_v1 = vrot.slane %v13933_v47, 2  ;;  %v10006_v39 = vld [vmem:[%s10237_s27 + $0x7c0] sm:$0xff] }
 0x494   : > { %v14036_v44 = vpop.eup %9790  ;;  %v5066_v62 = vsel %vm483_vm0, %v14033_v21, 0.0  ;;  %v3169_v26 = vrot.slane %v3168_v17, 2  ;;  %v3176_v19 = vrot.slane %v3175_v12, 4  ;;  %v7395_v60 = vadd.f32 %v7394_v4, %v13923_v14 }
 0x495   : > { %v5649_v42 = vrot.slane %v5648_v11, 1  ;;  %v5067_v2 = vsel %vm483_vm0, %v14036_v44, 0.0  ;;  %9802 = vpow2.f32 %v4513_v51  ;;  %v7404_v3 = vadd.f32 %v7403_v1, %v13933_v47 }
 0x496   : > { %v5068_v54 = vadd.f32 %v5067_v2, %v5066_v62  ;;  %9804 = vpow2.f32 %v4515_v37  ;;  %v3170_v48 = vmax.f32 %v3168_v17, %v3169_v26  ;;  %v3177_v5 = vmax.f32 %v3175_v12, %v3176_v19  ;;  %v10007_v17 = vld [vmem:[%s10237_s27 + $0x7c8] sm:$0xff] }
 0x497   : > { %v14044_v8 = vpop.eup %9792  ;;  %v6301_v59 = vmul.f32 %v10006_v39, %v6045_v25  ;;  %v5650_v56 = vadd.f32 %v5649_v42, %v5648_v11  ;;  %v7396_v15 = vrot.slane %v7395_v60, 1  ;;  %v7411_v14 = vadd.f32 %v7410_v46, %v13963_v27 }
 0x498   : > { %v14050_v28 = vpop.eup %9794  ;;  %v5069_v7 = vrot.slane %v5068_v54, 4  ;;  %v5651_v47 = vsel %vm483_vm0, %v14044_v8, 0.0  ;;  %v3171_v50 = vrot.slane %v3170_v48, 1  ;;  %v3178_v63 = vrot.slane %v3177_v5, 2 }
 0x499   : > { %v6302_v12 = vmul.f32 %v10007_v17, %v6046_v53  ;;  %9806 = vrcp.f32 %v5650_v56  ;;  %v5652_v25 = vsel %vm483_vm0, %v14050_v28, 0.0  ;;  %v7405_v4 = vrot.slane %v7404_v3, 1 }
 0x49a   : > { %v5070_v11 = vadd.f32 %v5069_v7, %v5068_v54  ;;  %v5653_v51 = vadd.f32 %v5652_v25, %v5651_v47  ;;  %v3172_v37 = vmax.f32 %v3170_v48, %v3171_v50  ;;  %v3179_v1 = vmax.f32 %v3177_v5, %v3178_v63 }
 0x49b   : > { %v14058_v27 = vadd.f32 %v6841_v0, %v14017_v45  ;;  %v7425_v46 = vsel %vm483_vm0, %v6301_v59, 0.0  ;;  %v14061_v62 = vadd.f32 %v7396_v15, %v7395_v60  ;;  %v7412_v26 = vrot.slane %v7411_v14, 2 }
 0x49c   : > { %v5071_v19 = vrot.slane %v5070_v11, 2  ;;  %v5654_v42 = vrot.slane %v5653_v51, 4  ;;  %v3875_v53 = vsub.f32 %v13992_v22, %v3172_v37  ;;  %v3876_v2 = vsub.f32 %v13980_v13, %v3172_v37 }
 0x49d   : > { %v14065_v39 = vpop.eup %9796  ;;  %v3180_v54 = vrot.slane %v3179_v1, 1  ;;  %v14067_v56 = vadd.f32 %v7405_v4, %v7404_v3  ;;  %v7419_v48 = vrot.slane %v14014_v38, 4  ;;  %v7426_v45 = vsel %vm483_vm0, %v6302_v12, 0.0 }
 0x49e   : > { %v9799_v0 = vpop.eup %9798  ;;  %v5072_v5 = vadd.f32 %v5071_v19, %v5070_v11  ;;  %v5655_v60 = vadd.f32 %v5654_v42, %v5653_v51  ;;  %v5075_v59 = vsel %vm483_vm0, %v14065_v39, 0.0  ;;  %v4257_v15 = vmul.f32 1.442695, %v3875_v53  ;;  %v10008_v19 = vld [vmem:[%s10237_s27 + $0x3c0] sm:$0xff] }
 0x49f   : > { %v14073_v7 = vpop.eup %9800  ;;  %v5917_v13 = vmul.f32 %v9799_v0, %v13956_v20  ;;  %v4259_v22 = vmul.f32 1.442695, %v3876_v2  ;;  %v3181_v47 = vmax.f32 %v3179_v1, %v3180_v54  ;;  %v7413_v50 = vadd.f32 %v7412_v26, %v7411_v14 }
 0x4a0   : > { %v5073_v3 = vrot.slane %v5072_v5, 1  ;;  %v5656_v63 = vrot.slane %v5655_v60, 2  ;;  %v5076_v17 = vsel %vm483_vm0, %v14073_v7, 0.0  ;;  %9808 = vpow2.f32 %v4257_v15 }
 0x4a1   : > { %v5077_v12 = vadd.f32 %v5076_v17, %v5075_v59  ;;  %9810 = vpow2.f32 %v4259_v22  ;;  %v7420_v25 = vadd.f32 %v7419_v48, %v14014_v38  ;;  %v7427_v4 = vadd.f32 %v7426_v45, %v7425_v46 }
 0x4a2   : > { %v14079_v11 = vpop.eup %9802  ;;  %v5074_v51 = vadd.f32 %v5073_v3, %v5072_v5  ;;  %v5657_v37 = vadd.f32 %v5656_v63, %v5655_v60  ;;  %v3877_v20 = vsub.f32 %v14021_v33, %v3181_v47  ;;  %v3878_v14 = vsub.f32 %v14006_v30, %v3181_v47  ;;  %v10009_v47 = vld [vmem:[%s10237_s27 + $0x3c8] sm:$0xff] }
 0x4a3   : > { %v14083_v1 = vpop.eup %9804  ;;  %v5918_v26 = vmul.f32 %v9799_v0, %v13973_v57  ;;  %v6173_v42 = vmul.f32 %v10008_v19, %v5917_v13  ;;  %v5078_v53 = vrot.slane %v5077_v12, 4  ;;  %v5660_v2 = vsel %vm483_vm0, %v14079_v11, 0.0  ;;  %v10011_v19 = vld [vmem:[%s10237_s27 + $0x7d8] sm:$0xff] }
 0x4a4   : > { %9812 = vrcp.f32 %v5074_v51  ;;  %v5658_v38 = vrot.slane %v5657_v37, 1  ;;  %v5661_v46 = vsel %vm483_vm0, %v14083_v1, 0.0  ;;  %v4261_v54 = vmul.f32 1.442695, %v3877_v20 }
 0x4a5   : > { %v5079_v33 = vadd.f32 %v5078_v53, %v5077_v12  ;;  %v5662_v48 = vadd.f32 %v5661_v46, %v5660_v2  ;;  %v4263_v30 = vmul.f32 1.442695, %v3878_v14  ;;  %v7414_v45 = vrot.slane %v7413_v50, 1  ;;  %v10010_v12 = vld [vmem:[%s10237_s27 + $0x7d0] sm:$0xff] }
 0x4a6   : > { %v9807_v57 = vpop.eup %9806  ;;  %v5659_v0 = vadd.f32 %v5658_v38, %v5657_v37  ;;  %9814 = vpow2.f32 %v4261_v54  ;;  %v7421_v5 = vrot.slane %v7420_v25, 2  ;;  %v7428_v60 = vrot.slane %v7427_v4, 4 }
 0x4a7   : > { %v6047_v59 = vmul.f32 %v9807_v57, %v13998_v52  ;;  %v6048_v15 = vmul.f32 %v9807_v57, %v14002_v6  ;;  %v5080_v13 = vrot.slane %v5079_v33, 2  ;;  %v5663_v22 = vrot.slane %v5662_v48, 4 }
 0x4a8   : > { %v14094_v3 = vmul.f32 %v10009_v47, %v5918_v26  ;;  %9816 = vrcp.f32 %v5659_v0  ;;  %v7422_v63 = vadd.f32 %v7421_v5, %v7420_v25  ;;  %v7429_v17 = vadd.f32 %v7428_v60, %v7427_v4 }
 0x4a9   : > { %v6303_v51 = vmul.f32 %v10010_v12, %v6047_v59  ;;  %v5081_v20 = vadd.f32 %v5080_v13, %v5079_v33  ;;  %v5664_v37 = vadd.f32 %v5663_v22, %v5662_v48  ;;  %9818 = vpow2.f32 %v4263_v30 }
 0x4aa   : > { %v14098_v14 = vsel %vm483_vm0, %v6173_v42, 0.0  ;;  %v6304_v52 = vmul.f32 %v10011_v19, %v6048_v15  ;;  %v7423_v53 = vrot.slane %v7422_v63, 1  ;;  %v7430_v6 = vrot.slane %v7429_v17, 2 }
 0x4ab   : > { %v5082_v2 = vrot.slane %v5081_v20, 1  ;;  %v5665_v38 = vrot.slane %v5664_v37, 2  ;;  %v7415_v46 = vadd.f32 %v7414_v45, %v7413_v50  ;;  %v7434_v26 = vsel %vm483_vm0, %v6303_v51, 0.0 }
 0x4ac   : > { %v7431_v54 = vadd.f32 %v7430_v6, %v7429_v17  ;;  %v7435_v25 = vsel %vm483_vm0, %v6304_v52, 0.0  ;;  %v7424_v42 = vadd.f32 %v7423_v53, %v7422_v63  ;;  %v7729_v45 = vsel %vm7617_vm1, %v14067_v56, %v14061_v62  ;;  %v10012_v56 = vld [vmem:[%s10237_s27 + $0x758] sm:$0xff]  ;;  %v10013_v53 = vld [vmem:[%s10237_s27 + $0x768] sm:$0xff] }
 0x4ad   : > { %v14103_v4 = vpop.eup %9808  ;;  %v5083_v33 = vadd.f32 %v5082_v2, %v5081_v20  ;;  %v5666_v48 = vadd.f32 %v5665_v38, %v5664_v37  ;;  %v7436_v30 = vadd.f32 %v7435_v25, %v7434_v26  ;;  %v7730_v22 = vsel %vm7619_vm2, %v7415_v46, %v7729_v45  ;;  %v10016_v26 = vld [vmem:[%s10237_s27 + $0x778] sm:$0xff] }
 0x4ae   : > { %v14105_v57 = vpop.eup %9810  ;;  %v5084_v0 = vsel %vm483_vm0, %v14103_v4, 0.0  ;;  %v7432_v50 = vrot.slane %v7431_v54, 1  ;;  %v6036_v47 = vmul.f32 %v13813_v43, %v13681_v40  ;;  %v7731_v62 = vsel %vm7621_vm3, %v7424_v42, %v7730_v22  ;;  %v10017_v22 = vld [vmem:[%s10237_s27 + $0x7e0] sm:$0xff] }
 0x4af   : > { %9820 = vrcp.f32 %v5083_v33  ;;  %v5667_v5 = vrot.slane %v5666_v48, 1  ;;  %v5085_v60 = vsel %vm483_vm0, %v14105_v57, 0.0  ;;  %v7437_v59 = vrot.slane %v7436_v30, 4 }
 0x4b0   : > { %v5086_v15 = vadd.f32 %v5085_v60, %v5084_v0  ;;  %v7433_v13 = vadd.f32 %v7432_v50, %v7431_v54  ;;  %v14120_v51 = vmul.f32 %v10012_v56, %v13707_v29  ;;  %v14131_v6 = vmul.f32 %v10013_v53, %v13746_v58  ;;  %v10014_v29 = vld [vmem:[%s10237_s27 + $0x770] sm:$0xff] }
 0x4b1   : > { %v9813_v63 = vpop.eup %9812  ;;  %v5668_v17 = vadd.f32 %v5667_v5, %v5666_v48  ;;  %v7438_v12 = vadd.f32 %v7437_v59, %v7436_v30  ;;  %v14135_v2 = vmul.f32 %v10014_v29, %v13864_v36  ;;  %v14143_v54 = vmul.f32 %v10016_v26, %v6036_v47 }
 0x4b2   : > { %v5919_v20 = vmul.f32 %v9813_v63, %v14033_v21  ;;  %v14124_v37 = vmul.f32 %v9813_v63, %v14036_v44  ;;  %v5087_v19 = vrot.slane %v5086_v15, 4  ;;  %v7732_v40 = vsel %vm7623_vm4, %v7433_v13, %v7731_v62  ;;  %v10015_v21 = vld [vmem:[%s10237_s27 + $0x3d0] sm:$0xff] }
 0x4b3   : > { %v14127_v43 = vpop.eup %9814  ;;  %9822 = vrcp.f32 %v5668_v17  ;;  %v7439_v52 = vrot.slane %v7438_v12, 2  ;;  %v7322_v58 = vrot.slane %v13472_v18, 2  ;;  %v7331_v48 = vrot.slane %v13524_v31, 2  ;;  %v10018_v17 = vld [vmem:[%s10237_s27 + $0x7e8] sm:$0xff] }
 0x4b4   : > { %v14138_v38 = vmul.f32 %v10015_v21, %v5919_v20  ;;  %v5088_v44 = vadd.f32 %v5087_v19, %v5086_v15  ;;  %v5093_v46 = vsel %vm483_vm0, %v14127_v43, 0.0  ;;  %v15102_v36 = vrot.slane %v13542_v10, 4 }
 0x4b5   : > { %v9817_v25 = vpop.eup %9816  ;;  %v7440_v33 = vadd.f32 %v7439_v52, %v7438_v12  ;;  %v7347_v5 = vrot.slane %v13598_v32, 4  ;;  %v7323_v15 = vadd.f32 %v7322_v58, %v13472_v18  ;;  %v7332_v13 = vadd.f32 %v7331_v48, %v13524_v31 }
 0x4b6   : > { %v7339_v42 = vadd.f32 %v15102_v36, %v13542_v10  ;;  %v14150_v30 = vpop.eup %9818  ;;  %v6049_v0 = vmul.f32 %v9817_v25, %v14044_v8  ;;  %v6050_v50 = vmul.f32 %v9817_v25, %v14050_v28  ;;  %v5089_v45 = vrot.slane %v5088_v44, 2 }
 0x4b7   : > { %v5094_v60 = vsel %vm483_vm0, %v14150_v30, 0.0  ;;  %v7441_v59 = vrot.slane %v7440_v33, 1  ;;  %v7324_v62 = vrot.slane %v7323_v15, 1  ;;  %v7333_v28 = vrot.slane %v7332_v13, 1 }
 0x4b8   : > { %v6305_v47 = vmul.f32 %v10017_v22, %v6049_v0  ;;  %v5090_v10 = vadd.f32 %v5089_v45, %v5088_v44  ;;  %v5095_v63 = vadd.f32 %v5094_v60, %v5093_v46  ;;  %v6306_v12 = vmul.f32 %v10018_v17, %v6050_v50  ;;  %v10019_v60 = vld [vmem:[%s10237_s27 + $0x3e0] sm:$0xff] }
 0x4b9   : > { %v7442_v8 = vadd.f32 %v7441_v59, %v7440_v33  ;;  %v7340_v56 = vrot.slane %v7339_v42, 2  ;;  %v14164_v31 = vadd.f32 %v7324_v62, %v7323_v15  ;;  %v7334_v21 = vadd.f32 %v7333_v28, %v7332_v13  ;;  %v10021_v28 = vld [vmem:[%s10237_s27 + $0x7f8] sm:$0xff] }
 0x4ba   : > { %v5091_v20 = vrot.slane %v5090_v10, 1  ;;  %v5096_v19 = vrot.slane %v5095_v63, 4  ;;  %v7443_v52 = vsel %vm483_vm0, %v6305_v47, 0.0  ;;  %v7444_v53 = vsel %vm483_vm0, %v6306_v12, 0.0 }
 0x4bb   : > { %v7445_v29 = vadd.f32 %v7444_v53, %v7443_v52  ;;  %v7733_v18 = vsel %vm7625_vm5, %v7442_v8, %v7732_v40  ;;  %v7341_v25 = vadd.f32 %v7340_v56, %v7339_v42  ;;  %v7348_v33 = vadd.f32 %v7347_v5, %v13598_v32  ;;  %v10020_v8 = vld [vmem:[%s10237_s27 + $0x7f0] sm:$0xff] }
 0x4bc   : > { %v9821_v44 = vpop.eup %9820  ;;  %v5092_v46 = vadd.f32 %v5091_v20, %v5090_v10  ;;  %v5097_v26 = vadd.f32 %v5096_v19, %v5095_v63  ;;  %v7354_v0 = vsel %vm483_vm0, %v13638_v55, 0.0  ;;  %v7362_v32 = vsel %vm483_vm0, %v13716_v61, 0.0 }
 0x4bd   : > { %v5921_v58 = vmul.f32 %v9821_v44, %v14065_v39  ;;  %v14169_v48 = vmul.f32 %v9821_v44, %v14073_v7  ;;  %v7446_v36 = vrot.slane %v7445_v29, 4  ;;  %v7342_v50 = vrot.slane %v7341_v25, 1 }
 0x4be   : > { %9824 = vrcp.f32 %v5092_v46  ;;  %v5098_v40 = vrot.slane %v5097_v26, 2  ;;  %v7349_v45 = vrot.slane %v7348_v33, 2  ;;  %v7355_v42 = vadd.f32 %v7354_v0, %v13652_v34 }
 0x4bf   : > { %v14174_v59 = vmul.f32 %v10019_v60, %v5921_v58  ;;  %v7447_v15 = vadd.f32 %v7446_v36, %v7445_v29  ;;  %v7343_v5 = vadd.f32 %v7342_v50, %v7341_v25  ;;  %v7363_v13 = vsel %vm483_vm0, %v14120_v51, 0.0 }
 0x4c0   : > { %v9823_v39 = vpop.eup %9822  ;;  %v5099_v7 = vadd.f32 %v5098_v40, %v5097_v26  ;;  %v7350_v55 = vadd.f32 %v7349_v45, %v7348_v33  ;;  %v7356_v63 = vrot.slane %v7355_v42, 4  ;;  %v7364_v12 = vadd.f32 %v7363_v13, %v7362_v32 }
 0x4c1   : > { %v6051_v22 = vmul.f32 %v9823_v39, %v14079_v11  ;;  %v6052_v47 = vmul.f32 %v9823_v39, %v14083_v1  ;;  %v7448_v10 = vrot.slane %v7447_v15, 2  ;;  %v7371_v61 = vsel %vm483_vm0, %v13773_v35, 0.0 }
 0x4c2   : > { %v5100_v34 = vrot.slane %v5099_v7, 1  ;;  %v7351_v17 = vrot.slane %v7350_v55, 1  ;;  %v7357_v19 = vadd.f32 %v7356_v63, %v7355_v42  ;;  %v7365_v53 = vrot.slane %v7364_v12, 4 }
 0x4c3   : > { %v6307_v62 = vmul.f32 %v10020_v8, %v6051_v22  ;;  %v6308_v56 = vmul.f32 %v10021_v28, %v6052_v47  ;;  %v7449_v20 = vadd.f32 %v7448_v10, %v7447_v15  ;;  %v7372_v11 = vsel %vm483_vm0, %v14131_v6, 0.0  ;;  %v10023_v10 = vld [vmem:[%s10237_s27 + $0x6e8] sm:$0xff]  ;;  %v15104_v8 = vld [vmem:[#allocation157_spill] sm:$0xff] }
 0x4c4   : > { %v5101_v52 = vadd.f32 %v5100_v34, %v5099_v7  ;;  %v7352_v51 = vadd.f32 %v7351_v17, %v7350_v55  ;;  %v7358_v46 = vrot.slane %v7357_v19, 2  ;;  %v7366_v26 = vadd.f32 %v7365_v53, %v7364_v12  ;;  %v15105_v53 = vld [vmem:[#allocation136_spill] sm:$0xff] }
 0x4c5   : > { %v7450_v1 = vrot.slane %v7449_v20, 1  ;;  %v7452_v29 = vsel %vm483_vm0, %v6307_v62, 0.0  ;;  %v7453_v44 = vsel %vm483_vm0, %v6308_v56, 0.0  ;;  %v7373_v25 = vadd.f32 %v7372_v11, %v7371_v61  ;;  %v10024_v61 = vld [vmem:[%s10237_s27 + $0x6f0] sm:$0xff]  ;;  %v10025_v62 = vld [vmem:[%s10237_s27 + $0x6f8] sm:$0xff] }
 0x4c6   : > { %9826 = vrcp.f32 %v5101_v52  ;;  %v7454_v35 = vadd.f32 %v7453_v44, %v7452_v29  ;;  %v7359_v58 = vadd.f32 %v7358_v46, %v7357_v19  ;;  %v7380_v36 = vsel %vm483_vm0, %v14135_v2, 0.0  ;;  %v15106_v11 = vld [vmem:[#allocation138_spill] sm:$0xff]  ;;  %v15107_v29 = vld [vmem:[#allocation140_spill] sm:$0xff] }
 0x4c7   : > { %v7451_v33 = vadd.f32 %v7450_v1, %v7449_v20  ;;  %v7381_v0 = vsel %vm483_vm0, %v14143_v54, 0.0  ;;  %v7367_v6 = vrot.slane %v7366_v26, 2  ;;  %v7374_v50 = vrot.slane %v7373_v25, 4 }
 0x4c8   : > { %v7455_v40 = vrot.slane %v7454_v35, 4  ;;  %v7382_v45 = vadd.f32 %v7381_v0, %v7380_v36  ;;  %v7360_v15 = vrot.slane %v7359_v58, 1  ;;  %v7722_v42 = vsel %vm7617_vm1, %v7334_v21, %v14164_v31  ;;  %v15103_v31 = vld [vmem:[#allocation152_spill] sm:$0xff] }
 0x4c9   : > { %v7734_v60 = vsel %vm7627_vm6, %v7451_v33, %v7733_v18  ;;  %v6020_v32 = vmul.f32 %v13367_v9, %v13257_v16  ;;  %v7368_v2 = vadd.f32 %v7367_v6, %v7366_v26  ;;  %v7375_v7 = vadd.f32 %v7374_v50, %v7373_v25  ;;  %v10022_v18 = vld [vmem:[%s10237_s27 + $0x6d8] sm:$0xff] }
 0x4ca   : > { %v7456_v39 = vadd.f32 %v7455_v40, %v7454_v35  ;;  %v7383_v54 = vrot.slane %v7382_v45, 4  ;;  %v7361_v13 = vadd.f32 %v7360_v15, %v7359_v58  ;;  %v7723_v22 = vsel %vm7619_vm2, %v7343_v5, %v7722_v42  ;;  %v15109_v25 = vld [vmem:[#allocation142_spill] sm:$0xff]  ;;  %v15110_v15 = vld [vmem:[#allocation144_spill] sm:$0xff] }
 0x4cb   : > { %v14200_v55 = vpop.eup %9824  ;;  %v6272_v47 = vmul.f32 %v10022_v18, %v13292_v23  ;;  %v14207_v21 = vmul.f32 %v10023_v10, %v15103_v31  ;;  %v7369_v63 = vrot.slane %v7368_v2, 1  ;;  %v7376_v34 = vrot.slane %v7375_v7, 2 }
 0x4cc   : > { %v14211_v16 = vmul.f32 %v14200_v55, %v14103_v4  ;;  %v7457_v9 = vrot.slane %v7456_v39, 2  ;;  %v7384_v17 = vadd.f32 %v7383_v54, %v7382_v45  ;;  %v7724_v12 = vsel %vm7621_vm3, %v7352_v51, %v7723_v22 }
 0x4cd   : > { %v6275_v5 = vmul.f32 %v10024_v61, %v15104_v8  ;;  %v6276_v28 = vmul.f32 %v10025_v62, %v6020_v32  ;;  %v7370_v56 = vadd.f32 %v7369_v63, %v7368_v2  ;;  %v7377_v20 = vadd.f32 %v7376_v34, %v7375_v7  ;;  %v10027_v61 = vld [vmem:[%s10237_s27 + $0x408] sm:$0xff] }
 0x4ce   : > { %v7458_v23 = vadd.f32 %v7457_v9, %v7456_v39  ;;  %v7725_v19 = vsel %vm7623_vm4, %v7361_v13, %v7724_v12  ;;  %v7385_v52 = vrot.slane %v7384_v17, 2  ;;  %v7250_v4 = vrot.slane %v15105_v53, 2 }
 0x4cf   : > { %v7259_v1 = vrot.slane %v15106_v11, 2  ;;  %v15108_v44 = vrot.slane %v15107_v29, 4  ;;  %v7378_v35 = vrot.slane %v7377_v20, 1  ;;  %v7726_v26 = vsel %vm7625_vm5, %v7370_v56, %v7725_v19  ;;  %v15112_v56 = vld [vmem:[#allocation149_spill] sm:$0xff] }
 0x4d0   : > { %v7459_v51 = vrot.slane %v7458_v23, 1  ;;  %v7275_v33 = vrot.slane %v15109_v25, 4  ;;  %v7386_v58 = vadd.f32 %v7385_v52, %v7384_v17  ;;  %v7251_v36 = vadd.f32 %v7250_v4, %v15105_v53  ;;  %v10026_v17 = vld [vmem:[%s10237_s27 + $0x400] sm:$0xff] }
 0x4d1   : > { %v7267_v46 = vadd.f32 %v15108_v44, %v15107_v29  ;;  %v7260_v0 = vadd.f32 %v7259_v1, %v15106_v11  ;;  %v7379_v50 = vadd.f32 %v7378_v35, %v7377_v20  ;;  %v7282_v42 = vsel %vm483_vm0, %v15110_v15, 0.0  ;;  %v15113_v44 = vld [vmem:[#allocation153_spill] sm:$0xff] }
 0x4d2   : > { %v7460_v6 = vadd.f32 %v7459_v51, %v7458_v23  ;;  %v7276_v45 = vadd.f32 %v7275_v33, %v15109_v25  ;;  %v7387_v39 = vrot.slane %v7386_v58, 1  ;;  %v7252_v2 = vrot.slane %v7251_v36, 1 }
 0x4d3   : > { %v7268_v40 = vrot.slane %v7267_v46, 2  ;;  %v9827_v32 = vpop.eup %9826  ;;  %v7261_v7 = vrot.slane %v7260_v0, 1  ;;  %v7727_v10 = vsel %vm7627_vm6, %v7379_v50, %v7726_v26  ;;  %v7290_v20 = vsel %vm483_vm0, %v15112_v56, 0.0  ;;  %v15119_v56 = vld [vmem:[#allocation110_spill] sm:$0xff] }
 0x4d4   : > { %v5925_v13 = vmul.f32 %v9827_v32, %v14127_v43  ;;  %v5926_v22 = vmul.f32 %v9827_v32, %v14150_v30  ;;  %v7735_v18 = vsel %vm7629_vm7, %v7460_v6, %v7734_v60  ;;  %v7388_v31 = vadd.f32 %v7387_v39, %v7386_v58  ;;  %v15111_v43 = vld [vmem:[#allocation145_spill] sm:$0xff]  ;;  %v15114_v32 = vld [vmem:[#allocation120_spill] sm:$0xff] }
 0x4d5   : > { %v7269_v54 = vadd.f32 %v7268_v40, %v7267_v46  ;;  %8959 = vmatprep.subr.msk.mxu1 %vm483_vm0, %v7735_v18  ;;  %v7253_v9 = vadd.f32 %v7252_v2, %v7251_v36  ;;  %v7262_v63 = vadd.f32 %v7261_v7, %v7260_v0  ;;  %v7277_v62 = vrot.slane %v7276_v45, 2 }
 0x4d6   : > { %v6181_v12 = vmul.f32 %v10026_v17, %v5925_v13  ;;  %v6182_v8 = vmul.f32 %v10027_v61, %v5926_v22  ;;  %8960 = vmatpush3.xpose.msk.msra.mxu1 %vm483_vm0, %v7735_v18  ;;  %v7283_v23 = vadd.f32 %v7282_v42, %v15111_v43  ;;  %v7728_v30 = vsel %vm7629_vm7, %v7388_v31, %v7727_v10  ;;  %v10028_v18 = vld [vmem:[%s10237_s27 + $0x658] sm:$0xff]  ;;  %v15116_v10 = vld [vmem:[#allocation124_spill] sm:$0xff] }
 0x4d7   : > { %v7270_v34 = vrot.slane %v7269_v54, 1  ;;  %v7291_v19 = vsel %vm483_vm0, %v6272_v47, 0.0  ;;  %8961 = vmatprep.subr.msk.mxu1 %vm483_vm0, %v7728_v30  ;;  %v7278_v4 = vadd.f32 %v7277_v62, %v7276_v45  ;;  %v7299_v46 = vsel %vm483_vm0, %v15113_v44, 0.0  ;;  %v15118_v62 = vld [vmem:[#allocation134_spill] sm:$0xff] }
 0x4d8   : > { %v6885_v52 = vsel %vm483_vm0, %v6181_v12, 0.0  ;;  %v6886_v53 = vsel %vm483_vm0, %v6182_v8, 0.0  ;;  %v7284_v11 = vrot.slane %v7283_v23, 4  ;;  %v7292_v29 = vadd.f32 %v7291_v19, %v7290_v20  ;;  %v10030_v8 = vld [vmem:[%s10237_s27 + $0x670] sm:$0xff]  ;;  %v15120_v19 = vld [vmem:[#allocation112_spill] sm:$0xff] }
 0x4d9   : > { %v7271_v60 = vadd.f32 %v7270_v34, %v7269_v54  ;;  %v6887_v1 = vadd.f32 %v6886_v53, %v6885_v52  ;;  %v7300_v51 = vsel %vm483_vm0, %v14207_v21, 0.0  ;;  %v7279_v35 = vrot.slane %v7278_v4, 1 }
 0x4da   : > { %8962 = vmatpush3.xpose.msk.msra.mxu1 %vm483_vm0, %v7728_v30  ;;  %v7285_v47 = vadd.f32 %v7284_v11, %v7283_v23  ;;  %v7301_v26 = vadd.f32 %v7300_v51, %v7299_v46  ;;  %v7308_v25 = vsel %vm483_vm0, %v6275_v5, 0.0  ;;  %v7293_v58 = vrot.slane %v7292_v29, 4  ;;  %v15115_v5 = vld [vmem:[#allocation130_spill] sm:$0xff] }
 0x4db   : > { %v6888_v33 = vrot.slane %v6887_v1, 4  ;;  %v7309_v36 = vsel %vm483_vm0, %v6276_v28, 0.0  ;;  %v7715_v0 = vsel %vm7617_vm1, %v7262_v63, %v7253_v9  ;;  %v7280_v40 = vadd.f32 %v7279_v35, %v7278_v4  ;;  %v10029_v9 = vld [vmem:[%s10237_s27 + $0x668] sm:$0xff]  ;;  %v10031_v30 = vld [vmem:[%s10237_s27 + $0x678] sm:$0xff] }
 0x4dc   : > { %v7286_v6 = vrot.slane %v7285_v47, 2  ;;  %v7302_v50 = vrot.slane %v7301_v26, 4  ;;  %v7310_v45 = vadd.f32 %v7309_v36, %v7308_v25  ;;  %v7294_v15 = vadd.f32 %v7293_v58, %v7292_v29  ;;  %v15117_v63 = vld [vmem:[#allocation128_spill] sm:$0xff] }
 0x4dd   : > { %v14254_v21 = vadd.f32 %v6888_v33, %v6887_v1  ;;  %v7716_v42 = vsel %vm7619_vm2, %v7271_v60, %v7715_v0  ;;  %v6004_v39 = vmul.f32 %v15115_v5, %v15114_v32  ;;  %v6256_v31 = vmul.f32 %v10028_v18, %v15116_v10  ;;  %v15121_v1 = vld [vmem:[#allocation114_spill] sm:$0xff]  ;;  %v15125_v10 = vld [vmem:[#allocation119_spill] sm:$0xff] }
 0x4de   : > { %v7287_v2 = vadd.f32 %v7286_v6, %v7285_v47  ;;  %v7303_v28 = vadd.f32 %v7302_v50, %v7301_v26  ;;  %v7311_v7 = vrot.slane %v7310_v45, 4  ;;  %v7717_v54 = vsel %vm7621_vm3, %v7280_v40, %v7716_v42  ;;  %v15123_v47 = vld [vmem:[#allocation116_spill] sm:$0xff]  ;;  %v15124_v32 = vld [vmem:[#allocation118_spill] sm:$0xff] }
 0x4df   : > { %v6890_v13 = vrot.slane %v14254_v21, 2  ;;  %v7295_v22 = vrot.slane %v7294_v15, 2  ;;  %v6258_v34 = vmul.f32 %v10029_v9, %v15117_v63  ;;  %v6259_v43 = vmul.f32 %v10030_v8, %v15118_v62  ;;  %v15127_v8 = vld [vmem:[#allocation129_spill] sm:$0xff] }
 0x4e0   : > { %v7288_v17 = vrot.slane %v7287_v2, 1  ;;  %v7304_v12 = vrot.slane %v7303_v28, 2  ;;  %v7312_v61 = vadd.f32 %v7311_v7, %v7310_v45  ;;  %v6260_v60 = vmul.f32 %v10031_v30, %v6004_v39 }
 0x4e1   : > { %v7296_v23 = vadd.f32 %v7295_v22, %v7294_v15  ;;  %v7178_v20 = vrot.slane %v15119_v56, 2  ;;  %v7187_v52 = vrot.slane %v15120_v19, 2  ;;  %v15122_v29 = vrot.slane %v15121_v1, 4 }
 0x4e2   : > { %v7289_v53 = vadd.f32 %v7288_v17, %v7287_v2  ;;  %v7305_v4 = vadd.f32 %v7304_v12, %v7303_v28  ;;  %v7313_v11 = vrot.slane %v7312_v61, 2  ;;  %v7203_v26 = vrot.slane %v15123_v47, 4  ;;  %v15126_v17 = vld [vmem:[#allocation125_spill] sm:$0xff] }
 0x4e3   : > { %v7195_v44 = vadd.f32 %v15122_v29, %v15121_v1  ;;  %v7297_v46 = vrot.slane %v7296_v23, 1  ;;  %v7179_v51 = vadd.f32 %v7178_v20, %v15119_v56  ;;  %v7188_v35 = vadd.f32 %v7187_v52, %v15120_v19 }
 0x4e4   : > { %v7306_v25 = vrot.slane %v7305_v4, 1  ;;  %v7314_v33 = vadd.f32 %v7313_v11, %v7312_v61  ;;  %v7718_v58 = vsel %vm7623_vm4, %v7289_v53, %v7717_v54  ;;  %v7204_v50 = vadd.f32 %v7203_v26, %v15123_v47  ;;  %v15130_v26 = vld [vmem:[#allocation97_spill] sm:$0xff] }
 0x4e5   : > { %v7196_v36 = vrot.slane %v7195_v44, 2  ;;  %v7298_v0 = vadd.f32 %v7297_v46, %v7296_v23  ;;  %v7180_v40 = vrot.slane %v7179_v51, 1  ;;  %v7189_v6 = vrot.slane %v7188_v35, 1 }
 0x4e6   : > { %v7307_v45 = vadd.f32 %v7306_v25, %v7305_v4  ;;  %v7315_v15 = vrot.slane %v7314_v33, 1  ;;  %v7210_v5 = vsel %vm483_vm0, %v15124_v32, 0.0  ;;  %v7205_v7 = vrot.slane %v7204_v50, 2 }
 0x4e7   : > { %v7197_v42 = vadd.f32 %v7196_v36, %v7195_v44  ;;  %v7719_v39 = vsel %vm7625_vm5, %v7298_v0, %v7718_v58  ;;  %v7181_v2 = vadd.f32 %v7180_v40, %v7179_v51  ;;  %v7190_v28 = vadd.f32 %v7189_v6, %v7188_v35  ;;  %v15128_v51 = vld [vmem:[#allocation96_spill] sm:$0xff]  ;;  %v15131_v40 = vld [vmem:[#allocation102_spill] sm:$0xff] }
 0x4e8   : > { %v7316_v22 = vadd.f32 %v7315_v15, %v7314_v33  ;;  %v7720_v54 = vsel %vm7627_vm6, %v7307_v45, %v7719_v39  ;;  %v7211_v9 = vadd.f32 %v7210_v5, %v15125_v10  ;;  %v7206_v63 = vadd.f32 %v7205_v7, %v7204_v50  ;;  %v15129_v35 = vld [vmem:[#allocation104_spill] sm:$0xff]  ;;  %v10034_v50 = vld [vmem:[%s10237_s27 + $0x5f0] sm:$0xff] }
 0x4e9   : > { %v7198_v18 = vrot.slane %v7197_v42, 1  ;;  %v7218_v12 = vsel %vm483_vm0, %v15126_v17, 0.0  ;;  %v7219_v61 = vsel %vm483_vm0, %v6256_v31, 0.0  ;;  %v7227_v62 = vsel %vm483_vm0, %v15127_v8, 0.0  ;;  %v10033_v0 = vld [vmem:[%s10237_s27 + $0x5e8] sm:$0xff] }
 0x4ea   : > { %v7721_v23 = vsel %vm7629_vm7, %v7316_v22, %v7720_v54  ;;  %v7212_v56 = vrot.slane %v7211_v9, 4  ;;  %v7220_v20 = vadd.f32 %v7219_v61, %v7218_v12  ;;  %v7207_v19 = vrot.slane %v7206_v63, 1  ;;  %v15132_v45 = vld [vmem:[#allocation108_spill] sm:$0xff] }
 0x4eb   : > { %v7199_v30 = vadd.f32 %v7198_v18, %v7197_v42  ;;  %8963 = vmatprep.subr.msk.mxu1 %vm483_vm0, %v7721_v23  ;;  %v7228_v52 = vsel %vm483_vm0, %v6258_v34, 0.0  ;;  %v7236_v53 = vsel %vm483_vm0, %v6259_v43, 0.0  ;;  %v7237_v4 = vsel %vm483_vm0, %v6260_v60, 0.0  ;;  %v10032_v34 = vld [vmem:[%s10237_s27 + $0x5d8] sm:$0xff]  ;;  %v15133_v22 = vld [vmem:[#allocation84_spill] sm:$0xff] }
 0x4ec   : > { %8964 = vmatpush3.xpose.msk.msra.mxu1 %vm483_vm0, %v7721_v23  ;;  %v7213_v31 = vadd.f32 %v7212_v56, %v7211_v9  ;;  %v7221_v11 = vrot.slane %v7220_v20, 4  ;;  %v7229_v1 = vadd.f32 %v7228_v52, %v7227_v62  ;;  %v7238_v29 = vadd.f32 %v7237_v4, %v7236_v53  ;;  %v10035_v42 = vld [vmem:[%s10237_s27 + $0x5f8] sm:$0xff]  ;;  %v15135_v9 = vld [vmem:[#allocation88_spill] sm:$0xff] }
 0x4ed   : > { %v7208_v44 = vadd.f32 %v7207_v19, %v7206_v63  ;;  %v7708_v46 = vsel %vm7617_vm1, %v7190_v28, %v7181_v2  ;;  %v5988_v47 = vmul.f32 %v15129_v35, %v15128_v51  ;;  %v6240_v43 = vmul.f32 %v10032_v34, %v15130_v26  ;;  %v15134_v18 = vld [vmem:[#allocation86_spill] sm:$0xff] }
 0x4ee   : > { %v7214_v25 = vrot.slane %v7213_v31, 2  ;;  %v7222_v60 = vadd.f32 %v7221_v11, %v7220_v20  ;;  %v7230_v33 = vrot.slane %v7229_v1, 4  ;;  %v7239_v58 = vrot.slane %v7238_v29, 4  ;;  %v15137_v20 = vld [vmem:[#allocation90_spill] sm:$0xff] }
 0x4ef   : > { %v7709_v36 = vsel %vm7619_vm2, %v7199_v30, %v7708_v46  ;;  %v6242_v6 = vmul.f32 %v10033_v0, %v15131_v40  ;;  %v6243_v15 = vmul.f32 %v10034_v50, %v15132_v45  ;;  %v6244_v32 = vmul.f32 %v10035_v42, %v5988_v47  ;;  %v15138_v0 = vld [vmem:[#allocation92_spill] sm:$0xff]  ;;  %v15139_v42 = vld [vmem:[#allocation93_spill] sm:$0xff] }
 0x4f0   : > { %v7215_v5 = vadd.f32 %v7214_v25, %v7213_v31  ;;  %v7223_v39 = vrot.slane %v7222_v60, 2  ;;  %v7231_v2 = vadd.f32 %v7230_v33, %v7229_v1  ;;  %v7240_v28 = vadd.f32 %v7239_v58, %v7238_v29 }
 0x4f1   : > { %v7710_v7 = vsel %vm7621_vm3, %v7208_v44, %v7709_v36  ;;  %v7106_v54 = vrot.slane %v15133_v22, 2  ;;  %v7115_v10 = vrot.slane %v15134_v18, 2  ;;  %v15136_v63 = vrot.slane %v15135_v9, 4 }
 0x4f2   : > { %v7216_v12 = vrot.slane %v7215_v5, 1  ;;  %v7224_v61 = vadd.f32 %v7223_v39, %v7222_v60  ;;  %v7232_v8 = vrot.slane %v7231_v2, 2  ;;  %v7241_v62 = vrot.slane %v7240_v28, 2  ;;  %v15140_v39 = vld [vmem:[#allocation98_spill] sm:$0xff] }
 0x4f3   : > { %v7123_v17 = vadd.f32 %v15136_v63, %v15135_v9  ;;  %v7107_v23 = vadd.f32 %v7106_v54, %v15133_v22  ;;  %v7116_v30 = vadd.f32 %v7115_v10, %v15134_v18  ;;  %v7131_v19 = vrot.slane %v15137_v20, 4  ;;  %v15141_v22 = vld [vmem:[#allocation103_spill] sm:$0xff] }
 0x4f4   : > { %v7217_v52 = vadd.f32 %v7216_v12, %v7215_v5  ;;  %v7225_v53 = vrot.slane %v7224_v61, 1  ;;  %v7233_v4 = vadd.f32 %v7232_v8, %v7231_v2  ;;  %v7242_v31 = vadd.f32 %v7241_v62, %v7240_v28 }
 0x4f5   : > { %v7124_v56 = vrot.slane %v7123_v17, 2  ;;  %v7108_v11 = vrot.slane %v7107_v23, 1  ;;  %v7117_v1 = vrot.slane %v7116_v30, 1  ;;  %v7132_v44 = vadd.f32 %v7131_v19, %v15137_v20  ;;  %v15142_v19 = vld [vmem:[#allocation69_spill] sm:$0xff] }
 0x4f6   : > { %v7226_v46 = vadd.f32 %v7225_v53, %v7224_v61  ;;  %v7234_v51 = vrot.slane %v7233_v4, 1  ;;  %v7243_v35 = vrot.slane %v7242_v31, 1  ;;  %v7711_v47 = vsel %vm7623_vm4, %v7217_v52, %v7710_v7  ;;  %v15143_v52 = vld [vmem:[#allocation80_spill] sm:$0xff] }
 0x4f7   : > { %v7125_v29 = vadd.f32 %v7124_v56, %v7123_v17  ;;  %v7109_v34 = vadd.f32 %v7108_v11, %v7107_v23  ;;  %v7118_v26 = vadd.f32 %v7117_v1, %v7116_v30  ;;  %v7133_v60 = vrot.slane %v7132_v44, 2 }
 0x4f8   : > { %v7235_v33 = vadd.f32 %v7234_v51, %v7233_v4  ;;  %v7244_v58 = vadd.f32 %v7243_v35, %v7242_v31  ;;  %v7712_v36 = vsel %vm7625_vm5, %v7226_v46, %v7711_v47  ;;  %v7138_v40 = vsel %vm483_vm0, %v15138_v0, 0.0  ;;  %v15144_v4 = vld [vmem:[#allocation71_spill] sm:$0xff]  ;;  %v10037_v46 = vld [vmem:[%s10237_s27 + $0x568] sm:$0xff]  ;;  %v10038_v47 = vld [vmem:[%s10237_s27 + $0x570] sm:$0xff] }
 0x4f9   : > { %v7126_v25 = vrot.slane %v7125_v29, 1  ;;  %v7134_v45 = vadd.f32 %v7133_v60, %v7132_v44  ;;  %v7139_v5 = vadd.f32 %v7138_v40, %v15139_v42  ;;  %v7146_v2 = vsel %vm483_vm0, %v15140_v39, 0.0  ;;  %v15145_v51 = vld [vmem:[#allocation76_spill] sm:$0xff]  ;;  %v15147_v0 = vld [vmem:[#allocation58_spill] sm:$0xff] }
 0x4fa   : > { %v7713_v28 = vsel %vm7627_vm6, %v7235_v33, %v7712_v36  ;;  %v7147_v7 = vsel %vm483_vm0, %v6240_v43, 0.0  ;;  %v7155_v54 = vsel %vm483_vm0, %v15141_v22, 0.0  ;;  %v7156_v18 = vsel %vm483_vm0, %v6242_v6, 0.0 }
 0x4fb   : > { %v7127_v50 = vadd.f32 %v7126_v25, %v7125_v29  ;;  %v7714_v10 = vsel %vm7629_vm7, %v7244_v58, %v7713_v28  ;;  %v7135_v9 = vrot.slane %v7134_v45, 1  ;;  %v7140_v63 = vrot.slane %v7139_v5, 4  ;;  %v10039_v25 = vld [vmem:[%s10237_s27 + $0x578] sm:$0xff]  ;;  %v15151_v28 = vld [vmem:[#allocation64_spill] sm:$0xff] }
 0x4fc   : > { %v7148_v17 = vadd.f32 %v7147_v7, %v7146_v2  ;;  %8965 = vmatprep.subr.msk.mxu1 %vm483_vm0, %v7714_v10  ;;  %v7157_v12 = vadd.f32 %v7156_v18, %v7155_v54  ;;  %v7164_v61 = vsel %vm483_vm0, %v6243_v15, 0.0  ;;  %v7165_v8 = vsel %vm483_vm0, %v6244_v32, 0.0  ;;  %v10036_v15 = vld [vmem:[%s10237_s27 + $0x558] sm:$0xff] }
 0x4fd   : > { %v7701_v43 = vsel %vm7617_vm1, %v7118_v26, %v7109_v34  ;;  %8966 = vmatpush3.xpose.msk.msra.mxu1 %vm483_vm0, %v7714_v10  ;;  %v7136_v62 = vadd.f32 %v7135_v9, %v7134_v45  ;;  %v7141_v6 = vadd.f32 %v7140_v63, %v7139_v5  ;;  %v7166_v30 = vadd.f32 %v7165_v8, %v7164_v61  ;;  %v15146_v34 = vld [vmem:[#allocation82_spill] sm:$0xff]  ;;  %v15148_v45 = vld [vmem:[#allocation60_spill] sm:$0xff]  ;;  %v15149_v5 = vld [vmem:[#allocation61_spill] sm:$0xff] }
 0x4fe   : > { %v7149_v23 = vrot.slane %v7148_v17, 4  ;;  %v7158_v56 = vrot.slane %v7157_v12, 4  ;;  %v7702_v20 = vsel %vm7619_vm2, %v7127_v50, %v7701_v43  ;;  %v5972_v53 = vmul.f32 %v15143_v52, %v15142_v19 }
 0x4ff   : > { %v6224_v32 = vmul.f32 %v10036_v15, %v15144_v4  ;;  %v7142_v31 = vrot.slane %v7141_v6, 2  ;;  %v7167_v1 = vrot.slane %v7166_v30, 4  ;;  %v7703_v29 = vsel %vm7621_vm3, %v7136_v62, %v7702_v20 }
 0x500   : > { %v7150_v11 = vadd.f32 %v7149_v23, %v7148_v17  ;;  %v7159_v44 = vadd.f32 %v7158_v56, %v7157_v12  ;;  %v6226_v35 = vmul.f32 %v10037_v46, %v15145_v51  ;;  %v6227_v26 = vmul.f32 %v10038_v47, %v15146_v34  ;;  %v15152_v46 = vld [vmem:[#allocation66_spill] sm:$0xff]  ;;  %v15153_v47 = vld [vmem:[#allocation73_spill] sm:$0xff] }
 0x501   : > { %v6228_v60 = vmul.f32 %v10039_v25, %v5972_v53  ;;  %v7143_v33 = vadd.f32 %v7142_v31, %v7141_v6  ;;  %v7168_v36 = vadd.f32 %v7167_v1, %v7166_v30  ;;  %v7034_v40 = vrot.slane %v15147_v0, 2 }
 0x502   : > { %v7151_v58 = vrot.slane %v7150_v11, 2  ;;  %v7160_v50 = vrot.slane %v7159_v44, 2  ;;  %v7043_v42 = vrot.slane %v15148_v45, 2  ;;  %v15150_v39 = vrot.slane %v15149_v5, 4 }
 0x503   : > { %v7059_v7 = vrot.slane %v15151_v28, 4  ;;  %v7144_v22 = vrot.slane %v7143_v33, 1  ;;  %v7169_v18 = vrot.slane %v7168_v36, 2  ;;  %v7035_v10 = vadd.f32 %v7034_v40, %v15147_v0 }
 0x504   : > { %v7051_v2 = vadd.f32 %v15150_v39, %v15149_v5  ;;  %v7152_v54 = vadd.f32 %v7151_v58, %v7150_v11  ;;  %v7161_v9 = vadd.f32 %v7160_v50, %v7159_v44  ;;  %v7044_v63 = vadd.f32 %v7043_v42, %v15148_v45  ;;  %v15155_v50 = vld [vmem:[#allocation77_spill] sm:$0xff] }
 0x505   : > { %v7060_v12 = vadd.f32 %v7059_v7, %v15151_v28  ;;  %v7145_v61 = vadd.f32 %v7144_v22, %v7143_v33  ;;  %v7170_v43 = vadd.f32 %v7169_v18, %v7168_v36  ;;  %v7036_v62 = vrot.slane %v7035_v10, 1  ;;  %v15154_v36 = vld [vmem:[#allocation67_spill] sm:$0xff]  ;;  %v15157_v18 = vld [vmem:[#allocation52_spill] sm:$0xff] }
 0x506   : > { %v7052_v17 = vrot.slane %v7051_v2, 2  ;;  %v7153_v8 = vrot.slane %v7152_v54, 1  ;;  %v7162_v6 = vrot.slane %v7161_v9, 1  ;;  %v7045_v23 = vrot.slane %v7044_v63, 1 }
 0x507   : > { %v7061_v56 = vrot.slane %v7060_v12, 2  ;;  %v7171_v19 = vrot.slane %v7170_v43, 1  ;;  %v7704_v52 = vsel %vm7623_vm4, %v7145_v61, %v7703_v29  ;;  %v7037_v53 = vadd.f32 %v7036_v62, %v7035_v10  ;;  %v10040_v61 = vld [vmem:[%s10237_s27 + $0x4d8] sm:$0xff]  ;;  %v10041_v62 = vld [vmem:[%s10237_s27 + $0x4e8] sm:$0xff] }
 0x508   : > { %v7053_v30 = vadd.f32 %v7052_v17, %v7051_v2  ;;  %v7154_v20 = vadd.f32 %v7153_v8, %v7152_v54  ;;  %v7163_v15 = vadd.f32 %v7162_v6, %v7161_v9  ;;  %v7046_v4 = vadd.f32 %v7045_v23, %v7044_v63  ;;  %v15156_v54 = vld [vmem:[#allocation42_spill] sm:$0xff]  ;;  %v10042_v23 = vld [vmem:[%s10237_s27 + $0x4f0] sm:$0xff] }
 0x509   : > { %v7062_v11 = vadd.f32 %v7061_v56, %v7060_v12  ;;  %v7172_v1 = vadd.f32 %v7171_v19, %v7170_v43  ;;  %v7066_v51 = vsel %vm483_vm0, %v15152_v46, 0.0  ;;  %v7074_v34 = vsel %vm483_vm0, %v15153_v47, 0.0  ;;  %v15158_v8 = vld [vmem:[#allocation46_spill] sm:$0xff] }
 0x50a   : > { %v7054_v31 = vrot.slane %v7053_v30, 1  ;;  %v7705_v44 = vsel %vm7625_vm5, %v7154_v20, %v7704_v52  ;;  %v7067_v29 = vadd.f32 %v7066_v51, %v15154_v36  ;;  %v7075_v40 = vsel %vm483_vm0, %v6224_v32, 0.0  ;;  %v15159_v6 = vld [vmem:[#allocation50_spill] sm:$0xff] }
 0x50b   : > { %v7706_v25 = vsel %vm7627_vm6, %v7163_v15, %v7705_v44  ;;  %v7063_v58 = vrot.slane %v7062_v11, 1  ;;  %v7083_v45 = vsel %vm483_vm0, %v15155_v50, 0.0  ;;  %v7084_v42 = vsel %vm483_vm0, %v6226_v35, 0.0  ;;  %v10043_v15 = vld [vmem:[%s10237_s27 + $0x4f8] sm:$0xff] }
 0x50c   : > { %v7055_v33 = vadd.f32 %v7054_v31, %v7053_v30  ;;  %v7707_v0 = vsel %vm7629_vm7, %v7172_v1, %v7706_v25  ;;  %v7068_v39 = vrot.slane %v7067_v29, 4  ;;  %v7076_v2 = vadd.f32 %v7075_v40, %v7074_v34  ;;  %v15161_v31 = vld [vmem:[#allocation32_spill] sm:$0xff]  ;;  %v15163_v44 = vld [vmem:[#allocation34_spill] sm:$0xff] }
 0x50d   : > { %8967 = vmatprep.subr.msk.mxu1 %vm483_vm0, %v7707_v0  ;;  %v7064_v5 = vadd.f32 %v7063_v58, %v7062_v11  ;;  %v7085_v28 = vadd.f32 %v7084_v42, %v7083_v45  ;;  %v7092_v7 = vsel %vm483_vm0, %v6227_v26, 0.0  ;;  %v7093_v32 = vsel %vm483_vm0, %v6228_v60, 0.0  ;;  %v15160_v60 = vld [vmem:[#allocation56_spill] sm:$0xff]  ;;  %v15167_v50 = vld [vmem:[#allocation38_spill] sm:$0xff] }
 0x50e   : > { %8968 = vmatpush3.xpose.msk.msra.mxu1 %vm483_vm0, %v7707_v0  ;;  %v7694_v22 = vsel %vm7617_vm1, %v7046_v4, %v7037_v53  ;;  %v5956_v35 = vmul.f32 %v15157_v18, %v15156_v54  ;;  %v7069_v10 = vadd.f32 %v7068_v39, %v7067_v29  ;;  %v7077_v9 = vrot.slane %v7076_v2, 4  ;;  %v15165_v29 = vld [vmem:[#allocation35_spill] sm:$0xff] }
 0x50f   : > { %v7086_v63 = vrot.slane %v7085_v28, 4  ;;  %v7094_v17 = vadd.f32 %v7093_v32, %v7092_v7  ;;  %v7695_v12 = vsel %vm7619_vm2, %v7055_v33, %v7694_v22  ;;  %v6208_v43 = vmul.f32 %v10040_v61, %v15158_v8 }
 0x510   : > { %v6210_v26 = vmul.f32 %v10041_v62, %v15159_v6  ;;  %v6211_v30 = vmul.f32 %v10042_v23, %v15160_v60  ;;  %v7070_v56 = vrot.slane %v7069_v10, 2  ;;  %v7078_v20 = vadd.f32 %v7077_v9, %v7076_v2 }
 0x511   : > { %v7087_v19 = vadd.f32 %v7086_v63, %v7085_v28  ;;  %v7095_v52 = vrot.slane %v7094_v17, 4  ;;  %v7696_v53 = vsel %vm7621_vm3, %v7064_v5, %v7695_v12  ;;  %v6212_v4 = vmul.f32 %v10043_v15, %v5956_v35  ;;  %v15168_v15 = vld [vmem:[#allocation40_spill] sm:$0xff] }
 0x512   : > { %v15162_v11 = vrot.slane %v15161_v31, 4  ;;  %v15164_v46 = vrot.slane %v15163_v44, 4  ;;  %v7071_v47 = vadd.f32 %v7070_v56, %v7069_v10  ;;  %v7079_v34 = vrot.slane %v7078_v20, 2 }
 0x513   : > { %v7088_v25 = vrot.slane %v7087_v19, 2  ;;  %v7096_v33 = vadd.f32 %v7095_v52, %v7094_v17  ;;  %v15166_v0 = vrot.slane %v15165_v29, 4  ;;  %v6987_v45 = vrot.slane %v15167_v50, 4 }
 0x514   : > { %v6961_v1 = vadd.f32 %v15162_v11, %v15161_v31  ;;  %v6970_v51 = vadd.f32 %v15164_v46, %v15163_v44  ;;  %v7072_v42 = vrot.slane %v7071_v47, 1  ;;  %v7080_v5 = vadd.f32 %v7079_v34, %v7078_v20  ;;  %v15169_v11 = vld [vmem:[#allocation47_spill] sm:$0xff] }
 0x515   : > { %v6979_v40 = vadd.f32 %v15166_v0, %v15165_v29  ;;  %v7089_v39 = vadd.f32 %v7088_v25, %v7087_v19  ;;  %v7097_v2 = vrot.slane %v7096_v33, 2  ;;  %v6988_v22 = vadd.f32 %v6987_v45, %v15167_v50 }
 0x516   : > { %v6962_v58 = vrot.slane %v6961_v1, 2  ;;  %v6971_v36 = vrot.slane %v6970_v51, 2  ;;  %v7073_v54 = vadd.f32 %v7072_v42, %v7071_v47  ;;  %v7081_v18 = vrot.slane %v7080_v5, 1  ;;  %v15170_v47 = vld [vmem:[#allocation41_spill] sm:$0xff] }
 0x517   : > { %v6980_v32 = vrot.slane %v6979_v40, 2  ;;  %v7090_v35 = vrot.slane %v7089_v39, 1  ;;  %v7098_v10 = vadd.f32 %v7097_v2, %v7096_v33  ;;  %v6989_v12 = vrot.slane %v6988_v22, 2  ;;  %v15171_v33 = vld [vmem:[#allocation51_spill] sm:$0xff] }
 0x518   : > { %v6963_v28 = vadd.f32 %v6962_v58, %v6961_v1  ;;  %v6972_v7 = vadd.f32 %v6971_v36, %v6970_v51  ;;  %v7082_v61 = vadd.f32 %v7081_v18, %v7080_v5  ;;  %v7697_v6 = vsel %vm7623_vm4, %v7073_v54, %v7696_v53  ;;  %v15172_v5 = vld [vmem:[#allocation13_spill] sm:$0xff]  ;;  %v15174_v54 = vld [vmem:[#allocation16_spill] sm:$0xff]  ;;  %v15175_v18 = vld [vmem:[#allocation26_spill] sm:$0xff] }
 0x519   : > { %v6981_v17 = vadd.f32 %v6980_v32, %v6979_v40  ;;  %v7091_v8 = vadd.f32 %v7090_v35, %v7089_v39  ;;  %v7099_v62 = vrot.slane %v7098_v10, 1  ;;  %v6990_v20 = vadd.f32 %v6989_v12, %v6988_v22  ;;  %v15173_v39 = vld [vmem:[#allocation22_spill] sm:$0xff] }
 0x51a   : > { %v6964_v9 = vrot.slane %v6963_v28, 1  ;;  %v6973_v63 = vrot.slane %v6972_v7, 1  ;;  %v7698_v52 = vsel %vm7625_vm5, %v7082_v61, %v7697_v6  ;;  %v6994_v31 = vsel %vm483_vm0, %v15168_v15, 0.0  ;;  %v15179_v15 = vld [vmem:[#allocation30_spill] sm:$0xff] }
 0x51b   : > { %v6982_v56 = vrot.slane %v6981_v17, 1  ;;  %v7100_v19 = vadd.f32 %v7099_v62, %v7098_v10  ;;  %v7002_v1 = vsel %vm483_vm0, %v15169_v11, 0.0  ;;  %v7699_v44 = vsel %vm7627_vm6, %v7091_v8, %v7698_v52  ;;  %v15176_v10 = vld [vmem:[#allocation9_spill] sm:$0xff] }
 0x51c   : > { %v6965_v23 = vadd.f32 %v6964_v9, %v6963_v28  ;;  %v6974_v60 = vadd.f32 %v6973_v63, %v6972_v7  ;;  %v6991_v51 = vrot.slane %v6990_v20, 1  ;;  %v6995_v34 = vadd.f32 %v6994_v31, %v15170_v47  ;;  %v10045_v9 = vld [vmem:[%s10237_s27 + $0x458] sm:$0xff]  ;;  %v10048_v52 = vld [vmem:[%s10237_s27 + $0x470] sm:$0xff] }
 0x51d   : > { %v6983_v46 = vadd.f32 %v6982_v56, %v6981_v17  ;;  %v7700_v53 = vsel %vm7629_vm7, %v7100_v19, %v7699_v44  ;;  %v7003_v25 = vsel %vm483_vm0, %v6208_v43, 0.0  ;;  %v7011_v58 = vsel %vm483_vm0, %v15171_v33, 0.0  ;;  %v15177_v63 = vld [vmem:[#allocation14_spill] sm:$0xff] }
 0x51e   : > { %v7012_v36 = vsel %vm483_vm0, %v6210_v26, 0.0  ;;  %8969 = vmatprep.subr.msk.mxu1 %vm483_vm0, %v7700_v53  ;;  %v6992_v29 = vadd.f32 %v6991_v51, %v6990_v20  ;;  %v6996_v0 = vrot.slane %v6995_v34, 4  ;;  %v7004_v40 = vadd.f32 %v7003_v25, %v7002_v1  ;;  %v10047_v20 = vld [vmem:[%s10237_s27 + $0x468] sm:$0xff]  ;;  %v10049_v51 = vld [vmem:[%s10237_s27 + $0x478] sm:$0xff] }
 0x51f   : > { %v7013_v50 = vadd.f32 %v7012_v36, %v7011_v58  ;;  %8970 = vmatpush3.xpose.msk.msra.mxu1 %vm483_vm0, %v7700_v53  ;;  %v7020_v45 = vsel %vm483_vm0, %v6211_v30, 0.0  ;;  %v7021_v42 = vsel %vm483_vm0, %v6212_v4, 0.0  ;;  %v7687_v43 = vsel %vm7617_vm1, %v6974_v60, %v6965_v23  ;;  %v10044_v30 = vld [vmem:[%s10237_s27 + $0x448] sm:$0xff]  ;;  %v10046_v23 = vld [vmem:[%s10237_s27 + $0x460] sm:$0xff]  ;;  %v15182_v58 = vld [vmem:[#allocation6_spill] sm:$0xff] }
 0x520   : > { %v5938_v2 = vmul.f32 %v15173_v39, %v15172_v5  ;;  %v6997_v26 = vadd.f32 %v6996_v0, %v6995_v34  ;;  %v7005_v28 = vrot.slane %v7004_v40, 4  ;;  %v7022_v32 = vadd.f32 %v7021_v42, %v7020_v45  ;;  %v15178_v60 = vld [vmem:[#allocation27_spill] sm:$0xff]  ;;  %v15180_v53 = vld [vmem:[#allocation4_spill] sm:$0xff] }
 0x521   : > { %v7014_v7 = vrot.slane %v7013_v50, 4  ;;  %v7688_v22 = vsel %vm7619_vm2, %v6983_v46, %v7687_v43  ;;  %v5940_v35 = vmul.f32 %v15175_v18, %v15174_v54  ;;  %v6190_v4 = vmul.f32 %v10044_v30, %v15176_v10  ;;  %v15183_v5 = vld [vmem:[#allocation8_spill] sm:$0xff] }
 0x522   : > { %v6192_v17 = vmul.f32 %v10045_v9, %v15177_v63  ;;  %v6998_v12 = vrot.slane %v6997_v26, 2  ;;  %v7006_v61 = vadd.f32 %v7005_v28, %v7004_v40  ;;  %v7023_v62 = vrot.slane %v7022_v32, 4 }
 0x523   : > { %v7015_v8 = vadd.f32 %v7014_v7, %v7013_v50  ;;  %v7689_v6 = vsel %vm7621_vm3, %v6992_v29, %v7688_v22  ;;  %v6193_v56 = vmul.f32 %v10046_v23, %v15178_v60  ;;  %v6194_v19 = vmul.f32 %v10047_v20, %v5938_v2  ;;  %v15184_v22 = vld [vmem:[#allocation10_spill] sm:$0xff]  ;;  %v15186_v20 = vld [vmem:[#allocation23_spill] sm:$0xff] }
 0x524   : > { %v6195_v31 = vmul.f32 %v10048_v52, %v15179_v15  ;;  %v6999_v11 = vadd.f32 %v6998_v12, %v6997_v26  ;;  %v7007_v1 = vrot.slane %v7006_v61, 2  ;;  %v7024_v46 = vadd.f32 %v7023_v62, %v7022_v32 }
 0x525   : > { %v7016_v44 = vrot.slane %v7015_v8, 2  ;;  %v6196_v47 = vmul.f32 %v10049_v51, %v5940_v35  ;;  %v6891_v34 = vadd.f32 %v6890_v13, %v14254_v21  ;;  %v15181_v25 = vrot.slane %v15180_v53, 4 }
 0x526   : > { %v6906_v36 = vrot.slane %v15182_v58, 4  ;;  %v7000_v29 = vrot.slane %v6999_v11, 1  ;;  %v7008_v0 = vadd.f32 %v7007_v1, %v7006_v61  ;;  %v7025_v50 = vrot.slane %v7024_v46, 2  ;;  %v15185_v61 = vld [vmem:[#allocation18_spill] sm:$0xff] }
 0x527   : > { %v6898_v33 = vadd.f32 %v15181_v25, %v15180_v53  ;;  %v7017_v40 = vadd.f32 %v7016_v44, %v7015_v8  ;;  %v6892_v45 = vrot.slane %v6891_v34, 1  ;;  %v6913_v39 = vsel %vm483_vm0, %v15183_v5, 0.0 }
 0x528   : > { %v6907_v43 = vadd.f32 %v6906_v36, %v15182_v58  ;;  %v7001_v2 = vadd.f32 %v7000_v29, %v6999_v11  ;;  %v7009_v26 = vrot.slane %v7008_v0, 1  ;;  %v7026_v13 = vadd.f32 %v7025_v50, %v7024_v46 }
 0x529   : > { %v6899_v42 = vrot.slane %v6898_v33, 2  ;;  %v7018_v21 = vrot.slane %v7017_v40, 1  ;;  %v6893_v28 = vadd.f32 %v6892_v45, %v6891_v34  ;;  %v6914_v54 = vadd.f32 %v6913_v39, %v15184_v22 }
 0x52a   : > { %v6908_v32 = vrot.slane %v6907_v43, 2  ;;  %v7010_v18 = vadd.f32 %v7009_v26, %v7008_v0  ;;  %v7027_v30 = vrot.slane %v7026_v13, 1  ;;  %v7690_v10 = vsel %vm7623_vm4, %v7001_v2, %v7689_v6  ;;  %v10050_v2 = vld [vmem:[%s10237_s27 + $0x3d8] sm:$0xff] }
 0x52b   : > { %v6900_v7 = vadd.f32 %v6899_v42, %v6898_v33  ;;  %v7019_v35 = vadd.f32 %v7018_v21, %v7017_v40  ;;  %v6915_v12 = vrot.slane %v6914_v54, 4  ;;  %v6921_v8 = vsel %vm483_vm0, %v15185_v61, 0.0 }
 0x52c   : > { %v6909_v63 = vadd.f32 %v6908_v32, %v6907_v43  ;;  %v7028_v62 = vadd.f32 %v7027_v30, %v7026_v13  ;;  %v7691_v23 = vsel %vm7625_vm5, %v7010_v18, %v7690_v10  ;;  %v6922_v60 = vsel %vm483_vm0, %v6190_v4, 0.0  ;;  %v10051_v13 = vld [vmem:[%s10237_s27 + $0x3e8] sm:$0xff] }
 0x52d   : > { %v6901_v9 = vrot.slane %v6900_v7, 1  ;;  %v6930_v52 = vsel %vm483_vm0, %v15186_v20, 0.0  ;;  %v7692_v15 = vsel %vm7627_vm6, %v7019_v35, %v7691_v23  ;;  %v6916_v44 = vadd.f32 %v6915_v12, %v6914_v54  ;;  %v10053_v35 = vld [vmem:[%s10237_s27 + $0x3f8] sm:$0xff]  ;;  %v15187_v10 = vld [vmem:[#allocation172_spill] sm:$0xff] }
 0x52e   : > { %v6910_v1 = vrot.slane %v6909_v63, 1  ;;  %v7693_v6 = vsel %vm7629_vm7, %v7028_v62, %v7692_v15  ;;  %v6923_v46 = vadd.f32 %v6922_v60, %v6921_v8  ;;  %v6931_v51 = vsel %vm483_vm0, %v6192_v17, 0.0 }
 0x52f   : > { %v6902_v11 = vadd.f32 %v6901_v9, %v6900_v7  ;;  %v6939_v34 = vsel %vm483_vm0, %v6193_v56, 0.0  ;;  %8971 = vmatprep.subr.msk.mxu1 %vm483_vm0, %v7693_v6  ;;  %v6917_v25 = vrot.slane %v6916_v44, 2  ;;  %v6932_v4 = vadd.f32 %v6931_v51, %v6930_v52 }
 0x530   : > { %v6911_v53 = vadd.f32 %v6910_v1, %v6909_v63  ;;  %v6940_v33 = vsel %vm483_vm0, %v6194_v19, 0.0  ;;  %8972 = vmatpush3.xpose.msk.msra.mxu1 %vm483_vm0, %v7693_v6  ;;  %v6924_v58 = vrot.slane %v6923_v46, 4  ;;  %v6948_v29 = vsel %vm483_vm0, %v6195_v31, 0.0 }
 0x531   : > { %v6941_v36 = vadd.f32 %v6940_v33, %v6939_v34  ;;  %v6949_v0 = vsel %vm483_vm0, %v6196_v47, 0.0  ;;  %v6918_v17 = vadd.f32 %v6917_v25, %v6916_v44  ;;  %v6933_v40 = vrot.slane %v6932_v4, 4 }
 0x532   : > { %v6950_v56 = vadd.f32 %v6949_v0, %v6948_v29  ;;  %v7680_v50 = vsel %vm7617_vm1, %v6902_v11, %v6893_v28  ;;  %v6925_v45 = vadd.f32 %v6924_v58, %v6923_v46  ;;  %v5924_v43 = vmul.f32 %v14200_v55, %v14105_v57  ;;  %v10052_v28 = vld [vmem:[%s10237_s27 + $0x3f0] sm:$0xff] }
 0x533   : > { %v6942_v42 = vrot.slane %v6941_v36, 4  ;;  %v7681_v19 = vsel %vm7619_vm2, %v6911_v53, %v7680_v50  ;;  %v6919_v5 = vrot.slane %v6918_v17, 1  ;;  %v6934_v39 = vadd.f32 %v6933_v40, %v6932_v4 }
 0x534   : > { %v6951_v31 = vrot.slane %v6950_v56, 4  ;;  %v6176_v47 = vmul.f32 %v10050_v2, %v14124_v37  ;;  %v6926_v26 = vrot.slane %v6925_v45, 2  ;;  %v6178_v7 = vmul.f32 %v10051_v13, %v14169_v48 }
 0x535   : > { %v6943_v21 = vadd.f32 %v6942_v42, %v6941_v36  ;;  %v6179_v32 = vmul.f32 %v10052_v28, %v14211_v16  ;;  %v6920_v22 = vadd.f32 %v6919_v5, %v6918_v17  ;;  %v6935_v54 = vrot.slane %v6934_v39, 2 }
 0x536   : > { %v6952_v18 = vadd.f32 %v6951_v31, %v6950_v56  ;;  %v6180_v30 = vmul.f32 %v10053_v35, %v5924_v43  ;;  %v6927_v57 = vadd.f32 %v6926_v26, %v6925_v45  ;;  %v6818_v9 = vrot.slane %v15187_v10, 2  ;;  %v15188_v26 = vld [vmem:[#allocation165_spill] sm:$0xff]  ;;  %v15190_v35 = vld [vmem:[#allocation166_spill] sm:$0xff] }
 0x537   : > { %v6944_v55 = vrot.slane %v6943_v21, 2  ;;  %v6827_v63 = vrot.slane %v13976_v49, 2  ;;  %v6936_v37 = vadd.f32 %v6935_v54, %v6934_v39  ;;  %v7682_v61 = vsel %vm7621_vm3, %v6920_v22, %v7681_v19 }
 0x538   : > { %v6953_v12 = vrot.slane %v6952_v18, 2  ;;  %v6835_v48 = vadd.f32 %v6834_v24, %v13986_v41  ;;  %v6928_v16 = vrot.slane %v6927_v57, 1  ;;  %v6819_v62 = vadd.f32 %v6818_v9, %v15187_v10 }
 0x539   : > { %v6945_v8 = vadd.f32 %v6944_v55, %v6943_v21  ;;  %v6828_v23 = vadd.f32 %v6827_v63, %v13976_v49  ;;  %v6937_v60 = vrot.slane %v6936_v37, 1  ;;  %v6843_v15 = vrot.slane %v14058_v27, 4  ;;  %v15191_v55 = vld [vmem:[#allocation168_spill] sm:$0xff] }
 0x53a   : > { %v6954_v20 = vadd.f32 %v6953_v12, %v6952_v18  ;;  %v6836_v52 = vrot.slane %v6835_v48, 2  ;;  %v6929_v11 = vadd.f32 %v6928_v16, %v6927_v57  ;;  %v6820_v44 = vrot.slane %v6819_v62, 1  ;;  %v10054_v18 = vld [vmem:[%s10237_s27 + $0x358] sm:$0xff]  ;;  %v10056_v12 = vld [vmem:[%s10237_s27 + $0x370] sm:$0xff] }
 0x53b   : > { %v6946_v1 = vrot.slane %v6945_v8, 1  ;;  %v6829_v6 = vrot.slane %v6828_v23, 1  ;;  %v6938_v46 = vadd.f32 %v6937_v60, %v6936_v37  ;;  %v6844_v41 = vadd.f32 %v6843_v15, %v14058_v27  ;;  %v15193_v60 = vld [vmem:[#allocation159_spill] sm:$0xff] }
 0x53c   : > { %v6955_v51 = vrot.slane %v6954_v20, 1  ;;  %v6837_v34 = vadd.f32 %v6836_v52, %v6835_v48  ;;  %v7683_v53 = vsel %vm7623_vm4, %v6929_v11, %v7682_v61  ;;  %v6821_v25 = vadd.f32 %v6820_v44, %v6819_v62  ;;  %v15192_v61 = vld [vmem:[#allocation171_spill] sm:$0xff]  ;;  %v10057_v62 = vld [vmem:[%s10237_s27 + $0x378] sm:$0xff]  ;;  %v15194_v11 = vld [vmem:[#allocation160_spill] sm:$0xff] }
 0x53d   : > { %v6947_v24 = vadd.f32 %v6946_v1, %v6945_v8  ;;  %v6830_v4 = vadd.f32 %v6829_v6, %v6828_v23  ;;  %v7684_v33 = vsel %vm7625_vm5, %v6938_v46, %v7683_v53  ;;  %v6845_v36 = vrot.slane %v6844_v41, 2  ;;  %v15195_v44 = vld [vmem:[#allocation161_spill] sm:$0xff] }
 0x53e   : > { %v6956_v49 = vadd.f32 %v6955_v51, %v6954_v20  ;;  %v6838_v58 = vrot.slane %v6837_v34, 1  ;;  %v6850_v0 = vsel %vm483_vm0, %v14094_v3, 0.0  ;;  %v6858_v17 = vsel %vm483_vm0, %v14138_v38, 0.0 }
 0x53f   : > { %v7685_v29 = vsel %vm7627_vm6, %v6947_v24, %v7684_v33  ;;  %v6859_v27 = vsel %vm483_vm0, %v6176_v47, 0.0  ;;  %v6846_v50 = vadd.f32 %v6845_v36, %v6844_v41  ;;  %v6851_v45 = vadd.f32 %v6850_v0, %v14098_v14  ;;  %v15197_v24 = vld [vmem:[#allocation162_spill] sm:$0xff] }
 0x540   : > { %v7686_v40 = vsel %vm7629_vm7, %v6956_v49, %v7685_v29  ;;  %v6839_v56 = vadd.f32 %v6838_v58, %v6837_v34  ;;  %v6860_v42 = vadd.f32 %v6859_v27, %v6858_v17  ;;  %v6867_v19 = vsel %vm483_vm0, %v14174_v59, 0.0  ;;  %v15189_v59 = vld [vmem:[#allocation169_spill] sm:$0xff]  ;;  %v7461_v58 = vld [vmem:[%s14833_s2] sm:$0xff] }
 0x541   : > { %8973 = vmatprep.subr.msk.mxu1 %vm483_vm0, %v7686_v40  ;;  %v6868_v43 = vsel %vm483_vm0, %v6178_v7, 0.0  ;;  %v6876_v3 = vsel %vm483_vm0, %v6179_v32, 0.0  ;;  %v6847_v38 = vrot.slane %v6846_v50, 1  ;;  %v6852_v5 = vrot.slane %v6851_v45, 4  ;;  %8991 = vmatprep.mubr.msk.f32.mxu1 %vm483_vm0, %v7461_v58 }
 0x542   : > { %8974 = vmatpush3.xpose.msk.msra.mxu1 %vm483_vm0, %v7686_v40  ;;  %v6869_v39 = vadd.f32 %v6868_v43, %v6867_v19  ;;  %v6877_v31 = vsel %vm483_vm0, %v6180_v30, 0.0  ;;  %v6861_v14 = vrot.slane %v6860_v42, 4  ;;  %v7673_v47 = vsel %vm7617_vm1, %v6830_v4, %v6821_v25  ;;  %v10055_v30 = vld [vmem:[%s10237_s27 + $0x368] sm:$0xff] }
 0x543   : > { %v6878_v2 = vadd.f32 %v6877_v31, %v6876_v3  ;;  %v5908_v21 = vmul.f32 %v15189_v59, %v15188_v26  ;;  %v6848_v13 = vadd.f32 %v6847_v38, %v6846_v50  ;;  %v6853_v7 = vadd.f32 %v6852_v5, %v6851_v45 }
 0x544   : > { %v6870_v28 = vrot.slane %v6869_v39, 4  ;;  %v7674_v32 = vsel %vm7619_vm2, %v6839_v56, %v7673_v47  ;;  %v6862_v22 = vadd.f32 %v6861_v14, %v6860_v42  ;;  %v6160_v57 = vmul.f32 %v10054_v18, %v15190_v35  ;;  %v15198_v47 = vld [vmem:[#allocation163_spill] sm:$0xff]  ;;  %v15201_v35 = vld [vmem:[#allocation170_spill] sm:$0xff] }
 0x545   : > { %v6879_v54 = vrot.slane %v6878_v2, 4  ;;  %v6162_v10 = vmul.f32 %v10055_v30, %v15191_v55  ;;  %v6854_v9 = vrot.slane %v6853_v7, 2  ;;  %v7675_v37 = vsel %vm7621_vm3, %v6848_v13, %v7674_v32  ;;  %v15199_v13 = vld [vmem:[#allocation164_spill] sm:$0xff] }
 0x546   : > { %v6871_v63 = vadd.f32 %v6870_v28, %v6869_v39  ;;  %v6163_v48 = vmul.f32 %v10056_v12, %v15192_v61  ;;  %v6863_v16 = vrot.slane %v6862_v22, 2  ;;  %v6164_v23 = vmul.f32 %v10057_v62, %v5908_v21  ;;  %v15200_v28 = vld [vmem:[#allocation167_spill] sm:$0xff] }
 0x547   : > { %v6880_v8 = vadd.f32 %v6879_v54, %v6878_v2  ;;  %v6746_v20 = vrot.slane %v15193_v60, 2  ;;  %v6855_v52 = vadd.f32 %v6854_v9, %v6853_v7  ;;  %v6755_v1 = vrot.slane %v15194_v11, 2 }
 0x548   : > { %v6872_v15 = vrot.slane %v6871_v63, 2  ;;  %v15196_v6 = vrot.slane %v15195_v44, 4  ;;  %v6864_v51 = vadd.f32 %v6863_v16, %v6862_v22  ;;  %v6771_v53 = vrot.slane %v15197_v24, 4 }
 0x549   : > { %v6881_v34 = vrot.slane %v6880_v8, 2  ;;  %v6747_v41 = vadd.f32 %v6746_v20, %v15193_v60  ;;  %v6856_v25 = vrot.slane %v6855_v52, 1  ;;  %v6756_v49 = vadd.f32 %v6755_v1, %v15194_v11  ;;  %v10058_v1 = vld [vmem:[%s10237_s27 + $0x2d8] sm:$0xff] }
 0x54a   : > { %v6763_v46 = vadd.f32 %v15196_v6, %v15195_v44  ;;  %v6873_v4 = vadd.f32 %v6872_v15, %v6871_v63  ;;  %v6865_v36 = vrot.slane %v6864_v51, 1  ;;  %v6772_v17 = vadd.f32 %v6771_v53, %v15197_v24  ;;  %v15203_v15 = vld [vmem:[#allocation156_spill] sm:$0xff]  ;;  %v15204_v44 = vld [vmem:[#allocation150_spill] sm:$0xff] }
 0x54b   : > { %v6882_v29 = vadd.f32 %v6881_v34, %v6880_v8  ;;  %v6748_v0 = vrot.slane %v6747_v41, 1  ;;  %v6857_v27 = vadd.f32 %v6856_v25, %v6855_v52  ;;  %v6757_v56 = vrot.slane %v6756_v49, 1  ;;  %v10059_v34 = vld [vmem:[%s10237_s27 + $0x2e8] sm:$0xff]  ;;  %v10060_v25 = vld [vmem:[%s10237_s27 + $0x2f0] sm:$0xff] }
 0x54c   : > { %v6764_v33 = vrot.slane %v6763_v46, 2  ;;  %v6874_v40 = vrot.slane %v6873_v4, 1  ;;  %v6866_v45 = vadd.f32 %v6865_v36, %v6864_v51  ;;  %v6773_v43 = vrot.slane %v6772_v17, 2  ;;  %v15207_v36 = vld [vmem:[#allocation137_spill] sm:$0xff] }
 0x54d   : > { %v6883_v42 = vrot.slane %v6882_v29, 1  ;;  %v6749_v19 = vadd.f32 %v6748_v0, %v6747_v41  ;;  %v7676_v38 = vsel %vm7623_vm4, %v6857_v27, %v7675_v37  ;;  %v6758_v5 = vadd.f32 %v6757_v56, %v6756_v49  ;;  %v15205_v41 = vld [vmem:[#allocation154_spill] sm:$0xff] }
 0x54e   : > { %v6765_v50 = vadd.f32 %v6764_v33, %v6763_v46  ;;  %v6875_v3 = vadd.f32 %v6874_v40, %v6873_v4  ;;  %v7677_v14 = vsel %vm7625_vm5, %v6866_v45, %v7676_v38  ;;  %v6774_v2 = vadd.f32 %v6773_v43, %v6772_v17  ;;  %v15206_v4 = vld [vmem:[#allocation158_spill] sm:$0xff]  ;;  %v15208_v40 = vld [vmem:[#allocation139_spill] sm:$0xff] }
 0x54f   : > { %v6884_v31 = vadd.f32 %v6883_v42, %v6882_v29  ;;  %v6778_v26 = vsel %vm483_vm0, %v15198_v47, 0.0  ;;  %v6786_v32 = vsel %vm483_vm0, %v15200_v28, 0.0  ;;  %v6787_v18 = vsel %vm483_vm0, %v6160_v57, 0.0  ;;  %v10061_v33 = vld [vmem:[%s10237_s27 + $0x2f8] sm:$0xff]  ;;  %v15209_v42 = vld [vmem:[#allocation141_spill] sm:$0xff] }
 0x550   : > { %v6766_v39 = vrot.slane %v6765_v50, 1  ;;  %v7678_v59 = vsel %vm7627_vm6, %v6875_v3, %v7677_v14  ;;  %v6779_v7 = vadd.f32 %v6778_v26, %v15199_v13  ;;  %v6775_v54 = vrot.slane %v6774_v2, 1  ;;  %v15211_v3 = vld [vmem:[#allocation143_spill] sm:$0xff] }
 0x551   : > { %v7679_v22 = vsel %vm7629_vm7, %v6884_v31, %v7678_v59  ;;  %v6795_v30 = vsel %vm483_vm0, %v15201_v35, 0.0  ;;  %v6788_v9 = vadd.f32 %v6787_v18, %v6786_v32  ;;  %v6796_v63 = vsel %vm483_vm0, %v6162_v10, 0.0 }
 0x552   : > { %v6767_v21 = vadd.f32 %v6766_v39, %v6765_v50  ;;  %8975 = vmatprep.subr.msk.mxu1 %vm483_vm0, %v7679_v22  ;;  %v6780_v55 = vrot.slane %v6779_v7, 4  ;;  %v6804_v37 = vsel %vm483_vm0, %v6163_v48, 0.0  ;;  %v6776_v12 = vadd.f32 %v6775_v54, %v6774_v2  ;;  %v15202_v48 = vld [vmem:[#allocation148_spill] sm:$0xff] }
 0x553   : > { %8976 = vmatpush3.xpose.msk.msra.mxu1 %vm483_vm0, %v7679_v22  ;;  %v6797_v61 = vadd.f32 %v6796_v63, %v6795_v30  ;;  %v6805_v16 = vsel %vm483_vm0, %v6164_v23, 0.0  ;;  %v7666_v57 = vsel %vm7617_vm1, %v6758_v5, %v6749_v19  ;;  %v6789_v62 = vrot.slane %v6788_v9, 4 }
 0x554   : > { %v6781_v8 = vadd.f32 %v6780_v55, %v6779_v7  ;;  %v6806_v60 = vadd.f32 %v6805_v16, %v6804_v37  ;;  %v7667_v20 = vsel %vm7619_vm2, %v6767_v21, %v7666_v57  ;;  %v5892_v11 = vmul.f32 %v15203_v15, %v15202_v48 }
 0x555   : > { %v6798_v52 = vrot.slane %v6797_v61, 4  ;;  %v7668_v10 = vsel %vm7621_vm3, %v6776_v12, %v7667_v20  ;;  %v6144_v6 = vmul.f32 %v10058_v1, %v15204_v44  ;;  %v6790_v23 = vadd.f32 %v6789_v62, %v6788_v9  ;;  %v15213_v62 = vld [vmem:[#allocation147_spill] sm:$0xff] }
 0x556   : > { %v6782_v46 = vrot.slane %v6781_v8, 2  ;;  %v6807_v51 = vrot.slane %v6806_v60, 4  ;;  %v6146_v24 = vmul.f32 %v10059_v34, %v15205_v41  ;;  %v6147_v49 = vmul.f32 %v10060_v25, %v15206_v4  ;;  %v15214_v20 = vld [vmem:[#allocation151_spill] sm:$0xff] }
 0x557   : > { %v6799_v53 = vadd.f32 %v6798_v52, %v6797_v61  ;;  %v6148_v58 = vmul.f32 %v10061_v33, %v5892_v11  ;;  %v6674_v29 = vrot.slane %v15207_v36, 2  ;;  %v6791_v17 = vrot.slane %v6790_v23, 2  ;;  %v15212_v61 = vld [vmem:[#allocation146_spill] sm:$0xff] }
 0x558   : > { %v6783_v0 = vadd.f32 %v6782_v46, %v6781_v8  ;;  %v6808_v27 = vadd.f32 %v6807_v51, %v6806_v60  ;;  %v6683_v56 = vrot.slane %v15208_v40, 2  ;;  %v15210_v19 = vrot.slane %v15209_v42, 4 }
 0x559   : > { %v6800_v50 = vrot.slane %v6799_v53, 2  ;;  %v6675_v45 = vadd.f32 %v6674_v29, %v15207_v36  ;;  %v6699_v38 = vrot.slane %v15211_v3, 4  ;;  %v6792_v39 = vadd.f32 %v6791_v17, %v6790_v23  ;;  %v15215_v23 = vld [vmem:[#allocation155_spill] sm:$0xff]  ;;  %v15217_v17 = vld [vmem:[#allocation133_spill] sm:$0xff] }
 0x55a   : > { %v6691_v43 = vadd.f32 %v15210_v19, %v15209_v42  ;;  %v6784_v5 = vrot.slane %v6783_v0, 1  ;;  %v6809_v31 = vrot.slane %v6808_v27, 2  ;;  %v6684_v14 = vadd.f32 %v6683_v56, %v15208_v40  ;;  %v10062_v40 = vld [vmem:[%s10237_s27 + $0x258] sm:$0xff] }
 0x55b   : > { %v6801_v2 = vadd.f32 %v6800_v50, %v6799_v53  ;;  %v6676_v47 = vrot.slane %v6675_v45, 1  ;;  %v6700_v59 = vadd.f32 %v6699_v38, %v15211_v3  ;;  %v6793_v13 = vrot.slane %v6792_v39, 1  ;;  %v15218_v56 = vld [vmem:[#allocation126_spill] sm:$0xff]  ;;  %v10063_v50 = vld [vmem:[%s10237_s27 + $0x268] sm:$0xff]  ;;  %v10064_v38 = vld [vmem:[%s10237_s27 + $0x270] sm:$0xff] }
 0x55c   : > { %v6692_v26 = vrot.slane %v6691_v43, 2  ;;  %v6785_v21 = vadd.f32 %v6784_v5, %v6783_v0  ;;  %v6810_v7 = vadd.f32 %v6809_v31, %v6808_v27  ;;  %v6685_v28 = vrot.slane %v6684_v14, 1  ;;  %v15216_v0 = vld [vmem:[#allocation122_spill] sm:$0xff]  ;;  %v15220_v5 = vld [vmem:[#allocation135_spill] sm:$0xff] }
 0x55d   : > { %v6802_v32 = vrot.slane %v6801_v2, 1  ;;  %v6677_v22 = vadd.f32 %v6676_v47, %v6675_v45  ;;  %v6701_v18 = vrot.slane %v6700_v59, 2  ;;  %v6794_v35 = vadd.f32 %v6793_v13, %v6792_v39  ;;  %v10065_v31 = vld [vmem:[%s10237_s27 + $0x278] sm:$0xff] }
 0x55e   : > { %v6693_v54 = vadd.f32 %v6692_v26, %v6691_v43  ;;  %v6811_v30 = vrot.slane %v6810_v7, 1  ;;  %v7669_v55 = vsel %vm7623_vm4, %v6785_v21, %v7668_v10  ;;  %v6686_v9 = vadd.f32 %v6685_v28, %v6684_v14 }
 0x55f   : > { %v6803_v63 = vadd.f32 %v6802_v32, %v6801_v2  ;;  %v6702_v12 = vadd.f32 %v6701_v18, %v6700_v59  ;;  %v6706_v16 = vsel %vm483_vm0, %v15212_v61, 0.0  ;;  %v7670_v8 = vsel %vm7625_vm5, %v6794_v35, %v7669_v55  ;;  %v15221_v2 = vld [vmem:[#allocation111_spill] sm:$0xff]  ;;  %v15222_v32 = vld [vmem:[#allocation113_spill] sm:$0xff] }
 0x560   : > { %v6694_v37 = vrot.slane %v6693_v54, 1  ;;  %v6812_v57 = vadd.f32 %v6811_v30, %v6810_v7  ;;  %v6707_v60 = vadd.f32 %v6706_v16, %v15213_v62  ;;  %v6714_v52 = vsel %vm483_vm0, %v15214_v20, 0.0  ;;  %v15225_v16 = vld [vmem:[#allocation117_spill] sm:$0xff] }
 0x561   : > { %v7671_v48 = vsel %vm7627_vm6, %v6803_v63, %v7670_v8  ;;  %v6703_v11 = vrot.slane %v6702_v12, 1  ;;  %v6715_v10 = vsel %vm483_vm0, %v6144_v6, 0.0  ;;  %v6723_v51 = vsel %vm483_vm0, %v15215_v23, 0.0 }
 0x562   : > { %v6695_v15 = vadd.f32 %v6694_v37, %v6693_v54  ;;  %v7672_v1 = vsel %vm7629_vm7, %v6812_v57, %v7671_v48  ;;  %v6708_v44 = vrot.slane %v6707_v60, 4  ;;  %v6716_v46 = vadd.f32 %v6715_v10, %v6714_v52  ;;  %v15223_v54 = vld [vmem:[#allocation115_spill] sm:$0xff] }
 0x563   : > { %8977 = vmatprep.subr.msk.mxu1 %vm483_vm0, %v7672_v1  ;;  %v6704_v34 = vadd.f32 %v6703_v11, %v6702_v12  ;;  %v6724_v41 = vsel %vm483_vm0, %v6146_v24, 0.0  ;;  %v6732_v53 = vsel %vm483_vm0, %v6147_v49, 0.0  ;;  %v6733_v25 = vsel %vm483_vm0, %v6148_v58, 0.0  ;;  %v15219_v49 = vld [vmem:[#allocation131_spill] sm:$0xff] }
 0x564   : > { %8978 = vmatpush3.xpose.msk.msra.mxu1 %vm483_vm0, %v7672_v1  ;;  %v6709_v6 = vadd.f32 %v6708_v44, %v6707_v60  ;;  %v6717_v4 = vrot.slane %v6716_v46, 4  ;;  %v6725_v33 = vadd.f32 %v6724_v41, %v6723_v51  ;;  %v6734_v36 = vadd.f32 %v6733_v25, %v6732_v53  ;;  %v15226_v41 = vld [vmem:[#allocation121_spill] sm:$0xff] }
 0x565   : > { %v7659_v29 = vsel %vm7617_vm1, %v6686_v9, %v6677_v22  ;;  %v5876_v27 = vmul.f32 %v15217_v17, %v15216_v0  ;;  %v6128_v24 = vmul.f32 %v10062_v40, %v15218_v56  ;;  %v6130_v45 = vmul.f32 %v10063_v50, %v15219_v49  ;;  %v15228_v17 = vld [vmem:[#allocation127_spill] sm:$0xff] }
 0x566   : > { %v6710_v58 = vrot.slane %v6709_v6, 2  ;;  %v6718_v42 = vadd.f32 %v6717_v4, %v6716_v46  ;;  %v6726_v19 = vrot.slane %v6725_v33, 4  ;;  %v6735_v43 = vrot.slane %v6734_v36, 4 }
 0x567   : > { %v7660_v3 = vsel %vm7619_vm2, %v6695_v15, %v7659_v29  ;;  %v6131_v39 = vmul.f32 %v10064_v38, %v15220_v5  ;;  %v6132_v14 = vmul.f32 %v10065_v31, %v5876_v27  ;;  %v6602_v47 = vrot.slane %v15221_v2, 2 }
 0x568   : > { %v6711_v26 = vadd.f32 %v6710_v58, %v6709_v6  ;;  %v6719_v59 = vrot.slane %v6718_v42, 2  ;;  %v6727_v21 = vadd.f32 %v6726_v19, %v6725_v33  ;;  %v6736_v13 = vadd.f32 %v6735_v43, %v6734_v36  ;;  %v15227_v33 = vld [vmem:[#allocation123_spill] sm:$0xff]  ;;  %v15229_v58 = vld [vmem:[#allocation132_spill] sm:$0xff] }
 0x569   : > { %v7661_v7 = vsel %vm7621_vm3, %v6704_v34, %v7660_v3  ;;  %v6603_v28 = vadd.f32 %v6602_v47, %v15221_v2  ;;  %v6611_v22 = vrot.slane %v15222_v32, 2  ;;  %v15224_v18 = vrot.slane %v15223_v54, 4 }
 0x56a   : > { %v6712_v30 = vrot.slane %v6711_v26, 1  ;;  %v6720_v55 = vadd.f32 %v6719_v59, %v6718_v42  ;;  %v6728_v9 = vrot.slane %v6727_v21, 2  ;;  %v6737_v63 = vrot.slane %v6736_v13, 2 }
 0x56b   : > { %v6619_v35 = vadd.f32 %v15224_v18, %v15223_v54  ;;  %v6604_v37 = vrot.slane %v6603_v28, 1  ;;  %v6612_v12 = vadd.f32 %v6611_v22, %v15222_v32  ;;  %v6627_v57 = vrot.slane %v15225_v16, 4  ;;  %v15232_v18 = vld [vmem:[#allocation100_spill] sm:$0xff] }
 0x56c   : > { %v6713_v8 = vadd.f32 %v6712_v30, %v6711_v26  ;;  %v6721_v62 = vrot.slane %v6720_v55, 1  ;;  %v6729_v60 = vadd.f32 %v6728_v9, %v6727_v21  ;;  %v6738_v20 = vadd.f32 %v6737_v63, %v6736_v13  ;;  %v15230_v21 = vld [vmem:[#allocation99_spill] sm:$0xff]  ;;  %v10067_v30 = vld [vmem:[%s10237_s27 + $0x1e8] sm:$0xff] }
 0x56d   : > { %v6620_v61 = vrot.slane %v6619_v35, 2  ;;  %v6605_v52 = vadd.f32 %v6604_v37, %v6603_v28  ;;  %v6613_v48 = vrot.slane %v6612_v12, 1  ;;  %v6628_v11 = vadd.f32 %v6627_v57, %v15225_v16  ;;  %v15234_v16 = vld [vmem:[#allocation109_spill] sm:$0xff] }
 0x56e   : > { %v6722_v10 = vadd.f32 %v6721_v62, %v6720_v55  ;;  %v6730_v1 = vrot.slane %v6729_v60, 1  ;;  %v6739_v44 = vrot.slane %v6738_v20, 1  ;;  %v7662_v46 = vsel %vm7623_vm4, %v6713_v8, %v7661_v7  ;;  %v15233_v55 = vld [vmem:[#allocation105_spill] sm:$0xff]  ;;  %v10069_v62 = vld [vmem:[%s10237_s27 + $0x1f8] sm:$0xff] }
 0x56f   : > { %v6621_v15 = vadd.f32 %v6620_v61, %v6619_v35  ;;  %v6614_v23 = vadd.f32 %v6613_v48, %v6612_v12  ;;  %v6629_v34 = vrot.slane %v6628_v11, 2  ;;  %v6634_v53 = vsel %vm483_vm0, %v15226_v41, 0.0  ;;  %v10068_v61 = vld [vmem:[%s10237_s27 + $0x1f0] sm:$0xff]  ;;  %v15236_v48 = vld [vmem:[#allocation87_spill] sm:$0xff] }
 0x570   : > { %v6731_v25 = vadd.f32 %v6730_v1, %v6729_v60  ;;  %v6740_v6 = vadd.f32 %v6739_v44, %v6738_v20  ;;  %v7663_v4 = vsel %vm7625_vm5, %v6722_v10, %v7662_v46  ;;  %v6635_v36 = vadd.f32 %v6634_v53, %v15227_v33  ;;  %v15235_v20 = vld [vmem:[#allocation85_spill] sm:$0xff]  ;;  %v15239_v53 = vld [vmem:[#allocation91_spill] sm:$0xff] }
 0x571   : > { %v6622_v51 = vrot.slane %v6621_v15, 1  ;;  %v6630_v0 = vadd.f32 %v6629_v34, %v6628_v11  ;;  %v6642_v27 = vsel %vm483_vm0, %v15228_v17, 0.0  ;;  %v6643_v40 = vsel %vm483_vm0, %v6128_v24, 0.0  ;;  %v15237_v44 = vld [vmem:[#allocation89_spill] sm:$0xff] }
 0x572   : > { %v7664_v56 = vsel %vm7627_vm6, %v6731_v25, %v7663_v4  ;;  %v6636_v50 = vrot.slane %v6635_v36, 4  ;;  %v6644_v49 = vadd.f32 %v6643_v40, %v6642_v27  ;;  %v6651_v42 = vsel %vm483_vm0, %v15229_v58, 0.0 }
 0x573   : > { %v6623_v29 = vadd.f32 %v6622_v51, %v6621_v15  ;;  %v7665_v19 = vsel %vm7629_vm7, %v6740_v6, %v7664_v56  ;;  %v6631_v43 = vrot.slane %v6630_v0, 1  ;;  %v6652_v3 = vsel %vm483_vm0, %v6130_v45, 0.0  ;;  %v15231_v45 = vld [vmem:[#allocation107_spill] sm:$0xff] }
 0x574   : > { %v6660_v38 = vsel %vm483_vm0, %v6131_v39, 0.0  ;;  %8979 = vmatprep.subr.msk.mxu1 %vm483_vm0, %v7665_v19  ;;  %v6637_v5 = vadd.f32 %v6636_v50, %v6635_v36  ;;  %v6645_v31 = vrot.slane %v6644_v49, 4  ;;  %v6653_v24 = vadd.f32 %v6652_v3, %v6651_v42 }
 0x575   : > { %v6661_v2 = vsel %vm483_vm0, %v6132_v14, 0.0  ;;  %8980 = vmatpush3.xpose.msk.msra.mxu1 %vm483_vm0, %v7665_v19  ;;  %v6632_v47 = vadd.f32 %v6631_v43, %v6630_v0  ;;  %v7652_v59 = vsel %vm7617_vm1, %v6614_v23, %v6605_v52  ;;  %v5860_v13 = vmul.f32 %v15231_v45, %v15230_v21  ;;  %v10066_v14 = vld [vmem:[%s10237_s27 + $0x1d8] sm:$0xff]  ;;  %v15242_v21 = vld [vmem:[#allocation101_spill] sm:$0xff] }
 0x576   : > { %v6662_v26 = vadd.f32 %v6661_v2, %v6660_v38  ;;  %v6638_v39 = vrot.slane %v6637_v5, 2  ;;  %v6646_v7 = vadd.f32 %v6645_v31, %v6644_v49  ;;  %v6654_v28 = vrot.slane %v6653_v24, 4  ;;  %v15240_v31 = vld [vmem:[#allocation94_spill] sm:$0xff] }
 0x577   : > { %v7653_v32 = vsel %vm7619_vm2, %v6623_v29, %v7652_v59  ;;  %v6112_v35 = vmul.f32 %v10066_v14, %v15232_v18  ;;  %v6114_v9 = vmul.f32 %v10067_v30, %v15233_v55  ;;  %v6115_v57 = vmul.f32 %v10068_v61, %v15234_v16 }
 0x578   : > { %v6663_v22 = vrot.slane %v6662_v26, 4  ;;  %v7654_v54 = vsel %vm7621_vm3, %v6632_v47, %v7653_v32  ;;  %v6639_v63 = vadd.f32 %v6638_v39, %v6637_v5  ;;  %v6647_v37 = vrot.slane %v6646_v7, 2 }
 0x579   : > { %v6655_v12 = vadd.f32 %v6654_v28, %v6653_v24  ;;  %v6116_v60 = vmul.f32 %v10069_v62, %v5860_v13  ;;  %v6530_v52 = vrot.slane %v15235_v20, 2  ;;  %v6539_v15 = vrot.slane %v15236_v48, 2  ;;  %v15243_v28 = vld [vmem:[#allocation106_spill] sm:$0xff] }
 0x57a   : > { %v6664_v8 = vadd.f32 %v6663_v22, %v6662_v26  ;;  %v6640_v11 = vrot.slane %v6639_v63, 1  ;;  %v6648_v10 = vadd.f32 %v6647_v37, %v6646_v7  ;;  %v15238_v46 = vrot.slane %v15237_v44, 4  ;;  %v15241_v26 = vld [vmem:[#allocation95_spill] sm:$0xff] }
 0x57b   : > { %v6656_v1 = vrot.slane %v6655_v12, 2  ;;  %v6531_v34 = vadd.f32 %v6530_v52, %v15235_v20  ;;  %v6540_v41 = vadd.f32 %v6539_v15, %v15236_v48  ;;  %v6555_v25 = vrot.slane %v15239_v53, 4  ;;  %v15244_v20 = vld [vmem:[#allocation72_spill] sm:$0xff]  ;;  %v15246_v48 = vld [vmem:[#allocation74_spill] sm:$0xff] }
 0x57c   : > { %v6547_v23 = vadd.f32 %v15238_v46, %v15237_v44  ;;  %v6665_v51 = vrot.slane %v6664_v8, 2  ;;  %v6641_v6 = vadd.f32 %v6640_v11, %v6639_v63  ;;  %v6649_v4 = vrot.slane %v6648_v10, 1  ;;  %v10071_v46 = vld [vmem:[%s10237_s27 + $0x168] sm:$0xff] }
 0x57d   : > { %v6657_v33 = vadd.f32 %v6656_v1, %v6655_v12  ;;  %v6532_v0 = vrot.slane %v6531_v34, 1  ;;  %v6541_v17 = vrot.slane %v6540_v41, 1  ;;  %v6556_v27 = vadd.f32 %v6555_v25, %v15239_v53  ;;  %v10073_v25 = vld [vmem:[%s10237_s27 + $0x178] sm:$0xff] }
 0x57e   : > { %v6548_v36 = vrot.slane %v6547_v23, 2  ;;  %v6666_v29 = vadd.f32 %v6665_v51, %v6664_v8  ;;  %v6650_v40 = vadd.f32 %v6649_v4, %v6648_v10  ;;  %v7655_v50 = vsel %vm7623_vm4, %v6641_v6, %v7654_v54 }
 0x57f   : > { %v6658_v56 = vrot.slane %v6657_v33, 1  ;;  %v6533_v42 = vadd.f32 %v6532_v0, %v6531_v34  ;;  %v6542_v19 = vadd.f32 %v6541_v17, %v6540_v41  ;;  %v6557_v43 = vrot.slane %v6556_v27, 2  ;;  %v10072_v34 = vld [vmem:[%s10237_s27 + $0x170] sm:$0xff]  ;;  %v15248_v41 = vld [vmem:[#allocation83_spill] sm:$0xff] }
 0x580   : > { %v6549_v49 = vadd.f32 %v6548_v36, %v6547_v23  ;;  %v6667_v58 = vrot.slane %v6666_v29, 1  ;;  %v7656_v38 = vsel %vm7625_vm5, %v6650_v40, %v7655_v50  ;;  %v6562_v24 = vsel %vm483_vm0, %v15240_v31, 0.0  ;;  %v15247_v23 = vld [vmem:[#allocation78_spill] sm:$0xff] }
 0x581   : > { %v6659_v3 = vadd.f32 %v6658_v56, %v6657_v33  ;;  %v6558_v47 = vadd.f32 %v6557_v43, %v6556_v27  ;;  %v6563_v59 = vadd.f32 %v6562_v24, %v15241_v26  ;;  %v6570_v45 = vsel %vm483_vm0, %v15242_v21, 0.0  ;;  %v15250_v27 = vld [vmem:[#allocation62_spill] sm:$0xff]  ;;  %v15251_v56 = vld [vmem:[#allocation63_spill] sm:$0xff] }
 0x582   : > { %v6550_v5 = vrot.slane %v6549_v49, 1  ;;  %v6668_v2 = vadd.f32 %v6667_v58, %v6666_v29  ;;  %v6571_v7 = vsel %vm483_vm0, %v6112_v35, 0.0  ;;  %v6579_v32 = vsel %vm483_vm0, %v15243_v28, 0.0  ;;  %v15249_v29 = vld [vmem:[#allocation59_spill] sm:$0xff]  ;;  %v15253_v58 = vld [vmem:[#allocation65_spill] sm:$0xff] }
 0x583   : > { %v7657_v13 = vsel %vm7627_vm6, %v6659_v3, %v7656_v38  ;;  %v6559_v54 = vrot.slane %v6558_v47, 1  ;;  %v6564_v14 = vrot.slane %v6563_v59, 4  ;;  %v6572_v18 = vadd.f32 %v6571_v7, %v6570_v45 }
 0x584   : > { %v6551_v39 = vadd.f32 %v6550_v5, %v6549_v49  ;;  %v7658_v22 = vsel %vm7629_vm7, %v6668_v2, %v7657_v13  ;;  %v6580_v30 = vsel %vm483_vm0, %v6114_v9, 0.0  ;;  %v6588_v55 = vsel %vm483_vm0, %v6115_v57, 0.0  ;;  %v15245_v9 = vld [vmem:[#allocation81_spill] sm:$0xff]  ;;  %v10070_v57 = vld [vmem:[%s10237_s27 + $0x158] sm:$0xff] }
 0x585   : > { %8981 = vmatprep.subr.msk.mxu1 %vm483_vm0, %v7658_v22  ;;  %v6589_v63 = vsel %vm483_vm0, %v6116_v60, 0.0  ;;  %v7645_v37 = vsel %vm7617_vm1, %v6542_v19, %v6533_v42  ;;  %v6560_v35 = vadd.f32 %v6559_v54, %v6558_v47  ;;  %v6565_v12 = vadd.f32 %v6564_v14, %v6563_v59 }
 0x586   : > { %8982 = vmatpush3.xpose.msk.msra.mxu1 %vm483_vm0, %v7658_v22  ;;  %v6573_v61 = vrot.slane %v6572_v18, 4  ;;  %v6581_v16 = vadd.f32 %v6580_v30, %v6579_v32  ;;  %v6590_v8 = vadd.f32 %v6589_v63, %v6588_v55  ;;  %v7646_v62 = vsel %vm7619_vm2, %v6551_v39, %v7645_v37 }
 0x587   : > { %v5844_v52 = vmul.f32 %v15245_v9, %v15244_v20  ;;  %v6096_v60 = vmul.f32 %v10070_v57, %v15246_v48  ;;  %v6566_v15 = vrot.slane %v6565_v12, 2  ;;  %v7647_v1 = vsel %vm7621_vm3, %v6560_v35, %v7646_v62  ;;  %v15254_v35 = vld [vmem:[#allocation68_spill] sm:$0xff]  ;;  %v15256_v9 = vld [vmem:[#allocation70_spill] sm:$0xff] }
 0x588   : > { %v6574_v11 = vadd.f32 %v6573_v61, %v6572_v18  ;;  %v6582_v10 = vrot.slane %v6581_v16, 4  ;;  %v6591_v44 = vrot.slane %v6590_v8, 4  ;;  %v6098_v51 = vmul.f32 %v10071_v46, %v15247_v23  ;;  %v15255_v61 = vld [vmem:[#allocation75_spill] sm:$0xff] }
 0x589   : > { %v6099_v53 = vmul.f32 %v10072_v34, %v15248_v41  ;;  %v6100_v6 = vmul.f32 %v10073_v25, %v5844_v52  ;;  %v6567_v4 = vadd.f32 %v6566_v15, %v6565_v12  ;;  %v6458_v0 = vrot.slane %v15249_v29, 2  ;;  %v15257_v15 = vld [vmem:[#allocation79_spill] sm:$0xff] }
 0x58a   : > { %v6575_v33 = vrot.slane %v6574_v11, 2  ;;  %v6583_v36 = vadd.f32 %v6582_v10, %v6581_v16  ;;  %v6592_v17 = vadd.f32 %v6591_v44, %v6590_v8  ;;  %v6467_v40 = vrot.slane %v15250_v27, 2 }
 0x58b   : > { %v15252_v50 = vrot.slane %v15251_v56, 4  ;;  %v6483_v42 = vrot.slane %v15253_v58, 4  ;;  %v6568_v19 = vrot.slane %v6567_v4, 1  ;;  %v6459_v38 = vadd.f32 %v6458_v0, %v15249_v29 }
 0x58c   : > { %v6576_v43 = vadd.f32 %v6575_v33, %v6574_v11  ;;  %v6584_v3 = vrot.slane %v6583_v36, 2  ;;  %v6593_v5 = vrot.slane %v6592_v17, 2  ;;  %v6468_v31 = vadd.f32 %v6467_v40, %v15250_v27  ;;  %v15259_v27 = vld [vmem:[#allocation53_spill] sm:$0xff]  ;;  %v10074_v40 = vld [vmem:[%s10237_s27 + $0xd8] sm:$0xff] }
 0x58d   : > { %v6475_v49 = vadd.f32 %v15252_v50, %v15251_v56  ;;  %v6484_v2 = vadd.f32 %v6483_v42, %v15253_v58  ;;  %v6569_v47 = vadd.f32 %v6568_v19, %v6567_v4  ;;  %v6460_v21 = vrot.slane %v6459_v38, 1  ;;  %v15260_v56 = vld [vmem:[#allocation48_spill] sm:$0xff]  ;;  %v15261_v19 = vld [vmem:[#allocation54_spill] sm:$0xff] }
 0x58e   : > { %v6577_v26 = vrot.slane %v6576_v43, 1  ;;  %v6585_v59 = vadd.f32 %v6584_v3, %v6583_v36  ;;  %v6594_v45 = vadd.f32 %v6593_v5, %v6592_v17  ;;  %v6469_v13 = vrot.slane %v6468_v31, 1  ;;  %v15258_v17 = vld [vmem:[#allocation44_spill] sm:$0xff]  ;;  %v15262_v5 = vld [vmem:[#allocation57_spill] sm:$0xff] }
 0x58f   : > { %v6476_v24 = vrot.slane %v6475_v49, 2  ;;  %v6485_v7 = vrot.slane %v6484_v2, 2  ;;  %v7648_v22 = vsel %vm7623_vm4, %v6569_v47, %v7647_v1  ;;  %v6461_v54 = vadd.f32 %v6460_v21, %v6459_v38  ;;  %v10075_v42 = vld [vmem:[%s10237_s27 + $0xe8] sm:$0xff]  ;;  %v10076_v38 = vld [vmem:[%s10237_s27 + $0xf0] sm:$0xff] }
 0x590   : > { %v6578_v28 = vadd.f32 %v6577_v26, %v6576_v43  ;;  %v6586_v32 = vrot.slane %v6585_v59, 1  ;;  %v6595_v14 = vrot.slane %v6594_v45, 1  ;;  %v6470_v18 = vadd.f32 %v6469_v13, %v6468_v31  ;;  %v15263_v47 = vld [vmem:[#allocation33_spill] sm:$0xff] }
 0x591   : > { %v6477_v39 = vadd.f32 %v6476_v24, %v6475_v49  ;;  %v6486_v55 = vadd.f32 %v6485_v7, %v6484_v2  ;;  %v6490_v12 = vsel %vm483_vm0, %v15254_v35, 0.0  ;;  %v6498_v16 = vsel %vm483_vm0, %v15255_v61, 0.0  ;;  %v10077_v24 = vld [vmem:[%s10237_s27 + $0xf8] sm:$0xff] }
 0x592   : > { %v6587_v63 = vadd.f32 %v6586_v32, %v6585_v59  ;;  %v7649_v37 = vsel %vm7625_vm5, %v6578_v28, %v7648_v22  ;;  %v6596_v8 = vadd.f32 %v6595_v14, %v6594_v45  ;;  %v6491_v52 = vadd.f32 %v6490_v12, %v15256_v9  ;;  %v15266_v22 = vld [vmem:[#allocation37_spill] sm:$0xff] }
 0x593   : > { %v6478_v30 = vrot.slane %v6477_v39, 1  ;;  %v6487_v20 = vrot.slane %v6486_v55, 1  ;;  %v6499_v48 = vsel %vm483_vm0, %v6096_v60, 0.0  ;;  %v6507_v11 = vsel %vm483_vm0, %v15257_v15, 0.0 }
 0x594   : > { %v7650_v57 = vsel %vm7627_vm6, %v6587_v63, %v7649_v37  ;;  %v6508_v10 = vsel %vm483_vm0, %v6098_v51, 0.0  ;;  %v6492_v46 = vrot.slane %v6491_v52, 4  ;;  %v6500_v23 = vadd.f32 %v6499_v48, %v6498_v16 }
 0x595   : > { %v6479_v62 = vadd.f32 %v6478_v30, %v6477_v39  ;;  %v7651_v1 = vsel %vm7629_vm7, %v6596_v8, %v7650_v57  ;;  %v6488_v44 = vadd.f32 %v6487_v20, %v6486_v55  ;;  %v6509_v34 = vadd.f32 %v6508_v10, %v6507_v11  ;;  %v15265_v39 = vld [vmem:[#allocation36_spill] sm:$0xff] }
 0x596   : > { %8983 = vmatprep.subr.msk.mxu1 %vm483_vm0, %v7651_v1  ;;  %v6516_v41 = vsel %vm483_vm0, %v6099_v53, 0.0  ;;  %v6517_v25 = vsel %vm483_vm0, %v6100_v6, 0.0  ;;  %v7638_v60 = vsel %vm7617_vm1, %v6470_v18, %v6461_v54  ;;  %v6493_v51 = vadd.f32 %v6492_v46, %v6491_v52  ;;  %v15268_v18 = vld [vmem:[#allocation39_spill] sm:$0xff] }
 0x597   : > { %8984 = vmatpush3.xpose.msk.msra.mxu1 %vm483_vm0, %v7651_v1  ;;  %v6501_v4 = vrot.slane %v6500_v23, 4  ;;  %v6518_v33 = vadd.f32 %v6517_v25, %v6516_v41  ;;  %v7639_v36 = vsel %vm7619_vm2, %v6479_v62, %v7638_v60  ;;  %v6510_v29 = vrot.slane %v6509_v34, 4 }
 0x598   : > { %v7640_v0 = vsel %vm7621_vm3, %v6488_v44, %v7639_v36  ;;  %v5828_v53 = vmul.f32 %v15259_v27, %v15258_v17  ;;  %v6080_v6 = vmul.f32 %v10074_v40, %v15260_v56  ;;  %v6494_v50 = vrot.slane %v6493_v51, 2  ;;  %v15270_v36 = vld [vmem:[#allocation49_spill] sm:$0xff] }
 0x599   : > { %v6502_v49 = vadd.f32 %v6501_v4, %v6500_v23  ;;  %v6519_v58 = vrot.slane %v6518_v33, 4  ;;  %v6082_v43 = vmul.f32 %v10075_v42, %v15261_v19  ;;  %v6511_v3 = vadd.f32 %v6510_v29, %v6509_v34  ;;  %v15269_v4 = vld [vmem:[#allocation43_spill] sm:$0xff]  ;;  %v15271_v40 = vld [vmem:[#allocation45_spill] sm:$0xff] }
 0x59a   : > { %v6083_v31 = vmul.f32 %v10076_v38, %v15262_v5  ;;  %v6084_v2 = vmul.f32 %v10077_v24, %v5828_v53  ;;  %v15264_v26 = vrot.slane %v15263_v47, 4  ;;  %v6495_v21 = vadd.f32 %v6494_v50, %v6493_v51 }
 0x59b   : > { %v6503_v45 = vrot.slane %v6502_v49, 2  ;;  %v6520_v13 = vadd.f32 %v6519_v58, %v6518_v33  ;;  %v6395_v7 = vrot.slane %v15265_v39, 2  ;;  %v6512_v28 = vrot.slane %v6511_v3, 2 }
 0x59c   : > { %v6385_v59 = vadd.f32 %v15264_v26, %v15263_v47  ;;  %v15267_v54 = vrot.slane %v15266_v22, 4  ;;  %v6411_v30 = vrot.slane %v15268_v18, 4  ;;  %v6496_v55 = vrot.slane %v6495_v21, 1  ;;  %v15273_v26 = vld [vmem:[#allocation15_spill] sm:$0xff] }
 0x59d   : > { %v6504_v63 = vadd.f32 %v6503_v45, %v6502_v49  ;;  %v6521_v37 = vrot.slane %v6520_v13, 2  ;;  %v6396_v35 = vadd.f32 %v6395_v7, %v15265_v39  ;;  %v6513_v12 = vadd.f32 %v6512_v28, %v6511_v3  ;;  %v15272_v49 = vld [vmem:[#allocation55_spill] sm:$0xff]  ;;  %v15275_v28 = vld [vmem:[#allocation20_spill] sm:$0xff] }
 0x59e   : > { %v6386_v32 = vrot.slane %v6385_v59, 2  ;;  %v6403_v14 = vadd.f32 %v15267_v54, %v15266_v22  ;;  %v6412_v8 = vadd.f32 %v6411_v30, %v15268_v18  ;;  %v6497_v62 = vadd.f32 %v6496_v55, %v6495_v21  ;;  %v15277_v54 = vld [vmem:[#allocation11_spill] sm:$0xff]  ;;  %v15278_v18 = vld [vmem:[#allocation21_spill] sm:$0xff] }
 0x59f   : > { %v6505_v20 = vrot.slane %v6504_v63, 1  ;;  %v6522_v9 = vadd.f32 %v6521_v37, %v6520_v13  ;;  %v6397_v52 = vrot.slane %v6396_v35, 1  ;;  %v6514_v57 = vrot.slane %v6513_v12, 1 }
 0x5a0   : > { %v6387_v61 = vadd.f32 %v6386_v32, %v6385_v59  ;;  %v6404_v16 = vrot.slane %v6403_v14, 2  ;;  %v6413_v11 = vrot.slane %v6412_v8, 2  ;;  %v7641_v44 = vsel %vm7623_vm4, %v6497_v62, %v7640_v0  ;;  %v15274_v59 = vld [vmem:[#allocation24_spill] sm:$0xff]  ;;  %v15276_v32 = vld [vmem:[#allocation29_spill] sm:$0xff] }
 0x5a1   : > { %v6506_v10 = vadd.f32 %v6505_v20, %v6504_v63  ;;  %v6523_v1 = vrot.slane %v6522_v9, 1  ;;  %v6398_v46 = vadd.f32 %v6397_v52, %v6396_v35  ;;  %v6515_v23 = vadd.f32 %v6514_v57, %v6513_v12  ;;  %v10081_v62 = vld [vmem:[%s10237_s27 + $0x68] sm:$0xff]  ;;  %v15280_v52 = vld [vmem:[#allocation31_spill] sm:$0xff] }
 0x5a2   : > { %v6388_v48 = vrot.slane %v6387_v61, 1  ;;  %v6405_v15 = vadd.f32 %v6404_v16, %v6403_v14  ;;  %v6414_v25 = vadd.f32 %v6413_v11, %v6412_v8  ;;  %v6418_v33 = vsel %vm483_vm0, %v15269_v4, 0.0  ;;  %v10079_v14 = vld [vmem:[%s10237_s27 + $0x58] sm:$0xff]  ;;  %v15279_v16 = vld [vmem:[#allocation28_spill] sm:$0xff] }
 0x5a3   : > { %v6524_v60 = vadd.f32 %v6523_v1, %v6522_v9  ;;  %v7642_v51 = vsel %vm7625_vm5, %v6506_v10, %v7641_v44  ;;  %v6426_v29 = vsel %vm483_vm0, %v15270_v36, 0.0  ;;  %v6419_v0 = vadd.f32 %v6418_v33, %v15271_v40  ;;  %v10082_v9 = vld [vmem:[%s10237_s27 + $0x70] sm:$0xff]  ;;  %v10083_v1 = vld [vmem:[%s10237_s27 + $0x78] sm:$0xff] }
 0x5a4   : > { %v6389_v34 = vadd.f32 %v6388_v48, %v6387_v61  ;;  %v6406_v41 = vrot.slane %v6405_v15, 1  ;;  %v7643_v17 = vsel %vm7627_vm6, %v6515_v23, %v7642_v51  ;;  %v6415_v53 = vrot.slane %v6414_v25, 1  ;;  %v10080_v61 = vld [vmem:[%s10237_s27 + $0x60] sm:$0xff] }
 0x5a5   : > { %v7644_v56 = vsel %vm7629_vm7, %v6524_v60, %v7643_v17  ;;  %v6427_v50 = vsel %vm483_vm0, %v6080_v6, 0.0  ;;  %v6435_v58 = vsel %vm483_vm0, %v15272_v49, 0.0  ;;  %v6436_v42 = vsel %vm483_vm0, %v6082_v43, 0.0  ;;  %v15285_v51 = vld [vmem:[#allocation7_spill] sm:$0xff] }
 0x5a6   : > { %v6407_v27 = vadd.f32 %v6406_v41, %v6405_v15  ;;  %8985 = vmatprep.subr.msk.mxu1 %vm483_vm0, %v7644_v56  ;;  %v6416_v19 = vadd.f32 %v6415_v53, %v6414_v25  ;;  %v6420_v3 = vrot.slane %v6419_v0, 4  ;;  %v6428_v38 = vadd.f32 %v6427_v50, %v6426_v29  ;;  %v15283_v41 = vld [vmem:[#allocation5_spill] sm:$0xff] }
 0x5a7   : > { %v6437_v5 = vadd.f32 %v6436_v42, %v6435_v58  ;;  %8986 = vmatpush3.xpose.msk.msra.mxu1 %vm483_vm0, %v7644_v56  ;;  %v6444_v24 = vsel %vm483_vm0, %v6083_v31, 0.0  ;;  %v6445_v47 = vsel %vm483_vm0, %v6084_v2, 0.0  ;;  %v7631_v6 = vsel %vm7617_vm1, %v6398_v46, %v6389_v34  ;;  %v10078_v31 = vld [vmem:[%s10237_s27 + $0x48] sm:$0xff]  ;;  %v15281_v46 = vld [vmem:[#allocation3_spill] sm:$0xff] }
 0x5a8   : > { %v5810_v21 = vmul.f32 %v15274_v59, %v15273_v26  ;;  %v6421_v43 = vadd.f32 %v6420_v3, %v6419_v0  ;;  %v6429_v45 = vrot.slane %v6428_v38, 4  ;;  %v6446_v39 = vadd.f32 %v6445_v47, %v6444_v24  ;;  %v15286_v0 = vld [vmem:[#allocation12_spill] sm:$0xff] }
 0x5a9   : > { %v6438_v13 = vrot.slane %v6437_v5, 4  ;;  %v7632_v7 = vsel %vm7619_vm2, %v6407_v27, %v7631_v6  ;;  %v5812_v22 = vmul.f32 %v15276_v32, %v15275_v28  ;;  %v6062_v2 = vmul.f32 %v10078_v31, %v15277_v54  ;;  %v15288_v28 = vld [vmem:[#allocation19_spill] sm:$0xff] }
 0x5aa   : > { %v6064_v30 = vmul.f32 %v10079_v14, %v15278_v18  ;;  %v6422_v55 = vrot.slane %v6421_v43, 2  ;;  %v6430_v63 = vadd.f32 %v6429_v45, %v6428_v38  ;;  %v6447_v35 = vrot.slane %v6446_v39, 4 }
 0x5ab   : > { %v6439_v37 = vadd.f32 %v6438_v13, %v6437_v5  ;;  %v7633_v12 = vsel %vm7621_vm3, %v6416_v19, %v7632_v7  ;;  %v6065_v8 = vmul.f32 %v10080_v61, %v15279_v16  ;;  %v6066_v20 = vmul.f32 %v10081_v62, %v5810_v21  ;;  %v15287_v5 = vld [vmem:[#allocation17_spill] sm:$0xff] }
 0x5ac   : > { %v6067_v57 = vmul.f32 %v10082_v9, %v15280_v52  ;;  %v6423_v48 = vadd.f32 %v6422_v55, %v6421_v43  ;;  %v6431_v15 = vrot.slane %v6430_v63, 2  ;;  %v6448_v10 = vadd.f32 %v6447_v35, %v6446_v39  ;;  %v15289_v35 = vld [vmem:[#allocation25_spill] sm:$0xff] }
 0x5ad   : > { %v6440_v11 = vrot.slane %v6439_v37, 2  ;;  %v6068_v44 = vmul.f32 %v10083_v1, %v5812_v22  ;;  %v15282_v23 = vrot.slane %v15281_v46, 4  ;;  %v15284_v25 = vrot.slane %v15283_v41, 4 }
 0x5ae   : > { %v6330_v4 = vrot.slane %v15285_v51, 4  ;;  %v6424_v33 = vrot.slane %v6423_v48, 1  ;;  %v6432_v36 = vadd.f32 %v6431_v15, %v6430_v63  ;;  %v6449_v17 = vrot.slane %v6448_v10, 2 }
 0x5af   : > { %v6313_v34 = vadd.f32 %v15282_v23, %v15281_v46  ;;  %v6322_v60 = vadd.f32 %v15284_v25, %v15283_v41  ;;  %v6441_v29 = vadd.f32 %v6440_v11, %v6439_v37  ;;  %v6337_v56 = vsel %vm483_vm0, %v15286_v0, 0.0  ;;  %v7465_v11 = vld [vmem:[%s14834_s3] sm:$0xff] }
 0x5b0   : > { %v6331_v40 = vadd.f32 %v6330_v4, %v15285_v51  ;;  %v6425_v50 = vadd.f32 %v6424_v33, %v6423_v48  ;;  %v6433_v49 = vrot.slane %v6432_v36, 1  ;;  %v6450_v42 = vadd.f32 %v6449_v17, %v6448_v10  ;;  %v7467_v10 = vld [vmem:[%s14834_s3 + $0x10] sm:$0xff] }
 0x5b1   : > { %v6314_v27 = vrot.slane %v6313_v34, 2  ;;  %v6323_v53 = vrot.slane %v6322_v60, 2  ;;  %v6442_v58 = vrot.slane %v6441_v29, 1  ;;  %v6338_v24 = vadd.f32 %v6337_v56, %v15287_v5 }
 0x5b2   : > { %v6332_v38 = vrot.slane %v6331_v40, 2  ;;  %v6434_v47 = vadd.f32 %v6433_v49, %v6432_v36  ;;  %v6451_v26 = vrot.slane %v6450_v42, 1  ;;  %v7634_v59 = vsel %vm7623_vm4, %v6425_v50, %v7633_v12  ;;  %v7468_v36 = vld [vmem:[%s14834_s3 + $0x18] sm:$0xff] }
 0x5b3   : > { %v6315_v19 = vadd.f32 %v6314_v27, %v6313_v34  ;;  %v6324_v3 = vadd.f32 %v6323_v53, %v6322_v60  ;;  %v6443_v6 = vadd.f32 %v6442_v58, %v6441_v29  ;;  %v6339_v13 = vrot.slane %v6338_v24, 4 }
 0x5b4   : > { %v6333_v45 = vadd.f32 %v6332_v38, %v6331_v40  ;;  %v6452_v39 = vadd.f32 %v6451_v26, %v6450_v42  ;;  %v7635_v7 = vsel %vm7625_vm5, %v6434_v47, %v7634_v59  ;;  %v6345_v32 = vsel %vm483_vm0, %v15288_v28, 0.0 }
 0x5b5   : > { %v6316_v21 = vrot.slane %v6315_v19, 1  ;;  %v6325_v43 = vrot.slane %v6324_v3, 1  ;;  %v6346_v22 = vsel %vm483_vm0, %v6062_v2, 0.0  ;;  %v7636_v31 = vsel %vm7627_vm6, %v6443_v6, %v7635_v7  ;;  %v7464_v7 = vld [vmem:[%s14833_s2 + $0x18] sm:$0xff] }
 0x5b6   : > { %v6334_v18 = vrot.slane %v6333_v45, 1  ;;  %v7637_v55 = vsel %vm7629_vm7, %v6452_v39, %v7636_v31  ;;  %v6340_v63 = vadd.f32 %v6339_v13, %v6338_v24  ;;  %v6347_v37 = vadd.f32 %v6346_v22, %v6345_v32  ;;  %v7462_v13 = vld [vmem:[%s14833_s2 + $0x8] sm:$0xff]  ;;  %v7463_v39 = vld [vmem:[%s14833_s2 + $0x10] sm:$0xff] }
 0x5b7   : > { %v6317_v54 = vadd.f32 %v6316_v21, %v6315_v19  ;;  %v6326_v14 = vadd.f32 %v6325_v43, %v6324_v3  ;;  %v6354_v12 = vsel %vm483_vm0, %v15289_v35, 0.0  ;;  %8987 = vmatprep.subr.msk.mxu1 %vm483_vm0, %v7637_v55  ;;  %v6355_v16 = vsel %vm483_vm0, %v6064_v30, 0.0 }
 0x5b8   : > { %v6335_v61 = vadd.f32 %v6334_v18, %v6333_v45  ;;  %v6363_v62 = vsel %vm483_vm0, %v6065_v8, 0.0  ;;  %v6364_v2 = vsel %vm483_vm0, %v6066_v20, 0.0  ;;  %8988 = vmatpush3.xpose.msk.msra.mxu1 %vm483_vm0, %v7637_v55  ;;  %v6341_v9 = vrot.slane %v6340_v63, 2 }
 0x5b9   : > { %v6348_v52 = vrot.slane %v6347_v37, 4  ;;  %v6356_v48 = vadd.f32 %v6355_v16, %v6354_v12  ;;  %v6365_v15 = vadd.f32 %v6364_v2, %v6363_v62  ;;  %v6372_v30 = vsel %vm483_vm0, %v6067_v57, 0.0 }
 0x5ba   : > { %v6373_v8 = vsel %vm483_vm0, %v6068_v44, 0.0  ;;  %v7618_v20 = vsel %vm7617_vm1, %v6326_v14, %v6317_v54  ;;  %v6342_v1 = vadd.f32 %v6341_v9, %v6340_v63  ;;  %v10140_v41 = vmov 0   ;;  %v7466_v44 = vld [vmem:[%s14834_s3 + $0x8] sm:$0xff] }
 0x5bb   : > { %v6349_v46 = vadd.f32 %v6348_v52, %v6347_v37  ;;  %v6357_v23 = vrot.slane %v6356_v48, 4  ;;  %v6366_v34 = vrot.slane %v6365_v15, 4  ;;  %9058 = vset.pattern.permute.xlu0 %v10140_v41  ;;  %9059 = vset.pattern.permute.xlu1 %v10140_v41  ;;  %v6374_v25 = vadd.f32 %v6373_v8, %v6372_v30 }
 0x5bc   : > { %v7620_v60 = vsel %vm7619_vm2, %v6335_v61, %v7618_v20  ;;  %7471 = vperm.xlu0 %9058, %v7465_v11   ;;  %7481 = vperm.xlu1 %9059, %v7467_v10   ;;  %v6343_v51 = vrot.slane %v6342_v1, 1 }
 0x5bd   : > { %v6350_v4 = vrot.slane %v6349_v46, 2  ;;  %v6358_v33 = vadd.f32 %v6357_v23, %v6356_v48  ;;  %v6367_v57 = vadd.f32 %v6366_v34, %v6365_v15  ;;  %v6375_v29 = vrot.slane %v6374_v25, 4 }
 0x5be   : > { %v6344_v17 = vadd.f32 %v6343_v51, %v6342_v1 }
 0x5bf   : > { %v6351_v27 = vadd.f32 %v6350_v4, %v6349_v46  ;;  %v6359_v53 = vrot.slane %v6358_v33, 2  ;;  %v6368_v40 = vrot.slane %v6367_v57, 2  ;;  %v6376_v0 = vadd.f32 %v6375_v29, %v6374_v25 }
 0x5c0   : > { %7476 = vperm.xlu0 %9058, %v7466_v44   ;;  %7486 = vperm.xlu1 %9059, %v7468_v36   ;;  %v7622_v58 = vsel %vm7621_vm3, %v6344_v17, %v7620_v60 }
 0x5c1   : > { %v6352_v56 = vrot.slane %v6351_v27, 1  ;;  %v6360_v50 = vadd.f32 %v6359_v53, %v6358_v33  ;;  %v6369_v49 = vadd.f32 %v6368_v40, %v6367_v57  ;;  %v6377_v42 = vrot.slane %v6376_v0, 2 }
 0x5c3   : > { %v6353_v19 = vadd.f32 %v6352_v56, %v6351_v27  ;;  %v6361_v3 = vrot.slane %v6360_v50, 1  ;;  %v6370_v38 = vrot.slane %v6369_v49, 1  ;;  %v6378_v5 = vadd.f32 %v6377_v42, %v6376_v0 }
 0x5c5   : > { %v6362_v24 = vadd.f32 %v6361_v3, %v6360_v50  ;;  %v6371_v47 = vadd.f32 %v6370_v38, %v6369_v49  ;;  %v7624_v6 = vsel %vm7623_vm4, %v6353_v19, %v7622_v58  ;;  %v6379_v26 = vrot.slane %v6378_v5, 1 }
 0x5c7   : > { %v7626_v59 = vsel %vm7625_vm5, %v6362_v24, %v7624_v6  ;;  %v6380_v21 = vadd.f32 %v6379_v26, %v6378_v5 }
 0x5c8   : > { %v7628_v43 = vsel %vm7627_vm6, %v6371_v47, %v7626_v59 }
 0x5c9   : > { %v7630_v45 = vsel %vm7629_vm7, %v6380_v21, %v7628_v43 }
 0x5ca   : > { %8989 = vmatprep.subr.msk.mxu1 %vm483_vm0, %v7630_v45 }
 0x5cb   : > { %8990 = vmatpush3.xpose.msk.msra.mxu1 %vm483_vm0, %v7630_v45 }
 0x5ce   : > { %8992 = vmatmul.mubr.msk.f32.vlgmr.msra.gmra.mxu1 %vm483_vm0, %v7462_v13 }
 0x5cf   : > { %8994 = vmatprep.mubr.msk.f32.mxu1 %vm483_vm0, %v7463_v39 }
 0x5d2   : > { %8995 = vmatmul.mubr.msk.f32.gmra.mxu1 %vm483_vm0, %v7464_v7 }
 0x637   : > { %v7472_v28 = vpop.permute.xlu0 %7471  ;;  %v7482_v32 = vpop.permute.xlu1 %7481 }
 0x63b   : > { %v7477_v22 = vpop.permute.xlu0 %7476  ;;  %v7487_v37 = vpop.permute.xlu1 %7486 }
 0x68e   : > { %v8993_v31 = vpop.f32.mrf.mxu1 }
 0x68f   : > { %v7852_v54 = vadd.f32 %v8993_v31, %v7477_v22 }
 0x690   : > { %v7846_v14 = vpop.f32.mrf.mxu1 }
 0x691   : > { %v7847_v18 = vadd.f32 %v7846_v14, %v7472_v28  ;;  %v7866_v55 = vmax.f32 %v7852_v54, 0.0 }
 0x692   : > { %v8996_v63 = vpop.f32.mrf.mxu1 }
 0x693   : > { %v7865_v35 = vmax.f32 %v7847_v18, 0.0  ;;  %7870 = vst [vmem:[%s213_s6 + $0x8] sm:$0xff] %v7866_v55  ;;  %v7862_v12 = vadd.f32 %v8996_v63, %v7487_v37 }
 0x694   : > { %v7856_v61 = vpop.f32.mrf.mxu1 }
 0x695   : > { %7869 = vst [vmem:[%s213_s6] sm:$0xff] %v7865_v35  ;;  %v7868_v16 = vmax.f32 %v7862_v12, 0.0  ;;  %v7857_v62 = vadd.f32 %v7856_v61, %v7482_v32  ;;  %7879 = sbr.rel (!%p10212_p5) target bundleno = 1698 (0x6a2), region = 40 }
 0x697   : > { %7872 = vst [vmem:[%s213_s6 + $0x18] sm:$0xff] %v7868_v16  ;;  %v7867_v2 = vmax.f32 %v7857_v62, 0.0 }
 0x699   : > { %7871 = vst [vmem:[%s213_s6 + $0x10] sm:$0xff] %v7867_v2 }
 0x69a   : > { %v7920_v52 = vld [vmem:[%s213_s6 + $0x8] sm:$0xff] }
 0x69b   : > { %7921 = vst [vmem:[%s7883_s11 + $0x10] sm:$0xff] %v7920_v52 }
 0x69c   : > { %v7918_v9 = vld [vmem:[%s213_s6] sm:$0xff] }
 0x69d   : > { %7919 = vst [vmem:[%s7883_s11] sm:$0xff] %v7918_v9 }
 0x69e   : > { %v7924_v15 = vld [vmem:[%s213_s6 + $0x18] sm:$0xff] }
 0x69f   : > { %7925 = vst [vmem:[%s7883_s11 + $0x30] sm:$0xff] %v7924_v15 }
 0x6a0   : > { %v7922_v48 = vld [vmem:[%s213_s6 + $0x10] sm:$0xff] }
 0x6a1   : > { %7923 = vst [vmem:[%s7883_s11 + $0x20] sm:$0xff] %v7922_v48 }
 0x6a2 PF: > { %s14_s21 = sadd.s32 1, %s10138_s21   ;;  %s15290_s15 = smov %s10118_s16 }
 0x6a3   : > { %p11_p11 = scmp.ge.s32.totalorder %s14_s21, 6   ;;  %s15291_s16 = smov %s10223_s30 }
 0x6a4   : > { %s15292_s17 = smov %s10130_s19  ;;  %s15293_s18 = smov %s10134_s20 }
 0x6a5   : > { %s15294_s19 = smov %s15297_s22  ;;  %s15295_s20 = smov %s15301_s23 }
 0x6a6   :  { %13 = sbr.rel (!%p11_p11) target bundleno = 4 (0x4), region = 104 }

</bundles_post_ra>
